<compile_context>
chip_gen: v6e
topology: v6e:2x2x1
jax: 0.10.0
libtpu: 0.0.40
codegen_flags: <defaults>
</compile_context>

<pallas_src>
import math

import jax
import jax.numpy as jnp
from jax import lax
from jax.experimental import pallas as pl
from jax.experimental.pallas import tpu as pltpu  # noqa: F401  (kept for TPU backend parity)

# ----------------------------------------------------------------------------
# Synthetic "DefaultValues" (small, consistent with the PyTorch module).
# ----------------------------------------------------------------------------
TOTAL_AMOUNT_OF_FACTORS = 4            # TAF
TOTAL_TYPES_OF_FN = 8                  # TTF
FORMULA_PROFILE_LENGTH = 4             # FPL
FN_PROFILE_LENGTH = 8                  # -> fn_para dims = FN_PROFILE_LENGTH - 3
FN_TIME_PARA_SCALE = 10.0
HIDDEN = 32                            # lstm_hidden_size
ENCO_NUM_LAYERS = 2
LSTM_NUM_LAYERS = 1
SUMMARIZER_LSTM_NUM_LAYERS = 4
ENCO_NHEAD = 4
IP_IDX_DIM = FORMULA_PROFILE_LENGTH + TOTAL_AMOUNT_OF_FACTORS   # 8
PARA_DIM = FN_PROFILE_LENGTH - 3                                # 5
SEQ_LEN = 6                            # = 1 + real_seq_len

TREE_TBL_ROWS = 2 ** (FORMULA_PROFILE_LENGTH + 1) - 1           # 31
FN_TBL_ROWS = TOTAL_AMOUNT_OF_FACTORS + TOTAL_TYPES_OF_FN       # 12

# Packed head layout (stage-1 hidden slab, 128 lanes).
HEAD_H1_WIDTH = 128
OFF_FT = 0                                          # fn_types hidden  (2H = 64)
OFF_IP1 = OFF_FT + 2 * HIDDEN                       # 64  (2D = 16)
OFF_IP2 = OFF_IP1 + 2 * IP_IDX_DIM                  # 80  (2D = 16)
OFF_M = OFF_IP2 + 2 * IP_IDX_DIM                    # 96  (PARA_DIM)
OFF_S = OFF_M + PARA_DIM                            # 101 (PARA_DIM)
HEAD_LOGITS = TOTAL_TYPES_OF_FN + 2 * IP_IDX_DIM    # 24
OUT_WIDTH = 128                                     # lane-dense packed output


def _round8(n):
    return ((n + 7) // 8) * 8


# ----------------------------------------------------------------------------
# Fused forward kernel (single pallas_call, no grid, all VMEM resident).
# ----------------------------------------------------------------------------
def fused_forward_kernel(
        idx_tree_ref, idx_fn_ref, tp_ref, rand0_ref, len_sel_ref, mask_ref,
        tree_tbl_ref, fn_tbl_ref, w_time_ref,
        w_lstm_ref, b_lstm_ref, w_sum_ref, b_sum_ref,
        enc_wqkv_ref, enc_bqkv_ref, enc_wo_ref, enc_bo_ref,
        enc_w1_ref, enc_b1_ref, enc_w2_ref, enc_b2_ref,
        enc_g1_ref, enc_be1_ref, enc_g2_ref, enc_be2_ref,
        head_w1_ref, head_b1_ref, head_w2_ref, head_b2_ref,
        out_ref):
    f32 = jnp.float32
    H = HIDDEN
    T = len_sel_ref.shape[0]
    N = rand0_ref.shape[0]
    B = mask_ref.shape[0]
    FPL = N // B
    S = TOTAL_AMOUNT_OF_FACTORS + FPL
    D = IP_IDX_DIM

    def lstm_cell(xt, h, c, w, bias):
        # Fused [x ; h] @ W, gate order i, f, g, o (PyTorch convention).
        xh = jnp.concatenate([xt, h], axis=-1)
        gates = jnp.dot(xh, w, preferred_element_type=f32) + bias        # [*, 4H]
        sig = jax.nn.sigmoid(gates)                                      # full-width EUP pass
        th = jnp.tanh(gates)                                             # full-width EUP pass
        i_g = sig[:, 0:H]
        f_g = sig[:, H:2 * H]
        g_g = th[:, 2 * H:3 * H]
        o_g = sig[:, 3 * H:4 * H]
        c_new = f_g * c + i_g * g_g
        h_new = o_g * jnp.tanh(c_new)
        return h_new, c_new

    def layer_norm(v, g, b):
        m = jnp.mean(v, axis=-1, keepdims=True)
        var = jnp.mean((v - m) ** 2, axis=-1, keepdims=True)
        return (v - m) * lax.rsqrt(var + 1e-5) * g + b

    # --- embedding prep: one-hot gathers on the MXU + time projection -------
    NT = idx_tree_ref.shape[0]                                           # T*N (time-major)
    tree_oh = (idx_tree_ref[...] ==
               lax.broadcasted_iota(jnp.int32, (NT, tree_tbl_ref.shape[0]), 1)).astype(f32)
    fn_oh = (idx_fn_ref[...] ==
             lax.broadcasted_iota(jnp.int32, (NT, fn_tbl_ref.shape[0]), 1)).astype(f32)
    tree_emb = jnp.dot(tree_oh, tree_tbl_ref[...], preferred_element_type=f32)
    fn_emb = jnp.dot(fn_oh, fn_tbl_ref[...], preferred_element_type=f32)
    tp = tp_ref[...]                                                     # [T*N, 2]
    wt = w_time_ref[...]                                                 # [2, H]
    proj = tp[:, 0:1] * wt[0:1, :] + tp[:, 1:2] * wt[1:2, :]             # Linear(2,H,bias=False)
    v = fn_emb + proj
    nrm = jnp.sqrt(jnp.sum(v * v, axis=-1, keepdims=True))
    v = v / jnp.maximum(nrm, 1e-12)                                      # F.normalize(dim=-1)
    x_flat = tree_emb + v                                                # [T*N, H], time-major

    # --- first LSTM stack; packed-sequence last-step selection in-kernel ----
    # Timestep 0 is replaced by the scaled random vector (as in the module).
    xs = [rand0_ref[...]] + [x_flat[t * N:(t + 1) * N, :] for t in range(1, T)]
    for l in range(w_lstm_ref.shape[0]):
        w_l = w_lstm_ref[l]
        b_l = b_lstm_ref[l]
        h = jnp.zeros((N, H), f32)
        c = jnp.zeros((N, H), f32)
        hs = []
        for t in range(T):                                               # unrolled (T=6)
            h, c = lstm_cell(xs[t], h, c, w_l, b_l)
            hs.append(h)
        xs = hs
    # pack_padded_sequence + gather(lengths-1) == causal LSTM + one-hot select.
    out_last = jnp.zeros((N, H), f32)
    for t in range(T):
        out_last = out_last + len_sel_ref[t] * xs[t]                     # [N, H]

    # --- transformer input: [factors ; per-formula last states] per batch ---
    factors = fn_tbl_ref[0:TOTAL_AMOUNT_OF_FACTORS, :]                   # [TAF, H]
    rows = []
    for bi in range(B):
        rows.append(factors)
        rows.append(out_last[bi * FPL:(bi + 1) * FPL, :])
    x2 = jnp.concatenate(rows, axis=0)                                   # [B*S, H]

    # --- transformer encoder (post-norm, relu FFN, eval mode dropout=id) ----
    nhead = ENCO_NHEAD
    hd = H // nhead
    scale = 1.0 / math.sqrt(hd)
    for l in range(enc_wqkv_ref.shape[0]):
        qkv = jnp.dot(x2, enc_wqkv_ref[l], preferred_element_type=f32) + enc_bqkv_ref[l]
        q = qkv[:, 0:H]
        k = qkv[:, H:2 * H]
        vv = qkv[:, 2 * H:3 * H]
        batch_outs = []
        for bi in range(B):
            rs = slice(bi * S, (bi + 1) * S)
            qb, kb, vb = q[rs, :], k[rs, :], vv[rs, :]
            head_outs = []
            for hi in range(nhead):
                cs = slice(hi * hd, (hi + 1) * hd)
                sc = lax.dot_general(qb[:, cs], kb[:, cs], (((1,), (1,)), ((), ())),
                                     preferred_element_type=f32) * scale
                p_attn = jax.nn.softmax(sc, axis=-1)
                head_outs.append(jnp.dot(p_attn, vb[:, cs], preferred_element_type=f32))
            batch_outs.append(jnp.concatenate(head_outs, axis=-1))
        attn = jnp.concatenate(batch_outs, axis=0)                       # [B*S, H]
        attn = jnp.dot(attn, enc_wo_ref[l], preferred_element_type=f32) + enc_bo_ref[l]
        y = layer_norm(x2 + attn, enc_g1_ref[l], enc_be1_ref[l])
        ff = jnp.maximum(jnp.dot(y, enc_w1_ref[l], preferred_element_type=f32)
                         + enc_b1_ref[l], 0.0)
        ff = jnp.dot(ff, enc_w2_ref[l], preferred_element_type=f32) + enc_b2_ref[l]
        x2 = layer_norm(y + ff, enc_g2_ref[l], enc_be2_ref[l])

    # --- summarizer LSTM stack (only last layer's final h is consumed) ------
    # TODO(synk): inter-layer dropout p=0.2 is train-only; eval semantics here.
    seq_ts = [jnp.concatenate([x2[bi * S + s:bi * S + s + 1, :] for bi in range(B)], axis=0)
              for s in range(S)]                                         # S x [B, H]
    for l in range(w_sum_ref.shape[0]):
        w_s = w_sum_ref[l]
        b_s = b_sum_ref[l]
        h = jnp.zeros((B, H), f32)
        c = jnp.zeros((B, H), f32)
        new_ts = []
        for s in range(S):                                               # unrolled (S=8)
            h, c = lstm_cell(seq_ts[s], h, c, w_s, b_s)
            new_ts.append(h)
        seq_ts = new_ts
    last = seq_ts[S - 1]                                                 # [B, H]

    # --- heads: two fused matmuls + one lane-dense packed store -------------
    h1 = jnp.maximum(jnp.dot(last, head_w1_ref[...], preferred_element_type=f32)
                     + head_b1_ref[...], 0.0)                            # [B, 128]
    logits = jnp.dot(h1, head_w2_ref[...], preferred_element_type=f32) + head_b2_ref[...]
    mask = mask_ref[...]                                                 # [B, D]
    ft = jax.nn.softmax(logits[:, 0:TOTAL_TYPES_OF_FN], axis=-1)
    ip1 = jax.nn.softmax(logits[:, TOTAL_TYPES_OF_FN:TOTAL_TYPES_OF_FN + D] + mask, axis=-1)
    ip2 = jax.nn.softmax(
        logits[:, TOTAL_TYPES_OF_FN + D:TOTAL_TYPES_OF_FN + 2 * D] + mask, axis=-1)
    m_pre = h1[:, OFF_M:OFF_M + PARA_DIM]                                # relu(x @ wm + bm)
    mean = jnp.round(jnp.log(m_pre + 1.0) * FN_TIME_PARA_SCALE - 0.5 + 1e-6)
    std = jnp.maximum(h1[:, OFF_S:OFF_S + PARA_DIM], 0.01)               # clamp(x@ws+bs, 0.01)
    used = TOTAL_TYPES_OF_FN + 2 * D + 2 * PARA_DIM
    pad = jnp.zeros((B, OUT_WIDTH - used), f32)
    out_ref[...] = jnp.concatenate([ft, ip1, ip2, mean, std, pad], axis=-1)


# ----------------------------------------------------------------------------
# Deterministic parameter initialization (shapes per the module's __init__),
# pre-packed into the fused-kernel layouts.
# ----------------------------------------------------------------------------
def _xavier(key, shape):
    std = math.sqrt(2.0 / (shape[0] + shape[-1]))
    return std * jax.random.normal(key, shape, jnp.float32)


def _uniform(key, shape, lim):
    return jax.random.uniform(key, shape, jnp.float32, minval=-lim, maxval=lim)


def init_params(key):
    keys = iter(jax.random.split(key, 256))
    nk = lambda: next(keys)
    H = HIDDEN
    D = IP_IDX_DIM
    p = {}

    fn_tbl = _uniform(nk(), (FN_TBL_ROWS, H), 0.1)
    tree_tbl = _uniform(nk(), (TREE_TBL_ROWS, H), 0.1)
    # Pad tables to a multiple of 8 sublanes (padded rows never indexed).
    p["fn_tbl"] = jnp.zeros((_round8(FN_TBL_ROWS), H), jnp.float32).at[:FN_TBL_ROWS].set(fn_tbl)
    p["tree_tbl"] = (jnp.zeros((_round8(TREE_TBL_ROWS), H), jnp.float32)
                     .at[:TREE_TBL_ROWS].set(tree_tbl))
    p["w_time"] = _xavier(nk(), (2, H))                 # Linear(2, H, bias=False), x @ W

    def lstm_fused(in_dim):
        wih = _xavier(nk(), (in_dim, 4 * H))
        whh = _xavier(nk(), (H, 4 * H))                 # TODO(synk): orthogonal init approximated by xavier-normal
        w = jnp.concatenate([wih, whh], axis=0)         # [(in+H), 4H] fused [x ; h] weight
        bias = jnp.zeros((1, 4 * H), jnp.float32).at[:, H:2 * H].set(2.0)   # forget bias 1+1
        return w, bias

    ws, bs = zip(*[lstm_fused(H) for _ in range(LSTM_NUM_LAYERS)])
    p["w_lstm"], p["b_lstm"] = jnp.stack(ws), jnp.stack(bs)
    ws, bs = zip(*[lstm_fused(H) for _ in range(SUMMARIZER_LSTM_NUM_LAYERS)])
    p["w_sum"], p["b_sum"] = jnp.stack(ws), jnp.stack(bs)

    enc_layers = []
    for _ in range(ENCO_NUM_LAYERS):
        wq, wk, wv = _xavier(nk(), (H, H)), _xavier(nk(), (H, H)), _xavier(nk(), (H, H))
        enc_layers.append({
            "wqkv": jnp.concatenate([wq, wk, wv], axis=1),
            "bqkv": jnp.zeros((1, 3 * H), jnp.float32),
            "wo": _xavier(nk(), (H, H)), "bo": jnp.zeros((1, H), jnp.float32),
            "w1": _xavier(nk(), (H, 4 * H)), "b1": jnp.zeros((1, 4 * H), jnp.float32),
            "w2": _xavier(nk(), (4 * H, H)), "b2": jnp.zeros((1, H), jnp.float32),
            "g1": jnp.ones((1, H), jnp.float32), "be1": jnp.zeros((1, H), jnp.float32),
            "g2": jnp.ones((1, H), jnp.float32), "be2": jnp.zeros((1, H), jnp.float32),
        })
    for name in ["wqkv", "bqkv", "wo", "bo", "w1", "b1", "w2", "b2",
                 "g1", "be1", "g2", "be2"]:
        p["enc_" + name] = jnp.stack([L[name] for L in enc_layers])

    # Heads, packed lane-dense (stage-1 concat, stage-2 block-diagonal).
    wft1 = _uniform(nk(), (H, 2 * H), 0.01)
    wft2 = _uniform(nk(), (2 * H, TOTAL_TYPES_OF_FN), 0.01)
    w1a = _xavier(nk(), (H, 2 * D)); w1b = _xavier(nk(), (2 * D, D))
    w2a = _xavier(nk(), (H, 2 * D)); w2b = _xavier(nk(), (2 * D, D))
    wm = _uniform(nk(), (H, PARA_DIM), 0.01)
    wsd = _uniform(nk(), (H, PARA_DIM), 0.01)

    head_w1 = jnp.zeros((H, HEAD_H1_WIDTH), jnp.float32)
    head_w1 = head_w1.at[:, OFF_FT:OFF_FT + 2 * H].set(wft1)
    head_w1 = head_w1.at[:, OFF_IP1:OFF_IP1 + 2 * D].set(w1a)
    head_w1 = head_w1.at[:, OFF_IP2:OFF_IP2 + 2 * D].set(w2a)
    head_w1 = head_w1.at[:, OFF_M:OFF_M + PARA_DIM].set(wm)
    head_w1 = head_w1.at[:, OFF_S:OFF_S + PARA_DIM].set(wsd)
    p["head_w1"] = head_w1
    p["head_b1"] = jnp.zeros((1, HEAD_H1_WIDTH), jnp.float32)   # all Linear biases init to 0

    head_w2 = jnp.zeros((HEAD_H1_WIDTH, HEAD_LOGITS), jnp.float32)
    head_w2 = head_w2.at[OFF_FT:OFF_FT + 2 * H, 0:TOTAL_TYPES_OF_FN].set(wft2)
    head_w2 = head_w2.at[OFF_IP1:OFF_IP1 + 2 * D,
                         TOTAL_TYPES_OF_FN:TOTAL_TYPES_OF_FN + D].set(w1b)
    head_w2 = head_w2.at[OFF_IP2:OFF_IP2 + 2 * D,
                         TOTAL_TYPES_OF_FN + D:TOTAL_TYPES_OF_FN + 2 * D].set(w2b)
    p["head_w2"] = head_w2
    p["head_b2"] = jnp.zeros((1, HEAD_LOGITS), jnp.float32)
    return p


# ----------------------------------------------------------------------------
# Forward pass: one fused pallas_call; wrapper only does trivial int reshapes
# and slices the packed [b, 128] output.
# ----------------------------------------------------------------------------
def lstm_ps_ag_forward(input_state, params, rng_key):
    b, fpl, T, _ = input_state.shape
    N = b * fpl
    H = HIDDEN

    seq = input_state.reshape(N, T, 4)
    tree_pos = seq[:, :, 0].astype(jnp.int32)
    fn_type = seq[:, :, 1].astype(jnp.int32)
    time_para = seq[:, :, 2:].astype(jnp.float32) / FN_TIME_PARA_SCALE

    # Time-major flat views (row = t*N + n) so the kernel slices each step statically.
    idx_tree = jnp.transpose(tree_pos, (1, 0)).reshape(T * N, 1)
    idx_fn = jnp.transpose(fn_type, (1, 0)).reshape(T * N, 1)
    tp_flat = jnp.transpose(time_para, (1, 0, 2)).reshape(T * N, 2)

    op_raw = input_state[:, :, 0, 0]
    lengths = op_raw.reshape(N) + 1
    mask_vals = jnp.where(op_raw > 0, 0.0, -jnp.inf).astype(jnp.float32)
    op_mask = jnp.concatenate(
        [jnp.zeros((b, TOTAL_AMOUNT_OF_FACTORS), jnp.float32), mask_vals], axis=-1)

    # input_seq[:, 0, :] = 0.01 * rand / lengths  (torch.rand_like replaced by jax PRNG)
    rand0 = 0.01 * jax.random.uniform(rng_key, (N, H), jnp.float32)
    rand0 = rand0 / lengths.astype(jnp.float32)[:, None]

    # One-hot time selector for the last valid step (pack_padded_sequence equivalent).
    len_sel = (jnp.arange(T)[:, None] == (lengths - 1)[None, :]
               ).astype(jnp.float32)[:, :, None]              # [T, N, 1]

    packed = pl.pallas_call(
        fused_forward_kernel,
        out_shape=jax.ShapeDtypeStruct((b, OUT_WIDTH), jnp.float32),
    )(idx_tree, idx_fn, tp_flat, rand0, len_sel, op_mask,
      params["tree_tbl"], params["fn_tbl"], params["w_time"],
      params["w_lstm"], params["b_lstm"], params["w_sum"], params["b_sum"],
      params["enc_wqkv"], params["enc_bqkv"], params["enc_wo"], params["enc_bo"],
      params["enc_w1"], params["enc_b1"], params["enc_w2"], params["enc_b2"],
      params["enc_g1"], params["enc_be1"], params["enc_g2"], params["enc_be2"],
      params["head_w1"], params["head_b1"], params["head_w2"], params["head_b2"])

    D = IP_IDX_DIM
    ft = packed[:, 0:TOTAL_TYPES_OF_FN]
    ip1 = packed[:, TOTAL_TYPES_OF_FN:TOTAL_TYPES_OF_FN + D]
    ip2 = packed[:, TOTAL_TYPES_OF_FN + D:TOTAL_TYPES_OF_FN + 2 * D]
    off = TOTAL_TYPES_OF_FN + 2 * D
    mean = packed[:, off:off + PARA_DIM]
    std = packed[:, off + PARA_DIM:off + 2 * PARA_DIM]
    # TODO(synk): train-mode dropouts (transformer p=0.1, summarizer p=0.2, self.drop)
    # are stochastic no-ops in eval; eval-mode semantics implemented.
    return ([ft, ip1, ip2], (mean, std))


# ----------------------------------------------------------------------------
if __name__ == "__main__":
    params = init_params(jax.random.PRNGKey(0))

    key = jax.random.PRNGKey(0)
    k_tree, k_type, k_ts, k_len, k_rand = jax.random.split(key, 5)
    b = 2
    tree_pos = jax.random.randint(
        k_tree, (b, FORMULA_PROFILE_LENGTH, SEQ_LEN), 0, TREE_TBL_ROWS)
    fn_type = jax.random.randint(
        k_type, (b, FORMULA_PROFILE_LENGTH, SEQ_LEN), 0, FN_TBL_ROWS)
    time_ps = jax.random.randint(
        k_ts, (b, FORMULA_PROFILE_LENGTH, SEQ_LEN, 2), 0, 20)
    # element [.,.,0,0] doubles as real_seq_len (lengths - 1); keep it < SEQ_LEN
    tree_pos = tree_pos.at[:, :, 0].set(
        jax.random.randint(k_len, (b, FORMULA_PROFILE_LENGTH), 0, SEQ_LEN))

    input_state = jnp.concatenate(
        [tree_pos[..., None], fn_type[..., None], time_ps], axis=-1
    ).astype(jnp.int32)                                # [b, FPL, SEQ_LEN, 4]

    fwd = jax.jit(lstm_ps_ag_forward)
    out = fwd(input_state, params, k_rand)
    jax.block_until_ready(out)
    print("KERNEL_OK")
</pallas_src>

<mosaic_0001>
module attributes {stable_mosaic.version = 11 : i64} {
  func.func @fused_forward_kernel(%arg0: memref<48x1xi32, #tpu.memory_space<vmem>>, %arg1: memref<48x1xi32, #tpu.memory_space<vmem>>, %arg2: memref<48x2xf32, #tpu.memory_space<vmem>>, %arg3: memref<8x32xf32, #tpu.memory_space<vmem>>, %arg4: memref<6x8x1xf32, #tpu.memory_space<vmem>>, %arg5: memref<2x8xf32, #tpu.memory_space<vmem>>, %arg6: memref<32x32xf32, #tpu.memory_space<vmem>>, %arg7: memref<16x32xf32, #tpu.memory_space<vmem>>, %arg8: memref<2x32xf32, #tpu.memory_space<vmem>>, %arg9: memref<1x64x128xf32, #tpu.memory_space<vmem>>, %arg10: memref<1x1x128xf32, #tpu.memory_space<vmem>>, %arg11: memref<4x64x128xf32, #tpu.memory_space<vmem>>, %arg12: memref<4x1x128xf32, #tpu.memory_space<vmem>>, %arg13: memref<2x32x96xf32, #tpu.memory_space<vmem>>, %arg14: memref<2x1x96xf32, #tpu.memory_space<vmem>>, %arg15: memref<2x32x32xf32, #tpu.memory_space<vmem>>, %arg16: memref<2x1x32xf32, #tpu.memory_space<vmem>>, %arg17: memref<2x32x128xf32, #tpu.memory_space<vmem>>, %arg18: memref<2x1x128xf32, #tpu.memory_space<vmem>>, %arg19: memref<2x128x32xf32, #tpu.memory_space<vmem>>, %arg20: memref<2x1x32xf32, #tpu.memory_space<vmem>>, %arg21: memref<2x1x32xf32, #tpu.memory_space<vmem>>, %arg22: memref<2x1x32xf32, #tpu.memory_space<vmem>>, %arg23: memref<2x1x32xf32, #tpu.memory_space<vmem>>, %arg24: memref<2x1x32xf32, #tpu.memory_space<vmem>>, %arg25: memref<32x128xf32, #tpu.memory_space<vmem>>, %arg26: memref<1x128xf32, #tpu.memory_space<vmem>>, %arg27: memref<128x24xf32, #tpu.memory_space<vmem>>, %arg28: memref<1x24xf32, #tpu.memory_space<vmem>>, %arg29: memref<2x128xf32, #tpu.memory_space<vmem>>) attributes {dimension_semantics = [], scalar_prefetch = 0 : i64, scratch_operands = 0 : i64, tpu.core_type = #tpu.core_type<tc>} {
    %c0 = arith.constant 0 : index
    %c0_0 = arith.constant 0 : index
    %0 = vector.load %arg0[%c0, %c0_0] : memref<48x1xi32, #tpu.memory_space<vmem>>, vector<48x1xi32>
    %1 = tpu.iota {dimensions = array<i32: 1>} : vector<48x32xi32>
    %2 = vector.broadcast %0 : vector<48x1xi32> to vector<48x32xi32>
    %3 = arith.cmpi eq, %2, %1 : vector<48x32xi32>
    %4 = arith.extui %3 : vector<48x32xi1> to vector<48x32xi32>
    %5 = arith.sitofp %4 : vector<48x32xi32> to vector<48x32xf32>
    %c0_1 = arith.constant 0 : index
    %c0_2 = arith.constant 0 : index
    %6 = vector.load %arg1[%c0_1, %c0_2] : memref<48x1xi32, #tpu.memory_space<vmem>>, vector<48x1xi32>
    %7 = tpu.iota {dimensions = array<i32: 1>} : vector<48x16xi32>
    %8 = vector.broadcast %6 : vector<48x1xi32> to vector<48x16xi32>
    %9 = arith.cmpi eq, %8, %7 : vector<48x16xi32>
    %10 = arith.extui %9 : vector<48x16xi1> to vector<48x16xi32>
    %11 = arith.sitofp %10 : vector<48x16xi32> to vector<48x16xf32>
    %c0_3 = arith.constant 0 : index
    %c0_4 = arith.constant 0 : index
    %12 = vector.load %arg6[%c0_3, %c0_4] : memref<32x32xf32, #tpu.memory_space<vmem>>, vector<32x32xf32>
    %cst = arith.constant dense<0.000000e+00> : vector<48x32xf32>
    %13 = tpu.matmul %5, %12, %cst {dimension_numbers = #tpu.dot_dimension_numbers<[1], [0], [0], [1], [0, 0, 1, 1], [], []>} : vector<48x32xf32>, vector<32x32xf32>, vector<48x32xf32> -> vector<48x32xf32>
    %c0_5 = arith.constant 0 : index
    %c0_6 = arith.constant 0 : index
    %14 = vector.load %arg7[%c0_5, %c0_6] : memref<16x32xf32, #tpu.memory_space<vmem>>, vector<16x32xf32>
    %cst_7 = arith.constant dense<0.000000e+00> : vector<48x32xf32>
    %15 = tpu.matmul %11, %14, %cst_7 {dimension_numbers = #tpu.dot_dimension_numbers<[1], [0], [0], [1], [0, 0, 1, 1], [], []>} : vector<48x16xf32>, vector<16x32xf32>, vector<48x32xf32> -> vector<48x32xf32>
    %c0_8 = arith.constant 0 : index
    %c0_9 = arith.constant 0 : index
    %16 = vector.load %arg2[%c0_8, %c0_9] : memref<48x2xf32, #tpu.memory_space<vmem>>, vector<48x2xf32>
    %c0_10 = arith.constant 0 : index
    %c0_11 = arith.constant 0 : index
    %17 = vector.load %arg8[%c0_10, %c0_11] : memref<2x32xf32, #tpu.memory_space<vmem>>, vector<2x32xf32>
    %18 = vector.extract_strided_slice %16 {offsets = [0, 0], sizes = [48, 1], strides = [1, 1]} : vector<48x2xf32> to vector<48x1xf32>
    %19 = vector.extract_strided_slice %17 {offsets = [0, 0], sizes = [1, 32], strides = [1, 1]} : vector<2x32xf32> to vector<1x32xf32>
    %20 = vector.broadcast %18 : vector<48x1xf32> to vector<48x32xf32>
    %21 = vector.broadcast %19 : vector<1x32xf32> to vector<48x32xf32>
    %22 = arith.mulf %20, %21 : vector<48x32xf32>
    %23 = vector.extract_strided_slice %16 {offsets = [0, 1], sizes = [48, 1], strides = [1, 1]} : vector<48x2xf32> to vector<48x1xf32>
    %24 = vector.extract_strided_slice %17 {offsets = [1, 0], sizes = [1, 32], strides = [1, 1]} : vector<2x32xf32> to vector<1x32xf32>
    %25 = vector.broadcast %23 : vector<48x1xf32> to vector<48x32xf32>
    %26 = vector.broadcast %24 : vector<1x32xf32> to vector<48x32xf32>
    %27 = arith.mulf %25, %26 : vector<48x32xf32>
    %28 = arith.addf %22, %27 : vector<48x32xf32>
    %29 = arith.addf %15, %28 : vector<48x32xf32>
    %30 = arith.mulf %29, %29 : vector<48x32xf32>
    %cst_12 = arith.constant dense<0.000000e+00> : vector<48xf32>
    %31 = vector.multi_reduction <add>, %30, %cst_12 [1] : vector<48x32xf32> to vector<48xf32>
    %32 = vector.shape_cast %31 : vector<48xf32> to vector<48x1xf32>
    %33 = math.sqrt %32 : vector<48x1xf32>
    %cst_13 = arith.constant 9.99999996E-13 : f32
    %34 = vector.broadcast %cst_13 : f32 to vector<48x1xf32>
    %35 = arith.maximumf %33, %34 : vector<48x1xf32>
    %36 = vector.broadcast %35 : vector<48x1xf32> to vector<48x32xf32>
    %37 = arith.divf %29, %36 : vector<48x32xf32>
    %38 = arith.addf %13, %37 : vector<48x32xf32>
    %c0_14 = arith.constant 0 : index
    %c0_15 = arith.constant 0 : index
    %39 = vector.load %arg3[%c0_14, %c0_15] : memref<8x32xf32, #tpu.memory_space<vmem>>, vector<8x32xf32>
    %40 = vector.extract_strided_slice %38 {offsets = [8, 0], sizes = [8, 32], strides = [1, 1]} : vector<48x32xf32> to vector<8x32xf32>
    %41 = vector.extract_strided_slice %38 {offsets = [16, 0], sizes = [8, 32], strides = [1, 1]} : vector<48x32xf32> to vector<8x32xf32>
    %42 = vector.extract_strided_slice %38 {offsets = [24, 0], sizes = [8, 32], strides = [1, 1]} : vector<48x32xf32> to vector<8x32xf32>
    %43 = vector.extract_strided_slice %38 {offsets = [32, 0], sizes = [8, 32], strides = [1, 1]} : vector<48x32xf32> to vector<8x32xf32>
    %44 = vector.extract_strided_slice %38 {offsets = [40, 0], sizes = [8, 32], strides = [1, 1]} : vector<48x32xf32> to vector<8x32xf32>
    %c0_16 = arith.constant 0 : index
    %c0_17 = arith.constant 0 : index
    %c0_18 = arith.constant 0 : index
    %45 = vector.load %arg9[%c0_16, %c0_17, %c0_18] : memref<1x64x128xf32, #tpu.memory_space<vmem>>, vector<1x64x128xf32>
    %46 = vector.shape_cast %45 : vector<1x64x128xf32> to vector<64x128xf32>
    %c0_19 = arith.constant 0 : index
    %c0_20 = arith.constant 0 : index
    %c0_21 = arith.constant 0 : index
    %47 = vector.load %arg10[%c0_19, %c0_20, %c0_21] : memref<1x1x128xf32, #tpu.memory_space<vmem>>, vector<1x1x128xf32>
    %48 = vector.shape_cast %47 : vector<1x1x128xf32> to vector<1x128xf32>
    %cst_22 = arith.constant 0.000000e+00 : f32
    %49 = vector.broadcast %cst_22 : f32 to vector<8x32xf32>
    %cst_23 = arith.constant 0.000000e+00 : f32
    %50 = vector.broadcast %cst_23 : f32 to vector<8x32xf32>
    %51 = tpu.concatenate %39, %49 in 1 : vector<8x32xf32>, vector<8x32xf32> -> vector<8x64xf32>
    %cst_24 = arith.constant dense<0.000000e+00> : vector<8x128xf32>
    %52 = tpu.matmul %51, %46, %cst_24 {dimension_numbers = #tpu.dot_dimension_numbers<[1], [0], [0], [1], [0, 0, 1, 1], [], []>} : vector<8x64xf32>, vector<64x128xf32>, vector<8x128xf32> -> vector<8x128xf32>
    %53 = vector.broadcast %48 : vector<1x128xf32> to vector<8x128xf32>
    %54 = arith.addf %52, %53 : vector<8x128xf32>
    %55 = arith.negf %54 : vector<8x128xf32>
    %56 = math.exp %55 : vector<8x128xf32>
    %cst_25 = arith.constant 1.000000e+00 : f32
    %57 = vector.broadcast %cst_25 : f32 to vector<8x128xf32>
    %58 = arith.addf %57, %56 : vector<8x128xf32>
    %59 = arith.divf %57, %58 : vector<8x128xf32>
    %60 = math.tanh %54 : vector<8x128xf32>
    %61 = vector.extract_strided_slice %59 {offsets = [0, 0], sizes = [8, 32], strides = [1, 1]} : vector<8x128xf32> to vector<8x32xf32>
    %62 = vector.extract_strided_slice %59 {offsets = [0, 32], sizes = [8, 32], strides = [1, 1]} : vector<8x128xf32> to vector<8x32xf32>
    %63 = vector.extract_strided_slice %60 {offsets = [0, 64], sizes = [8, 32], strides = [1, 1]} : vector<8x128xf32> to vector<8x32xf32>
    %64 = vector.extract_strided_slice %59 {offsets = [0, 96], sizes = [8, 32], strides = [1, 1]} : vector<8x128xf32> to vector<8x32xf32>
    %65 = arith.mulf %62, %50 : vector<8x32xf32>
    %66 = arith.mulf %61, %63 : vector<8x32xf32>
    %67 = arith.addf %65, %66 : vector<8x32xf32>
    %68 = math.tanh %67 : vector<8x32xf32>
    %69 = arith.mulf %64, %68 : vector<8x32xf32>
    %70 = tpu.concatenate %40, %69 in 1 : vector<8x32xf32>, vector<8x32xf32> -> vector<8x64xf32>
    %cst_26 = arith.constant dense<0.000000e+00> : vector<8x128xf32>
    %71 = tpu.matmul %70, %46, %cst_26 {dimension_numbers = #tpu.dot_dimension_numbers<[1], [0], [0], [1], [0, 0, 1, 1], [], []>} : vector<8x64xf32>, vector<64x128xf32>, vector<8x128xf32> -> vector<8x128xf32>
    %72 = vector.broadcast %48 : vector<1x128xf32> to vector<8x128xf32>
    %73 = arith.addf %71, %72 : vector<8x128xf32>
    %74 = arith.negf %73 : vector<8x128xf32>
    %75 = math.exp %74 : vector<8x128xf32>
    %cst_27 = arith.constant 1.000000e+00 : f32
    %76 = vector.broadcast %cst_27 : f32 to vector<8x128xf32>
    %77 = arith.addf %76, %75 : vector<8x128xf32>
    %78 = arith.divf %76, %77 : vector<8x128xf32>
    %79 = math.tanh %73 : vector<8x128xf32>
    %80 = vector.extract_strided_slice %78 {offsets = [0, 0], sizes = [8, 32], strides = [1, 1]} : vector<8x128xf32> to vector<8x32xf32>
    %81 = vector.extract_strided_slice %78 {offsets = [0, 32], sizes = [8, 32], strides = [1, 1]} : vector<8x128xf32> to vector<8x32xf32>
    %82 = vector.extract_strided_slice %79 {offsets = [0, 64], sizes = [8, 32], strides = [1, 1]} : vector<8x128xf32> to vector<8x32xf32>
    %83 = vector.extract_strided_slice %78 {offsets = [0, 96], sizes = [8, 32], strides = [1, 1]} : vector<8x128xf32> to vector<8x32xf32>
    %84 = arith.mulf %81, %67 : vector<8x32xf32>
    %85 = arith.mulf %80, %82 : vector<8x32xf32>
    %86 = arith.addf %84, %85 : vector<8x32xf32>
    %87 = math.tanh %86 : vector<8x32xf32>
    %88 = arith.mulf %83, %87 : vector<8x32xf32>
    %89 = tpu.concatenate %41, %88 in 1 : vector<8x32xf32>, vector<8x32xf32> -> vector<8x64xf32>
    %cst_28 = arith.constant dense<0.000000e+00> : vector<8x128xf32>
    %90 = tpu.matmul %89, %46, %cst_28 {dimension_numbers = #tpu.dot_dimension_numbers<[1], [0], [0], [1], [0, 0, 1, 1], [], []>} : vector<8x64xf32>, vector<64x128xf32>, vector<8x128xf32> -> vector<8x128xf32>
    %91 = vector.broadcast %48 : vector<1x128xf32> to vector<8x128xf32>
    %92 = arith.addf %90, %91 : vector<8x128xf32>
    %93 = arith.negf %92 : vector<8x128xf32>
    %94 = math.exp %93 : vector<8x128xf32>
    %cst_29 = arith.constant 1.000000e+00 : f32
    %95 = vector.broadcast %cst_29 : f32 to vector<8x128xf32>
    %96 = arith.addf %95, %94 : vector<8x128xf32>
    %97 = arith.divf %95, %96 : vector<8x128xf32>
    %98 = math.tanh %92 : vector<8x128xf32>
    %99 = vector.extract_strided_slice %97 {offsets = [0, 0], sizes = [8, 32], strides = [1, 1]} : vector<8x128xf32> to vector<8x32xf32>
    %100 = vector.extract_strided_slice %97 {offsets = [0, 32], sizes = [8, 32], strides = [1, 1]} : vector<8x128xf32> to vector<8x32xf32>
    %101 = vector.extract_strided_slice %98 {offsets = [0, 64], sizes = [8, 32], strides = [1, 1]} : vector<8x128xf32> to vector<8x32xf32>
    %102 = vector.extract_strided_slice %97 {offsets = [0, 96], sizes = [8, 32], strides = [1, 1]} : vector<8x128xf32> to vector<8x32xf32>
    %103 = arith.mulf %100, %86 : vector<8x32xf32>
    %104 = arith.mulf %99, %101 : vector<8x32xf32>
    %105 = arith.addf %103, %104 : vector<8x32xf32>
    %106 = math.tanh %105 : vector<8x32xf32>
    %107 = arith.mulf %102, %106 : vector<8x32xf32>
    %108 = tpu.concatenate %42, %107 in 1 : vector<8x32xf32>, vector<8x32xf32> -> vector<8x64xf32>
    %cst_30 = arith.constant dense<0.000000e+00> : vector<8x128xf32>
    %109 = tpu.matmul %108, %46, %cst_30 {dimension_numbers = #tpu.dot_dimension_numbers<[1], [0], [0], [1], [0, 0, 1, 1], [], []>} : vector<8x64xf32>, vector<64x128xf32>, vector<8x128xf32> -> vector<8x128xf32>
    %110 = vector.broadcast %48 : vector<1x128xf32> to vector<8x128xf32>
    %111 = arith.addf %109, %110 : vector<8x128xf32>
    %112 = arith.negf %111 : vector<8x128xf32>
    %113 = math.exp %112 : vector<8x128xf32>
    %cst_31 = arith.constant 1.000000e+00 : f32
    %114 = vector.broadcast %cst_31 : f32 to vector<8x128xf32>
    %115 = arith.addf %114, %113 : vector<8x128xf32>
    %116 = arith.divf %114, %115 : vector<8x128xf32>
    %117 = math.tanh %111 : vector<8x128xf32>
    %118 = vector.extract_strided_slice %116 {offsets = [0, 0], sizes = [8, 32], strides = [1, 1]} : vector<8x128xf32> to vector<8x32xf32>
    %119 = vector.extract_strided_slice %116 {offsets = [0, 32], sizes = [8, 32], strides = [1, 1]} : vector<8x128xf32> to vector<8x32xf32>
    %120 = vector.extract_strided_slice %117 {offsets = [0, 64], sizes = [8, 32], strides = [1, 1]} : vector<8x128xf32> to vector<8x32xf32>
    %121 = vector.extract_strided_slice %116 {offsets = [0, 96], sizes = [8, 32], strides = [1, 1]} : vector<8x128xf32> to vector<8x32xf32>
    %122 = arith.mulf %119, %105 : vector<8x32xf32>
    %123 = arith.mulf %118, %120 : vector<8x32xf32>
    %124 = arith.addf %122, %123 : vector<8x32xf32>
    %125 = math.tanh %124 : vector<8x32xf32>
    %126 = arith.mulf %121, %125 : vector<8x32xf32>
    %127 = tpu.concatenate %43, %126 in 1 : vector<8x32xf32>, vector<8x32xf32> -> vector<8x64xf32>
    %cst_32 = arith.constant dense<0.000000e+00> : vector<8x128xf32>
    %128 = tpu.matmul %127, %46, %cst_32 {dimension_numbers = #tpu.dot_dimension_numbers<[1], [0], [0], [1], [0, 0, 1, 1], [], []>} : vector<8x64xf32>, vector<64x128xf32>, vector<8x128xf32> -> vector<8x128xf32>
    %129 = vector.broadcast %48 : vector<1x128xf32> to vector<8x128xf32>
    %130 = arith.addf %128, %129 : vector<8x128xf32>
    %131 = arith.negf %130 : vector<8x128xf32>
    %132 = math.exp %131 : vector<8x128xf32>
    %cst_33 = arith.constant 1.000000e+00 : f32
    %133 = vector.broadcast %cst_33 : f32 to vector<8x128xf32>
    %134 = arith.addf %133, %132 : vector<8x128xf32>
    %135 = arith.divf %133, %134 : vector<8x128xf32>
    %136 = math.tanh %130 : vector<8x128xf32>
    %137 = vector.extract_strided_slice %135 {offsets = [0, 0], sizes = [8, 32], strides = [1, 1]} : vector<8x128xf32> to vector<8x32xf32>
    %138 = vector.extract_strided_slice %135 {offsets = [0, 32], sizes = [8, 32], strides = [1, 1]} : vector<8x128xf32> to vector<8x32xf32>
    %139 = vector.extract_strided_slice %136 {offsets = [0, 64], sizes = [8, 32], strides = [1, 1]} : vector<8x128xf32> to vector<8x32xf32>
    %140 = vector.extract_strided_slice %135 {offsets = [0, 96], sizes = [8, 32], strides = [1, 1]} : vector<8x128xf32> to vector<8x32xf32>
    %141 = arith.mulf %138, %124 : vector<8x32xf32>
    %142 = arith.mulf %137, %139 : vector<8x32xf32>
    %143 = arith.addf %141, %142 : vector<8x32xf32>
    %144 = math.tanh %143 : vector<8x32xf32>
    %145 = arith.mulf %140, %144 : vector<8x32xf32>
    %146 = tpu.concatenate %44, %145 in 1 : vector<8x32xf32>, vector<8x32xf32> -> vector<8x64xf32>
    %cst_34 = arith.constant dense<0.000000e+00> : vector<8x128xf32>
    %147 = tpu.matmul %146, %46, %cst_34 {dimension_numbers = #tpu.dot_dimension_numbers<[1], [0], [0], [1], [0, 0, 1, 1], [], []>} : vector<8x64xf32>, vector<64x128xf32>, vector<8x128xf32> -> vector<8x128xf32>
    %148 = vector.broadcast %48 : vector<1x128xf32> to vector<8x128xf32>
    %149 = arith.addf %147, %148 : vector<8x128xf32>
    %150 = arith.negf %149 : vector<8x128xf32>
    %151 = math.exp %150 : vector<8x128xf32>
    %cst_35 = arith.constant 1.000000e+00 : f32
    %152 = vector.broadcast %cst_35 : f32 to vector<8x128xf32>
    %153 = arith.addf %152, %151 : vector<8x128xf32>
    %154 = arith.divf %152, %153 : vector<8x128xf32>
    %155 = math.tanh %149 : vector<8x128xf32>
    %156 = vector.extract_strided_slice %154 {offsets = [0, 0], sizes = [8, 32], strides = [1, 1]} : vector<8x128xf32> to vector<8x32xf32>
    %157 = vector.extract_strided_slice %154 {offsets = [0, 32], sizes = [8, 32], strides = [1, 1]} : vector<8x128xf32> to vector<8x32xf32>
    %158 = vector.extract_strided_slice %155 {offsets = [0, 64], sizes = [8, 32], strides = [1, 1]} : vector<8x128xf32> to vector<8x32xf32>
    %159 = vector.extract_strided_slice %154 {offsets = [0, 96], sizes = [8, 32], strides = [1, 1]} : vector<8x128xf32> to vector<8x32xf32>
    %160 = arith.mulf %157, %143 : vector<8x32xf32>
    %161 = arith.mulf %156, %158 : vector<8x32xf32>
    %162 = arith.addf %160, %161 : vector<8x32xf32>
    %163 = math.tanh %162 : vector<8x32xf32>
    %164 = arith.mulf %159, %163 : vector<8x32xf32>
    %cst_36 = arith.constant 0.000000e+00 : f32
    %165 = vector.broadcast %cst_36 : f32 to vector<8x32xf32>
    %c0_37 = arith.constant 0 : index
    %c0_38 = arith.constant 0 : index
    %c0_39 = arith.constant 0 : index
    %166 = vector.load %arg4[%c0_37, %c0_38, %c0_39] : memref<6x8x1xf32, #tpu.memory_space<vmem>>, vector<1x8x1xf32>
    %167 = vector.shape_cast %166 : vector<1x8x1xf32> to vector<8x1xf32>
    %168 = vector.broadcast %167 : vector<8x1xf32> to vector<8x32xf32>
    %169 = arith.mulf %168, %69 : vector<8x32xf32>
    %170 = arith.addf %165, %169 : vector<8x32xf32>
    %c1 = arith.constant 1 : index
    %c0_40 = arith.constant 0 : index
    %c0_41 = arith.constant 0 : index
    %171 = vector.load %arg4[%c1, %c0_40, %c0_41] : memref<6x8x1xf32, #tpu.memory_space<vmem>>, vector<1x8x1xf32>
    %172 = vector.shape_cast %171 : vector<1x8x1xf32> to vector<8x1xf32>
    %173 = vector.broadcast %172 : vector<8x1xf32> to vector<8x32xf32>
    %174 = arith.mulf %173, %88 : vector<8x32xf32>
    %175 = arith.addf %170, %174 : vector<8x32xf32>
    %c2 = arith.constant 2 : index
    %c0_42 = arith.constant 0 : index
    %c0_43 = arith.constant 0 : index
    %176 = vector.load %arg4[%c2, %c0_42, %c0_43] : memref<6x8x1xf32, #tpu.memory_space<vmem>>, vector<1x8x1xf32>
    %177 = vector.shape_cast %176 : vector<1x8x1xf32> to vector<8x1xf32>
    %178 = vector.broadcast %177 : vector<8x1xf32> to vector<8x32xf32>
    %179 = arith.mulf %178, %107 : vector<8x32xf32>
    %180 = arith.addf %175, %179 : vector<8x32xf32>
    %c3 = arith.constant 3 : index
    %c0_44 = arith.constant 0 : index
    %c0_45 = arith.constant 0 : index
    %181 = vector.load %arg4[%c3, %c0_44, %c0_45] : memref<6x8x1xf32, #tpu.memory_space<vmem>>, vector<1x8x1xf32>
    %182 = vector.shape_cast %181 : vector<1x8x1xf32> to vector<8x1xf32>
    %183 = vector.broadcast %182 : vector<8x1xf32> to vector<8x32xf32>
    %184 = arith.mulf %183, %126 : vector<8x32xf32>
    %185 = arith.addf %180, %184 : vector<8x32xf32>
    %c4 = arith.constant 4 : index
    %c0_46 = arith.constant 0 : index
    %c0_47 = arith.constant 0 : index
    %186 = vector.load %arg4[%c4, %c0_46, %c0_47] : memref<6x8x1xf32, #tpu.memory_space<vmem>>, vector<1x8x1xf32>
    %187 = vector.shape_cast %186 : vector<1x8x1xf32> to vector<8x1xf32>
    %188 = vector.broadcast %187 : vector<8x1xf32> to vector<8x32xf32>
    %189 = arith.mulf %188, %145 : vector<8x32xf32>
    %190 = arith.addf %185, %189 : vector<8x32xf32>
    %c5 = arith.constant 5 : index
    %c0_48 = arith.constant 0 : index
    %c0_49 = arith.constant 0 : index
    %191 = vector.load %arg4[%c5, %c0_48, %c0_49] : memref<6x8x1xf32, #tpu.memory_space<vmem>>, vector<1x8x1xf32>
    %192 = vector.shape_cast %191 : vector<1x8x1xf32> to vector<8x1xf32>
    %193 = vector.broadcast %192 : vector<8x1xf32> to vector<8x32xf32>
    %194 = arith.mulf %193, %164 : vector<8x32xf32>
    %195 = arith.addf %190, %194 : vector<8x32xf32>
    %c0_50 = arith.constant 0 : index
    %c0_51 = arith.constant 0 : index
    %196 = vector.load %arg7[%c0_50, %c0_51] : memref<16x32xf32, #tpu.memory_space<vmem>>, vector<4x32xf32>
    %197 = vector.extract_strided_slice %195 {offsets = [0, 0], sizes = [4, 32], strides = [1, 1]} : vector<8x32xf32> to vector<4x32xf32>
    %198 = vector.extract_strided_slice %195 {offsets = [4, 0], sizes = [4, 32], strides = [1, 1]} : vector<8x32xf32> to vector<4x32xf32>
    %199 = tpu.concatenate %196, %197, %196, %198 in 0 : vector<4x32xf32>, vector<4x32xf32>, vector<4x32xf32>, vector<4x32xf32> -> vector<16x32xf32>
    %c0_52 = arith.constant 0 : index
    %c0_53 = arith.constant 0 : index
    %c0_54 = arith.constant 0 : index
    %200 = vector.load %arg13[%c0_52, %c0_53, %c0_54] : memref<2x32x96xf32, #tpu.memory_space<vmem>>, vector<1x32x96xf32>
    %201 = vector.shape_cast %200 : vector<1x32x96xf32> to vector<32x96xf32>
    %cst_55 = arith.constant dense<0.000000e+00> : vector<16x96xf32>
    %202 = tpu.matmul %199, %201, %cst_55 {dimension_numbers = #tpu.dot_dimension_numbers<[1], [0], [0], [1], [0, 0, 1, 1], [], []>} : vector<16x32xf32>, vector<32x96xf32>, vector<16x96xf32> -> vector<16x96xf32>
    %c0_56 = arith.constant 0 : index
    %c0_57 = arith.constant 0 : index
    %c0_58 = arith.constant 0 : index
    %203 = vector.load %arg14[%c0_56, %c0_57, %c0_58] : memref<2x1x96xf32, #tpu.memory_space<vmem>>, vector<1x1x96xf32>
    %204 = vector.shape_cast %203 : vector<1x1x96xf32> to vector<1x96xf32>
    %205 = vector.broadcast %204 : vector<1x96xf32> to vector<16x96xf32>
    %206 = arith.addf %202, %205 : vector<16x96xf32>
    %207 = vector.extract_strided_slice %206 {offsets = [0, 0], sizes = [16, 32], strides = [1, 1]} : vector<16x96xf32> to vector<16x32xf32>
    %208 = vector.extract_strided_slice %206 {offsets = [0, 32], sizes = [16, 32], strides = [1, 1]} : vector<16x96xf32> to vector<16x32xf32>
    %209 = vector.extract_strided_slice %206 {offsets = [0, 64], sizes = [16, 32], strides = [1, 1]} : vector<16x96xf32> to vector<16x32xf32>
    %210 = vector.extract_strided_slice %207 {offsets = [0, 0], sizes = [8, 32], strides = [1, 1]} : vector<16x32xf32> to vector<8x32xf32>
    %211 = vector.extract_strided_slice %208 {offsets = [0, 0], sizes = [8, 32], strides = [1, 1]} : vector<16x32xf32> to vector<8x32xf32>
    %212 = vector.extract_strided_slice %209 {offsets = [0, 0], sizes = [8, 32], strides = [1, 1]} : vector<16x32xf32> to vector<8x32xf32>
    %213 = vector.extract_strided_slice %210 {offsets = [0, 0], sizes = [8, 8], strides = [1, 1]} : vector<8x32xf32> to vector<8x8xf32>
    %214 = vector.extract_strided_slice %211 {offsets = [0, 0], sizes = [8, 8], strides = [1, 1]} : vector<8x32xf32> to vector<8x8xf32>
    %cst_59 = arith.constant dense<0.000000e+00> : vector<8x8xf32>
    %215 = tpu.matmul %213, %214, %cst_59 {dimension_numbers = #tpu.dot_dimension_numbers<[1], [1], [0], [0], [0, 0, 1, 0], [], []>} : vector<8x8xf32>, vector<8x8xf32>, vector<8x8xf32> -> vector<8x8xf32>
    %cst_60 = arith.constant 0.353553385 : f32
    %216 = vector.broadcast %cst_60 : f32 to vector<8x8xf32>
    %217 = arith.mulf %215, %216 : vector<8x8xf32>
    %cst_61 = arith.constant dense<0xFF800000> : vector<8xf32>
    %218 = vector.multi_reduction <maximumf>, %217, %cst_61 [1] : vector<8x8xf32> to vector<8xf32>
    %cst_62 = arith.constant 0xFF800000 : f32
    %219 = vector.broadcast %cst_62 : f32 to vector<8xf32>
    %220 = arith.maximumf %219, %218 : vector<8xf32>
    %221 = vector.shape_cast %220 : vector<8xf32> to vector<8x1xf32>
    %222 = vector.broadcast %221 : vector<8x1xf32> to vector<8x8xf32>
    %223 = arith.subf %217, %222 : vector<8x8xf32>
    %224 = math.exp %223 : vector<8x8xf32>
    %cst_63 = arith.constant dense<0.000000e+00> : vector<8xf32>
    %225 = vector.multi_reduction <add>, %224, %cst_63 [1] : vector<8x8xf32> to vector<8xf32>
    %226 = vector.shape_cast %225 : vector<8xf32> to vector<8x1xf32>
    %227 = vector.broadcast %226 : vector<8x1xf32> to vector<8x8xf32>
    %228 = arith.divf %224, %227 : vector<8x8xf32>
    %229 = vector.extract_strided_slice %212 {offsets = [0, 0], sizes = [8, 8], strides = [1, 1]} : vector<8x32xf32> to vector<8x8xf32>
    %cst_64 = arith.constant dense<0.000000e+00> : vector<8x8xf32>
    %230 = tpu.matmul %228, %229, %cst_64 {dimension_numbers = #tpu.dot_dimension_numbers<[1], [0], [0], [1], [0, 0, 1, 1], [], []>} : vector<8x8xf32>, vector<8x8xf32>, vector<8x8xf32> -> vector<8x8xf32>
    %231 = vector.extract_strided_slice %210 {offsets = [0, 8], sizes = [8, 8], strides = [1, 1]} : vector<8x32xf32> to vector<8x8xf32>
    %232 = vector.extract_strided_slice %211 {offsets = [0, 8], sizes = [8, 8], strides = [1, 1]} : vector<8x32xf32> to vector<8x8xf32>
    %cst_65 = arith.constant dense<0.000000e+00> : vector<8x8xf32>
    %233 = tpu.matmul %231, %232, %cst_65 {dimension_numbers = #tpu.dot_dimension_numbers<[1], [1], [0], [0], [0, 0, 1, 0], [], []>} : vector<8x8xf32>, vector<8x8xf32>, vector<8x8xf32> -> vector<8x8xf32>
    %cst_66 = arith.constant 0.353553385 : f32
    %234 = vector.broadcast %cst_66 : f32 to vector<8x8xf32>
    %235 = arith.mulf %233, %234 : vector<8x8xf32>
    %cst_67 = arith.constant dense<0xFF800000> : vector<8xf32>
    %236 = vector.multi_reduction <maximumf>, %235, %cst_67 [1] : vector<8x8xf32> to vector<8xf32>
    %cst_68 = arith.constant 0xFF800000 : f32
    %237 = vector.broadcast %cst_68 : f32 to vector<8xf32>
    %238 = arith.maximumf %237, %236 : vector<8xf32>
    %239 = vector.shape_cast %238 : vector<8xf32> to vector<8x1xf32>
    %240 = vector.broadcast %239 : vector<8x1xf32> to vector<8x8xf32>
    %241 = arith.subf %235, %240 : vector<8x8xf32>
    %242 = math.exp %241 : vector<8x8xf32>
    %cst_69 = arith.constant dense<0.000000e+00> : vector<8xf32>
    %243 = vector.multi_reduction <add>, %242, %cst_69 [1] : vector<8x8xf32> to vector<8xf32>
    %244 = vector.shape_cast %243 : vector<8xf32> to vector<8x1xf32>
    %245 = vector.broadcast %244 : vector<8x1xf32> to vector<8x8xf32>
    %246 = arith.divf %242, %245 : vector<8x8xf32>
    %247 = vector.extract_strided_slice %212 {offsets = [0, 8], sizes = [8, 8], strides = [1, 1]} : vector<8x32xf32> to vector<8x8xf32>
    %cst_70 = arith.constant dense<0.000000e+00> : vector<8x8xf32>
    %248 = tpu.matmul %246, %247, %cst_70 {dimension_numbers = #tpu.dot_dimension_numbers<[1], [0], [0], [1], [0, 0, 1, 1], [], []>} : vector<8x8xf32>, vector<8x8xf32>, vector<8x8xf32> -> vector<8x8xf32>
    %249 = vector.extract_strided_slice %210 {offsets = [0, 16], sizes = [8, 8], strides = [1, 1]} : vector<8x32xf32> to vector<8x8xf32>
    %250 = vector.extract_strided_slice %211 {offsets = [0, 16], sizes = [8, 8], strides = [1, 1]} : vector<8x32xf32> to vector<8x8xf32>
    %cst_71 = arith.constant dense<0.000000e+00> : vector<8x8xf32>
    %251 = tpu.matmul %249, %250, %cst_71 {dimension_numbers = #tpu.dot_dimension_numbers<[1], [1], [0], [0], [0, 0, 1, 0], [], []>} : vector<8x8xf32>, vector<8x8xf32>, vector<8x8xf32> -> vector<8x8xf32>
    %cst_72 = arith.constant 0.353553385 : f32
    %252 = vector.broadcast %cst_72 : f32 to vector<8x8xf32>
    %253 = arith.mulf %251, %252 : vector<8x8xf32>
    %cst_73 = arith.constant dense<0xFF800000> : vector<8xf32>
    %254 = vector.multi_reduction <maximumf>, %253, %cst_73 [1] : vector<8x8xf32> to vector<8xf32>
    %cst_74 = arith.constant 0xFF800000 : f32
    %255 = vector.broadcast %cst_74 : f32 to vector<8xf32>
    %256 = arith.maximumf %255, %254 : vector<8xf32>
    %257 = vector.shape_cast %256 : vector<8xf32> to vector<8x1xf32>
    %258 = vector.broadcast %257 : vector<8x1xf32> to vector<8x8xf32>
    %259 = arith.subf %253, %258 : vector<8x8xf32>
    %260 = math.exp %259 : vector<8x8xf32>
    %cst_75 = arith.constant dense<0.000000e+00> : vector<8xf32>
    %261 = vector.multi_reduction <add>, %260, %cst_75 [1] : vector<8x8xf32> to vector<8xf32>
    %262 = vector.shape_cast %261 : vector<8xf32> to vector<8x1xf32>
    %263 = vector.broadcast %262 : vector<8x1xf32> to vector<8x8xf32>
    %264 = arith.divf %260, %263 : vector<8x8xf32>
    %265 = vector.extract_strided_slice %212 {offsets = [0, 16], sizes = [8, 8], strides = [1, 1]} : vector<8x32xf32> to vector<8x8xf32>
    %cst_76 = arith.constant dense<0.000000e+00> : vector<8x8xf32>
    %266 = tpu.matmul %264, %265, %cst_76 {dimension_numbers = #tpu.dot_dimension_numbers<[1], [0], [0], [1], [0, 0, 1, 1], [], []>} : vector<8x8xf32>, vector<8x8xf32>, vector<8x8xf32> -> vector<8x8xf32>
    %267 = vector.extract_strided_slice %210 {offsets = [0, 24], sizes = [8, 8], strides = [1, 1]} : vector<8x32xf32> to vector<8x8xf32>
    %268 = vector.extract_strided_slice %211 {offsets = [0, 24], sizes = [8, 8], strides = [1, 1]} : vector<8x32xf32> to vector<8x8xf32>
    %cst_77 = arith.constant dense<0.000000e+00> : vector<8x8xf32>
    %269 = tpu.matmul %267, %268, %cst_77 {dimension_numbers = #tpu.dot_dimension_numbers<[1], [1], [0], [0], [0, 0, 1, 0], [], []>} : vector<8x8xf32>, vector<8x8xf32>, vector<8x8xf32> -> vector<8x8xf32>
    %cst_78 = arith.constant 0.353553385 : f32
    %270 = vector.broadcast %cst_78 : f32 to vector<8x8xf32>
    %271 = arith.mulf %269, %270 : vector<8x8xf32>
    %cst_79 = arith.constant dense<0xFF800000> : vector<8xf32>
    %272 = vector.multi_reduction <maximumf>, %271, %cst_79 [1] : vector<8x8xf32> to vector<8xf32>
    %cst_80 = arith.constant 0xFF800000 : f32
    %273 = vector.broadcast %cst_80 : f32 to vector<8xf32>
    %274 = arith.maximumf %273, %272 : vector<8xf32>
    %275 = vector.shape_cast %274 : vector<8xf32> to vector<8x1xf32>
    %276 = vector.broadcast %275 : vector<8x1xf32> to vector<8x8xf32>
    %277 = arith.subf %271, %276 : vector<8x8xf32>
    %278 = math.exp %277 : vector<8x8xf32>
    %cst_81 = arith.constant dense<0.000000e+00> : vector<8xf32>
    %279 = vector.multi_reduction <add>, %278, %cst_81 [1] : vector<8x8xf32> to vector<8xf32>
    %280 = vector.shape_cast %279 : vector<8xf32> to vector<8x1xf32>
    %281 = vector.broadcast %280 : vector<8x1xf32> to vector<8x8xf32>
    %282 = arith.divf %278, %281 : vector<8x8xf32>
    %283 = vector.extract_strided_slice %212 {offsets = [0, 24], sizes = [8, 8], strides = [1, 1]} : vector<8x32xf32> to vector<8x8xf32>
    %cst_82 = arith.constant dense<0.000000e+00> : vector<8x8xf32>
    %284 = tpu.matmul %282, %283, %cst_82 {dimension_numbers = #tpu.dot_dimension_numbers<[1], [0], [0], [1], [0, 0, 1, 1], [], []>} : vector<8x8xf32>, vector<8x8xf32>, vector<8x8xf32> -> vector<8x8xf32>
    %285 = tpu.concatenate %230, %248, %266, %284 in 1 : vector<8x8xf32>, vector<8x8xf32>, vector<8x8xf32>, vector<8x8xf32> -> vector<8x32xf32>
    %286 = vector.extract_strided_slice %207 {offsets = [8, 0], sizes = [8, 32], strides = [1, 1]} : vector<16x32xf32> to vector<8x32xf32>
    %287 = vector.extract_strided_slice %208 {offsets = [8, 0], sizes = [8, 32], strides = [1, 1]} : vector<16x32xf32> to vector<8x32xf32>
    %288 = vector.extract_strided_slice %209 {offsets = [8, 0], sizes = [8, 32], strides = [1, 1]} : vector<16x32xf32> to vector<8x32xf32>
    %289 = vector.extract_strided_slice %286 {offsets = [0, 0], sizes = [8, 8], strides = [1, 1]} : vector<8x32xf32> to vector<8x8xf32>
    %290 = vector.extract_strided_slice %287 {offsets = [0, 0], sizes = [8, 8], strides = [1, 1]} : vector<8x32xf32> to vector<8x8xf32>
    %cst_83 = arith.constant dense<0.000000e+00> : vector<8x8xf32>
    %291 = tpu.matmul %289, %290, %cst_83 {dimension_numbers = #tpu.dot_dimension_numbers<[1], [1], [0], [0], [0, 0, 1, 0], [], []>} : vector<8x8xf32>, vector<8x8xf32>, vector<8x8xf32> -> vector<8x8xf32>
    %cst_84 = arith.constant 0.353553385 : f32
    %292 = vector.broadcast %cst_84 : f32 to vector<8x8xf32>
    %293 = arith.mulf %291, %292 : vector<8x8xf32>
    %cst_85 = arith.constant dense<0xFF800000> : vector<8xf32>
    %294 = vector.multi_reduction <maximumf>, %293, %cst_85 [1] : vector<8x8xf32> to vector<8xf32>
    %cst_86 = arith.constant 0xFF800000 : f32
    %295 = vector.broadcast %cst_86 : f32 to vector<8xf32>
    %296 = arith.maximumf %295, %294 : vector<8xf32>
    %297 = vector.shape_cast %296 : vector<8xf32> to vector<8x1xf32>
    %298 = vector.broadcast %297 : vector<8x1xf32> to vector<8x8xf32>
    %299 = arith.subf %293, %298 : vector<8x8xf32>
    %300 = math.exp %299 : vector<8x8xf32>
    %cst_87 = arith.constant dense<0.000000e+00> : vector<8xf32>
    %301 = vector.multi_reduction <add>, %300, %cst_87 [1] : vector<8x8xf32> to vector<8xf32>
    %302 = vector.shape_cast %301 : vector<8xf32> to vector<8x1xf32>
    %303 = vector.broadcast %302 : vector<8x1xf32> to vector<8x8xf32>
    %304 = arith.divf %300, %303 : vector<8x8xf32>
    %305 = vector.extract_strided_slice %288 {offsets = [0, 0], sizes = [8, 8], strides = [1, 1]} : vector<8x32xf32> to vector<8x8xf32>
    %cst_88 = arith.constant dense<0.000000e+00> : vector<8x8xf32>
    %306 = tpu.matmul %304, %305, %cst_88 {dimension_numbers = #tpu.dot_dimension_numbers<[1], [0], [0], [1], [0, 0, 1, 1], [], []>} : vector<8x8xf32>, vector<8x8xf32>, vector<8x8xf32> -> vector<8x8xf32>
    %307 = vector.extract_strided_slice %286 {offsets = [0, 8], sizes = [8, 8], strides = [1, 1]} : vector<8x32xf32> to vector<8x8xf32>
    %308 = vector.extract_strided_slice %287 {offsets = [0, 8], sizes = [8, 8], strides = [1, 1]} : vector<8x32xf32> to vector<8x8xf32>
    %cst_89 = arith.constant dense<0.000000e+00> : vector<8x8xf32>
    %309 = tpu.matmul %307, %308, %cst_89 {dimension_numbers = #tpu.dot_dimension_numbers<[1], [1], [0], [0], [0, 0, 1, 0], [], []>} : vector<8x8xf32>, vector<8x8xf32>, vector<8x8xf32> -> vector<8x8xf32>
    %cst_90 = arith.constant 0.353553385 : f32
    %310 = vector.broadcast %cst_90 : f32 to vector<8x8xf32>
    %311 = arith.mulf %309, %310 : vector<8x8xf32>
    %cst_91 = arith.constant dense<0xFF800000> : vector<8xf32>
    %312 = vector.multi_reduction <maximumf>, %311, %cst_91 [1] : vector<8x8xf32> to vector<8xf32>
    %cst_92 = arith.constant 0xFF800000 : f32
    %313 = vector.broadcast %cst_92 : f32 to vector<8xf32>
    %314 = arith.maximumf %313, %312 : vector<8xf32>
    %315 = vector.shape_cast %314 : vector<8xf32> to vector<8x1xf32>
    %316 = vector.broadcast %315 : vector<8x1xf32> to vector<8x8xf32>
    %317 = arith.subf %311, %316 : vector<8x8xf32>
    %318 = math.exp %317 : vector<8x8xf32>
    %cst_93 = arith.constant dense<0.000000e+00> : vector<8xf32>
    %319 = vector.multi_reduction <add>, %318, %cst_93 [1] : vector<8x8xf32> to vector<8xf32>
    %320 = vector.shape_cast %319 : vector<8xf32> to vector<8x1xf32>
    %321 = vector.broadcast %320 : vector<8x1xf32> to vector<8x8xf32>
    %322 = arith.divf %318, %321 : vector<8x8xf32>
    %323 = vector.extract_strided_slice %288 {offsets = [0, 8], sizes = [8, 8], strides = [1, 1]} : vector<8x32xf32> to vector<8x8xf32>
    %cst_94 = arith.constant dense<0.000000e+00> : vector<8x8xf32>
    %324 = tpu.matmul %322, %323, %cst_94 {dimension_numbers = #tpu.dot_dimension_numbers<[1], [0], [0], [1], [0, 0, 1, 1], [], []>} : vector<8x8xf32>, vector<8x8xf32>, vector<8x8xf32> -> vector<8x8xf32>
    %325 = vector.extract_strided_slice %286 {offsets = [0, 16], sizes = [8, 8], strides = [1, 1]} : vector<8x32xf32> to vector<8x8xf32>
    %326 = vector.extract_strided_slice %287 {offsets = [0, 16], sizes = [8, 8], strides = [1, 1]} : vector<8x32xf32> to vector<8x8xf32>
    %cst_95 = arith.constant dense<0.000000e+00> : vector<8x8xf32>
    %327 = tpu.matmul %325, %326, %cst_95 {dimension_numbers = #tpu.dot_dimension_numbers<[1], [1], [0], [0], [0, 0, 1, 0], [], []>} : vector<8x8xf32>, vector<8x8xf32>, vector<8x8xf32> -> vector<8x8xf32>
    %cst_96 = arith.constant 0.353553385 : f32
    %328 = vector.broadcast %cst_96 : f32 to vector<8x8xf32>
    %329 = arith.mulf %327, %328 : vector<8x8xf32>
    %cst_97 = arith.constant dense<0xFF800000> : vector<8xf32>
    %330 = vector.multi_reduction <maximumf>, %329, %cst_97 [1] : vector<8x8xf32> to vector<8xf32>
    %cst_98 = arith.constant 0xFF800000 : f32
    %331 = vector.broadcast %cst_98 : f32 to vector<8xf32>
    %332 = arith.maximumf %331, %330 : vector<8xf32>
    %333 = vector.shape_cast %332 : vector<8xf32> to vector<8x1xf32>
    %334 = vector.broadcast %333 : vector<8x1xf32> to vector<8x8xf32>
    %335 = arith.subf %329, %334 : vector<8x8xf32>
    %336 = math.exp %335 : vector<8x8xf32>
    %cst_99 = arith.constant dense<0.000000e+00> : vector<8xf32>
    %337 = vector.multi_reduction <add>, %336, %cst_99 [1] : vector<8x8xf32> to vector<8xf32>
    %338 = vector.shape_cast %337 : vector<8xf32> to vector<8x1xf32>
    %339 = vector.broadcast %338 : vector<8x1xf32> to vector<8x8xf32>
    %340 = arith.divf %336, %339 : vector<8x8xf32>
    %341 = vector.extract_strided_slice %288 {offsets = [0, 16], sizes = [8, 8], strides = [1, 1]} : vector<8x32xf32> to vector<8x8xf32>
    %cst_100 = arith.constant dense<0.000000e+00> : vector<8x8xf32>
    %342 = tpu.matmul %340, %341, %cst_100 {dimension_numbers = #tpu.dot_dimension_numbers<[1], [0], [0], [1], [0, 0, 1, 1], [], []>} : vector<8x8xf32>, vector<8x8xf32>, vector<8x8xf32> -> vector<8x8xf32>
    %343 = vector.extract_strided_slice %286 {offsets = [0, 24], sizes = [8, 8], strides = [1, 1]} : vector<8x32xf32> to vector<8x8xf32>
    %344 = vector.extract_strided_slice %287 {offsets = [0, 24], sizes = [8, 8], strides = [1, 1]} : vector<8x32xf32> to vector<8x8xf32>
    %cst_101 = arith.constant dense<0.000000e+00> : vector<8x8xf32>
    %345 = tpu.matmul %343, %344, %cst_101 {dimension_numbers = #tpu.dot_dimension_numbers<[1], [1], [0], [0], [0, 0, 1, 0], [], []>} : vector<8x8xf32>, vector<8x8xf32>, vector<8x8xf32> -> vector<8x8xf32>
    %cst_102 = arith.constant 0.353553385 : f32
    %346 = vector.broadcast %cst_102 : f32 to vector<8x8xf32>
    %347 = arith.mulf %345, %346 : vector<8x8xf32>
    %cst_103 = arith.constant dense<0xFF800000> : vector<8xf32>
    %348 = vector.multi_reduction <maximumf>, %347, %cst_103 [1] : vector<8x8xf32> to vector<8xf32>
    %cst_104 = arith.constant 0xFF800000 : f32
    %349 = vector.broadcast %cst_104 : f32 to vector<8xf32>
    %350 = arith.maximumf %349, %348 : vector<8xf32>
    %351 = vector.shape_cast %350 : vector<8xf32> to vector<8x1xf32>
    %352 = vector.broadcast %351 : vector<8x1xf32> to vector<8x8xf32>
    %353 = arith.subf %347, %352 : vector<8x8xf32>
    %354 = math.exp %353 : vector<8x8xf32>
    %cst_105 = arith.constant dense<0.000000e+00> : vector<8xf32>
    %355 = vector.multi_reduction <add>, %354, %cst_105 [1] : vector<8x8xf32> to vector<8xf32>
    %356 = vector.shape_cast %355 : vector<8xf32> to vector<8x1xf32>
    %357 = vector.broadcast %356 : vector<8x1xf32> to vector<8x8xf32>
    %358 = arith.divf %354, %357 : vector<8x8xf32>
    %359 = vector.extract_strided_slice %288 {offsets = [0, 24], sizes = [8, 8], strides = [1, 1]} : vector<8x32xf32> to vector<8x8xf32>
    %cst_106 = arith.constant dense<0.000000e+00> : vector<8x8xf32>
    %360 = tpu.matmul %358, %359, %cst_106 {dimension_numbers = #tpu.dot_dimension_numbers<[1], [0], [0], [1], [0, 0, 1, 1], [], []>} : vector<8x8xf32>, vector<8x8xf32>, vector<8x8xf32> -> vector<8x8xf32>
    %361 = tpu.concatenate %306, %324, %342, %360 in 1 : vector<8x8xf32>, vector<8x8xf32>, vector<8x8xf32>, vector<8x8xf32> -> vector<8x32xf32>
    %362 = tpu.concatenate %285, %361 in 0 : vector<8x32xf32>, vector<8x32xf32> -> vector<16x32xf32>
    %c0_107 = arith.constant 0 : index
    %c0_108 = arith.constant 0 : index
    %c0_109 = arith.constant 0 : index
    %363 = vector.load %arg15[%c0_107, %c0_108, %c0_109] : memref<2x32x32xf32, #tpu.memory_space<vmem>>, vector<1x32x32xf32>
    %364 = vector.shape_cast %363 : vector<1x32x32xf32> to vector<32x32xf32>
    %cst_110 = arith.constant dense<0.000000e+00> : vector<16x32xf32>
    %365 = tpu.matmul %362, %364, %cst_110 {dimension_numbers = #tpu.dot_dimension_numbers<[1], [0], [0], [1], [0, 0, 1, 1], [], []>} : vector<16x32xf32>, vector<32x32xf32>, vector<16x32xf32> -> vector<16x32xf32>
    %c0_111 = arith.constant 0 : index
    %c0_112 = arith.constant 0 : index
    %c0_113 = arith.constant 0 : index
    %366 = vector.load %arg16[%c0_111, %c0_112, %c0_113] : memref<2x1x32xf32, #tpu.memory_space<vmem>>, vector<1x1x32xf32>
    %367 = vector.shape_cast %366 : vector<1x1x32xf32> to vector<1x32xf32>
    %368 = vector.broadcast %367 : vector<1x32xf32> to vector<16x32xf32>
    %369 = arith.addf %365, %368 : vector<16x32xf32>
    %370 = arith.addf %199, %369 : vector<16x32xf32>
    %c0_114 = arith.constant 0 : index
    %c0_115 = arith.constant 0 : index
    %c0_116 = arith.constant 0 : index
    %371 = vector.load %arg21[%c0_114, %c0_115, %c0_116] : memref<2x1x32xf32, #tpu.memory_space<vmem>>, vector<1x1x32xf32>
    %372 = vector.shape_cast %371 : vector<1x1x32xf32> to vector<1x32xf32>
    %c0_117 = arith.constant 0 : index
    %c0_118 = arith.constant 0 : index
    %c0_119 = arith.constant 0 : index
    %373 = vector.load %arg22[%c0_117, %c0_118, %c0_119] : memref<2x1x32xf32, #tpu.memory_space<vmem>>, vector<1x1x32xf32>
    %374 = vector.shape_cast %373 : vector<1x1x32xf32> to vector<1x32xf32>
    %cst_120 = arith.constant dense<0.000000e+00> : vector<16xf32>
    %375 = vector.multi_reduction <add>, %370, %cst_120 [1] : vector<16x32xf32> to vector<16xf32>
    %376 = vector.shape_cast %375 : vector<16xf32> to vector<16x1xf32>
    %cst_121 = arith.constant 3.200000e+01 : f32
    %377 = vector.broadcast %cst_121 : f32 to vector<16x1xf32>
    %378 = arith.divf %376, %377 : vector<16x1xf32>
    %379 = vector.broadcast %378 : vector<16x1xf32> to vector<16x32xf32>
    %380 = arith.subf %370, %379 : vector<16x32xf32>
    %381 = arith.mulf %380, %380 : vector<16x32xf32>
    %cst_122 = arith.constant dense<0.000000e+00> : vector<16xf32>
    %382 = vector.multi_reduction <add>, %381, %cst_122 [1] : vector<16x32xf32> to vector<16xf32>
    %383 = vector.shape_cast %382 : vector<16xf32> to vector<16x1xf32>
    %cst_123 = arith.constant 3.200000e+01 : f32
    %384 = vector.broadcast %cst_123 : f32 to vector<16x1xf32>
    %385 = arith.divf %383, %384 : vector<16x1xf32>
    %386 = vector.broadcast %378 : vector<16x1xf32> to vector<16x32xf32>
    %387 = arith.subf %370, %386 : vector<16x32xf32>
    %cst_124 = arith.constant 9.99999974E-6 : f32
    %388 = vector.broadcast %cst_124 : f32 to vector<16x1xf32>
    %389 = arith.addf %385, %388 : vector<16x1xf32>
    %390 = math.rsqrt %389 : vector<16x1xf32>
    %391 = vector.broadcast %390 : vector<16x1xf32> to vector<16x32xf32>
    %392 = arith.mulf %387, %391 : vector<16x32xf32>
    %393 = vector.broadcast %372 : vector<1x32xf32> to vector<16x32xf32>
    %394 = arith.mulf %392, %393 : vector<16x32xf32>
    %395 = vector.broadcast %374 : vector<1x32xf32> to vector<16x32xf32>
    %396 = arith.addf %394, %395 : vector<16x32xf32>
    %c0_125 = arith.constant 0 : index
    %c0_126 = arith.constant 0 : index
    %c0_127 = arith.constant 0 : index
    %397 = vector.load %arg17[%c0_125, %c0_126, %c0_127] : memref<2x32x128xf32, #tpu.memory_space<vmem>>, vector<1x32x128xf32>
    %398 = vector.shape_cast %397 : vector<1x32x128xf32> to vector<32x128xf32>
    %cst_128 = arith.constant dense<0.000000e+00> : vector<16x128xf32>
    %399 = tpu.matmul %396, %398, %cst_128 {dimension_numbers = #tpu.dot_dimension_numbers<[1], [0], [0], [1], [0, 0, 1, 1], [], []>} : vector<16x32xf32>, vector<32x128xf32>, vector<16x128xf32> -> vector<16x128xf32>
    %c0_129 = arith.constant 0 : index
    %c0_130 = arith.constant 0 : index
    %c0_131 = arith.constant 0 : index
    %400 = vector.load %arg18[%c0_129, %c0_130, %c0_131] : memref<2x1x128xf32, #tpu.memory_space<vmem>>, vector<1x1x128xf32>
    %401 = vector.shape_cast %400 : vector<1x1x128xf32> to vector<1x128xf32>
    %402 = vector.broadcast %401 : vector<1x128xf32> to vector<16x128xf32>
    %403 = arith.addf %399, %402 : vector<16x128xf32>
    %cst_132 = arith.constant 0.000000e+00 : f32
    %404 = vector.broadcast %cst_132 : f32 to vector<16x128xf32>
    %405 = arith.maximumf %403, %404 : vector<16x128xf32>
    %c0_133 = arith.constant 0 : index
    %c0_134 = arith.constant 0 : index
    %c0_135 = arith.constant 0 : index
    %406 = vector.load %arg19[%c0_133, %c0_134, %c0_135] : memref<2x128x32xf32, #tpu.memory_space<vmem>>, vector<1x128x32xf32>
    %407 = vector.shape_cast %406 : vector<1x128x32xf32> to vector<128x32xf32>
    %cst_136 = arith.constant dense<0.000000e+00> : vector<16x32xf32>
    %408 = tpu.matmul %405, %407, %cst_136 {dimension_numbers = #tpu.dot_dimension_numbers<[1], [0], [0], [1], [0, 0, 1, 1], [], []>} : vector<16x128xf32>, vector<128x32xf32>, vector<16x32xf32> -> vector<16x32xf32>
    %c0_137 = arith.constant 0 : index
    %c0_138 = arith.constant 0 : index
    %c0_139 = arith.constant 0 : index
    %409 = vector.load %arg20[%c0_137, %c0_138, %c0_139] : memref<2x1x32xf32, #tpu.memory_space<vmem>>, vector<1x1x32xf32>
    %410 = vector.shape_cast %409 : vector<1x1x32xf32> to vector<1x32xf32>
    %411 = vector.broadcast %410 : vector<1x32xf32> to vector<16x32xf32>
    %412 = arith.addf %408, %411 : vector<16x32xf32>
    %413 = arith.addf %396, %412 : vector<16x32xf32>
    %c0_140 = arith.constant 0 : index
    %c0_141 = arith.constant 0 : index
    %c0_142 = arith.constant 0 : index
    %414 = vector.load %arg23[%c0_140, %c0_141, %c0_142] : memref<2x1x32xf32, #tpu.memory_space<vmem>>, vector<1x1x32xf32>
    %415 = vector.shape_cast %414 : vector<1x1x32xf32> to vector<1x32xf32>
    %c0_143 = arith.constant 0 : index
    %c0_144 = arith.constant 0 : index
    %c0_145 = arith.constant 0 : index
    %416 = vector.load %arg24[%c0_143, %c0_144, %c0_145] : memref<2x1x32xf32, #tpu.memory_space<vmem>>, vector<1x1x32xf32>
    %417 = vector.shape_cast %416 : vector<1x1x32xf32> to vector<1x32xf32>
    %cst_146 = arith.constant dense<0.000000e+00> : vector<16xf32>
    %418 = vector.multi_reduction <add>, %413, %cst_146 [1] : vector<16x32xf32> to vector<16xf32>
    %419 = vector.shape_cast %418 : vector<16xf32> to vector<16x1xf32>
    %cst_147 = arith.constant 3.200000e+01 : f32
    %420 = vector.broadcast %cst_147 : f32 to vector<16x1xf32>
    %421 = arith.divf %419, %420 : vector<16x1xf32>
    %422 = vector.broadcast %421 : vector<16x1xf32> to vector<16x32xf32>
    %423 = arith.subf %413, %422 : vector<16x32xf32>
    %424 = arith.mulf %423, %423 : vector<16x32xf32>
    %cst_148 = arith.constant dense<0.000000e+00> : vector<16xf32>
    %425 = vector.multi_reduction <add>, %424, %cst_148 [1] : vector<16x32xf32> to vector<16xf32>
    %426 = vector.shape_cast %425 : vector<16xf32> to vector<16x1xf32>
    %cst_149 = arith.constant 3.200000e+01 : f32
    %427 = vector.broadcast %cst_149 : f32 to vector<16x1xf32>
    %428 = arith.divf %426, %427 : vector<16x1xf32>
    %429 = vector.broadcast %421 : vector<16x1xf32> to vector<16x32xf32>
    %430 = arith.subf %413, %429 : vector<16x32xf32>
    %cst_150 = arith.constant 9.99999974E-6 : f32
    %431 = vector.broadcast %cst_150 : f32 to vector<16x1xf32>
    %432 = arith.addf %428, %431 : vector<16x1xf32>
    %433 = math.rsqrt %432 : vector<16x1xf32>
    %434 = vector.broadcast %433 : vector<16x1xf32> to vector<16x32xf32>
    %435 = arith.mulf %430, %434 : vector<16x32xf32>
    %436 = vector.broadcast %415 : vector<1x32xf32> to vector<16x32xf32>
    %437 = arith.mulf %435, %436 : vector<16x32xf32>
    %438 = vector.broadcast %417 : vector<1x32xf32> to vector<16x32xf32>
    %439 = arith.addf %437, %438 : vector<16x32xf32>
    %c1_151 = arith.constant 1 : index
    %c0_152 = arith.constant 0 : index
    %c0_153 = arith.constant 0 : index
    %440 = vector.load %arg13[%c1_151, %c0_152, %c0_153] : memref<2x32x96xf32, #tpu.memory_space<vmem>>, vector<1x32x96xf32>
    %441 = vector.shape_cast %440 : vector<1x32x96xf32> to vector<32x96xf32>
    %cst_154 = arith.constant dense<0.000000e+00> : vector<16x96xf32>
    %442 = tpu.matmul %439, %441, %cst_154 {dimension_numbers = #tpu.dot_dimension_numbers<[1], [0], [0], [1], [0, 0, 1, 1], [], []>} : vector<16x32xf32>, vector<32x96xf32>, vector<16x96xf32> -> vector<16x96xf32>
    %c1_155 = arith.constant 1 : index
    %c0_156 = arith.constant 0 : index
    %c0_157 = arith.constant 0 : index
    %443 = vector.load %arg14[%c1_155, %c0_156, %c0_157] : memref<2x1x96xf32, #tpu.memory_space<vmem>>, vector<1x1x96xf32>
    %444 = vector.shape_cast %443 : vector<1x1x96xf32> to vector<1x96xf32>
    %445 = vector.broadcast %444 : vector<1x96xf32> to vector<16x96xf32>
    %446 = arith.addf %442, %445 : vector<16x96xf32>
    %447 = vector.extract_strided_slice %446 {offsets = [0, 0], sizes = [16, 32], strides = [1, 1]} : vector<16x96xf32> to vector<16x32xf32>
    %448 = vector.extract_strided_slice %446 {offsets = [0, 32], sizes = [16, 32], strides = [1, 1]} : vector<16x96xf32> to vector<16x32xf32>
    %449 = vector.extract_strided_slice %446 {offsets = [0, 64], sizes = [16, 32], strides = [1, 1]} : vector<16x96xf32> to vector<16x32xf32>
    %450 = vector.extract_strided_slice %447 {offsets = [0, 0], sizes = [8, 32], strides = [1, 1]} : vector<16x32xf32> to vector<8x32xf32>
    %451 = vector.extract_strided_slice %448 {offsets = [0, 0], sizes = [8, 32], strides = [1, 1]} : vector<16x32xf32> to vector<8x32xf32>
    %452 = vector.extract_strided_slice %449 {offsets = [0, 0], sizes = [8, 32], strides = [1, 1]} : vector<16x32xf32> to vector<8x32xf32>
    %453 = vector.extract_strided_slice %450 {offsets = [0, 0], sizes = [8, 8], strides = [1, 1]} : vector<8x32xf32> to vector<8x8xf32>
    %454 = vector.extract_strided_slice %451 {offsets = [0, 0], sizes = [8, 8], strides = [1, 1]} : vector<8x32xf32> to vector<8x8xf32>
    %cst_158 = arith.constant dense<0.000000e+00> : vector<8x8xf32>
    %455 = tpu.matmul %453, %454, %cst_158 {dimension_numbers = #tpu.dot_dimension_numbers<[1], [1], [0], [0], [0, 0, 1, 0], [], []>} : vector<8x8xf32>, vector<8x8xf32>, vector<8x8xf32> -> vector<8x8xf32>
    %cst_159 = arith.constant 0.353553385 : f32
    %456 = vector.broadcast %cst_159 : f32 to vector<8x8xf32>
    %457 = arith.mulf %455, %456 : vector<8x8xf32>
    %cst_160 = arith.constant dense<0xFF800000> : vector<8xf32>
    %458 = vector.multi_reduction <maximumf>, %457, %cst_160 [1] : vector<8x8xf32> to vector<8xf32>
    %cst_161 = arith.constant 0xFF800000 : f32
    %459 = vector.broadcast %cst_161 : f32 to vector<8xf32>
    %460 = arith.maximumf %459, %458 : vector<8xf32>
    %461 = vector.shape_cast %460 : vector<8xf32> to vector<8x1xf32>
    %462 = vector.broadcast %461 : vector<8x1xf32> to vector<8x8xf32>
    %463 = arith.subf %457, %462 : vector<8x8xf32>
    %464 = math.exp %463 : vector<8x8xf32>
    %cst_162 = arith.constant dense<0.000000e+00> : vector<8xf32>
    %465 = vector.multi_reduction <add>, %464, %cst_162 [1] : vector<8x8xf32> to vector<8xf32>
    %466 = vector.shape_cast %465 : vector<8xf32> to vector<8x1xf32>
    %467 = vector.broadcast %466 : vector<8x1xf32> to vector<8x8xf32>
    %468 = arith.divf %464, %467 : vector<8x8xf32>
    %469 = vector.extract_strided_slice %452 {offsets = [0, 0], sizes = [8, 8], strides = [1, 1]} : vector<8x32xf32> to vector<8x8xf32>
    %cst_163 = arith.constant dense<0.000000e+00> : vector<8x8xf32>
    %470 = tpu.matmul %468, %469, %cst_163 {dimension_numbers = #tpu.dot_dimension_numbers<[1], [0], [0], [1], [0, 0, 1, 1], [], []>} : vector<8x8xf32>, vector<8x8xf32>, vector<8x8xf32> -> vector<8x8xf32>
    %471 = vector.extract_strided_slice %450 {offsets = [0, 8], sizes = [8, 8], strides = [1, 1]} : vector<8x32xf32> to vector<8x8xf32>
    %472 = vector.extract_strided_slice %451 {offsets = [0, 8], sizes = [8, 8], strides = [1, 1]} : vector<8x32xf32> to vector<8x8xf32>
    %cst_164 = arith.constant dense<0.000000e+00> : vector<8x8xf32>
    %473 = tpu.matmul %471, %472, %cst_164 {dimension_numbers = #tpu.dot_dimension_numbers<[1], [1], [0], [0], [0, 0, 1, 0], [], []>} : vector<8x8xf32>, vector<8x8xf32>, vector<8x8xf32> -> vector<8x8xf32>
    %cst_165 = arith.constant 0.353553385 : f32
    %474 = vector.broadcast %cst_165 : f32 to vector<8x8xf32>
    %475 = arith.mulf %473, %474 : vector<8x8xf32>
    %cst_166 = arith.constant dense<0xFF800000> : vector<8xf32>
    %476 = vector.multi_reduction <maximumf>, %475, %cst_166 [1] : vector<8x8xf32> to vector<8xf32>
    %cst_167 = arith.constant 0xFF800000 : f32
    %477 = vector.broadcast %cst_167 : f32 to vector<8xf32>
    %478 = arith.maximumf %477, %476 : vector<8xf32>
    %479 = vector.shape_cast %478 : vector<8xf32> to vector<8x1xf32>
    %480 = vector.broadcast %479 : vector<8x1xf32> to vector<8x8xf32>
    %481 = arith.subf %475, %480 : vector<8x8xf32>
    %482 = math.exp %481 : vector<8x8xf32>
    %cst_168 = arith.constant dense<0.000000e+00> : vector<8xf32>
    %483 = vector.multi_reduction <add>, %482, %cst_168 [1] : vector<8x8xf32> to vector<8xf32>
    %484 = vector.shape_cast %483 : vector<8xf32> to vector<8x1xf32>
    %485 = vector.broadcast %484 : vector<8x1xf32> to vector<8x8xf32>
    %486 = arith.divf %482, %485 : vector<8x8xf32>
    %487 = vector.extract_strided_slice %452 {offsets = [0, 8], sizes = [8, 8], strides = [1, 1]} : vector<8x32xf32> to vector<8x8xf32>
    %cst_169 = arith.constant dense<0.000000e+00> : vector<8x8xf32>
    %488 = tpu.matmul %486, %487, %cst_169 {dimension_numbers = #tpu.dot_dimension_numbers<[1], [0], [0], [1], [0, 0, 1, 1], [], []>} : vector<8x8xf32>, vector<8x8xf32>, vector<8x8xf32> -> vector<8x8xf32>
    %489 = vector.extract_strided_slice %450 {offsets = [0, 16], sizes = [8, 8], strides = [1, 1]} : vector<8x32xf32> to vector<8x8xf32>
    %490 = vector.extract_strided_slice %451 {offsets = [0, 16], sizes = [8, 8], strides = [1, 1]} : vector<8x32xf32> to vector<8x8xf32>
    %cst_170 = arith.constant dense<0.000000e+00> : vector<8x8xf32>
    %491 = tpu.matmul %489, %490, %cst_170 {dimension_numbers = #tpu.dot_dimension_numbers<[1], [1], [0], [0], [0, 0, 1, 0], [], []>} : vector<8x8xf32>, vector<8x8xf32>, vector<8x8xf32> -> vector<8x8xf32>
    %cst_171 = arith.constant 0.353553385 : f32
    %492 = vector.broadcast %cst_171 : f32 to vector<8x8xf32>
    %493 = arith.mulf %491, %492 : vector<8x8xf32>
    %cst_172 = arith.constant dense<0xFF800000> : vector<8xf32>
    %494 = vector.multi_reduction <maximumf>, %493, %cst_172 [1] : vector<8x8xf32> to vector<8xf32>
    %cst_173 = arith.constant 0xFF800000 : f32
    %495 = vector.broadcast %cst_173 : f32 to vector<8xf32>
    %496 = arith.maximumf %495, %494 : vector<8xf32>
    %497 = vector.shape_cast %496 : vector<8xf32> to vector<8x1xf32>
    %498 = vector.broadcast %497 : vector<8x1xf32> to vector<8x8xf32>
    %499 = arith.subf %493, %498 : vector<8x8xf32>
    %500 = math.exp %499 : vector<8x8xf32>
    %cst_174 = arith.constant dense<0.000000e+00> : vector<8xf32>
    %501 = vector.multi_reduction <add>, %500, %cst_174 [1] : vector<8x8xf32> to vector<8xf32>
    %502 = vector.shape_cast %501 : vector<8xf32> to vector<8x1xf32>
    %503 = vector.broadcast %502 : vector<8x1xf32> to vector<8x8xf32>
    %504 = arith.divf %500, %503 : vector<8x8xf32>
    %505 = vector.extract_strided_slice %452 {offsets = [0, 16], sizes = [8, 8], strides = [1, 1]} : vector<8x32xf32> to vector<8x8xf32>
    %cst_175 = arith.constant dense<0.000000e+00> : vector<8x8xf32>
    %506 = tpu.matmul %504, %505, %cst_175 {dimension_numbers = #tpu.dot_dimension_numbers<[1], [0], [0], [1], [0, 0, 1, 1], [], []>} : vector<8x8xf32>, vector<8x8xf32>, vector<8x8xf32> -> vector<8x8xf32>
    %507 = vector.extract_strided_slice %450 {offsets = [0, 24], sizes = [8, 8], strides = [1, 1]} : vector<8x32xf32> to vector<8x8xf32>
    %508 = vector.extract_strided_slice %451 {offsets = [0, 24], sizes = [8, 8], strides = [1, 1]} : vector<8x32xf32> to vector<8x8xf32>
    %cst_176 = arith.constant dense<0.000000e+00> : vector<8x8xf32>
    %509 = tpu.matmul %507, %508, %cst_176 {dimension_numbers = #tpu.dot_dimension_numbers<[1], [1], [0], [0], [0, 0, 1, 0], [], []>} : vector<8x8xf32>, vector<8x8xf32>, vector<8x8xf32> -> vector<8x8xf32>
    %cst_177 = arith.constant 0.353553385 : f32
    %510 = vector.broadcast %cst_177 : f32 to vector<8x8xf32>
    %511 = arith.mulf %509, %510 : vector<8x8xf32>
    %cst_178 = arith.constant dense<0xFF800000> : vector<8xf32>
    %512 = vector.multi_reduction <maximumf>, %511, %cst_178 [1] : vector<8x8xf32> to vector<8xf32>
    %cst_179 = arith.constant 0xFF800000 : f32
    %513 = vector.broadcast %cst_179 : f32 to vector<8xf32>
    %514 = arith.maximumf %513, %512 : vector<8xf32>
    %515 = vector.shape_cast %514 : vector<8xf32> to vector<8x1xf32>
    %516 = vector.broadcast %515 : vector<8x1xf32> to vector<8x8xf32>
    %517 = arith.subf %511, %516 : vector<8x8xf32>
    %518 = math.exp %517 : vector<8x8xf32>
    %cst_180 = arith.constant dense<0.000000e+00> : vector<8xf32>
    %519 = vector.multi_reduction <add>, %518, %cst_180 [1] : vector<8x8xf32> to vector<8xf32>
    %520 = vector.shape_cast %519 : vector<8xf32> to vector<8x1xf32>
    %521 = vector.broadcast %520 : vector<8x1xf32> to vector<8x8xf32>
    %522 = arith.divf %518, %521 : vector<8x8xf32>
    %523 = vector.extract_strided_slice %452 {offsets = [0, 24], sizes = [8, 8], strides = [1, 1]} : vector<8x32xf32> to vector<8x8xf32>
    %cst_181 = arith.constant dense<0.000000e+00> : vector<8x8xf32>
    %524 = tpu.matmul %522, %523, %cst_181 {dimension_numbers = #tpu.dot_dimension_numbers<[1], [0], [0], [1], [0, 0, 1, 1], [], []>} : vector<8x8xf32>, vector<8x8xf32>, vector<8x8xf32> -> vector<8x8xf32>
    %525 = tpu.concatenate %470, %488, %506, %524 in 1 : vector<8x8xf32>, vector<8x8xf32>, vector<8x8xf32>, vector<8x8xf32> -> vector<8x32xf32>
    %526 = vector.extract_strided_slice %447 {offsets = [8, 0], sizes = [8, 32], strides = [1, 1]} : vector<16x32xf32> to vector<8x32xf32>
    %527 = vector.extract_strided_slice %448 {offsets = [8, 0], sizes = [8, 32], strides = [1, 1]} : vector<16x32xf32> to vector<8x32xf32>
    %528 = vector.extract_strided_slice %449 {offsets = [8, 0], sizes = [8, 32], strides = [1, 1]} : vector<16x32xf32> to vector<8x32xf32>
    %529 = vector.extract_strided_slice %526 {offsets = [0, 0], sizes = [8, 8], strides = [1, 1]} : vector<8x32xf32> to vector<8x8xf32>
    %530 = vector.extract_strided_slice %527 {offsets = [0, 0], sizes = [8, 8], strides = [1, 1]} : vector<8x32xf32> to vector<8x8xf32>
    %cst_182 = arith.constant dense<0.000000e+00> : vector<8x8xf32>
    %531 = tpu.matmul %529, %530, %cst_182 {dimension_numbers = #tpu.dot_dimension_numbers<[1], [1], [0], [0], [0, 0, 1, 0], [], []>} : vector<8x8xf32>, vector<8x8xf32>, vector<8x8xf32> -> vector<8x8xf32>
    %cst_183 = arith.constant 0.353553385 : f32
    %532 = vector.broadcast %cst_183 : f32 to vector<8x8xf32>
    %533 = arith.mulf %531, %532 : vector<8x8xf32>
    %cst_184 = arith.constant dense<0xFF800000> : vector<8xf32>
    %534 = vector.multi_reduction <maximumf>, %533, %cst_184 [1] : vector<8x8xf32> to vector<8xf32>
    %cst_185 = arith.constant 0xFF800000 : f32
    %535 = vector.broadcast %cst_185 : f32 to vector<8xf32>
    %536 = arith.maximumf %535, %534 : vector<8xf32>
    %537 = vector.shape_cast %536 : vector<8xf32> to vector<8x1xf32>
    %538 = vector.broadcast %537 : vector<8x1xf32> to vector<8x8xf32>
    %539 = arith.subf %533, %538 : vector<8x8xf32>
    %540 = math.exp %539 : vector<8x8xf32>
    %cst_186 = arith.constant dense<0.000000e+00> : vector<8xf32>
    %541 = vector.multi_reduction <add>, %540, %cst_186 [1] : vector<8x8xf32> to vector<8xf32>
    %542 = vector.shape_cast %541 : vector<8xf32> to vector<8x1xf32>
    %543 = vector.broadcast %542 : vector<8x1xf32> to vector<8x8xf32>
    %544 = arith.divf %540, %543 : vector<8x8xf32>
    %545 = vector.extract_strided_slice %528 {offsets = [0, 0], sizes = [8, 8], strides = [1, 1]} : vector<8x32xf32> to vector<8x8xf32>
    %cst_187 = arith.constant dense<0.000000e+00> : vector<8x8xf32>
    %546 = tpu.matmul %544, %545, %cst_187 {dimension_numbers = #tpu.dot_dimension_numbers<[1], [0], [0], [1], [0, 0, 1, 1], [], []>} : vector<8x8xf32>, vector<8x8xf32>, vector<8x8xf32> -> vector<8x8xf32>
    %547 = vector.extract_strided_slice %526 {offsets = [0, 8], sizes = [8, 8], strides = [1, 1]} : vector<8x32xf32> to vector<8x8xf32>
    %548 = vector.extract_strided_slice %527 {offsets = [0, 8], sizes = [8, 8], strides = [1, 1]} : vector<8x32xf32> to vector<8x8xf32>
    %cst_188 = arith.constant dense<0.000000e+00> : vector<8x8xf32>
    %549 = tpu.matmul %547, %548, %cst_188 {dimension_numbers = #tpu.dot_dimension_numbers<[1], [1], [0], [0], [0, 0, 1, 0], [], []>} : vector<8x8xf32>, vector<8x8xf32>, vector<8x8xf32> -> vector<8x8xf32>
    %cst_189 = arith.constant 0.353553385 : f32
    %550 = vector.broadcast %cst_189 : f32 to vector<8x8xf32>
    %551 = arith.mulf %549, %550 : vector<8x8xf32>
    %cst_190 = arith.constant dense<0xFF800000> : vector<8xf32>
    %552 = vector.multi_reduction <maximumf>, %551, %cst_190 [1] : vector<8x8xf32> to vector<8xf32>
    %cst_191 = arith.constant 0xFF800000 : f32
    %553 = vector.broadcast %cst_191 : f32 to vector<8xf32>
    %554 = arith.maximumf %553, %552 : vector<8xf32>
    %555 = vector.shape_cast %554 : vector<8xf32> to vector<8x1xf32>
    %556 = vector.broadcast %555 : vector<8x1xf32> to vector<8x8xf32>
    %557 = arith.subf %551, %556 : vector<8x8xf32>
    %558 = math.exp %557 : vector<8x8xf32>
    %cst_192 = arith.constant dense<0.000000e+00> : vector<8xf32>
    %559 = vector.multi_reduction <add>, %558, %cst_192 [1] : vector<8x8xf32> to vector<8xf32>
    %560 = vector.shape_cast %559 : vector<8xf32> to vector<8x1xf32>
    %561 = vector.broadcast %560 : vector<8x1xf32> to vector<8x8xf32>
    %562 = arith.divf %558, %561 : vector<8x8xf32>
    %563 = vector.extract_strided_slice %528 {offsets = [0, 8], sizes = [8, 8], strides = [1, 1]} : vector<8x32xf32> to vector<8x8xf32>
    %cst_193 = arith.constant dense<0.000000e+00> : vector<8x8xf32>
    %564 = tpu.matmul %562, %563, %cst_193 {dimension_numbers = #tpu.dot_dimension_numbers<[1], [0], [0], [1], [0, 0, 1, 1], [], []>} : vector<8x8xf32>, vector<8x8xf32>, vector<8x8xf32> -> vector<8x8xf32>
    %565 = vector.extract_strided_slice %526 {offsets = [0, 16], sizes = [8, 8], strides = [1, 1]} : vector<8x32xf32> to vector<8x8xf32>
    %566 = vector.extract_strided_slice %527 {offsets = [0, 16], sizes = [8, 8], strides = [1, 1]} : vector<8x32xf32> to vector<8x8xf32>
    %cst_194 = arith.constant dense<0.000000e+00> : vector<8x8xf32>
    %567 = tpu.matmul %565, %566, %cst_194 {dimension_numbers = #tpu.dot_dimension_numbers<[1], [1], [0], [0], [0, 0, 1, 0], [], []>} : vector<8x8xf32>, vector<8x8xf32>, vector<8x8xf32> -> vector<8x8xf32>
    %cst_195 = arith.constant 0.353553385 : f32
    %568 = vector.broadcast %cst_195 : f32 to vector<8x8xf32>
    %569 = arith.mulf %567, %568 : vector<8x8xf32>
    %cst_196 = arith.constant dense<0xFF800000> : vector<8xf32>
    %570 = vector.multi_reduction <maximumf>, %569, %cst_196 [1] : vector<8x8xf32> to vector<8xf32>
    %cst_197 = arith.constant 0xFF800000 : f32
    %571 = vector.broadcast %cst_197 : f32 to vector<8xf32>
    %572 = arith.maximumf %571, %570 : vector<8xf32>
    %573 = vector.shape_cast %572 : vector<8xf32> to vector<8x1xf32>
    %574 = vector.broadcast %573 : vector<8x1xf32> to vector<8x8xf32>
    %575 = arith.subf %569, %574 : vector<8x8xf32>
    %576 = math.exp %575 : vector<8x8xf32>
    %cst_198 = arith.constant dense<0.000000e+00> : vector<8xf32>
    %577 = vector.multi_reduction <add>, %576, %cst_198 [1] : vector<8x8xf32> to vector<8xf32>
    %578 = vector.shape_cast %577 : vector<8xf32> to vector<8x1xf32>
    %579 = vector.broadcast %578 : vector<8x1xf32> to vector<8x8xf32>
    %580 = arith.divf %576, %579 : vector<8x8xf32>
    %581 = vector.extract_strided_slice %528 {offsets = [0, 16], sizes = [8, 8], strides = [1, 1]} : vector<8x32xf32> to vector<8x8xf32>
    %cst_199 = arith.constant dense<0.000000e+00> : vector<8x8xf32>
    %582 = tpu.matmul %580, %581, %cst_199 {dimension_numbers = #tpu.dot_dimension_numbers<[1], [0], [0], [1], [0, 0, 1, 1], [], []>} : vector<8x8xf32>, vector<8x8xf32>, vector<8x8xf32> -> vector<8x8xf32>
    %583 = vector.extract_strided_slice %526 {offsets = [0, 24], sizes = [8, 8], strides = [1, 1]} : vector<8x32xf32> to vector<8x8xf32>
    %584 = vector.extract_strided_slice %527 {offsets = [0, 24], sizes = [8, 8], strides = [1, 1]} : vector<8x32xf32> to vector<8x8xf32>
    %cst_200 = arith.constant dense<0.000000e+00> : vector<8x8xf32>
    %585 = tpu.matmul %583, %584, %cst_200 {dimension_numbers = #tpu.dot_dimension_numbers<[1], [1], [0], [0], [0, 0, 1, 0], [], []>} : vector<8x8xf32>, vector<8x8xf32>, vector<8x8xf32> -> vector<8x8xf32>
    %cst_201 = arith.constant 0.353553385 : f32
    %586 = vector.broadcast %cst_201 : f32 to vector<8x8xf32>
    %587 = arith.mulf %585, %586 : vector<8x8xf32>
    %cst_202 = arith.constant dense<0xFF800000> : vector<8xf32>
    %588 = vector.multi_reduction <maximumf>, %587, %cst_202 [1] : vector<8x8xf32> to vector<8xf32>
    %cst_203 = arith.constant 0xFF800000 : f32
    %589 = vector.broadcast %cst_203 : f32 to vector<8xf32>
    %590 = arith.maximumf %589, %588 : vector<8xf32>
    %591 = vector.shape_cast %590 : vector<8xf32> to vector<8x1xf32>
    %592 = vector.broadcast %591 : vector<8x1xf32> to vector<8x8xf32>
    %593 = arith.subf %587, %592 : vector<8x8xf32>
    %594 = math.exp %593 : vector<8x8xf32>
    %cst_204 = arith.constant dense<0.000000e+00> : vector<8xf32>
    %595 = vector.multi_reduction <add>, %594, %cst_204 [1] : vector<8x8xf32> to vector<8xf32>
    %596 = vector.shape_cast %595 : vector<8xf32> to vector<8x1xf32>
    %597 = vector.broadcast %596 : vector<8x1xf32> to vector<8x8xf32>
    %598 = arith.divf %594, %597 : vector<8x8xf32>
    %599 = vector.extract_strided_slice %528 {offsets = [0, 24], sizes = [8, 8], strides = [1, 1]} : vector<8x32xf32> to vector<8x8xf32>
    %cst_205 = arith.constant dense<0.000000e+00> : vector<8x8xf32>
    %600 = tpu.matmul %598, %599, %cst_205 {dimension_numbers = #tpu.dot_dimension_numbers<[1], [0], [0], [1], [0, 0, 1, 1], [], []>} : vector<8x8xf32>, vector<8x8xf32>, vector<8x8xf32> -> vector<8x8xf32>
    %601 = tpu.concatenate %546, %564, %582, %600 in 1 : vector<8x8xf32>, vector<8x8xf32>, vector<8x8xf32>, vector<8x8xf32> -> vector<8x32xf32>
    %602 = tpu.concatenate %525, %601 in 0 : vector<8x32xf32>, vector<8x32xf32> -> vector<16x32xf32>
    %c1_206 = arith.constant 1 : index
    %c0_207 = arith.constant 0 : index
    %c0_208 = arith.constant 0 : index
    %603 = vector.load %arg15[%c1_206, %c0_207, %c0_208] : memref<2x32x32xf32, #tpu.memory_space<vmem>>, vector<1x32x32xf32>
    %604 = vector.shape_cast %603 : vector<1x32x32xf32> to vector<32x32xf32>
    %cst_209 = arith.constant dense<0.000000e+00> : vector<16x32xf32>
    %605 = tpu.matmul %602, %604, %cst_209 {dimension_numbers = #tpu.dot_dimension_numbers<[1], [0], [0], [1], [0, 0, 1, 1], [], []>} : vector<16x32xf32>, vector<32x32xf32>, vector<16x32xf32> -> vector<16x32xf32>
    %c1_210 = arith.constant 1 : index
    %c0_211 = arith.constant 0 : index
    %c0_212 = arith.constant 0 : index
    %606 = vector.load %arg16[%c1_210, %c0_211, %c0_212] : memref<2x1x32xf32, #tpu.memory_space<vmem>>, vector<1x1x32xf32>
    %607 = vector.shape_cast %606 : vector<1x1x32xf32> to vector<1x32xf32>
    %608 = vector.broadcast %607 : vector<1x32xf32> to vector<16x32xf32>
    %609 = arith.addf %605, %608 : vector<16x32xf32>
    %610 = arith.addf %439, %609 : vector<16x32xf32>
    %c1_213 = arith.constant 1 : index
    %c0_214 = arith.constant 0 : index
    %c0_215 = arith.constant 0 : index
    %611 = vector.load %arg21[%c1_213, %c0_214, %c0_215] : memref<2x1x32xf32, #tpu.memory_space<vmem>>, vector<1x1x32xf32>
    %612 = vector.shape_cast %611 : vector<1x1x32xf32> to vector<1x32xf32>
    %c1_216 = arith.constant 1 : index
    %c0_217 = arith.constant 0 : index
    %c0_218 = arith.constant 0 : index
    %613 = vector.load %arg22[%c1_216, %c0_217, %c0_218] : memref<2x1x32xf32, #tpu.memory_space<vmem>>, vector<1x1x32xf32>
    %614 = vector.shape_cast %613 : vector<1x1x32xf32> to vector<1x32xf32>
    %cst_219 = arith.constant dense<0.000000e+00> : vector<16xf32>
    %615 = vector.multi_reduction <add>, %610, %cst_219 [1] : vector<16x32xf32> to vector<16xf32>
    %616 = vector.shape_cast %615 : vector<16xf32> to vector<16x1xf32>
    %cst_220 = arith.constant 3.200000e+01 : f32
    %617 = vector.broadcast %cst_220 : f32 to vector<16x1xf32>
    %618 = arith.divf %616, %617 : vector<16x1xf32>
    %619 = vector.broadcast %618 : vector<16x1xf32> to vector<16x32xf32>
    %620 = arith.subf %610, %619 : vector<16x32xf32>
    %621 = arith.mulf %620, %620 : vector<16x32xf32>
    %cst_221 = arith.constant dense<0.000000e+00> : vector<16xf32>
    %622 = vector.multi_reduction <add>, %621, %cst_221 [1] : vector<16x32xf32> to vector<16xf32>
    %623 = vector.shape_cast %622 : vector<16xf32> to vector<16x1xf32>
    %cst_222 = arith.constant 3.200000e+01 : f32
    %624 = vector.broadcast %cst_222 : f32 to vector<16x1xf32>
    %625 = arith.divf %623, %624 : vector<16x1xf32>
    %626 = vector.broadcast %618 : vector<16x1xf32> to vector<16x32xf32>
    %627 = arith.subf %610, %626 : vector<16x32xf32>
    %cst_223 = arith.constant 9.99999974E-6 : f32
    %628 = vector.broadcast %cst_223 : f32 to vector<16x1xf32>
    %629 = arith.addf %625, %628 : vector<16x1xf32>
    %630 = math.rsqrt %629 : vector<16x1xf32>
    %631 = vector.broadcast %630 : vector<16x1xf32> to vector<16x32xf32>
    %632 = arith.mulf %627, %631 : vector<16x32xf32>
    %633 = vector.broadcast %612 : vector<1x32xf32> to vector<16x32xf32>
    %634 = arith.mulf %632, %633 : vector<16x32xf32>
    %635 = vector.broadcast %614 : vector<1x32xf32> to vector<16x32xf32>
    %636 = arith.addf %634, %635 : vector<16x32xf32>
    %c1_224 = arith.constant 1 : index
    %c0_225 = arith.constant 0 : index
    %c0_226 = arith.constant 0 : index
    %637 = vector.load %arg17[%c1_224, %c0_225, %c0_226] : memref<2x32x128xf32, #tpu.memory_space<vmem>>, vector<1x32x128xf32>
    %638 = vector.shape_cast %637 : vector<1x32x128xf32> to vector<32x128xf32>
    %cst_227 = arith.constant dense<0.000000e+00> : vector<16x128xf32>
    %639 = tpu.matmul %636, %638, %cst_227 {dimension_numbers = #tpu.dot_dimension_numbers<[1], [0], [0], [1], [0, 0, 1, 1], [], []>} : vector<16x32xf32>, vector<32x128xf32>, vector<16x128xf32> -> vector<16x128xf32>
    %c1_228 = arith.constant 1 : index
    %c0_229 = arith.constant 0 : index
    %c0_230 = arith.constant 0 : index
    %640 = vector.load %arg18[%c1_228, %c0_229, %c0_230] : memref<2x1x128xf32, #tpu.memory_space<vmem>>, vector<1x1x128xf32>
    %641 = vector.shape_cast %640 : vector<1x1x128xf32> to vector<1x128xf32>
    %642 = vector.broadcast %641 : vector<1x128xf32> to vector<16x128xf32>
    %643 = arith.addf %639, %642 : vector<16x128xf32>
    %cst_231 = arith.constant 0.000000e+00 : f32
    %644 = vector.broadcast %cst_231 : f32 to vector<16x128xf32>
    %645 = arith.maximumf %643, %644 : vector<16x128xf32>
    %c1_232 = arith.constant 1 : index
    %c0_233 = arith.constant 0 : index
    %c0_234 = arith.constant 0 : index
    %646 = vector.load %arg19[%c1_232, %c0_233, %c0_234] : memref<2x128x32xf32, #tpu.memory_space<vmem>>, vector<1x128x32xf32>
    %647 = vector.shape_cast %646 : vector<1x128x32xf32> to vector<128x32xf32>
    %cst_235 = arith.constant dense<0.000000e+00> : vector<16x32xf32>
    %648 = tpu.matmul %645, %647, %cst_235 {dimension_numbers = #tpu.dot_dimension_numbers<[1], [0], [0], [1], [0, 0, 1, 1], [], []>} : vector<16x128xf32>, vector<128x32xf32>, vector<16x32xf32> -> vector<16x32xf32>
    %c1_236 = arith.constant 1 : index
    %c0_237 = arith.constant 0 : index
    %c0_238 = arith.constant 0 : index
    %649 = vector.load %arg20[%c1_236, %c0_237, %c0_238] : memref<2x1x32xf32, #tpu.memory_space<vmem>>, vector<1x1x32xf32>
    %650 = vector.shape_cast %649 : vector<1x1x32xf32> to vector<1x32xf32>
    %651 = vector.broadcast %650 : vector<1x32xf32> to vector<16x32xf32>
    %652 = arith.addf %648, %651 : vector<16x32xf32>
    %653 = arith.addf %636, %652 : vector<16x32xf32>
    %c1_239 = arith.constant 1 : index
    %c0_240 = arith.constant 0 : index
    %c0_241 = arith.constant 0 : index
    %654 = vector.load %arg23[%c1_239, %c0_240, %c0_241] : memref<2x1x32xf32, #tpu.memory_space<vmem>>, vector<1x1x32xf32>
    %655 = vector.shape_cast %654 : vector<1x1x32xf32> to vector<1x32xf32>
    %c1_242 = arith.constant 1 : index
    %c0_243 = arith.constant 0 : index
    %c0_244 = arith.constant 0 : index
    %656 = vector.load %arg24[%c1_242, %c0_243, %c0_244] : memref<2x1x32xf32, #tpu.memory_space<vmem>>, vector<1x1x32xf32>
    %657 = vector.shape_cast %656 : vector<1x1x32xf32> to vector<1x32xf32>
    %cst_245 = arith.constant dense<0.000000e+00> : vector<16xf32>
    %658 = vector.multi_reduction <add>, %653, %cst_245 [1] : vector<16x32xf32> to vector<16xf32>
    %659 = vector.shape_cast %658 : vector<16xf32> to vector<16x1xf32>
    %cst_246 = arith.constant 3.200000e+01 : f32
    %660 = vector.broadcast %cst_246 : f32 to vector<16x1xf32>
    %661 = arith.divf %659, %660 : vector<16x1xf32>
    %662 = vector.broadcast %661 : vector<16x1xf32> to vector<16x32xf32>
    %663 = arith.subf %653, %662 : vector<16x32xf32>
    %664 = arith.mulf %663, %663 : vector<16x32xf32>
    %cst_247 = arith.constant dense<0.000000e+00> : vector<16xf32>
    %665 = vector.multi_reduction <add>, %664, %cst_247 [1] : vector<16x32xf32> to vector<16xf32>
    %666 = vector.shape_cast %665 : vector<16xf32> to vector<16x1xf32>
    %cst_248 = arith.constant 3.200000e+01 : f32
    %667 = vector.broadcast %cst_248 : f32 to vector<16x1xf32>
    %668 = arith.divf %666, %667 : vector<16x1xf32>
    %669 = vector.broadcast %661 : vector<16x1xf32> to vector<16x32xf32>
    %670 = arith.subf %653, %669 : vector<16x32xf32>
    %cst_249 = arith.constant 9.99999974E-6 : f32
    %671 = vector.broadcast %cst_249 : f32 to vector<16x1xf32>
    %672 = arith.addf %668, %671 : vector<16x1xf32>
    %673 = math.rsqrt %672 : vector<16x1xf32>
    %674 = vector.broadcast %673 : vector<16x1xf32> to vector<16x32xf32>
    %675 = arith.mulf %670, %674 : vector<16x32xf32>
    %676 = vector.broadcast %655 : vector<1x32xf32> to vector<16x32xf32>
    %677 = arith.mulf %675, %676 : vector<16x32xf32>
    %678 = vector.broadcast %657 : vector<1x32xf32> to vector<16x32xf32>
    %679 = arith.addf %677, %678 : vector<16x32xf32>
    %680 = vector.extract_strided_slice %679 {offsets = [0, 0], sizes = [1, 32], strides = [1, 1]} : vector<16x32xf32> to vector<1x32xf32>
    %681 = vector.extract_strided_slice %679 {offsets = [8, 0], sizes = [1, 32], strides = [1, 1]} : vector<16x32xf32> to vector<1x32xf32>
    %682 = tpu.concatenate %680, %681 in 0 : vector<1x32xf32>, vector<1x32xf32> -> vector<2x32xf32>
    %683 = vector.extract_strided_slice %679 {offsets = [1, 0], sizes = [1, 32], strides = [1, 1]} : vector<16x32xf32> to vector<1x32xf32>
    %684 = vector.extract_strided_slice %679 {offsets = [9, 0], sizes = [1, 32], strides = [1, 1]} : vector<16x32xf32> to vector<1x32xf32>
    %685 = tpu.concatenate %683, %684 in 0 : vector<1x32xf32>, vector<1x32xf32> -> vector<2x32xf32>
    %686 = vector.extract_strided_slice %679 {offsets = [2, 0], sizes = [1, 32], strides = [1, 1]} : vector<16x32xf32> to vector<1x32xf32>
    %687 = vector.extract_strided_slice %679 {offsets = [10, 0], sizes = [1, 32], strides = [1, 1]} : vector<16x32xf32> to vector<1x32xf32>
    %688 = tpu.concatenate %686, %687 in 0 : vector<1x32xf32>, vector<1x32xf32> -> vector<2x32xf32>
    %689 = vector.extract_strided_slice %679 {offsets = [3, 0], sizes = [1, 32], strides = [1, 1]} : vector<16x32xf32> to vector<1x32xf32>
    %690 = vector.extract_strided_slice %679 {offsets = [11, 0], sizes = [1, 32], strides = [1, 1]} : vector<16x32xf32> to vector<1x32xf32>
    %691 = tpu.concatenate %689, %690 in 0 : vector<1x32xf32>, vector<1x32xf32> -> vector<2x32xf32>
    %692 = vector.extract_strided_slice %679 {offsets = [4, 0], sizes = [1, 32], strides = [1, 1]} : vector<16x32xf32> to vector<1x32xf32>
    %693 = vector.extract_strided_slice %679 {offsets = [12, 0], sizes = [1, 32], strides = [1, 1]} : vector<16x32xf32> to vector<1x32xf32>
    %694 = tpu.concatenate %692, %693 in 0 : vector<1x32xf32>, vector<1x32xf32> -> vector<2x32xf32>
    %695 = vector.extract_strided_slice %679 {offsets = [5, 0], sizes = [1, 32], strides = [1, 1]} : vector<16x32xf32> to vector<1x32xf32>
    %696 = vector.extract_strided_slice %679 {offsets = [13, 0], sizes = [1, 32], strides = [1, 1]} : vector<16x32xf32> to vector<1x32xf32>
    %697 = tpu.concatenate %695, %696 in 0 : vector<1x32xf32>, vector<1x32xf32> -> vector<2x32xf32>
    %698 = vector.extract_strided_slice %679 {offsets = [6, 0], sizes = [1, 32], strides = [1, 1]} : vector<16x32xf32> to vector<1x32xf32>
    %699 = vector.extract_strided_slice %679 {offsets = [14, 0], sizes = [1, 32], strides = [1, 1]} : vector<16x32xf32> to vector<1x32xf32>
    %700 = tpu.concatenate %698, %699 in 0 : vector<1x32xf32>, vector<1x32xf32> -> vector<2x32xf32>
    %701 = vector.extract_strided_slice %679 {offsets = [7, 0], sizes = [1, 32], strides = [1, 1]} : vector<16x32xf32> to vector<1x32xf32>
    %702 = vector.extract_strided_slice %679 {offsets = [15, 0], sizes = [1, 32], strides = [1, 1]} : vector<16x32xf32> to vector<1x32xf32>
    %703 = tpu.concatenate %701, %702 in 0 : vector<1x32xf32>, vector<1x32xf32> -> vector<2x32xf32>
    %c0_250 = arith.constant 0 : index
    %c0_251 = arith.constant 0 : index
    %c0_252 = arith.constant 0 : index
    %704 = vector.load %arg11[%c0_250, %c0_251, %c0_252] : memref<4x64x128xf32, #tpu.memory_space<vmem>>, vector<1x64x128xf32>
    %705 = vector.shape_cast %704 : vector<1x64x128xf32> to vector<64x128xf32>
    %c0_253 = arith.constant 0 : index
    %c0_254 = arith.constant 0 : index
    %c0_255 = arith.constant 0 : index
    %706 = vector.load %arg12[%c0_253, %c0_254, %c0_255] : memref<4x1x128xf32, #tpu.memory_space<vmem>>, vector<1x1x128xf32>
    %707 = vector.shape_cast %706 : vector<1x1x128xf32> to vector<1x128xf32>
    %cst_256 = arith.constant 0.000000e+00 : f32
    %708 = vector.broadcast %cst_256 : f32 to vector<2x32xf32>
    %cst_257 = arith.constant 0.000000e+00 : f32
    %709 = vector.broadcast %cst_257 : f32 to vector<2x32xf32>
    %710 = tpu.concatenate %682, %708 in 1 : vector<2x32xf32>, vector<2x32xf32> -> vector<2x64xf32>
    %cst_258 = arith.constant dense<0.000000e+00> : vector<2x128xf32>
    %711 = tpu.matmul %710, %705, %cst_258 {dimension_numbers = #tpu.dot_dimension_numbers<[1], [0], [0], [1], [0, 0, 1, 1], [], []>} : vector<2x64xf32>, vector<64x128xf32>, vector<2x128xf32> -> vector<2x128xf32>
    %712 = vector.broadcast %707 : vector<1x128xf32> to vector<2x128xf32>
    %713 = arith.addf %711, %712 : vector<2x128xf32>
    %714 = arith.negf %713 : vector<2x128xf32>
    %715 = math.exp %714 : vector<2x128xf32>
    %cst_259 = arith.constant 1.000000e+00 : f32
    %716 = vector.broadcast %cst_259 : f32 to vector<2x128xf32>
    %717 = arith.addf %716, %715 : vector<2x128xf32>
    %718 = arith.divf %716, %717 : vector<2x128xf32>
    %719 = math.tanh %713 : vector<2x128xf32>
    %720 = vector.extract_strided_slice %718 {offsets = [0, 0], sizes = [2, 32], strides = [1, 1]} : vector<2x128xf32> to vector<2x32xf32>
    %721 = vector.extract_strided_slice %718 {offsets = [0, 32], sizes = [2, 32], strides = [1, 1]} : vector<2x128xf32> to vector<2x32xf32>
    %722 = vector.extract_strided_slice %719 {offsets = [0, 64], sizes = [2, 32], strides = [1, 1]} : vector<2x128xf32> to vector<2x32xf32>
    %723 = vector.extract_strided_slice %718 {offsets = [0, 96], sizes = [2, 32], strides = [1, 1]} : vector<2x128xf32> to vector<2x32xf32>
    %724 = arith.mulf %721, %709 : vector<2x32xf32>
    %725 = arith.mulf %720, %722 : vector<2x32xf32>
    %726 = arith.addf %724, %725 : vector<2x32xf32>
    %727 = math.tanh %726 : vector<2x32xf32>
    %728 = arith.mulf %723, %727 : vector<2x32xf32>
    %729 = tpu.concatenate %685, %728 in 1 : vector<2x32xf32>, vector<2x32xf32> -> vector<2x64xf32>
    %cst_260 = arith.constant dense<0.000000e+00> : vector<2x128xf32>
    %730 = tpu.matmul %729, %705, %cst_260 {dimension_numbers = #tpu.dot_dimension_numbers<[1], [0], [0], [1], [0, 0, 1, 1], [], []>} : vector<2x64xf32>, vector<64x128xf32>, vector<2x128xf32> -> vector<2x128xf32>
    %731 = vector.broadcast %707 : vector<1x128xf32> to vector<2x128xf32>
    %732 = arith.addf %730, %731 : vector<2x128xf32>
    %733 = arith.negf %732 : vector<2x128xf32>
    %734 = math.exp %733 : vector<2x128xf32>
    %cst_261 = arith.constant 1.000000e+00 : f32
    %735 = vector.broadcast %cst_261 : f32 to vector<2x128xf32>
    %736 = arith.addf %735, %734 : vector<2x128xf32>
    %737 = arith.divf %735, %736 : vector<2x128xf32>
    %738 = math.tanh %732 : vector<2x128xf32>
    %739 = vector.extract_strided_slice %737 {offsets = [0, 0], sizes = [2, 32], strides = [1, 1]} : vector<2x128xf32> to vector<2x32xf32>
    %740 = vector.extract_strided_slice %737 {offsets = [0, 32], sizes = [2, 32], strides = [1, 1]} : vector<2x128xf32> to vector<2x32xf32>
    %741 = vector.extract_strided_slice %738 {offsets = [0, 64], sizes = [2, 32], strides = [1, 1]} : vector<2x128xf32> to vector<2x32xf32>
    %742 = vector.extract_strided_slice %737 {offsets = [0, 96], sizes = [2, 32], strides = [1, 1]} : vector<2x128xf32> to vector<2x32xf32>
    %743 = arith.mulf %740, %726 : vector<2x32xf32>
    %744 = arith.mulf %739, %741 : vector<2x32xf32>
    %745 = arith.addf %743, %744 : vector<2x32xf32>
    %746 = math.tanh %745 : vector<2x32xf32>
    %747 = arith.mulf %742, %746 : vector<2x32xf32>
    %748 = tpu.concatenate %688, %747 in 1 : vector<2x32xf32>, vector<2x32xf32> -> vector<2x64xf32>
    %cst_262 = arith.constant dense<0.000000e+00> : vector<2x128xf32>
    %749 = tpu.matmul %748, %705, %cst_262 {dimension_numbers = #tpu.dot_dimension_numbers<[1], [0], [0], [1], [0, 0, 1, 1], [], []>} : vector<2x64xf32>, vector<64x128xf32>, vector<2x128xf32> -> vector<2x128xf32>
    %750 = vector.broadcast %707 : vector<1x128xf32> to vector<2x128xf32>
    %751 = arith.addf %749, %750 : vector<2x128xf32>
    %752 = arith.negf %751 : vector<2x128xf32>
    %753 = math.exp %752 : vector<2x128xf32>
    %cst_263 = arith.constant 1.000000e+00 : f32
    %754 = vector.broadcast %cst_263 : f32 to vector<2x128xf32>
    %755 = arith.addf %754, %753 : vector<2x128xf32>
    %756 = arith.divf %754, %755 : vector<2x128xf32>
    %757 = math.tanh %751 : vector<2x128xf32>
    %758 = vector.extract_strided_slice %756 {offsets = [0, 0], sizes = [2, 32], strides = [1, 1]} : vector<2x128xf32> to vector<2x32xf32>
    %759 = vector.extract_strided_slice %756 {offsets = [0, 32], sizes = [2, 32], strides = [1, 1]} : vector<2x128xf32> to vector<2x32xf32>
    %760 = vector.extract_strided_slice %757 {offsets = [0, 64], sizes = [2, 32], strides = [1, 1]} : vector<2x128xf32> to vector<2x32xf32>
    %761 = vector.extract_strided_slice %756 {offsets = [0, 96], sizes = [2, 32], strides = [1, 1]} : vector<2x128xf32> to vector<2x32xf32>
    %762 = arith.mulf %759, %745 : vector<2x32xf32>
    %763 = arith.mulf %758, %760 : vector<2x32xf32>
    %764 = arith.addf %762, %763 : vector<2x32xf32>
    %765 = math.tanh %764 : vector<2x32xf32>
    %766 = arith.mulf %761, %765 : vector<2x32xf32>
    %767 = tpu.concatenate %691, %766 in 1 : vector<2x32xf32>, vector<2x32xf32> -> vector<2x64xf32>
    %cst_264 = arith.constant dense<0.000000e+00> : vector<2x128xf32>
    %768 = tpu.matmul %767, %705, %cst_264 {dimension_numbers = #tpu.dot_dimension_numbers<[1], [0], [0], [1], [0, 0, 1, 1], [], []>} : vector<2x64xf32>, vector<64x128xf32>, vector<2x128xf32> -> vector<2x128xf32>
    %769 = vector.broadcast %707 : vector<1x128xf32> to vector<2x128xf32>
    %770 = arith.addf %768, %769 : vector<2x128xf32>
    %771 = arith.negf %770 : vector<2x128xf32>
    %772 = math.exp %771 : vector<2x128xf32>
    %cst_265 = arith.constant 1.000000e+00 : f32
    %773 = vector.broadcast %cst_265 : f32 to vector<2x128xf32>
    %774 = arith.addf %773, %772 : vector<2x128xf32>
    %775 = arith.divf %773, %774 : vector<2x128xf32>
    %776 = math.tanh %770 : vector<2x128xf32>
    %777 = vector.extract_strided_slice %775 {offsets = [0, 0], sizes = [2, 32], strides = [1, 1]} : vector<2x128xf32> to vector<2x32xf32>
    %778 = vector.extract_strided_slice %775 {offsets = [0, 32], sizes = [2, 32], strides = [1, 1]} : vector<2x128xf32> to vector<2x32xf32>
    %779 = vector.extract_strided_slice %776 {offsets = [0, 64], sizes = [2, 32], strides = [1, 1]} : vector<2x128xf32> to vector<2x32xf32>
    %780 = vector.extract_strided_slice %775 {offsets = [0, 96], sizes = [2, 32], strides = [1, 1]} : vector<2x128xf32> to vector<2x32xf32>
    %781 = arith.mulf %778, %764 : vector<2x32xf32>
    %782 = arith.mulf %777, %779 : vector<2x32xf32>
    %783 = arith.addf %781, %782 : vector<2x32xf32>
    %784 = math.tanh %783 : vector<2x32xf32>
    %785 = arith.mulf %780, %784 : vector<2x32xf32>
    %786 = tpu.concatenate %694, %785 in 1 : vector<2x32xf32>, vector<2x32xf32> -> vector<2x64xf32>
    %cst_266 = arith.constant dense<0.000000e+00> : vector<2x128xf32>
    %787 = tpu.matmul %786, %705, %cst_266 {dimension_numbers = #tpu.dot_dimension_numbers<[1], [0], [0], [1], [0, 0, 1, 1], [], []>} : vector<2x64xf32>, vector<64x128xf32>, vector<2x128xf32> -> vector<2x128xf32>
    %788 = vector.broadcast %707 : vector<1x128xf32> to vector<2x128xf32>
    %789 = arith.addf %787, %788 : vector<2x128xf32>
    %790 = arith.negf %789 : vector<2x128xf32>
    %791 = math.exp %790 : vector<2x128xf32>
    %cst_267 = arith.constant 1.000000e+00 : f32
    %792 = vector.broadcast %cst_267 : f32 to vector<2x128xf32>
    %793 = arith.addf %792, %791 : vector<2x128xf32>
    %794 = arith.divf %792, %793 : vector<2x128xf32>
    %795 = math.tanh %789 : vector<2x128xf32>
    %796 = vector.extract_strided_slice %794 {offsets = [0, 0], sizes = [2, 32], strides = [1, 1]} : vector<2x128xf32> to vector<2x32xf32>
    %797 = vector.extract_strided_slice %794 {offsets = [0, 32], sizes = [2, 32], strides = [1, 1]} : vector<2x128xf32> to vector<2x32xf32>
    %798 = vector.extract_strided_slice %795 {offsets = [0, 64], sizes = [2, 32], strides = [1, 1]} : vector<2x128xf32> to vector<2x32xf32>
    %799 = vector.extract_strided_slice %794 {offsets = [0, 96], sizes = [2, 32], strides = [1, 1]} : vector<2x128xf32> to vector<2x32xf32>
    %800 = arith.mulf %797, %783 : vector<2x32xf32>
    %801 = arith.mulf %796, %798 : vector<2x32xf32>
    %802 = arith.addf %800, %801 : vector<2x32xf32>
    %803 = math.tanh %802 : vector<2x32xf32>
    %804 = arith.mulf %799, %803 : vector<2x32xf32>
    %805 = tpu.concatenate %697, %804 in 1 : vector<2x32xf32>, vector<2x32xf32> -> vector<2x64xf32>
    %cst_268 = arith.constant dense<0.000000e+00> : vector<2x128xf32>
    %806 = tpu.matmul %805, %705, %cst_268 {dimension_numbers = #tpu.dot_dimension_numbers<[1], [0], [0], [1], [0, 0, 1, 1], [], []>} : vector<2x64xf32>, vector<64x128xf32>, vector<2x128xf32> -> vector<2x128xf32>
    %807 = vector.broadcast %707 : vector<1x128xf32> to vector<2x128xf32>
    %808 = arith.addf %806, %807 : vector<2x128xf32>
    %809 = arith.negf %808 : vector<2x128xf32>
    %810 = math.exp %809 : vector<2x128xf32>
    %cst_269 = arith.constant 1.000000e+00 : f32
    %811 = vector.broadcast %cst_269 : f32 to vector<2x128xf32>
    %812 = arith.addf %811, %810 : vector<2x128xf32>
    %813 = arith.divf %811, %812 : vector<2x128xf32>
    %814 = math.tanh %808 : vector<2x128xf32>
    %815 = vector.extract_strided_slice %813 {offsets = [0, 0], sizes = [2, 32], strides = [1, 1]} : vector<2x128xf32> to vector<2x32xf32>
    %816 = vector.extract_strided_slice %813 {offsets = [0, 32], sizes = [2, 32], strides = [1, 1]} : vector<2x128xf32> to vector<2x32xf32>
    %817 = vector.extract_strided_slice %814 {offsets = [0, 64], sizes = [2, 32], strides = [1, 1]} : vector<2x128xf32> to vector<2x32xf32>
    %818 = vector.extract_strided_slice %813 {offsets = [0, 96], sizes = [2, 32], strides = [1, 1]} : vector<2x128xf32> to vector<2x32xf32>
    %819 = arith.mulf %816, %802 : vector<2x32xf32>
    %820 = arith.mulf %815, %817 : vector<2x32xf32>
    %821 = arith.addf %819, %820 : vector<2x32xf32>
    %822 = math.tanh %821 : vector<2x32xf32>
    %823 = arith.mulf %818, %822 : vector<2x32xf32>
    %824 = tpu.concatenate %700, %823 in 1 : vector<2x32xf32>, vector<2x32xf32> -> vector<2x64xf32>
    %cst_270 = arith.constant dense<0.000000e+00> : vector<2x128xf32>
    %825 = tpu.matmul %824, %705, %cst_270 {dimension_numbers = #tpu.dot_dimension_numbers<[1], [0], [0], [1], [0, 0, 1, 1], [], []>} : vector<2x64xf32>, vector<64x128xf32>, vector<2x128xf32> -> vector<2x128xf32>
    %826 = vector.broadcast %707 : vector<1x128xf32> to vector<2x128xf32>
    %827 = arith.addf %825, %826 : vector<2x128xf32>
    %828 = arith.negf %827 : vector<2x128xf32>
    %829 = math.exp %828 : vector<2x128xf32>
    %cst_271 = arith.constant 1.000000e+00 : f32
    %830 = vector.broadcast %cst_271 : f32 to vector<2x128xf32>
    %831 = arith.addf %830, %829 : vector<2x128xf32>
    %832 = arith.divf %830, %831 : vector<2x128xf32>
    %833 = math.tanh %827 : vector<2x128xf32>
    %834 = vector.extract_strided_slice %832 {offsets = [0, 0], sizes = [2, 32], strides = [1, 1]} : vector<2x128xf32> to vector<2x32xf32>
    %835 = vector.extract_strided_slice %832 {offsets = [0, 32], sizes = [2, 32], strides = [1, 1]} : vector<2x128xf32> to vector<2x32xf32>
    %836 = vector.extract_strided_slice %833 {offsets = [0, 64], sizes = [2, 32], strides = [1, 1]} : vector<2x128xf32> to vector<2x32xf32>
    %837 = vector.extract_strided_slice %832 {offsets = [0, 96], sizes = [2, 32], strides = [1, 1]} : vector<2x128xf32> to vector<2x32xf32>
    %838 = arith.mulf %835, %821 : vector<2x32xf32>
    %839 = arith.mulf %834, %836 : vector<2x32xf32>
    %840 = arith.addf %838, %839 : vector<2x32xf32>
    %841 = math.tanh %840 : vector<2x32xf32>
    %842 = arith.mulf %837, %841 : vector<2x32xf32>
    %843 = tpu.concatenate %703, %842 in 1 : vector<2x32xf32>, vector<2x32xf32> -> vector<2x64xf32>
    %cst_272 = arith.constant dense<0.000000e+00> : vector<2x128xf32>
    %844 = tpu.matmul %843, %705, %cst_272 {dimension_numbers = #tpu.dot_dimension_numbers<[1], [0], [0], [1], [0, 0, 1, 1], [], []>} : vector<2x64xf32>, vector<64x128xf32>, vector<2x128xf32> -> vector<2x128xf32>
    %845 = vector.broadcast %707 : vector<1x128xf32> to vector<2x128xf32>
    %846 = arith.addf %844, %845 : vector<2x128xf32>
    %847 = arith.negf %846 : vector<2x128xf32>
    %848 = math.exp %847 : vector<2x128xf32>
    %cst_273 = arith.constant 1.000000e+00 : f32
    %849 = vector.broadcast %cst_273 : f32 to vector<2x128xf32>
    %850 = arith.addf %849, %848 : vector<2x128xf32>
    %851 = arith.divf %849, %850 : vector<2x128xf32>
    %852 = math.tanh %846 : vector<2x128xf32>
    %853 = vector.extract_strided_slice %851 {offsets = [0, 0], sizes = [2, 32], strides = [1, 1]} : vector<2x128xf32> to vector<2x32xf32>
    %854 = vector.extract_strided_slice %851 {offsets = [0, 32], sizes = [2, 32], strides = [1, 1]} : vector<2x128xf32> to vector<2x32xf32>
    %855 = vector.extract_strided_slice %852 {offsets = [0, 64], sizes = [2, 32], strides = [1, 1]} : vector<2x128xf32> to vector<2x32xf32>
    %856 = vector.extract_strided_slice %851 {offsets = [0, 96], sizes = [2, 32], strides = [1, 1]} : vector<2x128xf32> to vector<2x32xf32>
    %857 = arith.mulf %854, %840 : vector<2x32xf32>
    %858 = arith.mulf %853, %855 : vector<2x32xf32>
    %859 = arith.addf %857, %858 : vector<2x32xf32>
    %860 = math.tanh %859 : vector<2x32xf32>
    %861 = arith.mulf %856, %860 : vector<2x32xf32>
    %c1_274 = arith.constant 1 : index
    %c0_275 = arith.constant 0 : index
    %c0_276 = arith.constant 0 : index
    %862 = vector.load %arg11[%c1_274, %c0_275, %c0_276] : memref<4x64x128xf32, #tpu.memory_space<vmem>>, vector<1x64x128xf32>
    %863 = vector.shape_cast %862 : vector<1x64x128xf32> to vector<64x128xf32>
    %c1_277 = arith.constant 1 : index
    %c0_278 = arith.constant 0 : index
    %c0_279 = arith.constant 0 : index
    %864 = vector.load %arg12[%c1_277, %c0_278, %c0_279] : memref<4x1x128xf32, #tpu.memory_space<vmem>>, vector<1x1x128xf32>
    %865 = vector.shape_cast %864 : vector<1x1x128xf32> to vector<1x128xf32>
    %cst_280 = arith.constant 0.000000e+00 : f32
    %866 = vector.broadcast %cst_280 : f32 to vector<2x32xf32>
    %cst_281 = arith.constant 0.000000e+00 : f32
    %867 = vector.broadcast %cst_281 : f32 to vector<2x32xf32>
    %868 = tpu.concatenate %728, %866 in 1 : vector<2x32xf32>, vector<2x32xf32> -> vector<2x64xf32>
    %cst_282 = arith.constant dense<0.000000e+00> : vector<2x128xf32>
    %869 = tpu.matmul %868, %863, %cst_282 {dimension_numbers = #tpu.dot_dimension_numbers<[1], [0], [0], [1], [0, 0, 1, 1], [], []>} : vector<2x64xf32>, vector<64x128xf32>, vector<2x128xf32> -> vector<2x128xf32>
    %870 = vector.broadcast %865 : vector<1x128xf32> to vector<2x128xf32>
    %871 = arith.addf %869, %870 : vector<2x128xf32>
    %872 = arith.negf %871 : vector<2x128xf32>
    %873 = math.exp %872 : vector<2x128xf32>
    %cst_283 = arith.constant 1.000000e+00 : f32
    %874 = vector.broadcast %cst_283 : f32 to vector<2x128xf32>
    %875 = arith.addf %874, %873 : vector<2x128xf32>
    %876 = arith.divf %874, %875 : vector<2x128xf32>
    %877 = math.tanh %871 : vector<2x128xf32>
    %878 = vector.extract_strided_slice %876 {offsets = [0, 0], sizes = [2, 32], strides = [1, 1]} : vector<2x128xf32> to vector<2x32xf32>
    %879 = vector.extract_strided_slice %876 {offsets = [0, 32], sizes = [2, 32], strides = [1, 1]} : vector<2x128xf32> to vector<2x32xf32>
    %880 = vector.extract_strided_slice %877 {offsets = [0, 64], sizes = [2, 32], strides = [1, 1]} : vector<2x128xf32> to vector<2x32xf32>
    %881 = vector.extract_strided_slice %876 {offsets = [0, 96], sizes = [2, 32], strides = [1, 1]} : vector<2x128xf32> to vector<2x32xf32>
    %882 = arith.mulf %879, %867 : vector<2x32xf32>
    %883 = arith.mulf %878, %880 : vector<2x32xf32>
    %884 = arith.addf %882, %883 : vector<2x32xf32>
    %885 = math.tanh %884 : vector<2x32xf32>
    %886 = arith.mulf %881, %885 : vector<2x32xf32>
    %887 = tpu.concatenate %747, %886 in 1 : vector<2x32xf32>, vector<2x32xf32> -> vector<2x64xf32>
    %cst_284 = arith.constant dense<0.000000e+00> : vector<2x128xf32>
    %888 = tpu.matmul %887, %863, %cst_284 {dimension_numbers = #tpu.dot_dimension_numbers<[1], [0], [0], [1], [0, 0, 1, 1], [], []>} : vector<2x64xf32>, vector<64x128xf32>, vector<2x128xf32> -> vector<2x128xf32>
    %889 = vector.broadcast %865 : vector<1x128xf32> to vector<2x128xf32>
    %890 = arith.addf %888, %889 : vector<2x128xf32>
    %891 = arith.negf %890 : vector<2x128xf32>
    %892 = math.exp %891 : vector<2x128xf32>
    %cst_285 = arith.constant 1.000000e+00 : f32
    %893 = vector.broadcast %cst_285 : f32 to vector<2x128xf32>
    %894 = arith.addf %893, %892 : vector<2x128xf32>
    %895 = arith.divf %893, %894 : vector<2x128xf32>
    %896 = math.tanh %890 : vector<2x128xf32>
    %897 = vector.extract_strided_slice %895 {offsets = [0, 0], sizes = [2, 32], strides = [1, 1]} : vector<2x128xf32> to vector<2x32xf32>
    %898 = vector.extract_strided_slice %895 {offsets = [0, 32], sizes = [2, 32], strides = [1, 1]} : vector<2x128xf32> to vector<2x32xf32>
    %899 = vector.extract_strided_slice %896 {offsets = [0, 64], sizes = [2, 32], strides = [1, 1]} : vector<2x128xf32> to vector<2x32xf32>
    %900 = vector.extract_strided_slice %895 {offsets = [0, 96], sizes = [2, 32], strides = [1, 1]} : vector<2x128xf32> to vector<2x32xf32>
    %901 = arith.mulf %898, %884 : vector<2x32xf32>
    %902 = arith.mulf %897, %899 : vector<2x32xf32>
    %903 = arith.addf %901, %902 : vector<2x32xf32>
    %904 = math.tanh %903 : vector<2x32xf32>
    %905 = arith.mulf %900, %904 : vector<2x32xf32>
    %906 = tpu.concatenate %766, %905 in 1 : vector<2x32xf32>, vector<2x32xf32> -> vector<2x64xf32>
    %cst_286 = arith.constant dense<0.000000e+00> : vector<2x128xf32>
    %907 = tpu.matmul %906, %863, %cst_286 {dimension_numbers = #tpu.dot_dimension_numbers<[1], [0], [0], [1], [0, 0, 1, 1], [], []>} : vector<2x64xf32>, vector<64x128xf32>, vector<2x128xf32> -> vector<2x128xf32>
    %908 = vector.broadcast %865 : vector<1x128xf32> to vector<2x128xf32>
    %909 = arith.addf %907, %908 : vector<2x128xf32>
    %910 = arith.negf %909 : vector<2x128xf32>
    %911 = math.exp %910 : vector<2x128xf32>
    %cst_287 = arith.constant 1.000000e+00 : f32
    %912 = vector.broadcast %cst_287 : f32 to vector<2x128xf32>
    %913 = arith.addf %912, %911 : vector<2x128xf32>
    %914 = arith.divf %912, %913 : vector<2x128xf32>
    %915 = math.tanh %909 : vector<2x128xf32>
    %916 = vector.extract_strided_slice %914 {offsets = [0, 0], sizes = [2, 32], strides = [1, 1]} : vector<2x128xf32> to vector<2x32xf32>
    %917 = vector.extract_strided_slice %914 {offsets = [0, 32], sizes = [2, 32], strides = [1, 1]} : vector<2x128xf32> to vector<2x32xf32>
    %918 = vector.extract_strided_slice %915 {offsets = [0, 64], sizes = [2, 32], strides = [1, 1]} : vector<2x128xf32> to vector<2x32xf32>
    %919 = vector.extract_strided_slice %914 {offsets = [0, 96], sizes = [2, 32], strides = [1, 1]} : vector<2x128xf32> to vector<2x32xf32>
    %920 = arith.mulf %917, %903 : vector<2x32xf32>
    %921 = arith.mulf %916, %918 : vector<2x32xf32>
    %922 = arith.addf %920, %921 : vector<2x32xf32>
    %923 = math.tanh %922 : vector<2x32xf32>
    %924 = arith.mulf %919, %923 : vector<2x32xf32>
    %925 = tpu.concatenate %785, %924 in 1 : vector<2x32xf32>, vector<2x32xf32> -> vector<2x64xf32>
    %cst_288 = arith.constant dense<0.000000e+00> : vector<2x128xf32>
    %926 = tpu.matmul %925, %863, %cst_288 {dimension_numbers = #tpu.dot_dimension_numbers<[1], [0], [0], [1], [0, 0, 1, 1], [], []>} : vector<2x64xf32>, vector<64x128xf32>, vector<2x128xf32> -> vector<2x128xf32>
    %927 = vector.broadcast %865 : vector<1x128xf32> to vector<2x128xf32>
    %928 = arith.addf %926, %927 : vector<2x128xf32>
    %929 = arith.negf %928 : vector<2x128xf32>
    %930 = math.exp %929 : vector<2x128xf32>
    %cst_289 = arith.constant 1.000000e+00 : f32
    %931 = vector.broadcast %cst_289 : f32 to vector<2x128xf32>
    %932 = arith.addf %931, %930 : vector<2x128xf32>
    %933 = arith.divf %931, %932 : vector<2x128xf32>
    %934 = math.tanh %928 : vector<2x128xf32>
    %935 = vector.extract_strided_slice %933 {offsets = [0, 0], sizes = [2, 32], strides = [1, 1]} : vector<2x128xf32> to vector<2x32xf32>
    %936 = vector.extract_strided_slice %933 {offsets = [0, 32], sizes = [2, 32], strides = [1, 1]} : vector<2x128xf32> to vector<2x32xf32>
    %937 = vector.extract_strided_slice %934 {offsets = [0, 64], sizes = [2, 32], strides = [1, 1]} : vector<2x128xf32> to vector<2x32xf32>
    %938 = vector.extract_strided_slice %933 {offsets = [0, 96], sizes = [2, 32], strides = [1, 1]} : vector<2x128xf32> to vector<2x32xf32>
    %939 = arith.mulf %936, %922 : vector<2x32xf32>
    %940 = arith.mulf %935, %937 : vector<2x32xf32>
    %941 = arith.addf %939, %940 : vector<2x32xf32>
    %942 = math.tanh %941 : vector<2x32xf32>
    %943 = arith.mulf %938, %942 : vector<2x32xf32>
    %944 = tpu.concatenate %804, %943 in 1 : vector<2x32xf32>, vector<2x32xf32> -> vector<2x64xf32>
    %cst_290 = arith.constant dense<0.000000e+00> : vector<2x128xf32>
    %945 = tpu.matmul %944, %863, %cst_290 {dimension_numbers = #tpu.dot_dimension_numbers<[1], [0], [0], [1], [0, 0, 1, 1], [], []>} : vector<2x64xf32>, vector<64x128xf32>, vector<2x128xf32> -> vector<2x128xf32>
    %946 = vector.broadcast %865 : vector<1x128xf32> to vector<2x128xf32>
    %947 = arith.addf %945, %946 : vector<2x128xf32>
    %948 = arith.negf %947 : vector<2x128xf32>
    %949 = math.exp %948 : vector<2x128xf32>
    %cst_291 = arith.constant 1.000000e+00 : f32
    %950 = vector.broadcast %cst_291 : f32 to vector<2x128xf32>
    %951 = arith.addf %950, %949 : vector<2x128xf32>
    %952 = arith.divf %950, %951 : vector<2x128xf32>
    %953 = math.tanh %947 : vector<2x128xf32>
    %954 = vector.extract_strided_slice %952 {offsets = [0, 0], sizes = [2, 32], strides = [1, 1]} : vector<2x128xf32> to vector<2x32xf32>
    %955 = vector.extract_strided_slice %952 {offsets = [0, 32], sizes = [2, 32], strides = [1, 1]} : vector<2x128xf32> to vector<2x32xf32>
    %956 = vector.extract_strided_slice %953 {offsets = [0, 64], sizes = [2, 32], strides = [1, 1]} : vector<2x128xf32> to vector<2x32xf32>
    %957 = vector.extract_strided_slice %952 {offsets = [0, 96], sizes = [2, 32], strides = [1, 1]} : vector<2x128xf32> to vector<2x32xf32>
    %958 = arith.mulf %955, %941 : vector<2x32xf32>
    %959 = arith.mulf %954, %956 : vector<2x32xf32>
    %960 = arith.addf %958, %959 : vector<2x32xf32>
    %961 = math.tanh %960 : vector<2x32xf32>
    %962 = arith.mulf %957, %961 : vector<2x32xf32>
    %963 = tpu.concatenate %823, %962 in 1 : vector<2x32xf32>, vector<2x32xf32> -> vector<2x64xf32>
    %cst_292 = arith.constant dense<0.000000e+00> : vector<2x128xf32>
    %964 = tpu.matmul %963, %863, %cst_292 {dimension_numbers = #tpu.dot_dimension_numbers<[1], [0], [0], [1], [0, 0, 1, 1], [], []>} : vector<2x64xf32>, vector<64x128xf32>, vector<2x128xf32> -> vector<2x128xf32>
    %965 = vector.broadcast %865 : vector<1x128xf32> to vector<2x128xf32>
    %966 = arith.addf %964, %965 : vector<2x128xf32>
    %967 = arith.negf %966 : vector<2x128xf32>
    %968 = math.exp %967 : vector<2x128xf32>
    %cst_293 = arith.constant 1.000000e+00 : f32
    %969 = vector.broadcast %cst_293 : f32 to vector<2x128xf32>
    %970 = arith.addf %969, %968 : vector<2x128xf32>
    %971 = arith.divf %969, %970 : vector<2x128xf32>
    %972 = math.tanh %966 : vector<2x128xf32>
    %973 = vector.extract_strided_slice %971 {offsets = [0, 0], sizes = [2, 32], strides = [1, 1]} : vector<2x128xf32> to vector<2x32xf32>
    %974 = vector.extract_strided_slice %971 {offsets = [0, 32], sizes = [2, 32], strides = [1, 1]} : vector<2x128xf32> to vector<2x32xf32>
    %975 = vector.extract_strided_slice %972 {offsets = [0, 64], sizes = [2, 32], strides = [1, 1]} : vector<2x128xf32> to vector<2x32xf32>
    %976 = vector.extract_strided_slice %971 {offsets = [0, 96], sizes = [2, 32], strides = [1, 1]} : vector<2x128xf32> to vector<2x32xf32>
    %977 = arith.mulf %974, %960 : vector<2x32xf32>
    %978 = arith.mulf %973, %975 : vector<2x32xf32>
    %979 = arith.addf %977, %978 : vector<2x32xf32>
    %980 = math.tanh %979 : vector<2x32xf32>
    %981 = arith.mulf %976, %980 : vector<2x32xf32>
    %982 = tpu.concatenate %842, %981 in 1 : vector<2x32xf32>, vector<2x32xf32> -> vector<2x64xf32>
    %cst_294 = arith.constant dense<0.000000e+00> : vector<2x128xf32>
    %983 = tpu.matmul %982, %863, %cst_294 {dimension_numbers = #tpu.dot_dimension_numbers<[1], [0], [0], [1], [0, 0, 1, 1], [], []>} : vector<2x64xf32>, vector<64x128xf32>, vector<2x128xf32> -> vector<2x128xf32>
    %984 = vector.broadcast %865 : vector<1x128xf32> to vector<2x128xf32>
    %985 = arith.addf %983, %984 : vector<2x128xf32>
    %986 = arith.negf %985 : vector<2x128xf32>
    %987 = math.exp %986 : vector<2x128xf32>
    %cst_295 = arith.constant 1.000000e+00 : f32
    %988 = vector.broadcast %cst_295 : f32 to vector<2x128xf32>
    %989 = arith.addf %988, %987 : vector<2x128xf32>
    %990 = arith.divf %988, %989 : vector<2x128xf32>
    %991 = math.tanh %985 : vector<2x128xf32>
    %992 = vector.extract_strided_slice %990 {offsets = [0, 0], sizes = [2, 32], strides = [1, 1]} : vector<2x128xf32> to vector<2x32xf32>
    %993 = vector.extract_strided_slice %990 {offsets = [0, 32], sizes = [2, 32], strides = [1, 1]} : vector<2x128xf32> to vector<2x32xf32>
    %994 = vector.extract_strided_slice %991 {offsets = [0, 64], sizes = [2, 32], strides = [1, 1]} : vector<2x128xf32> to vector<2x32xf32>
    %995 = vector.extract_strided_slice %990 {offsets = [0, 96], sizes = [2, 32], strides = [1, 1]} : vector<2x128xf32> to vector<2x32xf32>
    %996 = arith.mulf %993, %979 : vector<2x32xf32>
    %997 = arith.mulf %992, %994 : vector<2x32xf32>
    %998 = arith.addf %996, %997 : vector<2x32xf32>
    %999 = math.tanh %998 : vector<2x32xf32>
    %1000 = arith.mulf %995, %999 : vector<2x32xf32>
    %1001 = tpu.concatenate %861, %1000 in 1 : vector<2x32xf32>, vector<2x32xf32> -> vector<2x64xf32>
    %cst_296 = arith.constant dense<0.000000e+00> : vector<2x128xf32>
    %1002 = tpu.matmul %1001, %863, %cst_296 {dimension_numbers = #tpu.dot_dimension_numbers<[1], [0], [0], [1], [0, 0, 1, 1], [], []>} : vector<2x64xf32>, vector<64x128xf32>, vector<2x128xf32> -> vector<2x128xf32>
    %1003 = vector.broadcast %865 : vector<1x128xf32> to vector<2x128xf32>
    %1004 = arith.addf %1002, %1003 : vector<2x128xf32>
    %1005 = arith.negf %1004 : vector<2x128xf32>
    %1006 = math.exp %1005 : vector<2x128xf32>
    %cst_297 = arith.constant 1.000000e+00 : f32
    %1007 = vector.broadcast %cst_297 : f32 to vector<2x128xf32>
    %1008 = arith.addf %1007, %1006 : vector<2x128xf32>
    %1009 = arith.divf %1007, %1008 : vector<2x128xf32>
    %1010 = math.tanh %1004 : vector<2x128xf32>
    %1011 = vector.extract_strided_slice %1009 {offsets = [0, 0], sizes = [2, 32], strides = [1, 1]} : vector<2x128xf32> to vector<2x32xf32>
    %1012 = vector.extract_strided_slice %1009 {offsets = [0, 32], sizes = [2, 32], strides = [1, 1]} : vector<2x128xf32> to vector<2x32xf32>
    %1013 = vector.extract_strided_slice %1010 {offsets = [0, 64], sizes = [2, 32], strides = [1, 1]} : vector<2x128xf32> to vector<2x32xf32>
    %1014 = vector.extract_strided_slice %1009 {offsets = [0, 96], sizes = [2, 32], strides = [1, 1]} : vector<2x128xf32> to vector<2x32xf32>
    %1015 = arith.mulf %1012, %998 : vector<2x32xf32>
    %1016 = arith.mulf %1011, %1013 : vector<2x32xf32>
    %1017 = arith.addf %1015, %1016 : vector<2x32xf32>
    %1018 = math.tanh %1017 : vector<2x32xf32>
    %1019 = arith.mulf %1014, %1018 : vector<2x32xf32>
    %c2_298 = arith.constant 2 : index
    %c0_299 = arith.constant 0 : index
    %c0_300 = arith.constant 0 : index
    %1020 = vector.load %arg11[%c2_298, %c0_299, %c0_300] : memref<4x64x128xf32, #tpu.memory_space<vmem>>, vector<1x64x128xf32>
    %1021 = vector.shape_cast %1020 : vector<1x64x128xf32> to vector<64x128xf32>
    %c2_301 = arith.constant 2 : index
    %c0_302 = arith.constant 0 : index
    %c0_303 = arith.constant 0 : index
    %1022 = vector.load %arg12[%c2_301, %c0_302, %c0_303] : memref<4x1x128xf32, #tpu.memory_space<vmem>>, vector<1x1x128xf32>
    %1023 = vector.shape_cast %1022 : vector<1x1x128xf32> to vector<1x128xf32>
    %cst_304 = arith.constant 0.000000e+00 : f32
    %1024 = vector.broadcast %cst_304 : f32 to vector<2x32xf32>
    %cst_305 = arith.constant 0.000000e+00 : f32
    %1025 = vector.broadcast %cst_305 : f32 to vector<2x32xf32>
    %1026 = tpu.concatenate %886, %1024 in 1 : vector<2x32xf32>, vector<2x32xf32> -> vector<2x64xf32>
    %cst_306 = arith.constant dense<0.000000e+00> : vector<2x128xf32>
    %1027 = tpu.matmul %1026, %1021, %cst_306 {dimension_numbers = #tpu.dot_dimension_numbers<[1], [0], [0], [1], [0, 0, 1, 1], [], []>} : vector<2x64xf32>, vector<64x128xf32>, vector<2x128xf32> -> vector<2x128xf32>
    %1028 = vector.broadcast %1023 : vector<1x128xf32> to vector<2x128xf32>
    %1029 = arith.addf %1027, %1028 : vector<2x128xf32>
    %1030 = arith.negf %1029 : vector<2x128xf32>
    %1031 = math.exp %1030 : vector<2x128xf32>
    %cst_307 = arith.constant 1.000000e+00 : f32
    %1032 = vector.broadcast %cst_307 : f32 to vector<2x128xf32>
    %1033 = arith.addf %1032, %1031 : vector<2x128xf32>
    %1034 = arith.divf %1032, %1033 : vector<2x128xf32>
    %1035 = math.tanh %1029 : vector<2x128xf32>
    %1036 = vector.extract_strided_slice %1034 {offsets = [0, 0], sizes = [2, 32], strides = [1, 1]} : vector<2x128xf32> to vector<2x32xf32>
    %1037 = vector.extract_strided_slice %1034 {offsets = [0, 32], sizes = [2, 32], strides = [1, 1]} : vector<2x128xf32> to vector<2x32xf32>
    %1038 = vector.extract_strided_slice %1035 {offsets = [0, 64], sizes = [2, 32], strides = [1, 1]} : vector<2x128xf32> to vector<2x32xf32>
    %1039 = vector.extract_strided_slice %1034 {offsets = [0, 96], sizes = [2, 32], strides = [1, 1]} : vector<2x128xf32> to vector<2x32xf32>
    %1040 = arith.mulf %1037, %1025 : vector<2x32xf32>
    %1041 = arith.mulf %1036, %1038 : vector<2x32xf32>
    %1042 = arith.addf %1040, %1041 : vector<2x32xf32>
    %1043 = math.tanh %1042 : vector<2x32xf32>
    %1044 = arith.mulf %1039, %1043 : vector<2x32xf32>
    %1045 = tpu.concatenate %905, %1044 in 1 : vector<2x32xf32>, vector<2x32xf32> -> vector<2x64xf32>
    %cst_308 = arith.constant dense<0.000000e+00> : vector<2x128xf32>
    %1046 = tpu.matmul %1045, %1021, %cst_308 {dimension_numbers = #tpu.dot_dimension_numbers<[1], [0], [0], [1], [0, 0, 1, 1], [], []>} : vector<2x64xf32>, vector<64x128xf32>, vector<2x128xf32> -> vector<2x128xf32>
    %1047 = vector.broadcast %1023 : vector<1x128xf32> to vector<2x128xf32>
    %1048 = arith.addf %1046, %1047 : vector<2x128xf32>
    %1049 = arith.negf %1048 : vector<2x128xf32>
    %1050 = math.exp %1049 : vector<2x128xf32>
    %cst_309 = arith.constant 1.000000e+00 : f32
    %1051 = vector.broadcast %cst_309 : f32 to vector<2x128xf32>
    %1052 = arith.addf %1051, %1050 : vector<2x128xf32>
    %1053 = arith.divf %1051, %1052 : vector<2x128xf32>
    %1054 = math.tanh %1048 : vector<2x128xf32>
    %1055 = vector.extract_strided_slice %1053 {offsets = [0, 0], sizes = [2, 32], strides = [1, 1]} : vector<2x128xf32> to vector<2x32xf32>
    %1056 = vector.extract_strided_slice %1053 {offsets = [0, 32], sizes = [2, 32], strides = [1, 1]} : vector<2x128xf32> to vector<2x32xf32>
    %1057 = vector.extract_strided_slice %1054 {offsets = [0, 64], sizes = [2, 32], strides = [1, 1]} : vector<2x128xf32> to vector<2x32xf32>
    %1058 = vector.extract_strided_slice %1053 {offsets = [0, 96], sizes = [2, 32], strides = [1, 1]} : vector<2x128xf32> to vector<2x32xf32>
    %1059 = arith.mulf %1056, %1042 : vector<2x32xf32>
    %1060 = arith.mulf %1055, %1057 : vector<2x32xf32>
    %1061 = arith.addf %1059, %1060 : vector<2x32xf32>
    %1062 = math.tanh %1061 : vector<2x32xf32>
    %1063 = arith.mulf %1058, %1062 : vector<2x32xf32>
    %1064 = tpu.concatenate %924, %1063 in 1 : vector<2x32xf32>, vector<2x32xf32> -> vector<2x64xf32>
    %cst_310 = arith.constant dense<0.000000e+00> : vector<2x128xf32>
    %1065 = tpu.matmul %1064, %1021, %cst_310 {dimension_numbers = #tpu.dot_dimension_numbers<[1], [0], [0], [1], [0, 0, 1, 1], [], []>} : vector<2x64xf32>, vector<64x128xf32>, vector<2x128xf32> -> vector<2x128xf32>
    %1066 = vector.broadcast %1023 : vector<1x128xf32> to vector<2x128xf32>
    %1067 = arith.addf %1065, %1066 : vector<2x128xf32>
    %1068 = arith.negf %1067 : vector<2x128xf32>
    %1069 = math.exp %1068 : vector<2x128xf32>
    %cst_311 = arith.constant 1.000000e+00 : f32
    %1070 = vector.broadcast %cst_311 : f32 to vector<2x128xf32>
    %1071 = arith.addf %1070, %1069 : vector<2x128xf32>
    %1072 = arith.divf %1070, %1071 : vector<2x128xf32>
    %1073 = math.tanh %1067 : vector<2x128xf32>
    %1074 = vector.extract_strided_slice %1072 {offsets = [0, 0], sizes = [2, 32], strides = [1, 1]} : vector<2x128xf32> to vector<2x32xf32>
    %1075 = vector.extract_strided_slice %1072 {offsets = [0, 32], sizes = [2, 32], strides = [1, 1]} : vector<2x128xf32> to vector<2x32xf32>
    %1076 = vector.extract_strided_slice %1073 {offsets = [0, 64], sizes = [2, 32], strides = [1, 1]} : vector<2x128xf32> to vector<2x32xf32>
    %1077 = vector.extract_strided_slice %1072 {offsets = [0, 96], sizes = [2, 32], strides = [1, 1]} : vector<2x128xf32> to vector<2x32xf32>
    %1078 = arith.mulf %1075, %1061 : vector<2x32xf32>
    %1079 = arith.mulf %1074, %1076 : vector<2x32xf32>
    %1080 = arith.addf %1078, %1079 : vector<2x32xf32>
    %1081 = math.tanh %1080 : vector<2x32xf32>
    %1082 = arith.mulf %1077, %1081 : vector<2x32xf32>
    %1083 = tpu.concatenate %943, %1082 in 1 : vector<2x32xf32>, vector<2x32xf32> -> vector<2x64xf32>
    %cst_312 = arith.constant dense<0.000000e+00> : vector<2x128xf32>
    %1084 = tpu.matmul %1083, %1021, %cst_312 {dimension_numbers = #tpu.dot_dimension_numbers<[1], [0], [0], [1], [0, 0, 1, 1], [], []>} : vector<2x64xf32>, vector<64x128xf32>, vector<2x128xf32> -> vector<2x128xf32>
    %1085 = vector.broadcast %1023 : vector<1x128xf32> to vector<2x128xf32>
    %1086 = arith.addf %1084, %1085 : vector<2x128xf32>
    %1087 = arith.negf %1086 : vector<2x128xf32>
    %1088 = math.exp %1087 : vector<2x128xf32>
    %cst_313 = arith.constant 1.000000e+00 : f32
    %1089 = vector.broadcast %cst_313 : f32 to vector<2x128xf32>
    %1090 = arith.addf %1089, %1088 : vector<2x128xf32>
    %1091 = arith.divf %1089, %1090 : vector<2x128xf32>
    %1092 = math.tanh %1086 : vector<2x128xf32>
    %1093 = vector.extract_strided_slice %1091 {offsets = [0, 0], sizes = [2, 32], strides = [1, 1]} : vector<2x128xf32> to vector<2x32xf32>
    %1094 = vector.extract_strided_slice %1091 {offsets = [0, 32], sizes = [2, 32], strides = [1, 1]} : vector<2x128xf32> to vector<2x32xf32>
    %1095 = vector.extract_strided_slice %1092 {offsets = [0, 64], sizes = [2, 32], strides = [1, 1]} : vector<2x128xf32> to vector<2x32xf32>
    %1096 = vector.extract_strided_slice %1091 {offsets = [0, 96], sizes = [2, 32], strides = [1, 1]} : vector<2x128xf32> to vector<2x32xf32>
    %1097 = arith.mulf %1094, %1080 : vector<2x32xf32>
    %1098 = arith.mulf %1093, %1095 : vector<2x32xf32>
    %1099 = arith.addf %1097, %1098 : vector<2x32xf32>
    %1100 = math.tanh %1099 : vector<2x32xf32>
    %1101 = arith.mulf %1096, %1100 : vector<2x32xf32>
    %1102 = tpu.concatenate %962, %1101 in 1 : vector<2x32xf32>, vector<2x32xf32> -> vector<2x64xf32>
    %cst_314 = arith.constant dense<0.000000e+00> : vector<2x128xf32>
    %1103 = tpu.matmul %1102, %1021, %cst_314 {dimension_numbers = #tpu.dot_dimension_numbers<[1], [0], [0], [1], [0, 0, 1, 1], [], []>} : vector<2x64xf32>, vector<64x128xf32>, vector<2x128xf32> -> vector<2x128xf32>
    %1104 = vector.broadcast %1023 : vector<1x128xf32> to vector<2x128xf32>
    %1105 = arith.addf %1103, %1104 : vector<2x128xf32>
    %1106 = arith.negf %1105 : vector<2x128xf32>
    %1107 = math.exp %1106 : vector<2x128xf32>
    %cst_315 = arith.constant 1.000000e+00 : f32
    %1108 = vector.broadcast %cst_315 : f32 to vector<2x128xf32>
    %1109 = arith.addf %1108, %1107 : vector<2x128xf32>
    %1110 = arith.divf %1108, %1109 : vector<2x128xf32>
    %1111 = math.tanh %1105 : vector<2x128xf32>
    %1112 = vector.extract_strided_slice %1110 {offsets = [0, 0], sizes = [2, 32], strides = [1, 1]} : vector<2x128xf32> to vector<2x32xf32>
    %1113 = vector.extract_strided_slice %1110 {offsets = [0, 32], sizes = [2, 32], strides = [1, 1]} : vector<2x128xf32> to vector<2x32xf32>
    %1114 = vector.extract_strided_slice %1111 {offsets = [0, 64], sizes = [2, 32], strides = [1, 1]} : vector<2x128xf32> to vector<2x32xf32>
    %1115 = vector.extract_strided_slice %1110 {offsets = [0, 96], sizes = [2, 32], strides = [1, 1]} : vector<2x128xf32> to vector<2x32xf32>
    %1116 = arith.mulf %1113, %1099 : vector<2x32xf32>
    %1117 = arith.mulf %1112, %1114 : vector<2x32xf32>
    %1118 = arith.addf %1116, %1117 : vector<2x32xf32>
    %1119 = math.tanh %1118 : vector<2x32xf32>
    %1120 = arith.mulf %1115, %1119 : vector<2x32xf32>
    %1121 = tpu.concatenate %981, %1120 in 1 : vector<2x32xf32>, vector<2x32xf32> -> vector<2x64xf32>
    %cst_316 = arith.constant dense<0.000000e+00> : vector<2x128xf32>
    %1122 = tpu.matmul %1121, %1021, %cst_316 {dimension_numbers = #tpu.dot_dimension_numbers<[1], [0], [0], [1], [0, 0, 1, 1], [], []>} : vector<2x64xf32>, vector<64x128xf32>, vector<2x128xf32> -> vector<2x128xf32>
    %1123 = vector.broadcast %1023 : vector<1x128xf32> to vector<2x128xf32>
    %1124 = arith.addf %1122, %1123 : vector<2x128xf32>
    %1125 = arith.negf %1124 : vector<2x128xf32>
    %1126 = math.exp %1125 : vector<2x128xf32>
    %cst_317 = arith.constant 1.000000e+00 : f32
    %1127 = vector.broadcast %cst_317 : f32 to vector<2x128xf32>
    %1128 = arith.addf %1127, %1126 : vector<2x128xf32>
    %1129 = arith.divf %1127, %1128 : vector<2x128xf32>
    %1130 = math.tanh %1124 : vector<2x128xf32>
    %1131 = vector.extract_strided_slice %1129 {offsets = [0, 0], sizes = [2, 32], strides = [1, 1]} : vector<2x128xf32> to vector<2x32xf32>
    %1132 = vector.extract_strided_slice %1129 {offsets = [0, 32], sizes = [2, 32], strides = [1, 1]} : vector<2x128xf32> to vector<2x32xf32>
    %1133 = vector.extract_strided_slice %1130 {offsets = [0, 64], sizes = [2, 32], strides = [1, 1]} : vector<2x128xf32> to vector<2x32xf32>
    %1134 = vector.extract_strided_slice %1129 {offsets = [0, 96], sizes = [2, 32], strides = [1, 1]} : vector<2x128xf32> to vector<2x32xf32>
    %1135 = arith.mulf %1132, %1118 : vector<2x32xf32>
    %1136 = arith.mulf %1131, %1133 : vector<2x32xf32>
    %1137 = arith.addf %1135, %1136 : vector<2x32xf32>
    %1138 = math.tanh %1137 : vector<2x32xf32>
    %1139 = arith.mulf %1134, %1138 : vector<2x32xf32>
    %1140 = tpu.concatenate %1000, %1139 in 1 : vector<2x32xf32>, vector<2x32xf32> -> vector<2x64xf32>
    %cst_318 = arith.constant dense<0.000000e+00> : vector<2x128xf32>
    %1141 = tpu.matmul %1140, %1021, %cst_318 {dimension_numbers = #tpu.dot_dimension_numbers<[1], [0], [0], [1], [0, 0, 1, 1], [], []>} : vector<2x64xf32>, vector<64x128xf32>, vector<2x128xf32> -> vector<2x128xf32>
    %1142 = vector.broadcast %1023 : vector<1x128xf32> to vector<2x128xf32>
    %1143 = arith.addf %1141, %1142 : vector<2x128xf32>
    %1144 = arith.negf %1143 : vector<2x128xf32>
    %1145 = math.exp %1144 : vector<2x128xf32>
    %cst_319 = arith.constant 1.000000e+00 : f32
    %1146 = vector.broadcast %cst_319 : f32 to vector<2x128xf32>
    %1147 = arith.addf %1146, %1145 : vector<2x128xf32>
    %1148 = arith.divf %1146, %1147 : vector<2x128xf32>
    %1149 = math.tanh %1143 : vector<2x128xf32>
    %1150 = vector.extract_strided_slice %1148 {offsets = [0, 0], sizes = [2, 32], strides = [1, 1]} : vector<2x128xf32> to vector<2x32xf32>
    %1151 = vector.extract_strided_slice %1148 {offsets = [0, 32], sizes = [2, 32], strides = [1, 1]} : vector<2x128xf32> to vector<2x32xf32>
    %1152 = vector.extract_strided_slice %1149 {offsets = [0, 64], sizes = [2, 32], strides = [1, 1]} : vector<2x128xf32> to vector<2x32xf32>
    %1153 = vector.extract_strided_slice %1148 {offsets = [0, 96], sizes = [2, 32], strides = [1, 1]} : vector<2x128xf32> to vector<2x32xf32>
    %1154 = arith.mulf %1151, %1137 : vector<2x32xf32>
    %1155 = arith.mulf %1150, %1152 : vector<2x32xf32>
    %1156 = arith.addf %1154, %1155 : vector<2x32xf32>
    %1157 = math.tanh %1156 : vector<2x32xf32>
    %1158 = arith.mulf %1153, %1157 : vector<2x32xf32>
    %1159 = tpu.concatenate %1019, %1158 in 1 : vector<2x32xf32>, vector<2x32xf32> -> vector<2x64xf32>
    %cst_320 = arith.constant dense<0.000000e+00> : vector<2x128xf32>
    %1160 = tpu.matmul %1159, %1021, %cst_320 {dimension_numbers = #tpu.dot_dimension_numbers<[1], [0], [0], [1], [0, 0, 1, 1], [], []>} : vector<2x64xf32>, vector<64x128xf32>, vector<2x128xf32> -> vector<2x128xf32>
    %1161 = vector.broadcast %1023 : vector<1x128xf32> to vector<2x128xf32>
    %1162 = arith.addf %1160, %1161 : vector<2x128xf32>
    %1163 = arith.negf %1162 : vector<2x128xf32>
    %1164 = math.exp %1163 : vector<2x128xf32>
    %cst_321 = arith.constant 1.000000e+00 : f32
    %1165 = vector.broadcast %cst_321 : f32 to vector<2x128xf32>
    %1166 = arith.addf %1165, %1164 : vector<2x128xf32>
    %1167 = arith.divf %1165, %1166 : vector<2x128xf32>
    %1168 = math.tanh %1162 : vector<2x128xf32>
    %1169 = vector.extract_strided_slice %1167 {offsets = [0, 0], sizes = [2, 32], strides = [1, 1]} : vector<2x128xf32> to vector<2x32xf32>
    %1170 = vector.extract_strided_slice %1167 {offsets = [0, 32], sizes = [2, 32], strides = [1, 1]} : vector<2x128xf32> to vector<2x32xf32>
    %1171 = vector.extract_strided_slice %1168 {offsets = [0, 64], sizes = [2, 32], strides = [1, 1]} : vector<2x128xf32> to vector<2x32xf32>
    %1172 = vector.extract_strided_slice %1167 {offsets = [0, 96], sizes = [2, 32], strides = [1, 1]} : vector<2x128xf32> to vector<2x32xf32>
    %1173 = arith.mulf %1170, %1156 : vector<2x32xf32>
    %1174 = arith.mulf %1169, %1171 : vector<2x32xf32>
    %1175 = arith.addf %1173, %1174 : vector<2x32xf32>
    %1176 = math.tanh %1175 : vector<2x32xf32>
    %1177 = arith.mulf %1172, %1176 : vector<2x32xf32>
    %c3_322 = arith.constant 3 : index
    %c0_323 = arith.constant 0 : index
    %c0_324 = arith.constant 0 : index
    %1178 = vector.load %arg11[%c3_322, %c0_323, %c0_324] : memref<4x64x128xf32, #tpu.memory_space<vmem>>, vector<1x64x128xf32>
    %1179 = vector.shape_cast %1178 : vector<1x64x128xf32> to vector<64x128xf32>
    %c3_325 = arith.constant 3 : index
    %c0_326 = arith.constant 0 : index
    %c0_327 = arith.constant 0 : index
    %1180 = vector.load %arg12[%c3_325, %c0_326, %c0_327] : memref<4x1x128xf32, #tpu.memory_space<vmem>>, vector<1x1x128xf32>
    %1181 = vector.shape_cast %1180 : vector<1x1x128xf32> to vector<1x128xf32>
    %cst_328 = arith.constant 0.000000e+00 : f32
    %1182 = vector.broadcast %cst_328 : f32 to vector<2x32xf32>
    %cst_329 = arith.constant 0.000000e+00 : f32
    %1183 = vector.broadcast %cst_329 : f32 to vector<2x32xf32>
    %1184 = tpu.concatenate %1044, %1182 in 1 : vector<2x32xf32>, vector<2x32xf32> -> vector<2x64xf32>
    %cst_330 = arith.constant dense<0.000000e+00> : vector<2x128xf32>
    %1185 = tpu.matmul %1184, %1179, %cst_330 {dimension_numbers = #tpu.dot_dimension_numbers<[1], [0], [0], [1], [0, 0, 1, 1], [], []>} : vector<2x64xf32>, vector<64x128xf32>, vector<2x128xf32> -> vector<2x128xf32>
    %1186 = vector.broadcast %1181 : vector<1x128xf32> to vector<2x128xf32>
    %1187 = arith.addf %1185, %1186 : vector<2x128xf32>
    %1188 = arith.negf %1187 : vector<2x128xf32>
    %1189 = math.exp %1188 : vector<2x128xf32>
    %cst_331 = arith.constant 1.000000e+00 : f32
    %1190 = vector.broadcast %cst_331 : f32 to vector<2x128xf32>
    %1191 = arith.addf %1190, %1189 : vector<2x128xf32>
    %1192 = arith.divf %1190, %1191 : vector<2x128xf32>
    %1193 = math.tanh %1187 : vector<2x128xf32>
    %1194 = vector.extract_strided_slice %1192 {offsets = [0, 0], sizes = [2, 32], strides = [1, 1]} : vector<2x128xf32> to vector<2x32xf32>
    %1195 = vector.extract_strided_slice %1192 {offsets = [0, 32], sizes = [2, 32], strides = [1, 1]} : vector<2x128xf32> to vector<2x32xf32>
    %1196 = vector.extract_strided_slice %1193 {offsets = [0, 64], sizes = [2, 32], strides = [1, 1]} : vector<2x128xf32> to vector<2x32xf32>
    %1197 = vector.extract_strided_slice %1192 {offsets = [0, 96], sizes = [2, 32], strides = [1, 1]} : vector<2x128xf32> to vector<2x32xf32>
    %1198 = arith.mulf %1195, %1183 : vector<2x32xf32>
    %1199 = arith.mulf %1194, %1196 : vector<2x32xf32>
    %1200 = arith.addf %1198, %1199 : vector<2x32xf32>
    %1201 = math.tanh %1200 : vector<2x32xf32>
    %1202 = arith.mulf %1197, %1201 : vector<2x32xf32>
    %1203 = tpu.concatenate %1063, %1202 in 1 : vector<2x32xf32>, vector<2x32xf32> -> vector<2x64xf32>
    %cst_332 = arith.constant dense<0.000000e+00> : vector<2x128xf32>
    %1204 = tpu.matmul %1203, %1179, %cst_332 {dimension_numbers = #tpu.dot_dimension_numbers<[1], [0], [0], [1], [0, 0, 1, 1], [], []>} : vector<2x64xf32>, vector<64x128xf32>, vector<2x128xf32> -> vector<2x128xf32>
    %1205 = vector.broadcast %1181 : vector<1x128xf32> to vector<2x128xf32>
    %1206 = arith.addf %1204, %1205 : vector<2x128xf32>
    %1207 = arith.negf %1206 : vector<2x128xf32>
    %1208 = math.exp %1207 : vector<2x128xf32>
    %cst_333 = arith.constant 1.000000e+00 : f32
    %1209 = vector.broadcast %cst_333 : f32 to vector<2x128xf32>
    %1210 = arith.addf %1209, %1208 : vector<2x128xf32>
    %1211 = arith.divf %1209, %1210 : vector<2x128xf32>
    %1212 = math.tanh %1206 : vector<2x128xf32>
    %1213 = vector.extract_strided_slice %1211 {offsets = [0, 0], sizes = [2, 32], strides = [1, 1]} : vector<2x128xf32> to vector<2x32xf32>
    %1214 = vector.extract_strided_slice %1211 {offsets = [0, 32], sizes = [2, 32], strides = [1, 1]} : vector<2x128xf32> to vector<2x32xf32>
    %1215 = vector.extract_strided_slice %1212 {offsets = [0, 64], sizes = [2, 32], strides = [1, 1]} : vector<2x128xf32> to vector<2x32xf32>
    %1216 = vector.extract_strided_slice %1211 {offsets = [0, 96], sizes = [2, 32], strides = [1, 1]} : vector<2x128xf32> to vector<2x32xf32>
    %1217 = arith.mulf %1214, %1200 : vector<2x32xf32>
    %1218 = arith.mulf %1213, %1215 : vector<2x32xf32>
    %1219 = arith.addf %1217, %1218 : vector<2x32xf32>
    %1220 = math.tanh %1219 : vector<2x32xf32>
    %1221 = arith.mulf %1216, %1220 : vector<2x32xf32>
    %1222 = tpu.concatenate %1082, %1221 in 1 : vector<2x32xf32>, vector<2x32xf32> -> vector<2x64xf32>
    %cst_334 = arith.constant dense<0.000000e+00> : vector<2x128xf32>
    %1223 = tpu.matmul %1222, %1179, %cst_334 {dimension_numbers = #tpu.dot_dimension_numbers<[1], [0], [0], [1], [0, 0, 1, 1], [], []>} : vector<2x64xf32>, vector<64x128xf32>, vector<2x128xf32> -> vector<2x128xf32>
    %1224 = vector.broadcast %1181 : vector<1x128xf32> to vector<2x128xf32>
    %1225 = arith.addf %1223, %1224 : vector<2x128xf32>
    %1226 = arith.negf %1225 : vector<2x128xf32>
    %1227 = math.exp %1226 : vector<2x128xf32>
    %cst_335 = arith.constant 1.000000e+00 : f32
    %1228 = vector.broadcast %cst_335 : f32 to vector<2x128xf32>
    %1229 = arith.addf %1228, %1227 : vector<2x128xf32>
    %1230 = arith.divf %1228, %1229 : vector<2x128xf32>
    %1231 = math.tanh %1225 : vector<2x128xf32>
    %1232 = vector.extract_strided_slice %1230 {offsets = [0, 0], sizes = [2, 32], strides = [1, 1]} : vector<2x128xf32> to vector<2x32xf32>
    %1233 = vector.extract_strided_slice %1230 {offsets = [0, 32], sizes = [2, 32], strides = [1, 1]} : vector<2x128xf32> to vector<2x32xf32>
    %1234 = vector.extract_strided_slice %1231 {offsets = [0, 64], sizes = [2, 32], strides = [1, 1]} : vector<2x128xf32> to vector<2x32xf32>
    %1235 = vector.extract_strided_slice %1230 {offsets = [0, 96], sizes = [2, 32], strides = [1, 1]} : vector<2x128xf32> to vector<2x32xf32>
    %1236 = arith.mulf %1233, %1219 : vector<2x32xf32>
    %1237 = arith.mulf %1232, %1234 : vector<2x32xf32>
    %1238 = arith.addf %1236, %1237 : vector<2x32xf32>
    %1239 = math.tanh %1238 : vector<2x32xf32>
    %1240 = arith.mulf %1235, %1239 : vector<2x32xf32>
    %1241 = tpu.concatenate %1101, %1240 in 1 : vector<2x32xf32>, vector<2x32xf32> -> vector<2x64xf32>
    %cst_336 = arith.constant dense<0.000000e+00> : vector<2x128xf32>
    %1242 = tpu.matmul %1241, %1179, %cst_336 {dimension_numbers = #tpu.dot_dimension_numbers<[1], [0], [0], [1], [0, 0, 1, 1], [], []>} : vector<2x64xf32>, vector<64x128xf32>, vector<2x128xf32> -> vector<2x128xf32>
    %1243 = vector.broadcast %1181 : vector<1x128xf32> to vector<2x128xf32>
    %1244 = arith.addf %1242, %1243 : vector<2x128xf32>
    %1245 = arith.negf %1244 : vector<2x128xf32>
    %1246 = math.exp %1245 : vector<2x128xf32>
    %cst_337 = arith.constant 1.000000e+00 : f32
    %1247 = vector.broadcast %cst_337 : f32 to vector<2x128xf32>
    %1248 = arith.addf %1247, %1246 : vector<2x128xf32>
    %1249 = arith.divf %1247, %1248 : vector<2x128xf32>
    %1250 = math.tanh %1244 : vector<2x128xf32>
    %1251 = vector.extract_strided_slice %1249 {offsets = [0, 0], sizes = [2, 32], strides = [1, 1]} : vector<2x128xf32> to vector<2x32xf32>
    %1252 = vector.extract_strided_slice %1249 {offsets = [0, 32], sizes = [2, 32], strides = [1, 1]} : vector<2x128xf32> to vector<2x32xf32>
    %1253 = vector.extract_strided_slice %1250 {offsets = [0, 64], sizes = [2, 32], strides = [1, 1]} : vector<2x128xf32> to vector<2x32xf32>
    %1254 = vector.extract_strided_slice %1249 {offsets = [0, 96], sizes = [2, 32], strides = [1, 1]} : vector<2x128xf32> to vector<2x32xf32>
    %1255 = arith.mulf %1252, %1238 : vector<2x32xf32>
    %1256 = arith.mulf %1251, %1253 : vector<2x32xf32>
    %1257 = arith.addf %1255, %1256 : vector<2x32xf32>
    %1258 = math.tanh %1257 : vector<2x32xf32>
    %1259 = arith.mulf %1254, %1258 : vector<2x32xf32>
    %1260 = tpu.concatenate %1120, %1259 in 1 : vector<2x32xf32>, vector<2x32xf32> -> vector<2x64xf32>
    %cst_338 = arith.constant dense<0.000000e+00> : vector<2x128xf32>
    %1261 = tpu.matmul %1260, %1179, %cst_338 {dimension_numbers = #tpu.dot_dimension_numbers<[1], [0], [0], [1], [0, 0, 1, 1], [], []>} : vector<2x64xf32>, vector<64x128xf32>, vector<2x128xf32> -> vector<2x128xf32>
    %1262 = vector.broadcast %1181 : vector<1x128xf32> to vector<2x128xf32>
    %1263 = arith.addf %1261, %1262 : vector<2x128xf32>
    %1264 = arith.negf %1263 : vector<2x128xf32>
    %1265 = math.exp %1264 : vector<2x128xf32>
    %cst_339 = arith.constant 1.000000e+00 : f32
    %1266 = vector.broadcast %cst_339 : f32 to vector<2x128xf32>
    %1267 = arith.addf %1266, %1265 : vector<2x128xf32>
    %1268 = arith.divf %1266, %1267 : vector<2x128xf32>
    %1269 = math.tanh %1263 : vector<2x128xf32>
    %1270 = vector.extract_strided_slice %1268 {offsets = [0, 0], sizes = [2, 32], strides = [1, 1]} : vector<2x128xf32> to vector<2x32xf32>
    %1271 = vector.extract_strided_slice %1268 {offsets = [0, 32], sizes = [2, 32], strides = [1, 1]} : vector<2x128xf32> to vector<2x32xf32>
    %1272 = vector.extract_strided_slice %1269 {offsets = [0, 64], sizes = [2, 32], strides = [1, 1]} : vector<2x128xf32> to vector<2x32xf32>
    %1273 = vector.extract_strided_slice %1268 {offsets = [0, 96], sizes = [2, 32], strides = [1, 1]} : vector<2x128xf32> to vector<2x32xf32>
    %1274 = arith.mulf %1271, %1257 : vector<2x32xf32>
    %1275 = arith.mulf %1270, %1272 : vector<2x32xf32>
    %1276 = arith.addf %1274, %1275 : vector<2x32xf32>
    %1277 = math.tanh %1276 : vector<2x32xf32>
    %1278 = arith.mulf %1273, %1277 : vector<2x32xf32>
    %1279 = tpu.concatenate %1139, %1278 in 1 : vector<2x32xf32>, vector<2x32xf32> -> vector<2x64xf32>
    %cst_340 = arith.constant dense<0.000000e+00> : vector<2x128xf32>
    %1280 = tpu.matmul %1279, %1179, %cst_340 {dimension_numbers = #tpu.dot_dimension_numbers<[1], [0], [0], [1], [0, 0, 1, 1], [], []>} : vector<2x64xf32>, vector<64x128xf32>, vector<2x128xf32> -> vector<2x128xf32>
    %1281 = vector.broadcast %1181 : vector<1x128xf32> to vector<2x128xf32>
    %1282 = arith.addf %1280, %1281 : vector<2x128xf32>
    %1283 = arith.negf %1282 : vector<2x128xf32>
    %1284 = math.exp %1283 : vector<2x128xf32>
    %cst_341 = arith.constant 1.000000e+00 : f32
    %1285 = vector.broadcast %cst_341 : f32 to vector<2x128xf32>
    %1286 = arith.addf %1285, %1284 : vector<2x128xf32>
    %1287 = arith.divf %1285, %1286 : vector<2x128xf32>
    %1288 = math.tanh %1282 : vector<2x128xf32>
    %1289 = vector.extract_strided_slice %1287 {offsets = [0, 0], sizes = [2, 32], strides = [1, 1]} : vector<2x128xf32> to vector<2x32xf32>
    %1290 = vector.extract_strided_slice %1287 {offsets = [0, 32], sizes = [2, 32], strides = [1, 1]} : vector<2x128xf32> to vector<2x32xf32>
    %1291 = vector.extract_strided_slice %1288 {offsets = [0, 64], sizes = [2, 32], strides = [1, 1]} : vector<2x128xf32> to vector<2x32xf32>
    %1292 = vector.extract_strided_slice %1287 {offsets = [0, 96], sizes = [2, 32], strides = [1, 1]} : vector<2x128xf32> to vector<2x32xf32>
    %1293 = arith.mulf %1290, %1276 : vector<2x32xf32>
    %1294 = arith.mulf %1289, %1291 : vector<2x32xf32>
    %1295 = arith.addf %1293, %1294 : vector<2x32xf32>
    %1296 = math.tanh %1295 : vector<2x32xf32>
    %1297 = arith.mulf %1292, %1296 : vector<2x32xf32>
    %1298 = tpu.concatenate %1158, %1297 in 1 : vector<2x32xf32>, vector<2x32xf32> -> vector<2x64xf32>
    %cst_342 = arith.constant dense<0.000000e+00> : vector<2x128xf32>
    %1299 = tpu.matmul %1298, %1179, %cst_342 {dimension_numbers = #tpu.dot_dimension_numbers<[1], [0], [0], [1], [0, 0, 1, 1], [], []>} : vector<2x64xf32>, vector<64x128xf32>, vector<2x128xf32> -> vector<2x128xf32>
    %1300 = vector.broadcast %1181 : vector<1x128xf32> to vector<2x128xf32>
    %1301 = arith.addf %1299, %1300 : vector<2x128xf32>
    %1302 = arith.negf %1301 : vector<2x128xf32>
    %1303 = math.exp %1302 : vector<2x128xf32>
    %cst_343 = arith.constant 1.000000e+00 : f32
    %1304 = vector.broadcast %cst_343 : f32 to vector<2x128xf32>
    %1305 = arith.addf %1304, %1303 : vector<2x128xf32>
    %1306 = arith.divf %1304, %1305 : vector<2x128xf32>
    %1307 = math.tanh %1301 : vector<2x128xf32>
    %1308 = vector.extract_strided_slice %1306 {offsets = [0, 0], sizes = [2, 32], strides = [1, 1]} : vector<2x128xf32> to vector<2x32xf32>
    %1309 = vector.extract_strided_slice %1306 {offsets = [0, 32], sizes = [2, 32], strides = [1, 1]} : vector<2x128xf32> to vector<2x32xf32>
    %1310 = vector.extract_strided_slice %1307 {offsets = [0, 64], sizes = [2, 32], strides = [1, 1]} : vector<2x128xf32> to vector<2x32xf32>
    %1311 = vector.extract_strided_slice %1306 {offsets = [0, 96], sizes = [2, 32], strides = [1, 1]} : vector<2x128xf32> to vector<2x32xf32>
    %1312 = arith.mulf %1309, %1295 : vector<2x32xf32>
    %1313 = arith.mulf %1308, %1310 : vector<2x32xf32>
    %1314 = arith.addf %1312, %1313 : vector<2x32xf32>
    %1315 = math.tanh %1314 : vector<2x32xf32>
    %1316 = arith.mulf %1311, %1315 : vector<2x32xf32>
    %1317 = tpu.concatenate %1177, %1316 in 1 : vector<2x32xf32>, vector<2x32xf32> -> vector<2x64xf32>
    %cst_344 = arith.constant dense<0.000000e+00> : vector<2x128xf32>
    %1318 = tpu.matmul %1317, %1179, %cst_344 {dimension_numbers = #tpu.dot_dimension_numbers<[1], [0], [0], [1], [0, 0, 1, 1], [], []>} : vector<2x64xf32>, vector<64x128xf32>, vector<2x128xf32> -> vector<2x128xf32>
    %1319 = vector.broadcast %1181 : vector<1x128xf32> to vector<2x128xf32>
    %1320 = arith.addf %1318, %1319 : vector<2x128xf32>
    %1321 = arith.negf %1320 : vector<2x128xf32>
    %1322 = math.exp %1321 : vector<2x128xf32>
    %cst_345 = arith.constant 1.000000e+00 : f32
    %1323 = vector.broadcast %cst_345 : f32 to vector<2x128xf32>
    %1324 = arith.addf %1323, %1322 : vector<2x128xf32>
    %1325 = arith.divf %1323, %1324 : vector<2x128xf32>
    %1326 = math.tanh %1320 : vector<2x128xf32>
    %1327 = vector.extract_strided_slice %1325 {offsets = [0, 0], sizes = [2, 32], strides = [1, 1]} : vector<2x128xf32> to vector<2x32xf32>
    %1328 = vector.extract_strided_slice %1325 {offsets = [0, 32], sizes = [2, 32], strides = [1, 1]} : vector<2x128xf32> to vector<2x32xf32>
    %1329 = vector.extract_strided_slice %1326 {offsets = [0, 64], sizes = [2, 32], strides = [1, 1]} : vector<2x128xf32> to vector<2x32xf32>
    %1330 = vector.extract_strided_slice %1325 {offsets = [0, 96], sizes = [2, 32], strides = [1, 1]} : vector<2x128xf32> to vector<2x32xf32>
    %1331 = arith.mulf %1328, %1314 : vector<2x32xf32>
    %1332 = arith.mulf %1327, %1329 : vector<2x32xf32>
    %1333 = arith.addf %1331, %1332 : vector<2x32xf32>
    %1334 = math.tanh %1333 : vector<2x32xf32>
    %1335 = arith.mulf %1330, %1334 : vector<2x32xf32>
    %c0_346 = arith.constant 0 : index
    %c0_347 = arith.constant 0 : index
    %1336 = vector.load %arg25[%c0_346, %c0_347] : memref<32x128xf32, #tpu.memory_space<vmem>>, vector<32x128xf32>
    %cst_348 = arith.constant dense<0.000000e+00> : vector<2x128xf32>
    %1337 = tpu.matmul %1335, %1336, %cst_348 {dimension_numbers = #tpu.dot_dimension_numbers<[1], [0], [0], [1], [0, 0, 1, 1], [], []>} : vector<2x32xf32>, vector<32x128xf32>, vector<2x128xf32> -> vector<2x128xf32>
    %c0_349 = arith.constant 0 : index
    %c0_350 = arith.constant 0 : index
    %1338 = vector.load %arg26[%c0_349, %c0_350] : memref<1x128xf32, #tpu.memory_space<vmem>>, vector<1x128xf32>
    %1339 = vector.broadcast %1338 : vector<1x128xf32> to vector<2x128xf32>
    %1340 = arith.addf %1337, %1339 : vector<2x128xf32>
    %cst_351 = arith.constant 0.000000e+00 : f32
    %1341 = vector.broadcast %cst_351 : f32 to vector<2x128xf32>
    %1342 = arith.maximumf %1340, %1341 : vector<2x128xf32>
    %c0_352 = arith.constant 0 : index
    %c0_353 = arith.constant 0 : index
    %1343 = vector.load %arg27[%c0_352, %c0_353] : memref<128x24xf32, #tpu.memory_space<vmem>>, vector<128x24xf32>
    %cst_354 = arith.constant dense<0.000000e+00> : vector<2x24xf32>
    %1344 = tpu.matmul %1342, %1343, %cst_354 {dimension_numbers = #tpu.dot_dimension_numbers<[1], [0], [0], [1], [0, 0, 1, 1], [], []>} : vector<2x128xf32>, vector<128x24xf32>, vector<2x24xf32> -> vector<2x24xf32>
    %c0_355 = arith.constant 0 : index
    %c0_356 = arith.constant 0 : index
    %1345 = vector.load %arg28[%c0_355, %c0_356] : memref<1x24xf32, #tpu.memory_space<vmem>>, vector<1x24xf32>
    %1346 = vector.broadcast %1345 : vector<1x24xf32> to vector<2x24xf32>
    %1347 = arith.addf %1344, %1346 : vector<2x24xf32>
    %c0_357 = arith.constant 0 : index
    %c0_358 = arith.constant 0 : index
    %1348 = vector.load %arg5[%c0_357, %c0_358] : memref<2x8xf32, #tpu.memory_space<vmem>>, vector<2x8xf32>
    %1349 = vector.extract_strided_slice %1347 {offsets = [0, 0], sizes = [2, 8], strides = [1, 1]} : vector<2x24xf32> to vector<2x8xf32>
    %cst_359 = arith.constant dense<0xFF800000> : vector<2xf32>
    %1350 = vector.multi_reduction <maximumf>, %1349, %cst_359 [1] : vector<2x8xf32> to vector<2xf32>
    %cst_360 = arith.constant 0xFF800000 : f32
    %1351 = vector.broadcast %cst_360 : f32 to vector<2xf32>
    %1352 = arith.maximumf %1351, %1350 : vector<2xf32>
    %1353 = vector.shape_cast %1352 : vector<2xf32> to vector<2x1xf32>
    %1354 = vector.broadcast %1353 : vector<2x1xf32> to vector<2x8xf32>
    %1355 = arith.subf %1349, %1354 : vector<2x8xf32>
    %1356 = math.exp %1355 : vector<2x8xf32>
    %cst_361 = arith.constant dense<0.000000e+00> : vector<2xf32>
    %1357 = vector.multi_reduction <add>, %1356, %cst_361 [1] : vector<2x8xf32> to vector<2xf32>
    %1358 = vector.shape_cast %1357 : vector<2xf32> to vector<2x1xf32>
    %1359 = vector.broadcast %1358 : vector<2x1xf32> to vector<2x8xf32>
    %1360 = arith.divf %1356, %1359 : vector<2x8xf32>
    %1361 = vector.extract_strided_slice %1347 {offsets = [0, 8], sizes = [2, 8], strides = [1, 1]} : vector<2x24xf32> to vector<2x8xf32>
    %1362 = arith.addf %1361, %1348 : vector<2x8xf32>
    %cst_362 = arith.constant dense<0xFF800000> : vector<2xf32>
    %1363 = vector.multi_reduction <maximumf>, %1362, %cst_362 [1] : vector<2x8xf32> to vector<2xf32>
    %cst_363 = arith.constant 0xFF800000 : f32
    %1364 = vector.broadcast %cst_363 : f32 to vector<2xf32>
    %1365 = arith.maximumf %1364, %1363 : vector<2xf32>
    %1366 = vector.shape_cast %1365 : vector<2xf32> to vector<2x1xf32>
    %1367 = vector.broadcast %1366 : vector<2x1xf32> to vector<2x8xf32>
    %1368 = arith.subf %1362, %1367 : vector<2x8xf32>
    %1369 = math.exp %1368 : vector<2x8xf32>
    %cst_364 = arith.constant dense<0.000000e+00> : vector<2xf32>
    %1370 = vector.multi_reduction <add>, %1369, %cst_364 [1] : vector<2x8xf32> to vector<2xf32>
    %1371 = vector.shape_cast %1370 : vector<2xf32> to vector<2x1xf32>
    %1372 = vector.broadcast %1371 : vector<2x1xf32> to vector<2x8xf32>
    %1373 = arith.divf %1369, %1372 : vector<2x8xf32>
    %1374 = vector.extract_strided_slice %1347 {offsets = [0, 16], sizes = [2, 8], strides = [1, 1]} : vector<2x24xf32> to vector<2x8xf32>
    %1375 = arith.addf %1374, %1348 : vector<2x8xf32>
    %cst_365 = arith.constant dense<0xFF800000> : vector<2xf32>
    %1376 = vector.multi_reduction <maximumf>, %1375, %cst_365 [1] : vector<2x8xf32> to vector<2xf32>
    %cst_366 = arith.constant 0xFF800000 : f32
    %1377 = vector.broadcast %cst_366 : f32 to vector<2xf32>
    %1378 = arith.maximumf %1377, %1376 : vector<2xf32>
    %1379 = vector.shape_cast %1378 : vector<2xf32> to vector<2x1xf32>
    %1380 = vector.broadcast %1379 : vector<2x1xf32> to vector<2x8xf32>
    %1381 = arith.subf %1375, %1380 : vector<2x8xf32>
    %1382 = math.exp %1381 : vector<2x8xf32>
    %cst_367 = arith.constant dense<0.000000e+00> : vector<2xf32>
    %1383 = vector.multi_reduction <add>, %1382, %cst_367 [1] : vector<2x8xf32> to vector<2xf32>
    %1384 = vector.shape_cast %1383 : vector<2xf32> to vector<2x1xf32>
    %1385 = vector.broadcast %1384 : vector<2x1xf32> to vector<2x8xf32>
    %1386 = arith.divf %1382, %1385 : vector<2x8xf32>
    %1387 = vector.extract_strided_slice %1342 {offsets = [0, 96], sizes = [2, 5], strides = [1, 1]} : vector<2x128xf32> to vector<2x5xf32>
    %cst_368 = arith.constant 1.000000e+00 : f32
    %1388 = vector.broadcast %cst_368 : f32 to vector<2x5xf32>
    %1389 = arith.addf %1387, %1388 : vector<2x5xf32>
    %1390 = math.log %1389 : vector<2x5xf32>
    %cst_369 = arith.constant 1.000000e+01 : f32
    %1391 = vector.broadcast %cst_369 : f32 to vector<2x5xf32>
    %1392 = arith.mulf %1390, %1391 : vector<2x5xf32>
    %cst_370 = arith.constant 5.000000e-01 : f32
    %1393 = vector.broadcast %cst_370 : f32 to vector<2x5xf32>
    %1394 = arith.subf %1392, %1393 : vector<2x5xf32>
    %cst_371 = arith.constant 9.99999997E-7 : f32
    %1395 = vector.broadcast %cst_371 : f32 to vector<2x5xf32>
    %1396 = arith.addf %1394, %1395 : vector<2x5xf32>
    %1397 = math.roundeven %1396 : vector<2x5xf32>
    %1398 = vector.extract_strided_slice %1342 {offsets = [0, 101], sizes = [2, 5], strides = [1, 1]} : vector<2x128xf32> to vector<2x5xf32>
    %cst_372 = arith.constant 0.00999999977 : f32
    %1399 = vector.broadcast %cst_372 : f32 to vector<2x5xf32>
    %1400 = arith.maximumf %1398, %1399 : vector<2x5xf32>
    %cst_373 = arith.constant 0.000000e+00 : f32
    %1401 = vector.broadcast %cst_373 : f32 to vector<2x94xf32>
    %1402 = tpu.concatenate %1360, %1373, %1386, %1397, %1400, %1401 in 1 : vector<2x8xf32>, vector<2x8xf32>, vector<2x8xf32>, vector<2x5xf32>, vector<2x5xf32>, vector<2x94xf32> -> vector<2x128xf32>
    %c0_374 = arith.constant 0 : index
    %c0_375 = arith.constant 0 : index
    %1403 = vector.load %arg29[%c0_374, %c0_375] : memref<2x128xf32, #tpu.memory_space<vmem>>, vector<2x128xf32>
    tpu.vector_store %arg29[%c0_374, %c0_375], %1402 {strides = array<i32>} : memref<2x128xf32, #tpu.memory_space<vmem>>, vector<2x128xf32>,
    return
  }
}

</mosaic_0001>

<bundles_post_ra>
// kernel: lstm_ps_ag_forward.1
= control target key start
LH: loop header
LB: loop body
LE: loop exit
PB: predicated region body
PF: predicated region fallthrough
CT: control target
= control target key end

     0   :  { %v11015_v0 = vmov 0   ;;  %s11016_s6 = smov 6   ;;  %s11017_s10 = smov 1   ;;  %v11019_v15 = vmov 0.0   ;;  %v128_v16 = vlaneseq  ;;  %vm414_vm0 = vcmask 261120   ;;  %s13146_s0 = inlined_call_operand.smem [shape: u32[30], index: -1, kind: input, shape index: {}] }
   0x1   :  { %10583 = vset.pattern.permute.xlu1 %v11015_v0  ;;  %10582 = vset.pattern.permute.xlu0 %v11015_v0  ;;  %s1_s5 = sld [smem:[%s13146_s0]]   ;;  %s11018_s14 = smov 7   ;;  %vm296_vm7 = vcmask 130048   ;;  %vm11022_vm10 = vmmov 0   ;;  %vm609_vm11 = vcmask 523264   ;;  %v11024_v56 = vmov 1  }
   0x2   :  { %s8640_s9 = sld [smem:[%s13146_s0 + %s11016_s6]]   ;;  %v11090_v17 = vand.u32 127, %v128_v16  ;;  %s11020_s18 = smov 9  }
   0x3   :  { %s11076_s13 = sld [smem:[%s13146_s0 + %s11017_s10]]   ;;  %s11021_s22 = smov 3  }
   0x4   :  { %s11081_s17 = sld [smem:[%s13146_s0 + %s11018_s14]]   ;;  %s11023_s26 = smov 10  }
   0x5   :  { %s11095_s21 = sld [smem:[%s13146_s0 + %s11020_s18]]   ;;  %s11025_s30 = smov 2  }
   0x6   :  { %s8637_s25 = sld [smem:[%s13146_s0 + %s11021_s22]]   ;;  %s11026_s4 = smov 64  }
   0x7   :  { %v124_v1 = vld [vmem:[%s1_s5 + $0x10] sm:$0xff]  ;;  %v122_v2 = vld [vmem:[%s1_s5] sm:$0xff]  ;;  %v125_v3 = vld [vmem:[%s1_s5 + $0x18] sm:$0xff]  ;;  %s8644_s29 = sld [smem:[%s13146_s0 + %s11023_s26]]   ;;  %s11028_s6 = smov 8  }
   0x8   :  { %137 = vperm.xlu1 %10583, %v124_v1   ;;  %131 = vperm.xlu0 %10582, %v122_v2   ;;  %v123_v4 = vld [vmem:[%s1_s5 + $0x8] sm:$0xff]  ;;  %v211_v5 = vld [vmem:[%s8640_s9 + $0x18] sm:$0xff]  ;;  %v210_v6 = vld [vmem:[%s8640_s9 + $0x10] sm:$0xff]  ;;  %s11222_s3 = sld [smem:[%s13146_s0 + %s11025_s30]]   ;;  %s11029_s10 = smov 4  }
   0x9   :  { %9448 = vmatprep.subr.mxu1 %v211_v5  ;;  %v209_v7 = vld [vmem:[%s8640_s9 + $0x8] sm:$0xff]  ;;  %v126_v9 = vld [vmem:[%s1_s5 + $0x20] sm:$0xff]  ;;  %s11030_s14 = smov 13   ;;  %s11031_s19 = smov 14  }
   0xa   :  { %9449 = vmatpush3.msra.mxu1 %v211_v5  ;;  %v127_v8 = vld [vmem:[%s1_s5 + $0x28] sm:$0xff]  ;;  %v208_v10 = vld [vmem:[%s8640_s9] sm:$0xff]  ;;  %s13147_s5 = smov 32   ;;  %s8642_s9 = sld [smem:[%s13146_s0 + %s11028_s6]]   ;;  %v251_v5 = vshrl.u32 %v128_v16, 7 }
   0xb   :  { %9450 = vmatprep.subr.mxu1 %v210_v6  ;;  %v213_v11 = vld [vmem:[%s11081_s17 + $0x8] sm:$0xff]  ;;  %v166_v13 = vld [vmem:[%s11076_s13] sm:$0xff]  ;;  %v11105_v24 = vld [vmem:[%s11095_s21 + $0x38] sm:$0xff]  ;;  %s11435_s18 = sld [smem:[%s13146_s0 + %s11030_s14]]   ;;  %s11032_s22 = smov 88  }
   0xc   :  { %140 = vperm.xlu1 %10583, %v125_v3   ;;  %134 = vperm.xlu0 %10582, %v123_v4   ;;  %v167_v12 = vld [vmem:[%s11076_s13 + $0x8] sm:$0xff]  ;;  %v212_v14 = vld [vmem:[%s11081_s17] sm:$0xff]  ;;  %v11110_v26 = vld [vmem:[%s11095_s21 + $0x30] sm:$0xff]  ;;  %s11033_s23 = smov 96   ;;  %s11034_s24 = smov 80  }
   0xd   :  { %9451 = vmatpush3.msra.mxu1 %v210_v6  ;;  %9435 = vmatprep.subr.mxu0 %v213_v11  ;;  %v11118_v30 = vld [vmem:[%s11095_s21 + $0x28] sm:$0xff]  ;;  %v11128_v32 = vld [vmem:[%s11095_s21 + $0x20] sm:$0xff]  ;;  %v11140_v37 = vld [vmem:[%s11095_s21 + $0x18] sm:$0xff]  ;;  %v252_v6 = vsub.s32 0, %v251_v5  ;;  %s11036_s26 = smov 72   ;;  %s11037_s27 = smov 112  }
   0xe   :  { %9452 = vmatprep.subr.mxu1 %v209_v7  ;;  %9436 = vmatpush3.msra.mxu0 %v213_v11  ;;  %v11148_v39 = vld [vmem:[%s11095_s21 + $0x10] sm:$0xff]  ;;  %v11155_v40 = vld [vmem:[%s11095_s21 + $0x8] sm:$0xff]  ;;  %v592_v41 = vld [vmem:[%s8637_s25] sm:$0xff]  ;;  %s11035_s25 = smov 120   ;;  %s11038_s28 = smov 104  }
   0xf   :  { %9453 = vmatpush3.msra.mxu1 %v209_v7  ;;  %9437 = vmatprep.subr.mxu0 %v212_v14  ;;  %v11162_v42 = vld [vmem:[%s11095_s21] sm:$0xff]  ;;  %v602_v43 = vsel %vm414_vm0, %v592_v41, 0.0  ;;  %v215_v58 = vld [vmem:[%s11222_s3 + $0x8] sm:$0xff]  ;;  %v284_v7 = vsub.s32 1, %v251_v5  ;;  %s11040_s30 = smov 40   ;;  %s11041_s1 = smov 48  }
  0x10   :  { %146 = vperm.xlu1 %10583, %v127_v8   ;;  %143 = vperm.xlu0 %10582, %v126_v9   ;;  %v11215_v52 = vld [vmem:[%s8644_s29] ss:$0 sm:$0xff]  ;;  %s11039_s29 = smov 56   ;;  %s11042_s2 = smov 16  }
  0x11   :  { %9454 = vmatprep.subr.mxu1 %v208_v10  ;;  %9438 = vmatpush3.msra.mxu0 %v212_v14  ;;  %v220_v8 = vld [vmem:[%s8642_s9] sm:$0x3]  ;;  %s11044_s7 = smov 15   ;;  %s11045_s14 = smov 17  }
  0x12   :  { %9455 = vmatpush3.msra.mxu1 %v208_v10  ;;  %9503 = vmatprep.subr.mxu0 %v11019_v15  ;;  %v11236_v9 = vrot.slane %v220_v8, %v252_v6  ;;  %v11238_v10 = vrot.slane %v220_v8, %v284_v7  ;;  %s11046_s20 = smov 19   ;;  %s11047_s9 = smov 21  }
  0x13   :  { %9465 = vmatprep.subr.mxu1 %v11019_v15  ;;  %s11674_s8 = sld [smem:[%s13146_s0 + %s11046_s20]]   ;;  %s11048_s15 = smov 22  }
  0x14   :  { %176 = vperm.xlu1 %10583, %v167_v12   ;;  %173 = vperm.xlu0 %10582, %v166_v13   ;;  %s11696_s21 = sld [smem:[%s13146_s0 + %s11048_s15]]   ;;  %s11050_s15 = smov 20  }
  0x18   :  { %10584 = vset.pattern.permute.xlu1 %v11024_v56 }
  0x83   :  { %v138_v18 = vpop.permute.xlu1 %137  ;;  %v132_v19 = vpop.permute.xlu0 %131 }
  0x84   :  { %vm148_vm1 = vcmp.eq.s32.totalorder %v132_v19, %v11090_v17  ;;  %vm150_vm2 = vcmp.eq.s32.totalorder %v138_v18, %v11090_v17 }
  0x85   :  { %v8664_v20 = vsel %vm148_vm1, 1.0, %v11019_v15  ;;  %v8666_v23 = vsel %vm150_vm2, 1.0, %v11019_v15 }
  0x86   :  { %9456 = vmatprep.mubr.msk.f32.mxu1 %vm414_vm0, %v8664_v20 }
  0x87   :  { %v141_v21 = vpop.permute.xlu1 %140  ;;  %v135_v22 = vpop.permute.xlu0 %134 }
  0x88   :  { %vm151_vm3 = vcmp.eq.s32.totalorder %v141_v21, %v11090_v17  ;;  %vm149_vm4 = vcmp.eq.s32.totalorder %v135_v22, %v11090_v17 }
  0x89   :  { %v8665_v25 = vsel %vm149_vm4, 1.0, %v11019_v15  ;;  %v8667_v27 = vsel %vm151_vm3, 1.0, %v11019_v15 }
  0x8a   :  { %9457 = vmatmul.mubr.msk.f32.vlgmr.msra.gmra.mxu1 %vm414_vm0, %v8665_v25  ;;  %v168_v25 = vld [vmem:[%s11076_s13 + $0x10] sm:$0xff] }
  0x8b   :  { %9466 = vmatpush3.msra.mxu1 %v11105_v24  ;;  %v147_v28 = vpop.permute.xlu1 %146  ;;  %v144_v29 = vpop.permute.xlu0 %143  ;;  %9459 = vmatprep.mubr.msk.f32.mxu1 %vm414_vm0, %v8666_v23 }
  0x8c   :  { %9467 = vmatprep.subr.mxu1 %v11019_v15  ;;  %vm152_vm5 = vcmp.eq.s32.totalorder %v144_v29, %v11090_v17  ;;  %vm153_vm6 = vcmp.eq.s32.totalorder %v147_v28, %v11090_v17 }
  0x8d   :  { %v8668_v31 = vsel %vm152_vm5, 1.0, %v11019_v15  ;;  %9468 = vmatpush3.msra.mxu1 %v11110_v26  ;;  %v8669_v38 = vsel %vm153_vm6, 1.0, %v11019_v15 }
  0x8e   :  { %9469 = vmatprep.subr.mxu1 %v11019_v15  ;;  %9460 = vmatmul.mubr.msk.f32.gmra.mxu1 %vm414_vm0, %v8667_v27  ;;  %v169_v27 = vld [vmem:[%s11076_s13 + $0x18] sm:$0xff] }
  0x8f   :  { %9470 = vmatpush3.msra.mxu1 %v11118_v30  ;;  %v177_v33 = vpop.permute.xlu1 %176  ;;  %9462 = vmatprep.mubr.msk.f32.mxu1 %vm414_vm0, %v8668_v31  ;;  %v174_v34 = vpop.permute.xlu0 %173 }
  0x90   :  { %vm191_vm8 = vcmp.eq.s32.totalorder %v177_v33, %v11090_v17  ;;  %9471 = vmatprep.subr.mxu1 %v11019_v15  ;;  %vm190_vm9 = vcmp.eq.s32.totalorder %v174_v34, %v11090_v17 }
  0x91   :  { %v8671_v35 = vsel %vm191_vm8, 1.0, %v11019_v15  ;;  %9472 = vmatpush3.msra.mxu1 %v11128_v32  ;;  %v8670_v36 = vsel %vm190_vm9, 1.0, %v11019_v15 }
  0x92   :  { %9473 = vmatprep.subr.mxu1 %v11019_v15  ;;  %9439 = vmatprep.mubr.msk.f32.mxu0 %vm296_vm7, %v8670_v36 }
  0x93   :  { %9463 = vmatmul.mubr.msk.f32.gmra.mxu1 %vm414_vm0, %v8669_v38  ;;  %9440 = vmatmul.mubr.msk.f32.vlgmr.msra.gmra.mxu0 %vm296_vm7, %v8671_v35 }
  0x94   :  { %9474 = vmatpush3.msra.mxu1 %v11140_v37  ;;  %9481 = vmatprep.mubr.msk.f32.mxu1 %vm11022_vm10, %v11019_v15 }
  0x95   :  { %9475 = vmatprep.subr.mxu1 %v11019_v15  ;;  %9504 = vmatpush3.msra.mxu0 %v11105_v24 }
  0x96   :  { %9476 = vmatpush3.msra.mxu1 %v11148_v39  ;;  %9505 = vmatprep.subr.mxu0 %v11019_v15 }
  0x97   :  { %9477 = vmatprep.subr.mxu1 %v11019_v15  ;;  %9506 = vmatpush3.msra.mxu0 %v11110_v26 }
  0x98   :  { %9478 = vmatpush3.msra.mxu1 %v11155_v40  ;;  %9507 = vmatprep.subr.mxu0 %v11019_v15 }
  0x99   :  { %9479 = vmatprep.subr.mxu1 %v11019_v15  ;;  %9508 = vmatpush3.msra.mxu0 %v11118_v30 }
  0x9a   :  { %9480 = vmatpush3.msra.mxu1 %v11162_v42  ;;  %9509 = vmatprep.subr.mxu0 %v11019_v15 }
  0x9b   :  { %9482 = vmatmul.mubr.msk.f32.vlgmr.msra.gmra.mxu1 %vm609_vm11, %v602_v43  ;;  %9484 = vmatprep.subr.mxu1 %v11019_v15 }
  0x9c   :  { %9485 = vmatpush3.msra.mxu1 %v11105_v24  ;;  %9500 = vmatprep.mubr.msk.f32.mxu1 %vm11022_vm10, %v11019_v15 }
  0x9d   :  { %9486 = vmatprep.subr.mxu1 %v11019_v15  ;;  %9510 = vmatpush3.msra.mxu0 %v11128_v32 }
  0x9e   :  { %9487 = vmatpush3.msra.mxu1 %v11110_v26  ;;  %9511 = vmatprep.subr.mxu0 %v11019_v15 }
  0x9f   :  { %9488 = vmatprep.subr.mxu1 %v11019_v15  ;;  %9512 = vmatpush3.msra.mxu0 %v11140_v37 }
  0xa0   :  { %9489 = vmatpush3.msra.mxu1 %v11118_v30  ;;  %9513 = vmatprep.subr.mxu0 %v11019_v15 }
  0xa1   :  { %9490 = vmatprep.subr.mxu1 %v11019_v15  ;;  %9514 = vmatpush3.msra.mxu0 %v11148_v39 }
  0xa2   :  { %9491 = vmatpush3.msra.mxu1 %v11128_v32  ;;  %9515 = vmatprep.subr.mxu0 %v11019_v15 }
  0xa3   :  { %9492 = vmatprep.subr.mxu1 %v11019_v15  ;;  %9516 = vmatpush3.msra.mxu0 %v11155_v40 }
  0xa4   :  { %9493 = vmatpush3.msra.mxu1 %v11140_v37  ;;  %9517 = vmatprep.subr.mxu0 %v11019_v15 }
  0xa5   :  { %9494 = vmatprep.subr.mxu1 %v11019_v15  ;;  %9518 = vmatpush3.msra.mxu0 %v11162_v42 }
  0xa6   :  { %9495 = vmatpush3.msra.mxu1 %v11148_v39  ;;  %9541 = vmatprep.subr.mxu0 %v11019_v15 }
  0xa7   :  { %9496 = vmatprep.subr.mxu1 %v11019_v15 }
  0xa8   :  { %9497 = vmatpush3.msra.mxu1 %v11155_v40 }
  0xa9   :  { %9498 = vmatprep.subr.mxu1 %v11019_v15 }
  0xaa   :  { %9499 = vmatpush3.msra.mxu1 %v11162_v42 }
  0xab   :  { %9522 = vmatprep.subr.mxu1 %v11019_v15 }
 0x14a   :  { %v11202_v44 = vpop.f32.mrf.mxu1 }
 0x14c   :  { %v564_v45 = vpop.f32.mrf.mxu1 }
 0x14e   :  { %v11204_v46 = vpop.f32.mrf.mxu1 }
 0x150   :  { %v11206_v47 = vpop.f32.mrf.mxu1 }
 0x153   :  { %v9441_v48 = vpop.f32.mrf.mxu0  ;;  %v11211_v49 = vpop.f32.mrf.mxu1 }
 0x155   :  { %v381_v50 = vpop.f32.mrf.mxu0  ;;  %v11213_v51 = vpop.f32.mrf.mxu1 }
 0x15b   :  { %v679_v53 = vpop.f32.mrf.mxu1 }
 0x15c   :  { %v680_v54 = vadd.f32 %v11215_v52, %v679_v53 }
 0x15d   :  { %v9483_v55 = vpop.f32.mrf.mxu1 }
 0x15e   :  { %10594 = vtanh.f32 %v680_v54  ;;  %v8690_v59 = vmul.f32 -1.442695, %v680_v54 }
 0x160   :  { %10596 = vpow2.f32 %v8690_v59 }
 0x16b   :  { %v10595_v57 = vpop.eup %10594 }
 0x16c   :  { %692 = vrot.lane.b32.xlu0 %v10595_v57, %s11026_s4 }
 0x16d   :  { %v10597_v60 = vpop.eup %10596 }
 0x16e   :  { %v686_v61 = vadd.f32 1.0, %v10597_v60 }
 0x170   :  { %227 = vperm.xlu0 %10582, %v215_v58   ;;  %10598 = vrcp.f32 %v686_v61 }
 0x17d   :  { %v10599_v62 = vpop.eup %10598 }
 0x17e   :  { %v690_v2 = vmul.f32 0.0, %v10599_v62 }
 0x1de   :  { %v693_v63 = vpop.permute.xlu0 %692 }
 0x1df   :  { %v695_v1 = vmul.f32 %v10599_v62, %v693_v63 }
 0x1e1   :  { %697 = vrot.lane.b32.xlu1 %v695_v1, %s13147_s5 }
 0x1e5   :  { %263 = vperm.xlu1 %10584, %v215_v58  }
 0x1e9   :  { %10587 = vset.pattern.permute.xlu1 %v11015_v0 }
 0x1eb   :  { %v228_v11 = vpop.permute.xlu0 %227 }
 0x1ec   :  { %v254_v13 = vmul.f32 %v11236_v9, %v228_v11 }
 0x253   :  { %v698_v3 = vpop.permute.xlu1 %697 }
 0x254   :  { %v11232_v4 = vadd.f32 %v698_v3, %v690_v2  ;;  %v216_v3 = vld [vmem:[%s11222_s3 + $0x10] sm:$0xff] }
 0x256   :  { %10600 = vtanh.f32 %v11232_v4 }
 0x260   :  { %v264_v12 = vpop.permute.xlu1 %263 }
 0x261   :  { %v286_v14 = vmul.f32 %v11238_v10, %v264_v12 }
 0x263   :  { %v10601_v18 = vpop.eup %10600  ;;  %v291_v19 = vadd.f32 %v286_v14, %v254_v13  ;;  %v170_v14 = vld [vmem:[%s11076_s13 + $0x20] sm:$0xff] }
 0x264   :  { %703 = vrot.lane.b32.xlu0 %v10601_v18, %s11026_s4 }
 0x265   :  { %v386_v16 = vadd.f32 %v9441_v48, %v291_v19 }
 0x267   :  { %v409_v20 = vmul.f32 %v386_v16, %v386_v16 }
 0x269   :  { %v415_v21 = vsel %vm414_vm0, %v409_v20, 0.0 }
 0x26a   :  { %416 = vadd.xlane.f32.xlu1 %v415_v21 }
 0x2d6   :  { %v704_v22 = vpop.permute.xlu0 %703 }
 0x2d7   :  { %v11244_v23 = vmul.f32 %v10599_v62, %v704_v22 }
 0x2d9   :  { %708 = vrot.lane.b32.xlu0 %v11244_v23, %s11026_s4 }
 0x2dd   :  { %179 = vperm.xlu0 %10582, %v168_v25   ;;  %v171_v25 = vld [vmem:[%s11076_s13 + $0x28] sm:$0xff]  ;;  %s11411_s13 = sld [smem:[%s13146_s0 + %s11029_s10]]  }
 0x2de   :  { %s11624_s10 = sld [smem:[%s13146_s0 + %s11044_s7]]   ;;  %s11049_s7 = smov 18  }
 0x2df   :  { %s11712_s12 = sld [smem:[%s13146_s0 + %s11049_s7]]   ;;  %s11051_s7 = smov 23  }
 0x2e1   :  { %182 = vperm.xlu0 %10582, %v169_v27   ;;  %v11297_v27 = vld [vmem:[%s11222_s3 + $0x18] sm:$0xff] }
 0x2f3   :  { %v417_v28 = vpop.xlane.xlu1 %416 }
 0x2f4   :  { %10602 = vrsqrt.f32 %v417_v28  ;;  %vm432_vm12 = vcmp.eq.f32.partialorder %v417_v28, inf  ;;  %v435_v34 = vand.u32 2147483648, %v417_v28  ;;  %vm434_vm13 = vcmp.eq.f32.partialorder %v417_v28, 0.0 }
 0x301   :  { %v10603_v29 = vpop.eup %10602 }
 0x302   :  { %v431_v31 = vmul.f32 %v10603_v29, %v417_v28 }
 0x304   :  { %v433_v33 = vsel %vm432_vm12, %v417_v28, %v431_v31 }
 0x305   :  { %v436_v35 = vsel %vm434_vm13, %v435_v34, %v433_v33 }
 0x306   :  { %v465_v36 = vmax.f32 %v436_v35, 1e-12 }
 0x308   :  { %10604 = vrcp.f32 %v465_v36 }
 0x315   :  { %v10605_v38 = vpop.eup %10604 }
 0x316   :  { %v471_v41 = vmul.f32 %v10605_v38, %v386_v16 }
 0x318   :  { %v569_v43 = vadd.f32 %v11202_v44, %v471_v41 }
 0x34b   :  { %v709_v45 = vpop.permute.xlu0 %708 }
 0x34c   :  { %v711_v48 = vsel %vm414_vm0, %v569_v43, %v709_v45 }
 0x34d   :  { %9501 = vmatmul.mubr.msk.f32.vlgmr.msra.gmra.mxu1 %vm609_vm11, %v711_v48 }
 0x34e   :  { %9523 = vmatpush3.msra.mxu1 %v11105_v24  ;;  %9538 = vmatprep.mubr.msk.f32.mxu1 %vm11022_vm10, %v11019_v15 }
 0x34f   :  { %9524 = vmatprep.subr.mxu1 %v11019_v15 }
 0x350   :  { %9525 = vmatpush3.msra.mxu1 %v11110_v26 }
 0x351   :  { %9526 = vmatprep.subr.mxu1 %v11019_v15 }
 0x352   :  { %9527 = vmatpush3.msra.mxu1 %v11118_v30 }
 0x353   :  { %9528 = vmatprep.subr.mxu1 %v11019_v15 }
 0x354   :  { %9529 = vmatpush3.msra.mxu1 %v11128_v32 }
 0x355   :  { %9530 = vmatprep.subr.mxu1 %v11019_v15 }
 0x356   :  { %9531 = vmatpush3.msra.mxu1 %v11140_v37 }
 0x357   :  { %9532 = vmatprep.subr.mxu1 %v11019_v15 }
 0x358   :  { %v180_v44 = vpop.permute.xlu0 %179  ;;  %9533 = vmatpush3.msra.mxu1 %v11148_v39 }
 0x359   :  { %vm192_vm14 = vcmp.eq.s32.totalorder %v180_v44, %v11090_v17  ;;  %9534 = vmatprep.subr.mxu1 %v11019_v15 }
 0x35a   :  { %v8672_v50 = vsel %vm192_vm14, 1.0, %v11019_v15  ;;  %9535 = vmatpush3.msra.mxu1 %v11155_v40  ;;  %vm1279_vm14 = vcmask 1043456  }
 0x35b   :  { %9442 = vmatprep.mubr.msk.f32.mxu0 %vm296_vm7, %v8672_v50  ;;  %9536 = vmatprep.subr.mxu1 %v11019_v15 }
 0x35c   :  { %v183_v53 = vpop.permute.xlu0 %182  ;;  %9537 = vmatpush3.msra.mxu1 %v11162_v42 }
 0x35d   :  { %vm193_vm15 = vcmp.eq.s32.totalorder %v183_v53, %v11090_v17  ;;  %9560 = vmatprep.subr.mxu1 %v11019_v15 }
 0x35e   :  { %v8673_v54 = vsel %vm193_vm15, 1.0, %v11019_v15  ;;  %vm1377_vm15 = vcmask 64512  }
 0x35f   :  { %9443 = vmatmul.mubr.msk.f32.gmra.mxu0 %vm296_vm7, %v8673_v54 }
 0x40d   :  { %v781_v55 = vpop.f32.mrf.mxu1 }
 0x40e   :  { %v782_v57 = vadd.f32 %v11215_v52, %v781_v55 }
 0x40f   :  { %v9502_v58 = vpop.f32.mrf.mxu1 }
 0x410   :  { %10606 = vtanh.f32 %v782_v57  ;;  %v8692_v60 = vmul.f32 -1.442695, %v782_v57 }
 0x412   :  { %10608 = vpow2.f32 %v8692_v60 }
 0x41d   :  { %v10607_v59 = vpop.eup %10606 }
 0x41e   :  { %794 = vrot.lane.b32.xlu0 %v10607_v59, %s11026_s4 }
 0x41f   :  { %v10609_v61 = vpop.eup %10608  ;;  %v11288_v12 = vpop.f32.mrf.mxu0 }
 0x420   :  { %v788_v62 = vadd.f32 1.0, %v10609_v61 }
 0x421   :  { %v390_v16 = vpop.f32.mrf.mxu0 }
 0x422   :  { %10610 = vrcp.f32 %v788_v62 }
 0x42f   :  { %v10611_v63 = vpop.eup %10610 }
 0x430   :  { %v792_v5 = vmul.f32 %v10611_v63, %v11232_v4 }
 0x490   :  { %v795_v1 = vpop.permute.xlu0 %794 }
 0x491   :  { %v797_v2 = vmul.f32 %v10611_v63, %v795_v1 }
 0x493   :  { %799 = vrot.lane.b32.xlu0 %v797_v2, %s13147_s5 }
 0x497   :  { %232 = vperm.xlu0 %10582, %v216_v3  }
 0x49b   :  { %10585 = vset.pattern.permute.xlu0 %v11024_v56 }
 0x49c   :  { %267 = vperm.xlu0 %10585, %v216_v3  }
 0x4a0   :  { %10586 = vset.pattern.permute.xlu0 %v11015_v0 }
 0x505   :  { %v800_v6 = vpop.permute.xlu0 %799 }
 0x506   :  { %v11284_v7 = vadd.f32 %v800_v6, %v792_v5 }
 0x508   :  { %10612 = vtanh.f32 %v11284_v7 }
 0x512   :  { %v233_v8 = vpop.permute.xlu0 %232 }
 0x513   :  { %v255_v18 = vmul.f32 %v11236_v9, %v233_v8 }
 0x515   :  { %v10613_v11 = vpop.eup %10612 }
 0x516   :  { %805 = vrot.lane.b32.xlu0 %v10613_v11, %s11026_s4 }
 0x517   :  { %v268_v13 = vpop.permute.xlu0 %267 }
 0x518   :  { %v287_v19 = vmul.f32 %v11238_v10, %v268_v13 }
 0x51a   :  { %v292_v4 = vadd.f32 %v287_v19, %v255_v18  ;;  %185 = vperm.xlu0 %10586, %v170_v14  }
 0x51c   :  { %v391_v20 = vadd.f32 %v390_v16, %v292_v4 }
 0x51e   :  { %v410_v21 = vmul.f32 %v391_v20, %v391_v20  ;;  %10588 = vset.pattern.permute.xlu0 %v11024_v56 }
 0x520   :  { %v418_v22 = vsel %vm414_vm0, %v410_v21, 0.0 }
 0x521   :  { %419 = vadd.xlane.f32.xlu1 %v418_v22 }
 0x532   :  { %188 = vperm.xlu1 %10587, %v171_v25  }
 0x536   :  { %237 = vperm.xlu1 %10587, %v11297_v27  }
 0x588   :  { %v806_v28 = vpop.permute.xlu0 %805 }
 0x589   :  { %v11300_v29 = vmul.f32 %v10611_v63, %v806_v28 }
 0x58b   :  { %810 = vrot.lane.b32.xlu0 %v11300_v29, %s11026_s4 }
 0x595   :  { %v186_v31 = vpop.permute.xlu0 %185 }
 0x596   :  { %vm194_vm1 = vcmp.eq.s32.totalorder %v186_v31, %v11090_v17 }
 0x597   :  { %v8674_v33 = vsel %vm194_vm1, 1.0, %v11019_v15  ;;  %vm2052_vm1 = vcmask 195584  }
 0x598   :  { %9445 = vmatprep.mubr.msk.f32.mxu0 %vm296_vm7, %v8674_v33 }
 0x5aa   :  { %v420_v34 = vpop.xlane.xlu1 %419 }
 0x5ab   :  { %10614 = vrsqrt.f32 %v420_v34  ;;  %vm439_vm3 = vcmp.eq.f32.partialorder %v420_v34, inf  ;;  %v442_v45 = vand.u32 2147483648, %v420_v34  ;;  %vm441_vm4 = vcmp.eq.f32.partialorder %v420_v34, 0.0 }
 0x5ae   :  { %v189_v35 = vpop.permute.xlu1 %188 }
 0x5af   :  { %vm195_vm2 = vcmp.eq.s32.totalorder %v189_v35, %v11090_v17 }
 0x5b0   :  { %v8675_v36 = vsel %vm195_vm2, 1.0, %v11019_v15  ;;  %vm4948_vm2 = vcmask 1040384  }
 0x5b1   :  { %9446 = vmatmul.mubr.msk.f32.gmra.mxu0 %vm296_vm7, %v8675_v36 }
 0x5b2   :  { %9519 = vmatprep.mubr.msk.f32.mxu0 %vm11022_vm10, %v11019_v15  ;;  %v238_v18 = vpop.permute.xlu1 %237 }
 0x5b3   :  { %v256_v4 = vmul.f32 %v11236_v9, %v238_v18 }
 0x5b8   :  { %v10615_v38 = vpop.eup %10614 }
 0x5b9   :  { %v438_v41 = vmul.f32 %v10615_v38, %v420_v34 }
 0x5bb   :  { %v440_v43 = vsel %vm439_vm3, %v420_v34, %v438_v41 }
 0x5bc   :  { %v443_v48 = vsel %vm441_vm4, %v442_v45, %v440_v43  ;;  %vm8626_vm4 = vcmask 236544  }
 0x5bd   :  { %v466_v44 = vmax.f32 %v443_v48, 1e-12 }
 0x5bf   :  { %10616 = vrcp.f32 %v466_v44 }
 0x5cc   :  { %v10617_v50 = vpop.eup %10616 }
 0x5cd   :  { %v473_v53 = vmul.f32 %v10617_v50, %v391_v20 }
 0x5cf   :  { %v574_v17 = vadd.f32 %v11206_v47, %v473_v53 }
 0x5fd   :  { %v811_v54 = vpop.permute.xlu0 %810 }
 0x5fe   :  { %v813_v55 = vsel %vm414_vm0, %v574_v17, %v811_v54 }
 0x5ff   :  { %9520 = vmatmul.mubr.msk.f32.vlgmr.msra.gmra.mxu0 %vm609_vm11, %v813_v55 }
 0x600   :  { %9542 = vmatpush3.msra.mxu0 %v11105_v24  ;;  %9557 = vmatprep.mubr.msk.f32.mxu0 %vm11022_vm10, %v11019_v15 }
 0x601   :  { %9543 = vmatprep.subr.mxu0 %v11019_v15 }
 0x602   :  { %9544 = vmatpush3.msra.mxu0 %v11110_v26 }
 0x603   :  { %9545 = vmatprep.subr.mxu0 %v11019_v15 }
 0x604   :  { %9546 = vmatpush3.msra.mxu0 %v11118_v30 }
 0x605   :  { %9547 = vmatprep.subr.mxu0 %v11019_v15 }
 0x606   :  { %9548 = vmatpush3.msra.mxu0 %v11128_v32 }
 0x607   :  { %9549 = vmatprep.subr.mxu0 %v11019_v15 }
 0x608   :  { %9550 = vmatpush3.msra.mxu0 %v11140_v37 }
 0x609   :  { %9551 = vmatprep.subr.mxu0 %v11019_v15 }
 0x60a   :  { %9552 = vmatpush3.msra.mxu0 %v11148_v39 }
 0x60b   :  { %9553 = vmatprep.subr.mxu0 %v11019_v15 }
 0x60c   :  { %9554 = vmatpush3.msra.mxu0 %v11155_v40 }
 0x60d   :  { %9555 = vmatprep.subr.mxu0 %v11019_v15 }
 0x60e   :  { %9556 = vmatpush3.msra.mxu0 %v11162_v42 }
 0x671   :  { %v11332_v47 = vpop.f32.mrf.mxu0 }
 0x673   :  { %v11334_v57 = vpop.f32.mrf.mxu0 }
 0x6bf   :  { %v883_v58 = vpop.f32.mrf.mxu0 }
 0x6c0   :  { %v884_v59 = vadd.f32 %v11215_v52, %v883_v58 }
 0x6c1   :  { %v9521_v60 = vpop.f32.mrf.mxu0 }
 0x6c2   :  { %10618 = vtanh.f32 %v884_v59  ;;  %v8694_v62 = vmul.f32 -1.442695, %v884_v59 }
 0x6c4   :  { %10620 = vpow2.f32 %v8694_v62 }
 0x6cf   :  { %v10619_v61 = vpop.eup %10618 }
 0x6d0   :  { %896 = vrot.lane.b32.xlu0 %v10619_v61, %s11026_s4 }
 0x6d1   :  { %v10621_v63 = vpop.eup %10620 }
 0x6d2   :  { %v890_v1 = vadd.f32 1.0, %v10621_v63 }
 0x6d4   :  { %10622 = vrcp.f32 %v890_v1 }
 0x6e1   :  { %v10623_v2 = vpop.eup %10622 }
 0x6e2   :  { %v894_v6 = vmul.f32 %v10623_v2, %v11284_v7 }
 0x742   :  { %v897_v3 = vpop.permute.xlu0 %896 }
 0x743   :  { %v899_v5 = vmul.f32 %v10623_v2, %v897_v3 }
 0x745   :  { %901 = vrot.lane.b32.xlu0 %v899_v5, %s13147_s5 }
 0x749   :  { %271 = vperm.xlu0 %10588, %v11297_v27  }
 0x74d   :  { %10589 = vset.pattern.permute.xlu0 %v11015_v0 }
 0x7b7   :  { %v902_v8 = vpop.permute.xlu0 %901 }
 0x7b8   :  { %v11342_v11 = vadd.f32 %v902_v8, %v894_v6 }
 0x7ba   :  { %10624 = vtanh.f32 %v11342_v11 }
 0x7c4   :  { %v272_v14 = vpop.permute.xlu0 %271 }
 0x7c5   :  { %v288_v19 = vmul.f32 %v11238_v10, %v272_v14 }
 0x7c7   :  { %v10625_v13 = vpop.eup %10624  ;;  %v293_v16 = vadd.f32 %v288_v19, %v256_v4 }
 0x7c8   :  { %907 = vrot.lane.b32.xlu1 %v10625_v13, %s11026_s4 }
 0x7c9   :  { %v396_v20 = vadd.f32 %v11288_v12, %v293_v16 }
 0x7cb   :  { %v411_v21 = vmul.f32 %v396_v20, %v396_v20 }
 0x7cd   :  { %v421_v7 = vsel %vm414_vm0, %v411_v21, 0.0 }
 0x7ec   :  { %422 = vadd.xlane.f32.xlu1 %v421_v7 }
 0x83a   :  { %v908_v22 = vpop.permute.xlu1 %907 }
 0x83b   :  { %v11350_v25 = vmul.f32 %v10623_v2, %v908_v22 }
 0x83d   :  { %912 = vrot.lane.b32.xlu0 %v11350_v25, %s11026_s4 }
 0x875   :  { %v423_v27 = vpop.xlane.xlu1 %422 }
 0x876   :  { %10626 = vrsqrt.f32 %v423_v27  ;;  %vm446_vm5 = vcmp.eq.f32.partialorder %v423_v27, inf  ;;  %v449_v34 = vand.u32 2147483648, %v423_v27  ;;  %vm448_vm6 = vcmp.eq.f32.partialorder %v423_v27, 0.0 }
 0x883   :  { %v10627_v28 = vpop.eup %10626 }
 0x884   :  { %v445_v31 = vmul.f32 %v10627_v28, %v423_v27 }
 0x886   :  { %v447_v33 = vsel %vm446_vm5, %v423_v27, %v445_v31  ;;  %vm8628_vm5 = vcmask 277504  }
 0x887   :  { %v450_v35 = vsel %vm448_vm6, %v449_v34, %v447_v33 }
 0x888   :  { %v467_v12 = vmax.f32 %v450_v35, 1e-12 }
 0x88a   :  { %10628 = vrcp.f32 %v467_v12  ;;  %v219_v12 = vld [vmem:[%s11222_s3 + $0x28] sm:$0xff] }
 0x897   :  { %v10629_v36 = vpop.eup %10628 }
 0x898   :  { %v475_v38 = vmul.f32 %v10629_v36, %v396_v20 }
 0x89a   :  { %v579_v41 = vadd.f32 %v11204_v46, %v475_v38 }
 0x8af   :  { %v913_v43 = vpop.permute.xlu0 %912 }
 0x8b0   :  { %v915_v45 = vsel %vm414_vm0, %v579_v41, %v913_v43 }
 0x8b1   :  { %9539 = vmatmul.mubr.msk.f32.vlgmr.msra.gmra.mxu1 %vm609_vm11, %v915_v45 }
 0x8b2   :  { %9561 = vmatpush3.msra.mxu1 %v11105_v24  ;;  %9576 = vmatprep.mubr.msk.f32.mxu1 %vm11022_vm10, %v11019_v15 }
 0x8b3   :  { %9562 = vmatprep.subr.mxu1 %v11019_v15 }
 0x8b4   :  { %9563 = vmatpush3.msra.mxu1 %v11110_v26 }
 0x8b5   :  { %9564 = vmatprep.subr.mxu1 %v11019_v15 }
 0x8b6   :  { %9565 = vmatpush3.msra.mxu1 %v11118_v30 }
 0x8b7   :  { %9566 = vmatprep.subr.mxu1 %v11019_v15 }
 0x8b8   :  { %9567 = vmatpush3.msra.mxu1 %v11128_v32 }
 0x8b9   :  { %9568 = vmatprep.subr.mxu1 %v11019_v15 }
 0x8ba   :  { %9569 = vmatpush3.msra.mxu1 %v11140_v37 }
 0x8bb   :  { %9570 = vmatprep.subr.mxu1 %v11019_v15 }
 0x8bc   :  { %9571 = vmatpush3.msra.mxu1 %v11148_v39 }
 0x8bd   :  { %9572 = vmatprep.subr.mxu1 %v11019_v15 }
 0x8be   :  { %9573 = vmatpush3.msra.mxu1 %v11155_v40 }
 0x8bf   :  { %9574 = vmatprep.subr.mxu1 %v11019_v15 }
 0x8c0   :  { %9575 = vmatpush3.msra.mxu1 %v11162_v42  ;;  %v218_v42 = vld [vmem:[%s11222_s3 + $0x20] sm:$0xff]  ;;  %s11043_s3 = smov 24  }
 0x8c1   :  { %9590 = vmatprep.subr.mxu1 %v11019_v15 }
 0x971   :  { %v985_v24 = vpop.f32.mrf.mxu1 }
 0x972   :  { %v986_v26 = vadd.f32 %v11215_v52, %v985_v24 }
 0x973   :  { %v9540_v30 = vpop.f32.mrf.mxu1 }
 0x974   :  { %10630 = vtanh.f32 %v986_v26  ;;  %v8696_v37 = vmul.f32 -1.442695, %v986_v26 }
 0x976   :  { %10632 = vpow2.f32 %v8696_v37 }
 0x981   :  { %v10631_v32 = vpop.eup %10630 }
 0x982   :  { %998 = vrot.lane.b32.xlu0 %v10631_v32, %s11026_s4 }
 0x983   :  { %v10633_v39 = vpop.eup %10632 }
 0x984   :  { %v992_v46 = vadd.f32 1.0, %v10633_v39  ;;  %v8701_v39 = vld [vmem:[%s11411_s13 + $0x8] sm:$0xff] }
 0x986   :  { %10634 = vrcp.f32 %v992_v46 }
 0x993   :  { %v10635_v40 = vpop.eup %10634 }
 0x994   :  { %v996_v50 = vmul.f32 %v10635_v40, %v11342_v11 }
 0x9f4   :  { %v999_v48 = vpop.permute.xlu0 %998 }
 0x9f5   :  { %v1001_v44 = vmul.f32 %v10635_v40, %v999_v48 }
 0x9f7   :  { %1003 = vrot.lane.b32.xlu0 %v1001_v44, %s13147_s5 }
 0x9fb   :  { %242 = vperm.xlu0 %10589, %v218_v42  }
 0x9ff   :  { %10590 = vset.pattern.permute.xlu0 %v11024_v56 }
 0xa00   :  { %275 = vperm.xlu0 %10590, %v218_v42  }
 0xa04   :  { %10592 = vset.pattern.permute.xlu0 %v11015_v0 }
 0xa69   :  { %v1004_v53 = vpop.permute.xlu0 %1003 }
 0xa6a   :  { %v1006_v17 = vadd.f32 %v1004_v53, %v996_v50 }
 0xa6c   :  { %10636 = vtanh.f32 %v1006_v17 }
 0xa76   :  { %v243_v55 = vpop.permute.xlu0 %242 }
 0xa77   :  { %v257_v59 = vmul.f32 %v11236_v9, %v243_v55 }
 0xa79   :  { %v10637_v54 = vpop.eup %10636 }
 0xa7a   :  { %1009 = vrot.lane.b32.xlu0 %v10637_v54, %s11026_s4 }
 0xa7b   :  { %v276_v58 = vpop.permute.xlu0 %275 }
 0xa7c   :  { %v289_v60 = vmul.f32 %v11238_v10, %v276_v58 }
 0xa7e   :  { %v294_v61 = vadd.f32 %v289_v60, %v257_v59 }
 0xa80   :  { %v401_v62 = vadd.f32 %v11334_v57, %v294_v61 }
 0xa82   :  { %v412_v63 = vmul.f32 %v401_v62, %v401_v62 }
 0xa84   :  { %v424_v1 = vsel %vm414_vm0, %v412_v63, 0.0 }
 0xa99   :  { %425 = vadd.xlane.f32.xlu0 %v424_v1 }
 0xaec   :  { %v1010_v2 = vpop.permute.xlu0 %1009 }
 0xaed   :  { %v11387_v3 = vmul.f32 %v10635_v40, %v1010_v2 }
 0xaef   :  { %1014 = vrot.lane.b32.xlu1 %v11387_v3, %s11026_s4 }
 0xb22   :  { %v426_v5 = vpop.xlane.xlu0 %425 }
 0xb23   :  { %10638 = vrsqrt.f32 %v426_v5  ;;  %vm453_vm8 = vcmp.eq.f32.partialorder %v426_v5, inf  ;;  %v456_v13 = vand.u32 2147483648, %v426_v5  ;;  %vm455_vm9 = vcmp.eq.f32.partialorder %v426_v5, 0.0 }
 0xb30   :  { %v10639_v6 = vpop.eup %10638 }
 0xb31   :  { %v452_v8 = vmul.f32 %v10639_v6, %v426_v5 }
 0xb33   :  { %v454_v11 = vsel %vm453_vm8, %v426_v5, %v452_v8  ;;  %v8702_v8 = vld [vmem:[%s11411_s13 + $0x10] sm:$0xff] }
 0xb34   :  { %v457_v14 = vsel %vm455_vm9, %v456_v13, %v454_v11  ;;  %v8703_v11 = vld [vmem:[%s11411_s13 + $0x18] sm:$0xff]  ;;  %v8704_v13 = vld [vmem:[%s11411_s13 + $0x20] sm:$0xff] }
 0xb35   :  { %v468_v57 = vmax.f32 %v457_v14, 1e-12  ;;  %v8705_v14 = vld [vmem:[%s11411_s13 + $0x28] sm:$0xff] }
 0xb37   :  { %10640 = vrcp.f32 %v468_v57 }
 0xb44   :  { %v10641_v18 = vpop.eup %10640 }
 0xb45   :  { %v477_v19 = vmul.f32 %v10641_v18, %v401_v62 }
 0xb47   :  { %v584_v4 = vadd.f32 %v11213_v51, %v477_v19 }
 0xb61   :  { %v1015_v16 = vpop.permute.xlu1 %1014 }
 0xb62   :  { %v1017_v20 = vsel %vm414_vm0, %v584_v4, %v1015_v16  ;;  %v1285_v16 = vld [vmem:[%s11435_s18 + $0x18] sm:$0xff] }
 0xb63   :  { %9558 = vmatmul.mubr.msk.f32.vlgmr.msra.gmra.mxu0 %vm609_vm11, %v1017_v20  ;;  %v1284_v20 = vld [vmem:[%s11435_s18 + $0x10] sm:$0xff]  ;;  %9579 = vmatprep.subr.mxu0 %v1285_v16 }
 0xb64   :  { %9580 = vmatpush3.msra.mxu0 %v1285_v16 }
 0xb65   :  { %9581 = vmatprep.subr.mxu0 %v1284_v20 }
 0xb66   :  { %9582 = vmatpush3.msra.mxu0 %v1284_v20 }
 0xc23   :  { %v1087_v21 = vpop.f32.mrf.mxu0 }
 0xc24   :  { %v1088_v7 = vadd.f32 %v11215_v52, %v1087_v21 }
 0xc25   :  { %v9559_v22 = vpop.f32.mrf.mxu0 }
 0xc26   :  { %10642 = vtanh.f32 %v1088_v7  ;;  %v8698_v28 = vmul.f32 -1.442695, %v1088_v7 }
 0xc28   :  { %10644 = vpow2.f32 %v8698_v28 }
 0xc33   :  { %v10643_v27 = vpop.eup %10642 }
 0xc34   :  { %1100 = vrot.lane.b32.xlu1 %v10643_v27, %s11026_s4 }
 0xc35   :  { %v10645_v31 = vpop.eup %10644 }
 0xc36   :  { %v1094_v33 = vadd.f32 1.0, %v10645_v31  ;;  %v1283_v31 = vld [vmem:[%s11435_s18 + $0x8] sm:$0xff] }
 0xc37   :  { %9583 = vmatprep.subr.mxu0 %v1283_v31 }
 0xc38   :  { %10646 = vrcp.f32 %v1094_v33  ;;  %9584 = vmatpush3.msra.mxu0 %v1283_v31 }
 0xc45   :  { %v10647_v51 = vpop.eup %10646 }
 0xc46   :  { %v1098_v36 = vmul.f32 %v10647_v51, %v1006_v17 }
 0xca6   :  { %v1101_v34 = vpop.permute.xlu1 %1100 }
 0xca7   :  { %v1103_v35 = vmul.f32 %v10647_v51, %v1101_v34  ;;  %v1282_v34 = vld [vmem:[%s11435_s18] sm:$0xff] }
 0xca8   :  { %9585 = vmatprep.subr.mxu0 %v1282_v34 }
 0xca9   :  { %1105 = vrot.lane.b32.xlu1 %v1103_v35, %s13147_s5  ;;  %9586 = vmatpush3.msra.mxu0 %v1282_v34 }
 0xcaa   :  { %9595 = vmatprep.subr.mxu0 %v11019_v15 }
 0xcad   :  { %247 = vperm.xlu1 %10587, %v219_v12  }
 0xcb1   :  { %10591 = vset.pattern.permute.xlu1 %v11024_v56 }
 0xcb2   :  { %279 = vperm.xlu1 %10591, %v219_v12  }
 0xcb6   :  { %10593 = vset.pattern.permute.xlu1 %v11015_v0 }
 0xd1b   :  { %v1106_v38 = vpop.permute.xlu1 %1105 }
 0xd1c   :  { %v11400_v41 = vadd.f32 %v1106_v38, %v1098_v36 }
 0xd1e   :  { %10648 = vtanh.f32 %v11400_v41 }
 0xd28   :  { %v248_v43 = vpop.permute.xlu1 %247 }
 0xd29   :  { %v258_v26 = vmul.f32 %v11236_v9, %v248_v43 }
 0xd2b   :  { %v10649_v45 = vpop.eup %10648 }
 0xd2c   :  { %1111 = vrot.lane.b32.xlu0 %v10649_v45, %s11026_s4 }
 0xd2d   :  { %v280_v24 = vpop.permute.xlu1 %279 }
 0xd2e   :  { %v290_v30 = vmul.f32 %v11238_v10, %v280_v24 }
 0xd30   :  { %v295_v32 = vadd.f32 %v290_v30, %v258_v26 }
 0xd32   :  { %v406_v56 = vadd.f32 %v11332_v47, %v295_v32  ;;  %v1270_v32 = vld [vmem:[%s11081_s17] sm:$0xf]  ;;  %s11464_s17 = sld [smem:[%s13146_s0 + %s11031_s19]]  }
 0xd33   :  { %s11665_s19 = sld [smem:[%s13146_s0 + %s11045_s14]]  }
 0xd34   :  { %v413_v37 = vmul.f32 %v406_v56, %v406_v56  ;;  %s11691_s14 = sld [smem:[%s13146_s0 + %s11047_s9]]  }
 0xd35   :  { %s11720_s9 = sld [smem:[%s13146_s0 + %s11050_s15]]   ;;  %s11057_s15 = smov 26  }
 0xd36   :  { %v427_v0 = vsel %vm414_vm0, %v413_v37, 0.0  ;;  %s8660_s20 = sld [smem:[%s13146_s0 + %s11057_s15]]  }
 0xd37   :  { %428 = vadd.xlane.f32.xlu1 %v427_v0 }
 0xd48   :  { %1229 = vperm.xlu1 %10593, %v8701_v39  }
 0xd9e   :  { %v1112_v46 = vpop.permute.xlu0 %1111 }
 0xd9f   :  { %v11414_v9 = vmul.f32 %v10647_v51, %v1112_v46  ;;  %v8706_v46 = vld [vmem:[%s11464_s17] ss:$0 sm:$0xff] }
 0xda1   :  { %1116 = vrot.lane.b32.xlu0 %v11414_v9, %s11026_s4 }
 0xdc0   :  { %v429_v10 = vpop.xlane.xlu1 %428 }
 0xdc1   :  { %10650 = vrsqrt.f32 %v429_v10  ;;  %vm460_vm12 = vcmp.eq.f32.partialorder %v429_v10, inf  ;;  %v463_v44 = vand.u32 2147483648, %v429_v10  ;;  %vm462_vm13 = vcmp.eq.f32.partialorder %v429_v10, 0.0 }
 0xdc4   :  { %v1230_v27 = vpop.permute.xlu1 %1229 }
 0xdc5   :  { %v1232_v33 = vmul.f32 %v1230_v27, %v11300_v29 }
 0xdce   :  { %v10651_v47 = vpop.eup %10650 }
 0xdcf   :  { %v459_v40 = vmul.f32 %v10651_v47, %v429_v10 }
 0xdd1   :  { %v461_v48 = vsel %vm460_vm12, %v429_v10, %v459_v40 }
 0xdd2   :  { %v464_v42 = vsel %vm462_vm13, %v463_v44, %v461_v48 }
 0xdd3   :  { %v469_v50 = vmax.f32 %v464_v42, 1e-12 }
 0xdd5   :  { %10652 = vrcp.f32 %v469_v50 }
 0xde2   :  { %v10653_v53 = vpop.eup %10652 }
 0xde3   :  { %v479_v17 = vmul.f32 %v10653_v53, %v406_v56 }
 0xde5   :  { %v589_v54 = vadd.f32 %v11211_v49, %v479_v17 }
 0xe13   :  { %v1117_v55 = vpop.permute.xlu0 %1116 }
 0xe14   :  { %v1119_v58 = vsel %vm414_vm0, %v589_v54, %v1117_v55 }
 0xe15   :  { %9577 = vmatmul.mubr.msk.f32.vlgmr.msra.gmra.mxu1 %vm609_vm11, %v1119_v58 }
 0xe16   :  { %9592 = vmatprep.mubr.msk.f32.mxu1 %vm11022_vm10, %v11019_v15 }
 0xed5   :  { %v1189_v59 = vpop.f32.mrf.mxu1 }
 0xed6   :  { %v1190_v60 = vadd.f32 %v11215_v52, %v1189_v59  ;;  %v1217_v52 = vld [vmem:[%s11411_s13] sm:$0xff]  ;;  %s11645_s13 = sld [smem:[%s13146_s0 + %s11042_s2]]  }
 0xed7   :  { %v9578_v61 = vpop.f32.mrf.mxu1 }
 0xed8   :  { %10654 = vtanh.f32 %v1190_v60  ;;  %v8700_v49 = vmul.f32 -1.442695, %v1190_v60 }
 0xeda   :  { %10656 = vpow2.f32 %v8700_v49 }
 0xee5   :  { %v10655_v62 = vpop.eup %10654 }
 0xee6   :  { %1202 = vrot.lane.b32.xlu0 %v10655_v62, %s11026_s4 }
 0xee7   :  { %v10657_v63 = vpop.eup %10656 }
 0xee8   :  { %v1196_v1 = vadd.f32 1.0, %v10657_v63 }
 0xeea   :  { %10658 = vrcp.f32 %v1196_v1 }
 0xef7   :  { %v10659_v2 = vpop.eup %10658 }
 0xef8   :  { %v1200_v57 = vmul.f32 %v10659_v2, %v11400_v41 }
 0xf58   :  { %v1203_v5 = vpop.permute.xlu0 %1202 }
 0xf59   :  { %v1205_v6 = vmul.f32 %v10659_v2, %v1203_v5 }
 0xf5b   :  { %1207 = vrot.lane.b32.xlu0 %v1205_v6, %s13147_s5 }
 0xf5f   :  { %1220 = vperm.xlu0 %10592, %v1217_v52  }
 0xf63   :  { %1238 = vperm.xlu0 %10592, %v8702_v8  }
 0xf67   :  { %1247 = vperm.xlu0 %10592, %v8703_v11  }
 0xf6b   :  { %1256 = vperm.xlu0 %10592, %v8704_v13  }
 0xf6f   :  { %1265 = vperm.xlu0 %10592, %v8705_v14  }
 0xfcd   :  { %v1208_v18 = vpop.permute.xlu0 %1207 }
 0xfce   :  { %v1210_v19 = vadd.f32 %v1208_v18, %v1200_v57 }
 0xfd0   :  { %10660 = vtanh.f32 %v1210_v19 }
 0xfda   :  { %v1221_v21 = vpop.permute.xlu0 %1220 }
 0xfdb   :  { %v1223_v28 = vmul.f32 %v1221_v21, %v11244_v23 }
 0xfdd   :  { %v10661_v4 = vpop.eup %10660  ;;  %v1233_v12 = vadd.f32 %v1232_v33, %v1223_v28 }
 0xfde   :  { %1213 = vrot.lane.b32.xlu1 %v10661_v4, %s11026_s4  ;;  %v1239_v7 = vpop.permute.xlu0 %1238 }
 0xfdf   :  { %v1241_v51 = vmul.f32 %v1239_v7, %v11350_v25 }
 0xfe1   :  { %v1242_v38 = vadd.f32 %v1241_v51, %v1233_v12 }
 0xfe2   :  { %v1248_v22 = vpop.permute.xlu0 %1247 }
 0xfe3   :  { %v1250_v36 = vmul.f32 %v1248_v22, %v11387_v3 }
 0xfe5   :  { %v1251_v43 = vadd.f32 %v1250_v36, %v1242_v38 }
 0xfe6   :  { %v1257_v35 = vpop.permute.xlu0 %1256 }
 0xfe7   :  { %v1259_v23 = vmul.f32 %v1257_v35, %v11414_v9 }
 0xfe9   :  { %v1260_v24 = vadd.f32 %v1259_v23, %v1251_v43 }
 0xfea   :  { %v1266_v29 = vpop.permute.xlu0 %1265 }
0x1050   :  { %v1214_v41 = vpop.permute.xlu1 %1213 }
0x1051   :  { %v1216_v45 = vmul.f32 %v10659_v2, %v1214_v41 }
0x1053   :  { %v1268_v25 = vmul.f32 %v1266_v29, %v1216_v45 }
0x1055   :  { %v1269_v26 = vadd.f32 %v1268_v25, %v1260_v24 }
0x1057   :  { %1276 = vrot.lane.b32.xlu1 %v1269_v26, %s13147_s5  ;;  %v1272_v30 = vrot.slane %v1269_v26, 4 }
0x1059   :  { %1273 = vrot.lane.b32.xlu0 %v1272_v30, %s13147_s5  ;;  %s11741_s5 = sld [smem:[%s13146_s0 + %s11043_s3]]  }
0x10c9   :  { %v1277_v3 = vpop.permute.xlu1 %1276 }
0x10ca   :  { %v11453_v0 = vsel %vm1279_vm14, %v1270_v32, %v1277_v3 }
0x10cb   :  { %v1274_v56 = vpop.permute.xlu0 %1273 }
0x10cc   :  { %v11451_v37 = vsel %vm1279_vm14, %v1270_v32, %v1274_v56 }
0x10cd   :  { %9587 = vmatprep.mubr.msk.f32.mxu0 %vm414_vm0, %v11451_v37 }
0x10ce   :  { %9588 = vmatmul.mubr.msk.f32.vlgmr.msra.gmra.mxu0 %vm414_vm0, %v11453_v0 }
0x10cf   :  { %9597 = vmatprep.mubr.msk.f32.mxu0 %vm11022_vm10, %v11019_v15 }
0x118e   :  { %v9589_v39 = vpop.f32.mrf.mxu0 }
0x118f   :  { %v11481_v47 = vadd.f32 %v9589_v39, %v8706_v46 }
0x1190   :  { %v1365_v9 = vpop.f32.mrf.mxu0 }
0x1191   :  { %v11467_v10 = vadd.f32 %v8706_v46, %v1365_v9 }
0x1193   :  { %1542 = vrot.lane.b32.xlu1 %v11467_v10, %s11032_s22  ;;  %1375 = vrot.lane.b32.xlu0 %v11467_v10, %s11033_s23 }
0x1197   :  { %1708 = vrot.lane.b32.xlu1 %v11467_v10, %s11034_s24  ;;  %1540 = vrot.lane.b32.xlu0 %v11467_v10, %s11035_s25 }
0x119b   :  { %1874 = vrot.lane.b32.xlu1 %v11467_v10, %s11036_s26  ;;  %1706 = vrot.lane.b32.xlu0 %v11467_v10, %s11037_s27 }
0x119f   :  { %2055 = vrot.lane.b32.xlu1 %v11481_v47, %s11033_s23  ;;  %1872 = vrot.lane.b32.xlu0 %v11467_v10, %s11038_s28 }
0x11a3   :  { %2219 = vrot.lane.b32.xlu1 %v11481_v47, %s11035_s25  ;;  %2221 = vrot.lane.b32.xlu0 %v11481_v47, %s11032_s22 }
0x11a7   :  { %2385 = vrot.lane.b32.xlu1 %v11481_v47, %s11037_s27  ;;  %2387 = vrot.lane.b32.xlu0 %v11481_v47, %s11034_s24 }
0x11ab   :  { %2551 = vrot.lane.b32.xlu1 %v11481_v47, %s11038_s28  ;;  %2553 = vrot.lane.b32.xlu0 %v11481_v47, %s11036_s26 }
0x11af   :  { %1630 = vrot.lane.b32.xlu1 %v11467_v10, %s11039_s29  ;;  %1464 = vrot.lane.b32.xlu0 %v11467_v10, %s11026_s4 }
0x1205   :  { %v1543_v40 = vpop.permute.xlu1 %1542  ;;  %v1376_v48 = vpop.permute.xlu0 %1375 }
0x1206   :  { %9591 = vmatpush3.xpose.msk.msra.mxu1 %vm1377_vm15, %v1376_v48 }
0x1207   :  { %9600 = vmatprep.subr.mxu1 %v11019_v15 }
0x1209   :  { %v1709_v44 = vpop.permute.xlu1 %1708  ;;  %9593 = vmatmul.mubr.msk.f32.vlgmr.msra.gmra.mxu1 %vm1377_vm15, %v11467_v10  ;;  %v1541_v42 = vpop.permute.xlu0 %1540 }
0x120a   :  { %9601 = vmatpush3.xpose.msk.msra.mxu1 %vm1377_vm15, %v1543_v40  ;;  %9602 = vmatprep.mubr.msk.f32.mxu1 %vm11022_vm10, %v11019_v15 }
0x120b   :  { %9610 = vmatprep.subr.mxu1 %v11019_v15 }
0x120d   :  { %v1875_v50 = vpop.permute.xlu1 %1874  ;;  %9603 = vmatmul.mubr.msk.f32.vlgmr.msra.gmra.mxu1 %vm1377_vm15, %v1541_v42  ;;  %v1707_v53 = vpop.permute.xlu0 %1706 }
0x120e   :  { %9611 = vmatpush3.xpose.msk.msra.mxu1 %vm1377_vm15, %v1709_v44  ;;  %9612 = vmatprep.mubr.msk.f32.mxu1 %vm11022_vm10, %v11019_v15 }
0x120f   :  { %9620 = vmatprep.subr.mxu1 %v11019_v15 }
0x1211   :  { %9613 = vmatmul.mubr.msk.f32.vlgmr.msra.gmra.mxu1 %vm1377_vm15, %v1707_v53  ;;  %v1873_v17 = vpop.permute.xlu0 %1872  ;;  %v2056_v54 = vpop.permute.xlu1 %2055 }
0x1212   :  { %9621 = vmatpush3.xpose.msk.msra.mxu1 %vm1377_vm15, %v1875_v50  ;;  %9622 = vmatprep.mubr.msk.f32.mxu1 %vm11022_vm10, %v11019_v15 }
0x1213   :  { %9630 = vmatprep.subr.mxu1 %v11019_v15 }
0x1215   :  { %9623 = vmatmul.mubr.msk.f32.vlgmr.msra.gmra.mxu1 %vm1377_vm15, %v1873_v17  ;;  %v2222_v55 = vpop.permute.xlu0 %2221  ;;  %v2220_v58 = vpop.permute.xlu1 %2219 }
0x1216   :  { %9631 = vmatpush3.xpose.msk.msra.mxu1 %vm1377_vm15, %v2056_v54  ;;  %9632 = vmatprep.mubr.msk.f32.mxu1 %vm11022_vm10, %v11019_v15 }
0x1217   :  { %9640 = vmatprep.subr.mxu1 %v11019_v15 }
0x1219   :  { %9633 = vmatmul.mubr.msk.f32.vlgmr.msra.gmra.mxu1 %vm1377_vm15, %v11481_v47  ;;  %v2388_v59 = vpop.permute.xlu0 %2387  ;;  %v2386_v61 = vpop.permute.xlu1 %2385 }
0x121a   :  { %9641 = vmatpush3.xpose.msk.msra.mxu1 %vm1377_vm15, %v2222_v55  ;;  %9642 = vmatprep.mubr.msk.f32.mxu1 %vm11022_vm10, %v11019_v15 }
0x121b   :  { %9650 = vmatprep.subr.mxu1 %v11019_v15 }
0x121d   :  { %9643 = vmatmul.mubr.msk.f32.vlgmr.msra.gmra.mxu1 %vm1377_vm15, %v2220_v58  ;;  %v2554_v60 = vpop.permute.xlu0 %2553  ;;  %v2552_v49 = vpop.permute.xlu1 %2551 }
0x121e   :  { %9651 = vmatpush3.xpose.msk.msra.mxu1 %vm1377_vm15, %v2388_v59  ;;  %9652 = vmatprep.mubr.msk.f32.mxu1 %vm11022_vm10, %v11019_v15 }
0x121f   :  { %9660 = vmatprep.subr.mxu1 %v11019_v15 }
0x1221   :  { %9653 = vmatmul.mubr.msk.f32.vlgmr.msra.gmra.mxu1 %vm1377_vm15, %v2386_v61  ;;  %v1465_v62 = vpop.permute.xlu0 %1464  ;;  %v11555_v45 = vpop.permute.xlu1 %1630 }
0x1222   :  { %9596 = vmatpush3.msra.mxu0 %v1465_v62  ;;  %9661 = vmatpush3.xpose.msk.msra.mxu1 %vm1377_vm15, %v2554_v60 }
0x1223   :  { %9662 = vmatprep.mubr.msk.f32.mxu1 %vm11022_vm10, %v11019_v15  ;;  %9605 = vmatprep.subr.mxu0 %v11019_v15 }
0x1225   :  { %9663 = vmatmul.mubr.msk.f32.vlgmr.msra.gmra.mxu1 %vm1377_vm15, %v2552_v49 }
0x12c9   :  { %v1448_v63 = vpop.f32.mrf.mxu1 }
0x12ca   :  { %v1452_v1 = vmul.f32 0.35355338, %v1448_v63 }
0x12cb   :  { %v9594_v2 = vpop.f32.mrf.mxu1 }
0x12cc   :  { %v1453_v5 = vsel %vm1377_vm15, %v1452_v1, -inf }
0x12cd   :  { %1454 = vmax.xlane.f32.xlu0 %v1453_v5  ;;  %v1614_v6 = vpop.f32.mrf.mxu1 }
0x12ce   :  { %v1618_v52 = vmul.f32 0.35355338, %v1614_v6 }
0x12cf   :  { %v9604_v8 = vpop.f32.mrf.mxu1 }
0x12d0   :  { %v1619_v11 = vsel %vm1377_vm15, %v1618_v52, -inf }
0x12d1   :  { %1620 = vmax.xlane.f32.xlu1 %v1619_v11  ;;  %v1780_v13 = vpop.f32.mrf.mxu1 }
0x12d2   :  { %v1784_v14 = vmul.f32 0.35355338, %v1780_v13 }
0x12d3   :  { %v9614_v57 = vpop.f32.mrf.mxu1 }
0x12d4   :  { %v1785_v18 = vsel %vm1377_vm15, %v1784_v14, -inf }
0x12d5   :  { %1786 = vmax.xlane.f32.xlu0 %v1785_v18  ;;  %v1946_v19 = vpop.f32.mrf.mxu1 }
0x12d6   :  { %v1950_v4 = vmul.f32 0.35355338, %v1946_v19 }
0x12d7   :  { %v9624_v16 = vpop.f32.mrf.mxu1 }
0x12d8   :  { %v1951_v20 = vsel %vm1377_vm15, %v1950_v4, -inf }
0x12d9   :  { %1952 = vmax.xlane.f32.xlu0 %v1951_v20  ;;  %v2127_v21 = vpop.f32.mrf.mxu1 }
0x12da   :  { %v2131_v7 = vmul.f32 0.35355338, %v2127_v21 }
0x12db   :  { %v9634_v22 = vpop.f32.mrf.mxu1 }
0x12dc   :  { %v2132_v27 = vsel %vm1377_vm15, %v2131_v7, -inf }
0x12dd   :  { %2133 = vmax.xlane.f32.xlu1 %v2132_v27  ;;  %v2293_v28 = vpop.f32.mrf.mxu1 }
0x12de   :  { %v2297_v31 = vmul.f32 0.35355338, %v2293_v28 }
0x12df   :  { %v9644_v33 = vpop.f32.mrf.mxu1 }
0x12e0   :  { %v2298_v51 = vsel %vm1377_vm15, %v2297_v31, -inf }
0x12e1   :  { %2299 = vmax.xlane.f32.xlu0 %v2298_v51  ;;  %v2459_v34 = vpop.f32.mrf.mxu1 }
0x12e2   :  { %v2463_v35 = vmul.f32 0.35355338, %v2459_v34 }
0x12e3   :  { %v9654_v12 = vpop.f32.mrf.mxu1 }
0x12e4   :  { %v2464_v36 = vsel %vm1377_vm15, %v2463_v35, -inf }
0x12e5   :  { %2465 = vmax.xlane.f32.xlu1 %v2464_v36  ;;  %v2625_v38 = vpop.f32.mrf.mxu1 }
0x12e6   :  { %v2629_v23 = vmul.f32 0.35355338, %v2625_v38 }
0x12e7   :  { %v9664_v41 = vpop.f32.mrf.mxu1 }
0x12e8   :  { %v2630_v43 = vsel %vm1377_vm15, %v2629_v23, -inf }
0x12e9   :  { %2631 = vmax.xlane.f32.xlu0 %v2630_v43 }
0x12f6   :  { %1962 = vrot.lane.b32.xlu1 %v11467_v10, %s11040_s30 }
0x12ff   :  { %1796 = vrot.lane.b32.xlu0 %v11467_v10, %s11041_s1 }
0x1356   :  { %v1455_v29 = vpop.xlane.xlu0 %1454 }
0x1357   :  { %v1456_v24 = vsub.f32 %v1452_v1, %v1455_v29 }
0x1359   :  { %v1457_v25 = vmul.f32 1.442695, %v1456_v24 }
0x135a   :  { %v1621_v26 = vpop.xlane.xlu1 %1620 }
0x135b   :  { %10662 = vpow2.f32 %v1457_v25  ;;  %v1622_v30 = vsub.f32 %v1618_v52, %v1621_v26 }
0x135d   :  { %v1623_v32 = vmul.f32 1.442695, %v1622_v30 }
0x135e   :  { %v1787_v3 = vpop.xlane.xlu0 %1786 }
0x135f   :  { %10664 = vpow2.f32 %v1623_v32  ;;  %v1788_v56 = vsub.f32 %v1784_v14, %v1787_v3 }
0x1361   :  { %v1789_v39 = vmul.f32 1.442695, %v1788_v56 }
0x1362   :  { %v1953_v46 = vpop.xlane.xlu0 %1952 }
0x1363   :  { %10666 = vpow2.f32 %v1789_v39  ;;  %v1954_v9 = vsub.f32 %v1950_v4, %v1953_v46 }
0x1365   :  { %v1955_v40 = vmul.f32 1.442695, %v1954_v9 }
0x1366   :  { %v2134_v55 = vpop.xlane.xlu1 %2133 }
0x1367   :  { %10668 = vpow2.f32 %v1955_v40  ;;  %v2135_v58 = vsub.f32 %v2131_v7, %v2134_v55  ;;  %v2732_v55 = vld [vmem:[%s11624_s10] sm:$0xff] }
0x1368   :  { %v10663_v48 = vpop.eup %10662 }
0x1369   :  { %v1459_v10 = vsel %vm1377_vm15, %v10663_v48, 0.0  ;;  %v2136_v62 = vmul.f32 1.442695, %v2135_v58 }
0x136a   :  { %1460 = vadd.xlane.f32.xlu1 %v1459_v10  ;;  %v2300_v59 = vpop.xlane.xlu0 %2299 }
0x136b   :  { %v2301_v61 = vsub.f32 %v2297_v31, %v2300_v59  ;;  %10670 = vpow2.f32 %v2136_v62 }
0x136c   :  { %v10665_v44 = vpop.eup %10664 }
0x136d   :  { %v1625_v42 = vsel %vm1377_vm15, %v10665_v44, 0.0  ;;  %v2302_v1 = vmul.f32 1.442695, %v2301_v61 }
0x136e   :  { %1626 = vadd.xlane.f32.xlu0 %v1625_v42  ;;  %v2466_v60 = vpop.xlane.xlu1 %2465 }
0x136f   :  { %v2467_v49 = vsub.f32 %v2463_v35, %v2466_v60  ;;  %10672 = vpow2.f32 %v2302_v1 }
0x1370   :  { %v10667_v50 = vpop.eup %10666 }
0x1371   :  { %v1791_v53 = vsel %vm1377_vm15, %v10667_v50, 0.0  ;;  %v2468_v2 = vmul.f32 1.442695, %v2467_v49 }
0x1372   :  { %1792 = vadd.xlane.f32.xlu1 %v1791_v53  ;;  %v2632_v63 = vpop.xlane.xlu0 %2631  ;;  %v1963_v4 = vpop.permute.xlu1 %1962  ;;  %v2735_v53 = vld [vmem:[%s11624_s10 + $0x18] sm:$0xff] }
0x1373   :  { %v2633_v5 = vsub.f32 %v2629_v23, %v2632_v63  ;;  %10674 = vpow2.f32 %v2468_v2  ;;  %9670 = vmatprep.subr.mxu1 %v2735_v53 }
0x1374   :  { %v11560_v17 = vpop.eup %10668  ;;  %9671 = vmatpush3.msra.mxu1 %v2735_v53 }
0x1375   :  { %v1957_v54 = vsel %vm1377_vm15, %v11560_v17, 0.0  ;;  %v2634_v6 = vmul.f32 1.442695, %v2633_v5 }
0x1376   :  { %1958 = vadd.xlane.f32.xlu0 %v1957_v54  ;;  %v1797_v16 = vpop.permute.xlu0 %1796  ;;  %v2733_v54 = vld [vmem:[%s11624_s10 + $0x8] sm:$0xff] }
0x1377   :  { %10676 = vpow2.f32 %v2634_v6 }
0x1378   :  { %v10671_v52 = vpop.eup %10670 }
0x1379   :  { %v2138_v11 = vsel %vm1377_vm15, %v10671_v52, 0.0 }
0x137c   :  { %v11568_v8 = vpop.eup %10672 }
0x137d   :  { %v2304_v57 = vsel %vm1377_vm15, %v11568_v8, 0.0 }
0x1380   :  { %v11571_v13 = vpop.eup %10674 }
0x1381   :  { %v2470_v14 = vsel %vm1377_vm15, %v11571_v13, 0.0 }
0x1383   :  { %2309 = vrot.lane.b32.xlu1 %v11481_v47, %s11039_s29 }
0x1384   :  { %v11577_v18 = vpop.eup %10676 }
0x1385   :  { %v2636_v19 = vsel %vm1377_vm15, %v11577_v18, 0.0 }
0x138c   :  { %2143 = vrot.lane.b32.xlu0 %v11481_v47, %s11026_s4 }
0x13a7   :  { %2139 = vadd.xlane.f32.xlu1 %v2138_v11 }
0x13ab   :  { %2471 = vadd.xlane.f32.xlu1 %v2470_v14  ;;  %2305 = vadd.xlane.f32.xlu0 %v2304_v57 }
0x13af   :  { %2637 = vadd.xlane.f32.xlu1 %v2636_v19 }
0x13c0   :  { %2641 = vrot.lane.b32.xlu1 %v11481_v47, %s11040_s30 }
0x13c1   :  { %2475 = vrot.lane.b32.xlu0 %v11481_v47, %s11041_s1 }
0x13f3   :  { %v1461_v20 = vpop.xlane.xlu1 %1460 }
0x13f4   :  { %10678 = vrcp.f32 %v1461_v20 }
0x13f7   :  { %v1627_v21 = vpop.xlane.xlu0 %1626 }
0x13f8   :  { %10680 = vrcp.f32 %v1627_v21 }
0x13fb   :  { %v1793_v7 = vpop.xlane.xlu1 %1792 }
0x13fc   :  { %10682 = vrcp.f32 %v1793_v7 }
0x13ff   :  { %v1959_v22 = vpop.xlane.xlu0 %1958  ;;  %v2310_v36 = vpop.permute.xlu1 %2309 }
0x1400   :  { %10684 = vrcp.f32 %v1959_v22 }
0x1401   :  { %v10679_v27 = vpop.eup %10678 }
0x1402   :  { %v1463_v28 = vmul.f32 %v10679_v27, %v10663_v48 }
0x1403   :  { %v2144_v12 = vpop.permute.xlu0 %2143 }
0x1404   :  { %9598 = vmatmul.mubr.msk.f32.vlgmr.msra.gmra.mxu0 %vm1377_vm15, %v1463_v28 }
0x1405   :  { %v10681_v31 = vpop.eup %10680  ;;  %9606 = vmatpush3.msra.mxu0 %v11555_v45  ;;  %9607 = vmatprep.mubr.msk.f32.mxu0 %vm11022_vm10, %v11019_v15 }
0x1406   :  { %9615 = vmatprep.subr.mxu0 %v11019_v15  ;;  %v1629_v47 = vmul.f32 %v10681_v31, %v10665_v44 }
0x1408   :  { %9608 = vmatmul.mubr.msk.f32.vlgmr.msra.gmra.mxu0 %vm1377_vm15, %v1629_v47 }
0x1409   :  { %v10683_v33 = vpop.eup %10682  ;;  %9616 = vmatpush3.msra.mxu0 %v1797_v16  ;;  %9617 = vmatprep.mubr.msk.f32.mxu0 %vm11022_vm10, %v11019_v15  ;;  %v8733_v16 = vld [vmem:[%s11645_s13] ss:$0 sm:$0xff] }
0x140a   :  { %9625 = vmatprep.subr.mxu0 %v11019_v15  ;;  %v1795_v51 = vmul.f32 %v10683_v33, %v10667_v50 }
0x140c   :  { %9618 = vmatmul.mubr.msk.f32.vlgmr.msra.gmra.mxu0 %vm1377_vm15, %v1795_v51 }
0x140d   :  { %v10685_v34 = vpop.eup %10684  ;;  %9626 = vmatpush3.msra.mxu0 %v1963_v4  ;;  %9627 = vmatprep.mubr.msk.f32.mxu0 %vm11022_vm10, %v11019_v15 }
0x140e   :  { %9635 = vmatprep.subr.mxu0 %v11019_v15  ;;  %v1961_v35 = vmul.f32 %v10685_v34, %v11560_v17  ;;  %v2734_v17 = vld [vmem:[%s11624_s10 + $0x10] sm:$0xff] }
0x140f   :  { %9672 = vmatprep.subr.mxu1 %v2734_v17 }
0x1410   :  { %9628 = vmatmul.mubr.msk.f32.vlgmr.msra.gmra.mxu0 %vm1377_vm15, %v1961_v35  ;;  %9673 = vmatpush3.msra.mxu1 %v2734_v17 }
0x1411   :  { %9636 = vmatpush3.msra.mxu0 %v2144_v12  ;;  %9637 = vmatprep.mubr.msk.f32.mxu0 %vm11022_vm10, %v11019_v15 }
0x1412   :  { %9645 = vmatprep.subr.mxu0 %v11019_v15  ;;  %9674 = vmatprep.subr.mxu1 %v2733_v54 }
0x1413   :  { %9675 = vmatpush3.msra.mxu1 %v2733_v54 }
0x1414   :  { %9676 = vmatprep.subr.mxu1 %v2732_v55 }
0x1415   :  { %9677 = vmatpush3.msra.mxu1 %v2732_v55  ;;  %v8736_v55 = vld [vmem:[%s11691_s14] ss:$0 sm:$0xff] }
0x1430   :  { %v2140_v38 = vpop.xlane.xlu1 %2139 }
0x1431   :  { %10686 = vrcp.f32 %v2140_v38 }
0x1434   :  { %v2472_v23 = vpop.xlane.xlu1 %2471  ;;  %v2306_v41 = vpop.xlane.xlu0 %2305 }
0x1435   :  { %10688 = vrcp.f32 %v2306_v41  ;;  %v2874_v41 = vld [vmem:[%s11665_s19 + $0x18] sm:$0xff] }
0x1436   :  { %10690 = vrcp.f32 %v2472_v23 }
0x1438   :  { %v2638_v43 = vpop.xlane.xlu1 %2637  ;;  %v2476_v30 = vpop.permute.xlu0 %2475 }
0x1439   :  { %10692 = vrcp.f32 %v2638_v43  ;;  %v2873_v43 = vld [vmem:[%s11665_s19 + $0x10] sm:$0xff] }
0x143c   :  { %v2642_v56 = vpop.permute.xlu1 %2641 }
0x143e   :  { %v10687_v45 = vpop.eup %10686 }
0x143f   :  { %v2142_v29 = vmul.f32 %v10687_v45, %v10671_v52  ;;  %v2872_v45 = vld [vmem:[%s11665_s19 + $0x8] sm:$0xff] }
0x1441   :  { %9638 = vmatmul.mubr.msk.f32.vlgmr.msra.gmra.mxu0 %vm1377_vm15, %v2142_v29  ;;  %v2871_v29 = vld [vmem:[%s11665_s19] sm:$0xff] }
0x1442   :  { %9646 = vmatpush3.msra.mxu0 %v2310_v36  ;;  %9647 = vmatprep.mubr.msk.f32.mxu0 %vm11022_vm10, %v11019_v15  ;;  %v10689_v24 = vpop.eup %10688 }
0x1443   :  { %9655 = vmatprep.subr.mxu0 %v11019_v15  ;;  %v2308_v25 = vmul.f32 %v10689_v24, %v11568_v8  ;;  %v10691_v26 = vpop.eup %10690  ;;  %v2980_v24 = vld [vmem:[%s11674_s8 + $0x78] sm:$0xff] }
0x1444   :  { %v2474_v32 = vmul.f32 %v10691_v26, %v11571_v13  ;;  %9692 = vmatprep.subr.mxu1 %v2980_v24  ;;  %v2978_v26 = vld [vmem:[%s11674_s8 + $0x68] sm:$0xff] }
0x1445   :  { %9648 = vmatmul.mubr.msk.f32.vlgmr.msra.gmra.mxu0 %vm1377_vm15, %v2308_v25  ;;  %v2979_v25 = vld [vmem:[%s11674_s8 + $0x70] sm:$0xff] }
0x1446   :  { %9656 = vmatpush3.msra.mxu0 %v2476_v30  ;;  %9657 = vmatprep.mubr.msk.f32.mxu0 %vm11022_vm10, %v11019_v15  ;;  %v10693_v3 = vpop.eup %10692  ;;  %v2977_v30 = vld [vmem:[%s11674_s8 + $0x60] sm:$0xff] }
0x1447   :  { %9665 = vmatprep.subr.mxu0 %v11019_v15  ;;  %v2640_v39 = vmul.f32 %v10693_v3, %v11577_v18  ;;  %v2975_v3 = vld [vmem:[%s11674_s8 + $0x50] sm:$0xff] }
0x1449   :  { %9658 = vmatmul.mubr.msk.f32.vlgmr.msra.gmra.mxu0 %vm1377_vm15, %v2474_v32  ;;  %v2976_v32 = vld [vmem:[%s11674_s8 + $0x58] sm:$0xff] }
0x144a   :  { %9666 = vmatpush3.msra.mxu0 %v2642_v56  ;;  %9667 = vmatprep.mubr.msk.f32.mxu0 %vm11022_vm10, %v11019_v15  ;;  %v2974_v56 = vld [vmem:[%s11674_s8 + $0x48] sm:$0xff] }
0x144b   :  { %9681 = vmatprep.subr.mxu0 %v2874_v41 }
0x144d   :  { %9668 = vmatmul.mubr.msk.f32.vlgmr.msra.gmra.mxu0 %vm1377_vm15, %v2640_v39  ;;  %v2973_v39 = vld [vmem:[%s11674_s8 + $0x40] sm:$0xff] }
0x144e   :  { %9682 = vmatpush3.msra.mxu0 %v2874_v41  ;;  %v8746_v41 = vld [vmem:[%s11435_s18 + $0x30] sm:$0xff] }
0x144f   :  { %9683 = vmatprep.subr.mxu0 %v2873_v43 }
0x1450   :  { %9684 = vmatpush3.msra.mxu0 %v2873_v43  ;;  %v8745_v43 = vld [vmem:[%s11435_s18 + $0x28] sm:$0xff] }
0x1451   :  { %9685 = vmatprep.subr.mxu0 %v2872_v45 }
0x1452   :  { %9686 = vmatpush3.msra.mxu0 %v2872_v45  ;;  %v8744_v45 = vld [vmem:[%s11435_s18 + $0x20] sm:$0xff] }
0x1453   :  { %9687 = vmatprep.subr.mxu0 %v2871_v29 }
0x1454   :  { %9688 = vmatpush3.msra.mxu0 %v2871_v29 }
0x14c4   :  { %v1536_v46 = vpop.f32.mrf.mxu0 }
0x14c6   :  { %v9599_v9 = vpop.f32.mrf.mxu0 }
0x14c7   :  { %v2971_v9 = vld [vmem:[%s11674_s8 + $0x30] sm:$0xff] }
0x14c8   :  { %v1702_v40 = vpop.f32.mrf.mxu0 }
0x14c9   :  { %2039 = vrot.lane.b32.xlu0 %v1702_v40, %s11028_s6  ;;  %v2970_v40 = vld [vmem:[%s11674_s8 + $0x28] sm:$0xff] }
0x14ca   :  { %v9609_v48 = vpop.f32.mrf.mxu0 }
0x14cb   :  { %v2969_v48 = vld [vmem:[%s11674_s8 + $0x20] sm:$0xff] }
0x14cc   :  { %v1868_v10 = vpop.f32.mrf.mxu0 }
0x14cd   :  { %2043 = vrot.lane.b32.xlu1 %v1868_v10, %s11042_s2 }
0x14ce   :  { %v9619_v44 = vpop.f32.mrf.mxu0 }
0x14d0   :  { %v2034_v42 = vpop.f32.mrf.mxu0 }
0x14d1   :  { %2047 = vrot.lane.b32.xlu1 %v2034_v42, %s11043_s3 }
0x14d2   :  { %v9629_v50 = vpop.f32.mrf.mxu0 }
0x1501   :  { %v2215_v58 = vpop.f32.mrf.mxu0 }
0x1503   :  { %v9639_v59 = vpop.f32.mrf.mxu0 }
0x1504   :  { %v8737_v59 = vld [vmem:[%s11696_s21] ss:$0 sm:$0xff] }
0x1505   :  { %v2381_v60 = vpop.f32.mrf.mxu0 }
0x1506   :  { %2718 = vrot.lane.b32.xlu0 %v2381_v60, %s11028_s6 }
0x1507   :  { %v9649_v61 = vpop.f32.mrf.mxu0 }
0x1509   :  { %v2547_v62 = vpop.f32.mrf.mxu0 }
0x150a   :  { %2722 = vrot.lane.b32.xlu0 %v2547_v62, %s11042_s2 }
0x150b   :  { %v9659_v49 = vpop.f32.mrf.mxu0 }
0x150d   :  { %v2713_v63 = vpop.f32.mrf.mxu0 }
0x150e   :  { %2726 = vrot.lane.b32.xlu1 %v2713_v63, %s11043_s3 }
0x150f   :  { %v9669_v1 = vpop.f32.mrf.mxu0 }
0x153b   :  { %v2040_v2 = vpop.permute.xlu0 %2039 }
0x153c   :  { %v2050_v6 = vsel %vm1377_vm15, %v1536_v46, %v2040_v2  ;;  %v2972_v46 = vld [vmem:[%s11674_s8 + $0x38] sm:$0xff] }
0x153d   :  { %v2968_v2 = vld [vmem:[%s11674_s8 + $0x18] sm:$0xff] }
0x153f   :  { %v2044_v5 = vpop.permute.xlu1 %2043 }
0x1540   :  { %v2051_v52 = vsel %vm296_vm7, %v2050_v6, %v2044_v5  ;;  %v2967_v5 = vld [vmem:[%s11674_s8 + $0x10] sm:$0xff]  ;;  %v2966_v6 = vld [vmem:[%s11674_s8 + $0x8] sm:$0xff] }
0x1543   :  { %v2048_v8 = vpop.permute.xlu1 %2047 }
0x1544   :  { %v2053_v11 = vsel %vm2052_vm1, %v2051_v52, %v2048_v8  ;;  %v2965_v52 = vld [vmem:[%s11674_s8] sm:$0xff] }
0x1545   :  { %9678 = vmatprep.mubr.msk.f32.mxu1 %vm414_vm0, %v2053_v11  ;;  %v8738_v8 = vld [vmem:[%s11712_s12] ss:$0 sm:$0xff] }
0x1578   :  { %v2719_v13 = vpop.permute.xlu0 %2718 }
0x1579   :  { %v2729_v57 = vsel %vm1377_vm15, %v2215_v58, %v2719_v13 }
0x157c   :  { %v2723_v14 = vpop.permute.xlu0 %2722 }
0x157d   :  { %v2730_v18 = vsel %vm296_vm7, %v2729_v57, %v2723_v14 }
0x1580   :  { %v2727_v19 = vpop.permute.xlu1 %2726 }
0x1581   :  { %v2731_v4 = vsel %vm2052_vm1, %v2730_v18, %v2727_v19 }
0x1582   :  { %9679 = vmatmul.mubr.msk.f32.vlgmr.msra.gmra.mxu1 %vm414_vm0, %v2731_v4  ;;  %v8741_v4 = vld [vmem:[%s11720_s9] ss:$0 sm:$0xff] }
0x1583   :  { %9693 = vmatpush3.msra.mxu1 %v2980_v24 }
0x1584   :  { %9694 = vmatprep.subr.mxu1 %v2979_v25 }
0x1585   :  { %9695 = vmatpush3.msra.mxu1 %v2979_v25 }
0x1586   :  { %9696 = vmatprep.subr.mxu1 %v2978_v26 }
0x1587   :  { %9697 = vmatpush3.msra.mxu1 %v2978_v26 }
0x1588   :  { %9698 = vmatprep.subr.mxu1 %v2977_v30 }
0x1589   :  { %9699 = vmatpush3.msra.mxu1 %v2977_v30 }
0x158a   :  { %9700 = vmatprep.subr.mxu1 %v2976_v32 }
0x158b   :  { %9701 = vmatpush3.msra.mxu1 %v2976_v32 }
0x158c   :  { %9702 = vmatprep.subr.mxu1 %v2975_v3 }
0x158d   :  { %9703 = vmatpush3.msra.mxu1 %v2975_v3 }
0x158e   :  { %9704 = vmatprep.subr.mxu1 %v2974_v56 }
0x158f   :  { %9705 = vmatpush3.msra.mxu1 %v2974_v56 }
0x1590   :  { %9706 = vmatprep.subr.mxu1 %v2973_v39 }
0x1591   :  { %9707 = vmatpush3.msra.mxu1 %v2973_v39 }
0x1592   :  { %9708 = vmatprep.subr.mxu1 %v2972_v46 }
0x1593   :  { %9709 = vmatpush3.msra.mxu1 %v2972_v46 }
0x1594   :  { %9710 = vmatprep.subr.mxu1 %v2971_v9 }
0x1595   :  { %9711 = vmatpush3.msra.mxu1 %v2971_v9 }
0x1596   :  { %9712 = vmatprep.subr.mxu1 %v2970_v40 }
0x1597   :  { %9713 = vmatpush3.msra.mxu1 %v2970_v40 }
0x1598   :  { %9714 = vmatprep.subr.mxu1 %v2969_v48 }
0x1599   :  { %9715 = vmatpush3.msra.mxu1 %v2969_v48  ;;  %v8743_v48 = vld [vmem:[%s11741_s5] ss:$0 sm:$0xff] }
0x159a   :  { %9716 = vmatprep.subr.mxu1 %v2968_v2 }
0x159b   :  { %9717 = vmatpush3.msra.mxu1 %v2968_v2 }
0x159c   :  { %9718 = vmatprep.subr.mxu1 %v2967_v5 }
0x159d   :  { %9719 = vmatpush3.msra.mxu1 %v2967_v5 }
0x159e   :  { %9720 = vmatprep.subr.mxu1 %v2966_v6 }
0x159f   :  { %9721 = vmatpush3.msra.mxu1 %v2966_v6 }
0x15a0   :  { %9722 = vmatprep.subr.mxu1 %v2965_v52 }
0x15a1   :  { %9723 = vmatpush3.msra.mxu1 %v2965_v52 }
0x15a2   :  { %9768 = vmatprep.subr.mxu1 %v11019_v15 }
0x1642   :  { %v9680_v20 = vpop.f32.mrf.mxu1 }
0x1643   :  { %v2821_v21 = vadd.f32 %v9680_v20, %v8733_v16 }
0x1644   :  { %v2815_v7 = vpop.f32.mrf.mxu1 }
0x1645   :  { %v2816_v22 = vadd.f32 %v8733_v16, %v2815_v7  ;;  %v2825_v27 = vadd.f32 %v2821_v21, %v11453_v0 }
0x1647   :  { %v2824_v28 = vadd.f32 %v2816_v22, %v11451_v37  ;;  %v2831_v31 = vsel %vm414_vm0, %v2825_v27, 0.0 }
0x1648   :  { %2832 = vadd.xlane.f32.xlu1 %v2831_v31 }
0x1649   :  { %v2828_v47 = vsel %vm414_vm0, %v2824_v28, 0.0 }
0x164a   :  { %2829 = vadd.xlane.f32.xlu0 %v2828_v47 }
0x16d1   :  { %v2833_v33 = vpop.xlane.xlu1 %2832 }
0x16d2   :  { %v2836_v51 = vmul.f32 0.03125, %v2833_v33 }
0x16d3   :  { %v2830_v34 = vpop.xlane.xlu0 %2829 }
0x16d4   :  { %v2835_v35 = vmul.f32 0.03125, %v2830_v34  ;;  %v11652_v12 = vsub.f32 %v2825_v27, %v2836_v51 }
0x16d6   :  { %v11654_v36 = vsub.f32 %v2824_v28, %v2835_v35  ;;  %v2840_v37 = vmul.f32 %v11652_v12, %v11652_v12 }
0x16d8   :  { %v2839_v38 = vmul.f32 %v11654_v36, %v11654_v36  ;;  %v2844_v23 = vsel %vm414_vm0, %v2840_v37, 0.0 }
0x16da   :  { %v2841_v0 = vsel %vm414_vm0, %v2839_v38, 0.0 }
0x16db   :  { %2842 = vadd.xlane.f32.xlu0 %v2841_v0 }
0x16df   :  { %2845 = vadd.xlane.f32.xlu0 %v2844_v23  ;;  %v8747_v23 = vld [vmem:[%s11435_s18 + $0x38] sm:$0xff]  ;;  %s11735_s18 = sld [smem:[%s13146_s0 + %s11051_s7]]  }
0x16e0   :  { %9727 = vmatprep.subr.mxu0 %v8747_v23 }
0x16e5   :  { %v8742_v56 = vld [vmem:[%s11735_s18] ss:$0 sm:$0xff] }
0x1764   :  { %v2843_v10 = vpop.xlane.xlu0 %2842 }
0x1765   :  { %v2847_v44 = vmul.f32 0.03125, %v2843_v10 }
0x1767   :  { %v2849_v42 = vadd.f32 1e-05, %v2847_v44 }
0x1768   :  { %v2846_v50 = vpop.xlane.xlu0 %2845 }
0x1769   :  { %10694 = vrsqrt.f32 %v2849_v42  ;;  %v2848_v53 = vmul.f32 0.03125, %v2846_v50  ;;  %v8749_v50 = vld [vmem:[%s11464_s17 + $0x1] ss:$0 sm:$0xff]  ;;  %s11052_s17 = smov 11  }
0x176b   :  { %v2850_v17 = vadd.f32 1e-05, %v2848_v53 }
0x176d   :  { %10696 = vrsqrt.f32 %v2850_v17 }
0x1776   :  { %v10695_v54 = vpop.eup %10694 }
0x1777   :  { %v2853_v58 = vmul.f32 %v10695_v54, %v11654_v36 }
0x1779   :  { %v2861_v60 = vmul.f32 %v8736_v55, %v2853_v58 }
0x177a   :  { %v10697_v61 = vpop.eup %10696 }
0x177b   :  { %v2854_v62 = vmul.f32 %v10697_v61, %v11652_v12  ;;  %v2869_v49 = vadd.f32 %v8737_v59, %v2861_v60 }
0x177d   :  { %v2862_v63 = vmul.f32 %v8736_v55, %v2854_v62  ;;  %9689 = vmatprep.mubr.msk.f32.mxu0 %vm414_vm0, %v2869_v49 }
0x177f   :  { %v2870_v1 = vadd.f32 %v8737_v59, %v2862_v63 }
0x1781   :  { %9690 = vmatmul.mubr.msk.f32.vlgmr.msra.gmra.mxu0 %vm414_vm0, %v2870_v1 }
0x1782   :  { %9728 = vmatpush3.msra.mxu0 %v8747_v23 }
0x1783   :  { %9729 = vmatprep.subr.mxu0 %v8746_v41 }
0x1784   :  { %9730 = vmatpush3.msra.mxu0 %v8746_v41 }
0x1785   :  { %9731 = vmatprep.subr.mxu0 %v8745_v43 }
0x1786   :  { %9732 = vmatpush3.msra.mxu0 %v8745_v43 }
0x1787   :  { %9733 = vmatprep.subr.mxu0 %v8744_v45 }
0x1788   :  { %9734 = vmatpush3.msra.mxu0 %v8744_v45 }
0x1789   :  { %9738 = vmatprep.subr.mxu0 %v11019_v15 }
0x1841   :  { %v9691_v11 = vpop.f32.mrf.mxu0 }
0x1842   :  { %v2960_v13 = vadd.f32 %v9691_v11, %v8738_v8 }
0x1843   :  { %v2954_v14 = vpop.f32.mrf.mxu0 }
0x1844   :  { %v2955_v57 = vadd.f32 %v8738_v8, %v2954_v14  ;;  %v2964_v19 = vmax.f32 %v2960_v13, 0.0 }
0x1846   :  { %v2963_v18 = vmax.f32 %v2955_v57, 0.0 }
0x1848   :  { %9724 = vmatprep.mubr.f32.mxu1 %v2963_v18 }
0x1849   :  { %9725 = vmatmul.mubr.f32.vlgmr.msra.gmra.mxu1 %v2964_v19 }
0x184a   :  { %9770 = vmatprep.mubr.msk.f32.mxu1 %vm11022_vm10, %v11019_v15 }
0x1909   :  { %v9726_v16 = vpop.f32.mrf.mxu1 }
0x190a   :  { %v3060_v20 = vadd.f32 %v9726_v16, %v8741_v4 }
0x190b   :  { %v3054_v21 = vpop.f32.mrf.mxu1 }
0x190c   :  { %v3064_v7 = vadd.f32 %v3060_v20, %v2870_v1  ;;  %v3055_v22 = vadd.f32 %v8741_v4, %v3054_v21 }
0x190e   :  { %v3070_v27 = vsel %vm414_vm0, %v3064_v7, 0.0  ;;  %v3063_v28 = vadd.f32 %v3055_v22, %v2869_v49 }
0x190f   :  { %3071 = vadd.xlane.f32.xlu0 %v3070_v27 }
0x1910   :  { %v3067_v31 = vsel %vm414_vm0, %v3063_v28, 0.0 }
0x1911   :  { %3068 = vadd.xlane.f32.xlu1 %v3067_v31 }
0x1998   :  { %v3072_v47 = vpop.xlane.xlu0 %3071 }
0x1999   :  { %v3074_v33 = vmul.f32 0.03125, %v3072_v47 }
0x199a   :  { %v3069_v51 = vpop.xlane.xlu1 %3068 }
0x199b   :  { %v3076_v34 = vsub.f32 %v3064_v7, %v3074_v33  ;;  %v3073_v35 = vmul.f32 0.03125, %v3069_v51 }
0x199d   :  { %v3075_v12 = vsub.f32 %v3063_v28, %v3073_v35  ;;  %v3078_v36 = vmul.f32 %v3076_v34, %v3076_v34 }
0x199f   :  { %v3082_v38 = vsel %vm414_vm0, %v3078_v36, 0.0  ;;  %v3077_v0 = vmul.f32 %v3075_v12, %v3075_v12 }
0x19a0   :  { %3083 = vadd.xlane.f32.xlu0 %v3082_v38 }
0x19a1   :  { %v3079_v37 = vsel %vm414_vm0, %v3077_v0, 0.0 }
0x19a2   :  { %3080 = vadd.xlane.f32.xlu1 %v3079_v37 }
0x1a29   :  { %v3084_v29 = vpop.xlane.xlu0 %3083 }
0x1a2a   :  { %v3086_v24 = vmul.f32 0.03125, %v3084_v29 }
0x1a2b   :  { %v3081_v25 = vpop.xlane.xlu1 %3080 }
0x1a2c   :  { %v3088_v26 = vadd.f32 1e-05, %v3086_v24  ;;  %v3085_v30 = vmul.f32 0.03125, %v3081_v25 }
0x1a2e   :  { %10698 = vrsqrt.f32 %v3088_v26  ;;  %v3087_v32 = vadd.f32 1e-05, %v3085_v30 }
0x1a30   :  { %10700 = vrsqrt.f32 %v3087_v32 }
0x1a3b   :  { %v10699_v3 = vpop.eup %10698 }
0x1a3c   :  { %v3092_v39 = vmul.f32 %v10699_v3, %v3076_v34 }
0x1a3d   :  { %v10701_v46 = vpop.eup %10700 }
0x1a3e   :  { %v3091_v9 = vmul.f32 %v10701_v46, %v3075_v12  ;;  %v3100_v40 = vmul.f32 %v8742_v56, %v3092_v39 }
0x1a40   :  { %v3099_v10 = vmul.f32 %v8742_v56, %v3091_v9  ;;  %v11747_v42 = vadd.f32 %v8743_v48, %v3100_v40 }
0x1a42   :  { %v11745_v44 = vadd.f32 %v8743_v48, %v3099_v10 }
0x1a44   :  { %9735 = vmatprep.mubr.msk.f32.mxu0 %vm414_vm0, %v11745_v44 }
0x1a45   :  { %9736 = vmatmul.mubr.msk.f32.vlgmr.msra.gmra.mxu0 %vm414_vm0, %v11747_v42 }
0x1a46   :  { %9740 = vmatprep.mubr.msk.f32.mxu0 %vm11022_vm10, %v11019_v15 }
0x1b05   :  { %v9737_v53 = vpop.f32.mrf.mxu0 }
0x1b06   :  { %v11756_v17 = vadd.f32 %v9737_v53, %v8749_v50 }
0x1b07   :  { %v3194_v54 = vpop.f32.mrf.mxu0 }
0x1b08   :  { %v11758_v55 = vadd.f32 %v8749_v50, %v3194_v54 }
0x1b0a   :  { %3204 = vrot.lane.b32.xlu1 %v11758_v55, %s11033_s23 }
0x1b0e   :  { %3370 = vrot.lane.b32.xlu1 %v11758_v55, %s11032_s22 }
0x1b12   :  { %3368 = vrot.lane.b32.xlu1 %v11758_v55, %s11035_s25 }
0x1b7c   :  { %v3205_v58 = vpop.permute.xlu1 %3204 }
0x1b7d   :  { %9739 = vmatpush3.xpose.msk.msra.mxu0 %vm1377_vm15, %v3205_v58 }
0x1b7e   :  { %9743 = vmatprep.subr.mxu0 %v11019_v15 }
0x1b80   :  { %9741 = vmatmul.mubr.msk.f32.vlgmr.msra.gmra.mxu0 %vm1377_vm15, %v11758_v55  ;;  %v3371_v11 = vpop.permute.xlu1 %3370 }
0x1b81   :  { %9745 = vmatprep.mubr.msk.f32.mxu0 %vm11022_vm10, %v11019_v15 }
0x1b84   :  { %v3369_v14 = vpop.permute.xlu1 %3368 }
0x1c40   :  { %v3276_v59 = vpop.f32.mrf.mxu0 }
0x1c41   :  { %v3280_v60 = vmul.f32 0.35355338, %v3276_v59 }
0x1c42   :  { %v9742_v61 = vpop.f32.mrf.mxu0 }
0x1c43   :  { %v3281_v62 = vsel %vm1377_vm15, %v3280_v60, -inf }
0x1c44   :  { %3282 = vmax.xlane.f32.xlu0 %v3281_v62 }
0x1ccd   :  { %v3283_v49 = vpop.xlane.xlu0 %3282 }
0x1cce   :  { %v3284_v63 = vsub.f32 %v3280_v60, %v3283_v49 }
0x1cd0   :  { %v3285_v1 = vmul.f32 1.442695, %v3284_v63 }
0x1cd2   :  { %10702 = vpow2.f32 %v3285_v1 }
0x1cdf   :  { %v10703_v2 = vpop.eup %10702 }
0x1ce0   :  { %v3287_v5 = vsel %vm1377_vm15, %v10703_v2, 0.0 }
0x1ce1   :  { %3288 = vadd.xlane.f32.xlu0 %v3287_v5 }
0x1cf7   :  { %3292 = vrot.lane.b32.xlu0 %v11758_v55, %s11026_s4 }
0x1d6a   :  { %v3289_v6 = vpop.xlane.xlu0 %3288 }
0x1d6b   :  { %10704 = vrcp.f32 %v3289_v6 }
0x1d6e   :  { %v3293_v52 = vpop.permute.xlu0 %3292 }
0x1d6f   :  { %9744 = vmatpush3.msra.mxu0 %v3293_v52 }
0x1d70   :  { %9748 = vmatprep.subr.mxu0 %v11019_v15 }
0x1d78   :  { %v10705_v8 = vpop.eup %10704 }
0x1d79   :  { %v3291_v13 = vmul.f32 %v10705_v8, %v10703_v2 }
0x1d7b   :  { %9746 = vmatmul.mubr.msk.f32.vlgmr.msra.gmra.mxu0 %vm1377_vm15, %v3291_v13 }
0x1d7c   :  { %9749 = vmatpush3.xpose.msk.msra.mxu0 %vm1377_vm15, %v3371_v11  ;;  %9750 = vmatprep.mubr.msk.f32.mxu0 %vm11022_vm10, %v11019_v15 }
0x1d7d   :  { %9753 = vmatprep.subr.mxu0 %v11019_v15 }
0x1d7f   :  { %9751 = vmatmul.mubr.msk.f32.vlgmr.msra.gmra.mxu0 %vm1377_vm15, %v3369_v14 }
0x1d80   :  { %9755 = vmatprep.mubr.msk.f32.mxu0 %vm11022_vm10, %v11019_v15 }
0x1e3b   :  { %v11785_v57 = vpop.f32.mrf.mxu0 }
0x1e3d   :  { %v9747_v18 = vpop.f32.mrf.mxu0 }
0x1e3f   :  { %v3442_v19 = vpop.f32.mrf.mxu0 }
0x1e40   :  { %v3446_v4 = vmul.f32 0.35355338, %v3442_v19 }
0x1e41   :  { %v9752_v16 = vpop.f32.mrf.mxu0 }
0x1e42   :  { %v3447_v20 = vsel %vm1377_vm15, %v3446_v4, -inf }
0x1e43   :  { %3448 = vmax.xlane.f32.xlu1 %v3447_v20 }
0x1e54   :  { %3458 = vrot.lane.b32.xlu1 %v11758_v55, %s11039_s29 }
0x1e58   :  { %3534 = vrot.lane.b32.xlu1 %v11758_v55, %s11037_s27 }
0x1e5c   :  { %3702 = vrot.lane.b32.xlu1 %v11758_v55, %s11036_s26 }
0x1e60   :  { %3882 = vrot.lane.b32.xlu1 %v11756_v17, %s11033_s23 }
0x1e64   :  { %4046 = vrot.lane.b32.xlu1 %v11756_v17, %s11035_s25 }
0x1e68   :  { %4212 = vrot.lane.b32.xlu1 %v11756_v17, %s11037_s27 }
0x1e6c   :  { %4378 = vrot.lane.b32.xlu1 %v11756_v17, %s11038_s28 }
0x1ecc   :  { %v3449_v21 = vpop.xlane.xlu1 %3448 }
0x1ecd   :  { %v3450_v7 = vsub.f32 %v3446_v4, %v3449_v21 }
0x1ecf   :  { %v3451_v22 = vmul.f32 1.442695, %v3450_v7 }
0x1ed0   :  { %v3459_v27 = vpop.permute.xlu1 %3458 }
0x1ed1   :  { %10706 = vpow2.f32 %v3451_v22  ;;  %9754 = vmatpush3.msra.mxu0 %v3459_v27 }
0x1ed2   :  { %9758 = vmatprep.subr.mxu0 %v11019_v15 }
0x1ed4   :  { %v3535_v28 = vpop.permute.xlu1 %3534 }
0x1ed8   :  { %v3703_v31 = vpop.permute.xlu1 %3702 }
0x1ed9   :  { %9769 = vmatpush3.xpose.msk.msra.mxu1 %vm1377_vm15, %v3703_v31 }
0x1eda   :  { %9778 = vmatprep.subr.mxu1 %v11019_v15 }
0x1edc   :  { %v3883_v35 = vpop.permute.xlu1 %3882 }
0x1ede   :  { %v10707_v47 = vpop.eup %10706 }
0x1edf   :  { %v3453_v33 = vsel %vm1377_vm15, %v10707_v47, 0.0 }
0x1ee0   :  { %3454 = vadd.xlane.f32.xlu0 %v3453_v33  ;;  %v4047_v36 = vpop.permute.xlu1 %4046 }
0x1ee4   :  { %v4213_v41 = vpop.permute.xlu1 %4212 }
0x1ee8   :  { %v4379_v45 = vpop.permute.xlu1 %4378 }
0x1ef6   :  { %3536 = vrot.lane.b32.xlu0 %v11758_v55, %s11034_s24 }
0x1efa   :  { %3700 = vrot.lane.b32.xlu0 %v11758_v55, %s11038_s28 }
0x1efe   :  { %4048 = vrot.lane.b32.xlu0 %v11756_v17, %s11032_s22 }
0x1f02   :  { %4214 = vrot.lane.b32.xlu0 %v11756_v17, %s11034_s24  ;;  %s11984_s24 = sld [smem:[%s13146_s0 + %s11052_s17]]   ;;  %s11058_s17 = smov 28  }
0x1f06   :  { %4380 = vrot.lane.b32.xlu0 %v11756_v17, %s11036_s26 }
0x1f69   :  { %v3455_v51 = vpop.xlane.xlu0 %3454 }
0x1f6a   :  { %10708 = vrcp.f32 %v3455_v51 }
0x1f6d   :  { %v3537_v34 = vpop.permute.xlu0 %3536 }
0x1f71   :  { %v3701_v12 = vpop.permute.xlu0 %3700 }
0x1f72   :  { %9771 = vmatmul.mubr.msk.f32.vlgmr.msra.gmra.mxu1 %vm1377_vm15, %v3701_v12 }
0x1f73   :  { %9779 = vmatpush3.xpose.msk.msra.mxu1 %vm1377_vm15, %v3883_v35  ;;  %9780 = vmatprep.mubr.msk.f32.mxu1 %vm11022_vm10, %v11019_v15 }
0x1f74   :  { %9788 = vmatprep.subr.mxu1 %v11019_v15 }
0x1f75   :  { %v4049_v38 = vpop.permute.xlu0 %4048 }
0x1f76   :  { %9781 = vmatmul.mubr.msk.f32.vlgmr.msra.gmra.mxu1 %vm1377_vm15, %v11756_v17 }
0x1f77   :  { %v10709_v0 = vpop.eup %10708  ;;  %9789 = vmatpush3.xpose.msk.msra.mxu1 %vm1377_vm15, %v4049_v38  ;;  %9790 = vmatprep.mubr.msk.f32.mxu1 %vm11022_vm10, %v11019_v15 }
0x1f78   :  { %9798 = vmatprep.subr.mxu1 %v11019_v15  ;;  %v3457_v37 = vmul.f32 %v10709_v0, %v10707_v47 }
0x1f79   :  { %v4215_v23 = vpop.permute.xlu0 %4214 }
0x1f7a   :  { %9756 = vmatmul.mubr.msk.f32.vlgmr.msra.gmra.mxu0 %vm1377_vm15, %v3457_v37  ;;  %9791 = vmatmul.mubr.msk.f32.vlgmr.msra.gmra.mxu1 %vm1377_vm15, %v4047_v36 }
0x1f7b   :  { %9759 = vmatpush3.xpose.msk.msra.mxu0 %vm1377_vm15, %v3537_v34  ;;  %9799 = vmatpush3.xpose.msk.msra.mxu1 %vm1377_vm15, %v4215_v23 }
0x1f7c   :  { %9760 = vmatprep.mubr.msk.f32.mxu0 %vm11022_vm10, %v11019_v15  ;;  %9800 = vmatprep.mubr.msk.f32.mxu1 %vm11022_vm10, %v11019_v15 }
0x1f7d   :  { %v4381_v43 = vpop.permute.xlu0 %4380  ;;  %9808 = vmatprep.subr.mxu1 %v11019_v15  ;;  %9763 = vmatprep.subr.mxu0 %v11019_v15 }
0x1f7e   :  { %9761 = vmatmul.mubr.msk.f32.vlgmr.msra.gmra.mxu0 %vm1377_vm15, %v3535_v28  ;;  %9801 = vmatmul.mubr.msk.f32.vlgmr.msra.gmra.mxu1 %vm1377_vm15, %v4213_v41 }
0x1f7f   :  { %9809 = vmatpush3.xpose.msk.msra.mxu1 %vm1377_vm15, %v4381_v43  ;;  %9810 = vmatprep.mubr.msk.f32.mxu1 %vm11022_vm10, %v11019_v15 }
0x1f80   :  { %9765 = vmatprep.mubr.msk.f32.mxu0 %vm11022_vm10, %v11019_v15 }
0x1f82   :  { %9811 = vmatmul.mubr.msk.f32.vlgmr.msra.gmra.mxu1 %vm1377_vm15, %v4379_v45 }
0x2032   :  { %v3774_v29 = vpop.f32.mrf.mxu1 }
0x2033   :  { %v3778_v24 = vmul.f32 0.35355338, %v3774_v29 }
0x2034   :  { %v9772_v25 = vpop.f32.mrf.mxu1 }
0x2035   :  { %v3779_v26 = vsel %vm1377_vm15, %v3778_v24, -inf }
0x2036   :  { %3780 = vmax.xlane.f32.xlu1 %v3779_v26  ;;  %v3954_v30 = vpop.f32.mrf.mxu1 }
0x2037   :  { %v3958_v54 = vmul.f32 0.35355338, %v3954_v30 }
0x2038   :  { %v9782_v32 = vpop.f32.mrf.mxu1 }
0x2039   :  { %v3959_v49 = vsel %vm1377_vm15, %v3958_v54, -inf }
0x203a   :  { %v11846_v3 = vpop.f32.mrf.mxu0  ;;  %v4120_v56 = vpop.f32.mrf.mxu1 }
0x203b   :  { %v4124_v62 = vmul.f32 0.35355338, %v4120_v56 }
0x203c   :  { %v9757_v39 = vpop.f32.mrf.mxu0  ;;  %v9792_v46 = vpop.f32.mrf.mxu1 }
0x203d   :  { %v4125_v1 = vsel %vm1377_vm15, %v4124_v62, -inf }
0x203e   :  { %v3608_v9 = vpop.f32.mrf.mxu0  ;;  %v4286_v40 = vpop.f32.mrf.mxu1 }
0x203f   :  { %v3612_v48 = vmul.f32 0.35355338, %v3608_v9  ;;  %v4290_v10 = vmul.f32 0.35355338, %v4286_v40 }
0x2040   :  { %v9762_v50 = vpop.f32.mrf.mxu0  ;;  %v9802_v53 = vpop.f32.mrf.mxu1 }
0x2041   :  { %v4291_v58 = vsel %vm1377_vm15, %v4290_v10, -inf  ;;  %v3613_v59 = vsel %vm1377_vm15, %v3612_v48, -inf }
0x2042   :  { %4292 = vmax.xlane.f32.xlu1 %v4291_v58  ;;  %v4452_v60 = vpop.f32.mrf.mxu1  ;;  %3614 = vmax.xlane.f32.xlu0 %v3613_v59 }
0x2043   :  { %v4456_v63 = vmul.f32 0.35355338, %v4452_v60 }
0x2044   :  { %v9812_v61 = vpop.f32.mrf.mxu1 }
0x2045   :  { %v4457_v2 = vsel %vm1377_vm15, %v4456_v63, -inf }
0x2046   :  { %3960 = vmax.xlane.f32.xlu0 %v3959_v49  ;;  %v8778_v49 = vld [vmem:[%s11624_s10 + $0x30] sm:$0xff] }
0x204a   :  { %4126 = vmax.xlane.f32.xlu0 %v4125_v1 }
0x204e   :  { %4458 = vmax.xlane.f32.xlu0 %v4457_v2  ;;  %v8777_v2 = vld [vmem:[%s11624_s10 + $0x28] sm:$0xff] }
0x20bf   :  { %v3781_v5 = vpop.xlane.xlu1 %3780 }
0x20c0   :  { %v3782_v6 = vsub.f32 %v3778_v24, %v3781_v5  ;;  %v8776_v5 = vld [vmem:[%s11624_s10 + $0x20] sm:$0xff] }
0x20c2   :  { %v3783_v52 = vmul.f32 1.442695, %v3782_v6 }
0x20c4   :  { %10710 = vpow2.f32 %v3783_v52 }
0x20cb   :  { %v4293_v8 = vpop.xlane.xlu1 %4292  ;;  %v3615_v11 = vpop.xlane.xlu0 %3614 }
0x20cc   :  { %v4294_v13 = vsub.f32 %v4290_v10, %v4293_v8  ;;  %v3616_v0 = vsub.f32 %v3612_v48, %v3615_v11 }
0x20ce   :  { %v4295_v4 = vmul.f32 1.442695, %v4294_v13  ;;  %v3617_v37 = vmul.f32 1.442695, %v3616_v0 }
0x20cf   :  { %v3961_v14 = vpop.xlane.xlu0 %3960 }
0x20d0   :  { %v3962_v18 = vsub.f32 %v3958_v54, %v3961_v14 }
0x20d1   :  { %v11853_v19 = vpop.eup %10710 }
0x20d2   :  { %v3963_v16 = vmul.f32 1.442695, %v3962_v18  ;;  %v3785_v20 = vsel %vm1377_vm15, %v11853_v19, 0.0 }
0x20d3   :  { %3786 = vadd.xlane.f32.xlu0 %v3785_v20  ;;  %v4127_v21 = vpop.xlane.xlu0 %4126 }
0x20d4   :  { %10712 = vpow2.f32 %v3963_v16  ;;  %v4128_v7 = vsub.f32 %v4124_v62, %v4127_v21  ;;  %v8779_v62 = vld [vmem:[%s11624_s10 + $0x38] sm:$0xff] }
0x20d5   :  { %10714 = vpow2.f32 %v4295_v4  ;;  %9818 = vmatprep.subr.mxu1 %v8779_v62 }
0x20d6   :  { %v4129_v22 = vmul.f32 1.442695, %v4128_v7  ;;  %9819 = vmatpush3.msra.mxu1 %v8779_v62 }
0x20d7   :  { %v4459_v27 = vpop.xlane.xlu0 %4458  ;;  %9820 = vmatprep.subr.mxu1 %v8778_v49 }
0x20d8   :  { %10716 = vpow2.f32 %v4129_v22  ;;  %v4460_v28 = vsub.f32 %v4456_v63, %v4459_v27  ;;  %9821 = vmatpush3.msra.mxu1 %v8778_v49 }
0x20d9   :  { %9822 = vmatprep.subr.mxu1 %v8777_v2 }
0x20da   :  { %v4461_v31 = vmul.f32 1.442695, %v4460_v28  ;;  %9823 = vmatpush3.msra.mxu1 %v8777_v2 }
0x20db   :  { %9824 = vmatprep.subr.mxu1 %v8776_v5 }
0x20dc   :  { %10718 = vpow2.f32 %v4461_v31  ;;  %9825 = vmatpush3.msra.mxu1 %v8776_v5 }
0x20dd   :  { %10720 = vpow2.f32 %v3617_v37 }
0x20e1   :  { %v10713_v47 = vpop.eup %10712 }
0x20e2   :  { %v3965_v33 = vsel %vm1377_vm15, %v10713_v47, 0.0  ;;  %v11858_v51 = vpop.eup %10714 }
0x20e3   :  { %3966 = vadd.xlane.f32.xlu1 %v3965_v33  ;;  %v4297_v35 = vsel %vm1377_vm15, %v11858_v51, 0.0 }
0x20e5   :  { %v10717_v34 = vpop.eup %10716 }
0x20e6   :  { %v4131_v12 = vsel %vm1377_vm15, %v10717_v34, 0.0 }
0x20e7   :  { %4298 = vadd.xlane.f32.xlu1 %v4297_v35  ;;  %4132 = vadd.xlane.f32.xlu0 %v4131_v12  ;;  %v8781_v35 = vld [vmem:[%s11645_s13 + $0x1] ss:$0 sm:$0xff] }
0x20e9   :  { %v11863_v36 = vpop.eup %10718 }
0x20ea   :  { %v4463_v38 = vsel %vm1377_vm15, %v11863_v36, 0.0  ;;  %v10721_v23 = vpop.eup %10720 }
0x20eb   :  { %4464 = vadd.xlane.f32.xlu0 %v4463_v38  ;;  %v3619_v41 = vsel %vm1377_vm15, %v10721_v23, 0.0 }
0x20f8   :  { %3624 = vrot.lane.b32.xlu1 %v11758_v55, %s11041_s1 }
0x2101   :  { %3790 = vrot.lane.b32.xlu0 %v11758_v55, %s11040_s30 }
0x2105   :  { %4302 = vrot.lane.b32.xlu0 %v11756_v17, %s11041_s1  ;;  %s13149_s1 = smov 32  }
0x2109   :  { %3867 = vrot.lane.b32.xlu0 %v11846_v3, %s11028_s6 }
0x211c   :  { %3620 = vadd.xlane.f32.xlu1 %v3619_v41 }
0x212d   :  { %3970 = vrot.lane.b32.xlu1 %v11756_v17, %s11026_s4 }
0x2131   :  { %4136 = vrot.lane.b32.xlu1 %v11756_v17, %s11039_s29 }
0x2135   :  { %4468 = vrot.lane.b32.xlu1 %v11756_v17, %s11040_s30 }
0x215c   :  { %v3787_v29 = vpop.xlane.xlu0 %3786 }
0x216c   :  { %v3967_v55 = vpop.xlane.xlu1 %3966 }
0x2170   :  { %v4299_v43 = vpop.xlane.xlu1 %4298  ;;  %v4133_v25 = vpop.xlane.xlu0 %4132 }
0x2174   :  { %v3625_v45 = vpop.permute.xlu1 %3624  ;;  %v4465_v26 = vpop.xlane.xlu0 %4464 }
0x2175   :  { %9764 = vmatpush3.msra.mxu0 %v3625_v45 }
0x2176   :  { %9773 = vmatprep.subr.mxu0 %v11019_v15 }
0x2178   :  { %v3791_v56 = vpop.permute.xlu0 %3790 }
0x217c   :  { %v4303_v53 = vpop.permute.xlu0 %4302 }
0x2180   :  { %v3868_v16 = vpop.permute.xlu0 %3867 }
0x2181   :  { %v3878_v21 = vsel %vm1377_vm15, %v11785_v57, %v3868_v16  ;;  %v8799_v16 = vld [vmem:[%s11674_s8 + $0x98] sm:$0xff] }
0x21a5   :  { %v3621_v24 = vpop.xlane.xlu1 %3620 }
0x21a6   :  { %10722 = vrcp.f32 %v3621_v24 }
0x21a7   :  { %10724 = vrcp.f32 %v3787_v29 }
0x21a8   :  { %10726 = vrcp.f32 %v3967_v55 }
0x21a9   :  { %10728 = vrcp.f32 %v4133_v25  ;;  %v3971_v17 = vpop.permute.xlu1 %3970 }
0x21aa   :  { %10730 = vrcp.f32 %v4299_v43 }
0x21ab   :  { %10732 = vrcp.f32 %v4465_v26 }
0x21ad   :  { %v4137_v48 = vpop.permute.xlu1 %4136 }
0x21b1   :  { %v4469_v59 = vpop.permute.xlu1 %4468 }
0x21b3   :  { %v10723_v30 = vpop.eup %10722 }
0x21b4   :  { %v3623_v32 = vmul.f32 %v10723_v30, %v10721_v23  ;;  %v10725_v3 = vpop.eup %10724 }
0x21b5   :  { %v3789_v39 = vmul.f32 %v10725_v3, %v11853_v19  ;;  %v10727_v46 = vpop.eup %10726  ;;  %v8790_v3 = vld [vmem:[%s11665_s19 + $0x30] sm:$0xff] }
0x21b6   :  { %9766 = vmatmul.mubr.msk.f32.vlgmr.msra.gmra.mxu0 %vm1377_vm15, %v3623_v32  ;;  %v3969_v9 = vmul.f32 %v10727_v46, %v10713_v47  ;;  %v10729_v40 = vpop.eup %10728  ;;  %v8791_v32 = vld [vmem:[%s11665_s19 + $0x38] sm:$0xff]  ;;  %v8810_v46 = vld [vmem:[%s11674_s8 + $0xf0] sm:$0xff] }
0x21b7   :  { %9774 = vmatpush3.msra.mxu0 %v3791_v56  ;;  %9775 = vmatprep.mubr.msk.f32.mxu0 %vm11022_vm10, %v11019_v15  ;;  %v4135_v10 = vmul.f32 %v10729_v40, %v10717_v34  ;;  %v10731_v50 = vpop.eup %10730  ;;  %v8789_v56 = vld [vmem:[%s11665_s19 + $0x28] sm:$0xff]  ;;  %v8808_v40 = vld [vmem:[%s11674_s8 + $0xe0] sm:$0xff] }
0x21b8   :  { %9783 = vmatprep.subr.mxu0 %v11019_v15  ;;  %v4301_v54 = vmul.f32 %v10731_v50, %v11858_v51  ;;  %v10733_v58 = vpop.eup %10732  ;;  %v8805_v50 = vld [vmem:[%s11674_s8 + $0xc8] sm:$0xff] }
0x21b9   :  { %v4467_v60 = vmul.f32 %v10733_v58, %v11863_v36  ;;  %v8802_v58 = vld [vmem:[%s11674_s8 + $0xb0] sm:$0xff] }
0x21ba   :  { %9776 = vmatmul.mubr.msk.f32.vlgmr.msra.gmra.mxu0 %vm1377_vm15, %v3789_v39  ;;  %v8811_v39 = vld [vmem:[%s11674_s8 + $0xf8] sm:$0xff] }
0x21bb   :  { %9784 = vmatpush3.msra.mxu0 %v3971_v17  ;;  %9785 = vmatprep.mubr.msk.f32.mxu0 %vm11022_vm10, %v11019_v15  ;;  %v8788_v17 = vld [vmem:[%s11665_s19 + $0x20] sm:$0xff] }
0x21bc   :  { %9793 = vmatprep.subr.mxu0 %v11019_v15  ;;  %9840 = vmatprep.subr.mxu1 %v8811_v39 }
0x21be   :  { %9786 = vmatmul.mubr.msk.f32.vlgmr.msra.gmra.mxu0 %vm1377_vm15, %v3969_v9  ;;  %v8809_v9 = vld [vmem:[%s11674_s8 + $0xe8] sm:$0xff] }
0x21bf   :  { %9794 = vmatpush3.msra.mxu0 %v4137_v48  ;;  %9795 = vmatprep.mubr.msk.f32.mxu0 %vm11022_vm10, %v11019_v15  ;;  %v8807_v48 = vld [vmem:[%s11674_s8 + $0xd8] sm:$0xff] }
0x21c0   :  { %9803 = vmatprep.subr.mxu0 %v11019_v15 }
0x21c2   :  { %9796 = vmatmul.mubr.msk.f32.vlgmr.msra.gmra.mxu0 %vm1377_vm15, %v4135_v10  ;;  %v8806_v10 = vld [vmem:[%s11674_s8 + $0xd0] sm:$0xff] }
0x21c3   :  { %9804 = vmatpush3.msra.mxu0 %v4303_v53  ;;  %9805 = vmatprep.mubr.msk.f32.mxu0 %vm11022_vm10, %v11019_v15  ;;  %v8804_v53 = vld [vmem:[%s11674_s8 + $0xc0] sm:$0xff] }
0x21c4   :  { %9813 = vmatprep.subr.mxu0 %v11019_v15 }
0x21c6   :  { %9806 = vmatmul.mubr.msk.f32.vlgmr.msra.gmra.mxu0 %vm1377_vm15, %v4301_v54  ;;  %v8803_v54 = vld [vmem:[%s11674_s8 + $0xb8] sm:$0xff] }
0x21c7   :  { %9814 = vmatpush3.msra.mxu0 %v4469_v59  ;;  %9815 = vmatprep.mubr.msk.f32.mxu0 %vm11022_vm10, %v11019_v15  ;;  %v8801_v59 = vld [vmem:[%s11674_s8 + $0xa8] sm:$0xff] }
0x21c8   :  { %9829 = vmatprep.subr.mxu0 %v8791_v32 }
0x21ca   :  { %9816 = vmatmul.mubr.msk.f32.vlgmr.msra.gmra.mxu0 %vm1377_vm15, %v4467_v60  ;;  %v8800_v60 = vld [vmem:[%s11674_s8 + $0xa0] sm:$0xff] }
0x21cb   :  { %9830 = vmatpush3.msra.mxu0 %v8791_v32  ;;  %v11993_v32 = vld [vmem:[%s11984_s24 + $0x30] sm:$0xff] }
0x21cc   :  { %9831 = vmatprep.subr.mxu0 %v8790_v3 }
0x21cd   :  { %9832 = vmatpush3.msra.mxu0 %v8790_v3  ;;  %v12000_v3 = vld [vmem:[%s11984_s24 + $0x28] sm:$0xff] }
0x21ce   :  { %9833 = vmatprep.subr.mxu0 %v8789_v56 }
0x21cf   :  { %9834 = vmatpush3.msra.mxu0 %v8789_v56  ;;  %v12007_v56 = vld [vmem:[%s11984_s24 + $0x20] sm:$0xff] }
0x21d0   :  { %9835 = vmatprep.subr.mxu0 %v8788_v17 }
0x21d1   :  { %9836 = vmatpush3.msra.mxu0 %v8788_v17  ;;  %v12014_v17 = vld [vmem:[%s11984_s24 + $0x18] sm:$0xff] }
0x21d2   :  { %9875 = vmatprep.subr.mxu0 %v11019_v15 }
0x2276   :  { %v3696_v61 = vpop.f32.mrf.mxu0 }
0x2277   :  { %3871 = vrot.lane.b32.xlu1 %v3696_v61, %s11042_s2 }
0x2278   :  { %v9767_v63 = vpop.f32.mrf.mxu0 }
0x227a   :  { %v3862_v1 = vpop.f32.mrf.mxu0 }
0x227b   :  { %3875 = vrot.lane.b32.xlu1 %v3862_v1, %s11043_s3 }
0x227c   :  { %v9777_v6 = vpop.f32.mrf.mxu0 }
0x227d   :  { %v8786_v6 = vld [vmem:[%s11691_s14 + $0x1] ss:$0 sm:$0xff] }
0x227e   :  { %v4042_v52 = vpop.f32.mrf.mxu0 }
0x2280   :  { %v9787_v8 = vpop.f32.mrf.mxu0 }
0x2281   :  { %v8787_v8 = vld [vmem:[%s11696_s21 + $0x1] ss:$0 sm:$0xff] }
0x2282   :  { %v4208_v11 = vpop.f32.mrf.mxu0 }
0x2283   :  { %4545 = vrot.lane.b32.xlu0 %v4208_v11, %s11028_s6 }
0x2284   :  { %v9797_v13 = vpop.f32.mrf.mxu0 }
0x2286   :  { %v4374_v14 = vpop.f32.mrf.mxu0 }
0x2287   :  { %4549 = vrot.lane.b32.xlu0 %v4374_v14, %s11042_s2 }
0x2288   :  { %v9807_v18 = vpop.f32.mrf.mxu0 }
0x228a   :  { %v4540_v19 = vpop.f32.mrf.mxu0 }
0x228b   :  { %4553 = vrot.lane.b32.xlu1 %v4540_v19, %s11043_s3  ;;  %s11054_s3 = smov 25  }
0x228c   :  { %v9817_v4 = vpop.f32.mrf.mxu0  ;;  %s8659_s19 = sld [smem:[%s13146_s0 + %s11054_s3]]  }
0x22e9   :  { %v3872_v20 = vpop.permute.xlu1 %3871 }
0x22ea   :  { %v3879_v7 = vsel %vm296_vm7, %v3878_v21, %v3872_v20  ;;  %v8798_v20 = vld [vmem:[%s11674_s8 + $0x90] sm:$0xff]  ;;  %v8797_v21 = vld [vmem:[%s11674_s8 + $0x88] sm:$0xff] }
0x22ed   :  { %v3876_v22 = vpop.permute.xlu1 %3875 }
0x22ee   :  { %v3880_v27 = vsel %vm2052_vm1, %v3879_v7, %v3876_v22  ;;  %v8796_v7 = vld [vmem:[%s11674_s8 + $0x80] sm:$0xff]  ;;  %s11055_s8 = smov 27  }
0x22ef   :  { %9826 = vmatprep.mubr.msk.f32.mxu1 %vm414_vm0, %v3880_v27  ;;  %v8793_v22 = vld [vmem:[%s11712_s12 + $0x1] ss:$0 sm:$0xff]  ;;  %s13086_s12 = sld [smem:[%s13146_s0 + %s11055_s8]]  }
0x22f5   :  { %v4546_v28 = vpop.permute.xlu0 %4545 }
0x22f6   :  { %v4556_v47 = vsel %vm1377_vm15, %v4042_v52, %v4546_v28 }
0x22f9   :  { %v4550_v31 = vpop.permute.xlu0 %4549 }
0x22fa   :  { %v4557_v33 = vsel %vm296_vm7, %v4556_v47, %v4550_v31 }
0x22fd   :  { %v4554_v51 = vpop.permute.xlu1 %4553 }
0x22fe   :  { %v4558_v34 = vsel %vm2052_vm1, %v4557_v33, %v4554_v51 }
0x22ff   :  { %9827 = vmatmul.mubr.msk.f32.vlgmr.msra.gmra.mxu1 %vm414_vm0, %v4558_v34  ;;  %v8813_v34 = vld [vmem:[%s11720_s9 + $0x1] ss:$0 sm:$0xff] }
0x2300   :  { %9841 = vmatpush3.msra.mxu1 %v8811_v39  ;;  %v12021_v39 = vld [vmem:[%s11984_s24 + $0x10] sm:$0xff] }
0x2301   :  { %9842 = vmatprep.subr.mxu1 %v8810_v46 }
0x2302   :  { %9843 = vmatpush3.msra.mxu1 %v8810_v46  ;;  %v12026_v46 = vld [vmem:[%s11984_s24 + $0x8] sm:$0xff] }
0x2303   :  { %9844 = vmatprep.subr.mxu1 %v8809_v9 }
0x2304   :  { %9845 = vmatpush3.msra.mxu1 %v8809_v9  ;;  %v12031_v9 = vld [vmem:[%s11984_s24] sm:$0xff] }
0x2305   :  { %9846 = vmatprep.subr.mxu1 %v8808_v40 }
0x2306   :  { %9847 = vmatpush3.msra.mxu1 %v8808_v40 }
0x2307   :  { %9848 = vmatprep.subr.mxu1 %v8807_v48 }
0x2308   :  { %9849 = vmatpush3.msra.mxu1 %v8807_v48 }
0x2309   :  { %9850 = vmatprep.subr.mxu1 %v8806_v10 }
0x230a   :  { %9851 = vmatpush3.msra.mxu1 %v8806_v10 }
0x230b   :  { %9852 = vmatprep.subr.mxu1 %v8805_v50 }
0x230c   :  { %9853 = vmatpush3.msra.mxu1 %v8805_v50 }
0x230d   :  { %9854 = vmatprep.subr.mxu1 %v8804_v53 }
0x230e   :  { %9855 = vmatpush3.msra.mxu1 %v8804_v53 }
0x230f   :  { %9856 = vmatprep.subr.mxu1 %v8803_v54 }
0x2310   :  { %9857 = vmatpush3.msra.mxu1 %v8803_v54 }
0x2311   :  { %9858 = vmatprep.subr.mxu1 %v8802_v58 }
0x2312   :  { %9859 = vmatpush3.msra.mxu1 %v8802_v58 }
0x2313   :  { %9860 = vmatprep.subr.mxu1 %v8801_v59 }
0x2314   :  { %9861 = vmatpush3.msra.mxu1 %v8801_v59  ;;  %v8816_v59 = vld [vmem:[%s11735_s18 + $0x1] ss:$0 sm:$0xff] }
0x2315   :  { %9862 = vmatprep.subr.mxu1 %v8800_v60 }
0x2316   :  { %9863 = vmatpush3.msra.mxu1 %v8800_v60 }
0x2317   :  { %9864 = vmatprep.subr.mxu1 %v8799_v16 }
0x2318   :  { %9865 = vmatpush3.msra.mxu1 %v8799_v16 }
0x2319   :  { %9866 = vmatprep.subr.mxu1 %v8798_v20 }
0x231a   :  { %9867 = vmatpush3.msra.mxu1 %v8798_v20 }
0x231b   :  { %9868 = vmatprep.subr.mxu1 %v8797_v21 }
0x231c   :  { %9869 = vmatpush3.msra.mxu1 %v8797_v21 }
0x231d   :  { %9870 = vmatprep.subr.mxu1 %v8796_v7 }
0x231e   :  { %9871 = vmatpush3.msra.mxu1 %v8796_v7 }
0x231f   :  { %9913 = vmatprep.subr.mxu1 %v11019_v15 }
0x23bf   :  { %v9828_v57 = vpop.f32.mrf.mxu1 }
0x23c0   :  { %v4650_v12 = vadd.f32 %v9828_v57, %v8781_v35 }
0x23c1   :  { %v4644_v36 = vpop.f32.mrf.mxu1 }
0x23c2   :  { %v4654_v38 = vadd.f32 %v4650_v12, %v11747_v42  ;;  %v4645_v0 = vadd.f32 %v8781_v35, %v4644_v36 }
0x23c4   :  { %v4653_v37 = vadd.f32 %v4645_v0, %v11745_v44  ;;  %v4662_v23 = vsel %vm414_vm0, %v4654_v38, 0.0 }
0x23c5   :  { %4663 = vadd.xlane.f32.xlu1 %v4662_v23 }
0x23c6   :  { %v4659_v41 = vsel %vm414_vm0, %v4653_v37, 0.0 }
0x23c7   :  { %4660 = vadd.xlane.f32.xlu0 %v4659_v41 }
0x244e   :  { %v4664_v55 = vpop.xlane.xlu1 %4663 }
0x244f   :  { %v4666_v43 = vmul.f32 0.03125, %v4664_v55 }
0x2450   :  { %v4661_v45 = vpop.xlane.xlu0 %4660 }
0x2451   :  { %v4665_v29 = vmul.f32 0.03125, %v4661_v45  ;;  %v11929_v24 = vsub.f32 %v4654_v38, %v4666_v43 }
0x2453   :  { %v11931_v25 = vsub.f32 %v4653_v37, %v4665_v29  ;;  %v4670_v26 = vmul.f32 %v11929_v24, %v11929_v24 }
0x2455   :  { %v4669_v44 = vmul.f32 %v11931_v25, %v11931_v25  ;;  %v4674_v30 = vsel %vm414_vm0, %v4670_v26, 0.0 }
0x2457   :  { %v4671_v42 = vsel %vm414_vm0, %v4669_v44, 0.0 }
0x2458   :  { %4672 = vadd.xlane.f32.xlu0 %v4671_v42 }
0x245c   :  { %4675 = vadd.xlane.f32.xlu0 %v4674_v30  ;;  %v11987_v30 = vld [vmem:[%s11984_s24 + $0x38] sm:$0xff] }
0x24e1   :  { %v4673_v61 = vpop.xlane.xlu0 %4672 }
0x24e2   :  { %v4677_v62 = vmul.f32 0.03125, %v4673_v61 }
0x24e4   :  { %v4679_v49 = vadd.f32 1e-05, %v4677_v62  ;;  %v8817_v62 = vld [vmem:[%s11741_s5 + $0x1] ss:$0 sm:$0xff]  ;;  %s11053_s5 = smov 12  }
0x24e5   :  { %v4676_v63 = vpop.xlane.xlu0 %4675  ;;  %s12088_s30 = sld [smem:[%s13146_s0 + %s11053_s5]]  }
0x24e6   :  { %10734 = vrsqrt.f32 %v4679_v49  ;;  %v4678_v1 = vmul.f32 0.03125, %v4676_v63 }
0x24e8   :  { %v4680_v2 = vadd.f32 1e-05, %v4678_v1 }
0x24ea   :  { %10736 = vrsqrt.f32 %v4680_v2 }
0x24f3   :  { %v10735_v5 = vpop.eup %10734 }
0x24f4   :  { %v4683_v52 = vmul.f32 %v10735_v5, %v11931_v25 }
0x24f6   :  { %v4691_v11 = vmul.f32 %v8786_v6, %v4683_v52 }
0x24f7   :  { %v10737_v13 = vpop.eup %10736 }
0x24f8   :  { %v4684_v14 = vmul.f32 %v10737_v13, %v11929_v24  ;;  %v4699_v18 = vadd.f32 %v8787_v8, %v4691_v11 }
0x24fa   :  { %v4692_v19 = vmul.f32 %v8786_v6, %v4684_v14  ;;  %9837 = vmatprep.mubr.msk.f32.mxu0 %vm414_vm0, %v4699_v18 }
0x24fc   :  { %v4700_v4 = vadd.f32 %v8787_v8, %v4692_v19 }
0x24fe   :  { %9838 = vmatmul.mubr.msk.f32.vlgmr.msra.gmra.mxu0 %vm414_vm0, %v4700_v4 }
0x24ff   :  { %9891 = vmatprep.mubr.msk.f32.mxu0 %vm11022_vm10, %v11019_v15  ;;  %9876 = vmatpush3.msra.mxu0 %v11987_v30 }
0x2500   :  { %9877 = vmatprep.subr.mxu0 %v11019_v15 }
0x2501   :  { %9878 = vmatpush3.msra.mxu0 %v11993_v32 }
0x2502   :  { %9879 = vmatprep.subr.mxu0 %v11019_v15 }
0x2503   :  { %9880 = vmatpush3.msra.mxu0 %v12000_v3 }
0x2504   :  { %9881 = vmatprep.subr.mxu0 %v11019_v15 }
0x2505   :  { %9882 = vmatpush3.msra.mxu0 %v12007_v56 }
0x2506   :  { %9883 = vmatprep.subr.mxu0 %v11019_v15 }
0x2507   :  { %9884 = vmatpush3.msra.mxu0 %v12014_v17 }
0x2508   :  { %9885 = vmatprep.subr.mxu0 %v11019_v15 }
0x2509   :  { %9886 = vmatpush3.msra.mxu0 %v12021_v39 }
0x250a   :  { %9887 = vmatprep.subr.mxu0 %v11019_v15 }
0x250b   :  { %9888 = vmatpush3.msra.mxu0 %v12026_v46 }
0x250c   :  { %9889 = vmatprep.subr.mxu0 %v11019_v15 }
0x250d   :  { %9890 = vmatpush3.msra.mxu0 %v12031_v9 }
0x250e   :  { %9894 = vmatprep.subr.mxu0 %v11019_v15 }
0x25be   :  { %v9839_v27 = vpop.f32.mrf.mxu0 }
0x25bf   :  { %v4792_v28 = vadd.f32 %v9839_v27, %v8793_v22 }
0x25c0   :  { %v4786_v31 = vpop.f32.mrf.mxu0 }
0x25c1   :  { %v4787_v47 = vadd.f32 %v8793_v22, %v4786_v31  ;;  %v4796_v51 = vmax.f32 %v4792_v28, 0.0 }
0x25c3   :  { %v4795_v33 = vmax.f32 %v4787_v47, 0.0 }
0x25c5   :  { %9872 = vmatprep.mubr.f32.mxu1 %v4795_v33 }
0x25c6   :  { %9873 = vmatmul.mubr.f32.vlgmr.msra.gmra.mxu1 %v4796_v51 }
0x25c7   :  { %9929 = vmatprep.mubr.msk.f32.mxu1 %vm11022_vm10, %v11019_v15  ;;  %9914 = vmatpush3.msra.mxu1 %v11987_v30 }
0x25c8   :  { %9915 = vmatprep.subr.mxu1 %v11019_v15 }
0x25c9   :  { %9916 = vmatpush3.msra.mxu1 %v11993_v32 }
0x25ca   :  { %9917 = vmatprep.subr.mxu1 %v11019_v15 }
0x25cb   :  { %9918 = vmatpush3.msra.mxu1 %v12000_v3 }
0x25cc   :  { %9919 = vmatprep.subr.mxu1 %v11019_v15 }
0x25cd   :  { %9920 = vmatpush3.msra.mxu1 %v12007_v56 }
0x25ce   :  { %9921 = vmatprep.subr.mxu1 %v11019_v15 }
0x25cf   :  { %9922 = vmatpush3.msra.mxu1 %v12014_v17 }
0x25d0   :  { %9923 = vmatprep.subr.mxu1 %v11019_v15 }
0x25d1   :  { %9924 = vmatpush3.msra.mxu1 %v12021_v39 }
0x25d2   :  { %9925 = vmatprep.subr.mxu1 %v11019_v15 }
0x25d3   :  { %9926 = vmatpush3.msra.mxu1 %v12026_v46 }
0x25d4   :  { %9927 = vmatprep.subr.mxu1 %v11019_v15 }
0x25d5   :  { %9928 = vmatpush3.msra.mxu1 %v12031_v9 }
0x25d6   :  { %9951 = vmatprep.subr.mxu1 %v11019_v15 }
0x2686   :  { %v9874_v35 = vpop.f32.mrf.mxu1 }
0x2687   :  { %v4894_v57 = vadd.f32 %v9874_v35, %v8813_v34 }
0x2688   :  { %v4888_v12 = vpop.f32.mrf.mxu1 }
0x2689   :  { %v4898_v36 = vadd.f32 %v4894_v57, %v4700_v4  ;;  %v4889_v38 = vadd.f32 %v8813_v34, %v4888_v12  ;;  %v12091_v12 = vld [vmem:[%s12088_s30] ss:$0 sm:$0xff] }
0x268b   :  { %v4897_v0 = vadd.f32 %v4889_v38, %v4699_v18  ;;  %v4906_v37 = vsel %vm414_vm0, %v4898_v36, 0.0 }
0x268c   :  { %4907 = vadd.xlane.f32.xlu1 %v4906_v37 }
0x268d   :  { %v4903_v23 = vsel %vm414_vm0, %v4897_v0, 0.0 }
0x268e   :  { %4904 = vadd.xlane.f32.xlu0 %v4903_v23 }
0x2715   :  { %v4908_v41 = vpop.xlane.xlu1 %4907 }
0x2716   :  { %v4910_v55 = vmul.f32 0.03125, %v4908_v41 }
0x2717   :  { %v4905_v43 = vpop.xlane.xlu0 %4904 }
0x2718   :  { %v4912_v45 = vsub.f32 %v4898_v36, %v4910_v55  ;;  %v4909_v29 = vmul.f32 0.03125, %v4905_v43 }
0x271a   :  { %v11975_v24 = vsub.f32 %v4897_v0, %v4909_v29  ;;  %v4914_v25 = vmul.f32 %v4912_v45, %v4912_v45 }
0x271c   :  { %v4918_v44 = vsel %vm414_vm0, %v4914_v25, 0.0  ;;  %v4913_v42 = vmul.f32 %v11975_v24, %v11975_v24 }
0x271d   :  { %4919 = vadd.xlane.f32.xlu1 %v4918_v44 }
0x271e   :  { %v4915_v26 = vsel %vm414_vm0, %v4913_v42, 0.0 }
0x271f   :  { %4916 = vadd.xlane.f32.xlu0 %v4915_v26 }
0x27a6   :  { %v4920_v40 = vpop.xlane.xlu1 %4919 }
0x27a7   :  { %v4922_v48 = vmul.f32 0.03125, %v4920_v40 }
0x27a8   :  { %v4917_v10 = vpop.xlane.xlu0 %4916 }
0x27a9   :  { %v4924_v50 = vadd.f32 1e-05, %v4922_v48  ;;  %v4921_v53 = vmul.f32 0.03125, %v4917_v10 }
0x27ab   :  { %10738 = vrsqrt.f32 %v4924_v50  ;;  %v4923_v54 = vadd.f32 1e-05, %v4921_v53 }
0x27ad   :  { %10740 = vrsqrt.f32 %v4923_v54 }
0x27b8   :  { %v10739_v58 = vpop.eup %10738 }
0x27b9   :  { %v4928_v60 = vmul.f32 %v10739_v58, %v4912_v45 }
0x27ba   :  { %v10741_v61 = vpop.eup %10740 }
0x27bb   :  { %v4936_v49 = vmul.f32 %v8816_v59, %v4928_v60  ;;  %v4927_v63 = vmul.f32 %v10741_v61, %v11975_v24 }
0x27bd   :  { %v4944_v1 = vadd.f32 %v8817_v62, %v4936_v49  ;;  %v4935_v2 = vmul.f32 %v8816_v59, %v4927_v63 }
0x27bf   :  { %v4943_v5 = vadd.f32 %v8817_v62, %v4935_v2  ;;  %v4946_v6 = vrot.slane %v4944_v1, 7  ;;  %v4956_v52 = vrot.slane %v4944_v1, 1  ;;  %v4961_v8 = vrot.slane %v4944_v1, 2 }
0x27c0   :  { %v4966_v11 = vrot.slane %v4944_v1, 3  ;;  %v4971_v13 = vrot.slane %v4944_v1, 4  ;;  %v4976_v14 = vrot.slane %v4944_v1, 5  ;;  %v4981_v18 = vrot.slane %v4944_v1, 6 }
0x27c1   :  { %v4949_v19 = vsel %vm4948_vm2, %v4943_v5, %v4946_v6  ;;  %v4951_v4 = vrot.slane %v4943_v5, 1  ;;  %v4954_v16 = vrot.slane %v4943_v5, 2  ;;  %v4959_v20 = vrot.slane %v4943_v5, 3 }
0x27c2   :  { %v4993_v21 = vsel %vm414_vm0, %v4949_v19, 0.0  ;;  %v4964_v7 = vrot.slane %v4943_v5, 4  ;;  %v4969_v22 = vrot.slane %v4943_v5, 5  ;;  %v4974_v27 = vrot.slane %v4943_v5, 6 }
0x27c3   :  { %9892 = vmatmul.mubr.msk.f32.vlgmr.msra.gmra.mxu0 %vm609_vm11, %v4993_v21  ;;  %v4953_v28 = vsel %vm4948_vm2, %v4951_v4, %v4944_v1  ;;  %v12050_v31 = vsel %vm4948_vm2, %v4954_v16, %v4956_v52  ;;  %v12053_v47 = vsel %vm4948_vm2, %v4959_v20, %v4961_v8  ;;  %v4979_v33 = vrot.slane %v4943_v5, 7 }
0x27c4   :  { %9895 = vmatpush3.msra.mxu0 %v11987_v30  ;;  %9910 = vmatprep.mubr.msk.f32.mxu0 %vm11022_vm10, %v11019_v15  ;;  %v12059_v51 = vsel %vm4948_vm2, %v4964_v7, %v4966_v11  ;;  %v12062_v34 = vsel %vm4948_vm2, %v4969_v22, %v4971_v13  ;;  %v12065_v35 = vsel %vm4948_vm2, %v4974_v27, %v4976_v14 }
0x27c5   :  { %9896 = vmatprep.subr.mxu0 %v11019_v15  ;;  %v12069_v57 = vsel %vm4948_vm2, %v4979_v33, %v4981_v18 }
0x27c6   :  { %9897 = vmatpush3.msra.mxu0 %v11993_v32 }
0x27c7   :  { %9898 = vmatprep.subr.mxu0 %v11019_v15 }
0x27c8   :  { %9899 = vmatpush3.msra.mxu0 %v12000_v3 }
0x27c9   :  { %9900 = vmatprep.subr.mxu0 %v11019_v15 }
0x27ca   :  { %9901 = vmatpush3.msra.mxu0 %v12007_v56 }
0x27cb   :  { %9902 = vmatprep.subr.mxu0 %v11019_v15 }
0x27cc   :  { %9903 = vmatpush3.msra.mxu0 %v12014_v17 }
0x27cd   :  { %9904 = vmatprep.subr.mxu0 %v11019_v15 }
0x27ce   :  { %9905 = vmatpush3.msra.mxu0 %v12021_v39 }
0x27cf   :  { %9906 = vmatprep.subr.mxu0 %v11019_v15 }
0x27d0   :  { %9907 = vmatpush3.msra.mxu0 %v12026_v46 }
0x27d1   :  { %9908 = vmatprep.subr.mxu0 %v11019_v15 }
0x27d2   :  { %9909 = vmatpush3.msra.mxu0 %v12031_v9 }
0x27d3   :  { %9932 = vmatprep.subr.mxu0 %v11019_v15 }
0x2883   :  { %v5069_v36 = vpop.f32.mrf.mxu0 }
0x2884   :  { %v5070_v38 = vadd.f32 %v12091_v12, %v5069_v36 }
0x2885   :  { %v9893_v0 = vpop.f32.mrf.mxu0 }
0x2886   :  { %10742 = vtanh.f32 %v5070_v38  ;;  %v8820_v23 = vmul.f32 -1.442695, %v5070_v38 }
0x2888   :  { %10744 = vpow2.f32 %v8820_v23 }
0x2893   :  { %v10743_v37 = vpop.eup %10742 }
0x2894   :  { %5082 = vrot.lane.b32.xlu1 %v10743_v37, %s11026_s4 }
0x2895   :  { %v10745_v41 = vpop.eup %10744 }
0x2896   :  { %v5076_v55 = vadd.f32 1.0, %v10745_v41 }
0x2898   :  { %10746 = vrcp.f32 %v5076_v55 }
0x28a5   :  { %v10747_v43 = vpop.eup %10746 }
0x28a6   :  { %v5080_v24 = vmul.f32 0.0, %v10747_v43 }
0x2906   :  { %v5083_v45 = vpop.permute.xlu1 %5082 }
0x2907   :  { %v5085_v29 = vmul.f32 %v10747_v43, %v5083_v45 }
0x2909   :  { %5087 = vrot.lane.b32.xlu0 %v5085_v29, %s13149_s1 }
0x297b   :  { %v5088_v25 = vpop.permute.xlu0 %5087 }
0x297c   :  { %v5090_v44 = vadd.f32 %v5088_v25, %v5080_v24 }
0x297e   :  { %10748 = vtanh.f32 %v5090_v44 }
0x298b   :  { %v10749_v42 = vpop.eup %10748 }
0x298c   :  { %5093 = vrot.lane.b32.xlu1 %v10749_v42, %s11026_s4 }
0x29fe   :  { %v5094_v26 = vpop.permute.xlu1 %5093 }
0x29ff   :  { %v12097_v40 = vmul.f32 %v10747_v43, %v5094_v26 }
0x2a01   :  { %5098 = vrot.lane.b32.xlu1 %v12097_v40, %s11026_s4 }
0x2a73   :  { %v5099_v48 = vpop.permute.xlu1 %5098 }
0x2a74   :  { %v5101_v10 = vsel %vm414_vm0, %v4953_v28, %v5099_v48 }
0x2a75   :  { %9911 = vmatmul.mubr.msk.f32.vlgmr.msra.gmra.mxu0 %vm609_vm11, %v5101_v10 }
0x2a76   :  { %9933 = vmatpush3.msra.mxu0 %v11987_v30  ;;  %9948 = vmatprep.mubr.msk.f32.mxu0 %vm11022_vm10, %v11019_v15 }
0x2a77   :  { %9934 = vmatprep.subr.mxu0 %v11019_v15 }
0x2a78   :  { %9935 = vmatpush3.msra.mxu0 %v11993_v32 }
0x2a79   :  { %9936 = vmatprep.subr.mxu0 %v11019_v15 }
0x2a7a   :  { %9937 = vmatpush3.msra.mxu0 %v12000_v3 }
0x2a7b   :  { %9938 = vmatprep.subr.mxu0 %v11019_v15 }
0x2a7c   :  { %9939 = vmatpush3.msra.mxu0 %v12007_v56 }
0x2a7d   :  { %9940 = vmatprep.subr.mxu0 %v11019_v15 }
0x2a7e   :  { %9941 = vmatpush3.msra.mxu0 %v12014_v17 }
0x2a7f   :  { %9942 = vmatprep.subr.mxu0 %v11019_v15 }
0x2a80   :  { %9943 = vmatpush3.msra.mxu0 %v12021_v39 }
0x2a81   :  { %9944 = vmatprep.subr.mxu0 %v11019_v15 }
0x2a82   :  { %9945 = vmatpush3.msra.mxu0 %v12026_v46 }
0x2a83   :  { %9946 = vmatprep.subr.mxu0 %v11019_v15 }
0x2a84   :  { %9947 = vmatpush3.msra.mxu0 %v12031_v9 }
0x2a85   :  { %9970 = vmatprep.subr.mxu0 %v11019_v15 }
0x2b35   :  { %v5171_v50 = vpop.f32.mrf.mxu0 }
0x2b36   :  { %v5172_v53 = vadd.f32 %v12091_v12, %v5171_v50 }
0x2b37   :  { %v9912_v54 = vpop.f32.mrf.mxu0 }
0x2b38   :  { %10750 = vtanh.f32 %v5172_v53  ;;  %v8822_v59 = vmul.f32 -1.442695, %v5172_v53 }
0x2b3a   :  { %10752 = vpow2.f32 %v8822_v59 }
0x2b45   :  { %v10751_v58 = vpop.eup %10750 }
0x2b46   :  { %5184 = vrot.lane.b32.xlu0 %v10751_v58, %s11026_s4 }
0x2b47   :  { %v10753_v60 = vpop.eup %10752 }
0x2b48   :  { %v5178_v61 = vadd.f32 1.0, %v10753_v60 }
0x2b4a   :  { %10754 = vrcp.f32 %v5178_v61 }
0x2b57   :  { %v10755_v62 = vpop.eup %10754 }
0x2b58   :  { %v5182_v1 = vmul.f32 %v10755_v62, %v5090_v44 }
0x2bb8   :  { %v5185_v49 = vpop.permute.xlu0 %5184 }
0x2bb9   :  { %v5187_v63 = vmul.f32 %v10755_v62, %v5185_v49 }
0x2bbb   :  { %5189 = vrot.lane.b32.xlu1 %v5187_v63, %s13149_s1 }
0x2c2d   :  { %v5190_v2 = vpop.permute.xlu1 %5189 }
0x2c2e   :  { %v5192_v5 = vadd.f32 %v5190_v2, %v5182_v1 }
0x2c30   :  { %10756 = vtanh.f32 %v5192_v5 }
0x2c3d   :  { %v10757_v6 = vpop.eup %10756 }
0x2c3e   :  { %5195 = vrot.lane.b32.xlu0 %v10757_v6, %s11026_s4 }
0x2cb0   :  { %v5196_v52 = vpop.permute.xlu0 %5195 }
0x2cb1   :  { %v12125_v8 = vmul.f32 %v10755_v62, %v5196_v52 }
0x2cb3   :  { %5200 = vrot.lane.b32.xlu1 %v12125_v8, %s11026_s4 }
0x2d25   :  { %v5201_v11 = vpop.permute.xlu1 %5200 }
0x2d26   :  { %v5203_v13 = vsel %vm414_vm0, %v12050_v31, %v5201_v11 }
0x2d27   :  { %9930 = vmatmul.mubr.msk.f32.vlgmr.msra.gmra.mxu1 %vm609_vm11, %v5203_v13 }
0x2d28   :  { %9952 = vmatpush3.msra.mxu1 %v11987_v30  ;;  %9967 = vmatprep.mubr.msk.f32.mxu1 %vm11022_vm10, %v11019_v15 }
0x2d29   :  { %9953 = vmatprep.subr.mxu1 %v11019_v15 }
0x2d2a   :  { %9954 = vmatpush3.msra.mxu1 %v11993_v32 }
0x2d2b   :  { %9955 = vmatprep.subr.mxu1 %v11019_v15 }
0x2d2c   :  { %9956 = vmatpush3.msra.mxu1 %v12000_v3 }
0x2d2d   :  { %9957 = vmatprep.subr.mxu1 %v11019_v15 }
0x2d2e   :  { %9958 = vmatpush3.msra.mxu1 %v12007_v56 }
0x2d2f   :  { %9959 = vmatprep.subr.mxu1 %v11019_v15 }
0x2d30   :  { %9960 = vmatpush3.msra.mxu1 %v12014_v17 }
0x2d31   :  { %9961 = vmatprep.subr.mxu1 %v11019_v15 }
0x2d32   :  { %9962 = vmatpush3.msra.mxu1 %v12021_v39 }
0x2d33   :  { %9963 = vmatprep.subr.mxu1 %v11019_v15 }
0x2d34   :  { %9964 = vmatpush3.msra.mxu1 %v12026_v46 }
0x2d35   :  { %9965 = vmatprep.subr.mxu1 %v11019_v15 }
0x2d36   :  { %9966 = vmatpush3.msra.mxu1 %v12031_v9 }
0x2d37   :  { %9989 = vmatprep.subr.mxu1 %v11019_v15 }
0x2de7   :  { %v5273_v14 = vpop.f32.mrf.mxu1 }
0x2de8   :  { %v5274_v18 = vadd.f32 %v12091_v12, %v5273_v14 }
0x2de9   :  { %v9931_v19 = vpop.f32.mrf.mxu1 }
0x2dea   :  { %10758 = vtanh.f32 %v5274_v18  ;;  %v8824_v16 = vmul.f32 -1.442695, %v5274_v18 }
0x2dec   :  { %10760 = vpow2.f32 %v8824_v16 }
0x2df7   :  { %v10759_v4 = vpop.eup %10758 }
0x2df8   :  { %5286 = vrot.lane.b32.xlu0 %v10759_v4, %s11026_s4 }
0x2df9   :  { %v10761_v20 = vpop.eup %10760 }
0x2dfa   :  { %v5280_v21 = vadd.f32 1.0, %v10761_v20 }
0x2dfc   :  { %10762 = vrcp.f32 %v5280_v21 }
0x2e09   :  { %v10763_v7 = vpop.eup %10762 }
0x2e0a   :  { %v5284_v28 = vmul.f32 %v10763_v7, %v5192_v5 }
0x2e6a   :  { %v5287_v22 = vpop.permute.xlu0 %5286 }
0x2e6b   :  { %v5289_v27 = vmul.f32 %v10763_v7, %v5287_v22 }
0x2e6d   :  { %5291 = vrot.lane.b32.xlu1 %v5289_v27, %s13149_s1 }
0x2edf   :  { %v5292_v31 = vpop.permute.xlu1 %5291 }
0x2ee0   :  { %v5294_v33 = vadd.f32 %v5292_v31, %v5284_v28 }
0x2ee2   :  { %10764 = vtanh.f32 %v5294_v33 }
0x2eef   :  { %v10765_v36 = vpop.eup %10764 }
0x2ef0   :  { %5297 = vrot.lane.b32.xlu0 %v10765_v36, %s11026_s4  ;;  %v12251_v36 = vld [vmem:[%s11984_s24 + $0x78] sm:$0xff] }
0x2f62   :  { %v5298_v38 = vpop.permute.xlu0 %5297 }
0x2f63   :  { %v12154_v0 = vmul.f32 %v10763_v7, %v5298_v38 }
0x2f65   :  { %5302 = vrot.lane.b32.xlu1 %v12154_v0, %s11026_s4 }
0x2fd7   :  { %v5303_v37 = vpop.permute.xlu1 %5302 }
0x2fd8   :  { %v5305_v23 = vsel %vm414_vm0, %v12053_v47, %v5303_v37  ;;  %v12257_v37 = vld [vmem:[%s11984_s24 + $0x70] sm:$0xff] }
0x2fd9   :  { %9949 = vmatmul.mubr.msk.f32.vlgmr.msra.gmra.mxu0 %vm609_vm11, %v5305_v23  ;;  %v12274_v23 = vld [vmem:[%s11984_s24 + $0x58] sm:$0xff] }
0x2fda   :  { %9971 = vmatpush3.msra.mxu0 %v11987_v30  ;;  %9986 = vmatprep.mubr.msk.f32.mxu0 %vm11022_vm10, %v11019_v15 }
0x2fdb   :  { %9972 = vmatprep.subr.mxu0 %v11019_v15 }
0x2fdc   :  { %9973 = vmatpush3.msra.mxu0 %v11993_v32 }
0x2fdd   :  { %9974 = vmatprep.subr.mxu0 %v11019_v15 }
0x2fde   :  { %9975 = vmatpush3.msra.mxu0 %v12000_v3 }
0x2fdf   :  { %9976 = vmatprep.subr.mxu0 %v11019_v15 }
0x2fe0   :  { %9977 = vmatpush3.msra.mxu0 %v12007_v56 }
0x2fe1   :  { %9978 = vmatprep.subr.mxu0 %v11019_v15 }
0x2fe2   :  { %9979 = vmatpush3.msra.mxu0 %v12014_v17 }
0x2fe3   :  { %9980 = vmatprep.subr.mxu0 %v11019_v15 }
0x2fe4   :  { %9981 = vmatpush3.msra.mxu0 %v12021_v39 }
0x2fe5   :  { %9982 = vmatprep.subr.mxu0 %v11019_v15 }
0x2fe6   :  { %9983 = vmatpush3.msra.mxu0 %v12026_v46 }
0x2fe7   :  { %9984 = vmatprep.subr.mxu0 %v11019_v15 }
0x2fe8   :  { %9985 = vmatpush3.msra.mxu0 %v12031_v9 }
0x2fe9   :  { %10008 = vmatprep.subr.mxu0 %v11019_v15 }
0x3099   :  { %v5375_v47 = vpop.f32.mrf.mxu0 }
0x309a   :  { %v5376_v41 = vadd.f32 %v12091_v12, %v5375_v47  ;;  %v12279_v47 = vld [vmem:[%s11984_s24 + $0x50] sm:$0xff] }
0x309b   :  { %v9950_v55 = vpop.f32.mrf.mxu0 }
0x309c   :  { %10766 = vtanh.f32 %v5376_v41  ;;  %v8826_v45 = vmul.f32 -1.442695, %v5376_v41  ;;  %v12284_v41 = vld [vmem:[%s11984_s24 + $0x48] sm:$0xff] }
0x309e   :  { %10768 = vpow2.f32 %v8826_v45 }
0x30a9   :  { %v10767_v43 = vpop.eup %10766 }
0x30aa   :  { %5388 = vrot.lane.b32.xlu0 %v10767_v43, %s11026_s4  ;;  %v12289_v43 = vld [vmem:[%s11984_s24 + $0x40] sm:$0xff] }
0x30ab   :  { %v10769_v29 = vpop.eup %10768 }
0x30ac   :  { %v5382_v24 = vadd.f32 1.0, %v10769_v29 }
0x30ae   :  { %10770 = vrcp.f32 %v5382_v24 }
0x30bb   :  { %v10771_v25 = vpop.eup %10770 }
0x30bc   :  { %v5386_v26 = vmul.f32 %v10771_v25, %v5294_v33 }
0x311c   :  { %v5389_v44 = vpop.permute.xlu0 %5388 }
0x311d   :  { %v5391_v42 = vmul.f32 %v10771_v25, %v5389_v44  ;;  %v12317_v44 = vld [vmem:[%s12088_s30 + $0x1] ss:$0 sm:$0xff] }
0x311f   :  { %5393 = vrot.lane.b32.xlu1 %v5391_v42, %s13149_s1 }
0x3191   :  { %v5394_v48 = vpop.permute.xlu1 %5393 }
0x3192   :  { %v5396_v10 = vadd.f32 %v5394_v48, %v5386_v26 }
0x3194   :  { %10772 = vtanh.f32 %v5396_v10 }
0x31a1   :  { %v10773_v50 = vpop.eup %10772 }
0x31a2   :  { %5399 = vrot.lane.b32.xlu0 %v10773_v50, %s11026_s4 }
0x3214   :  { %v5400_v53 = vpop.permute.xlu0 %5399 }
0x3215   :  { %v12183_v54 = vmul.f32 %v10771_v25, %v5400_v53 }
0x3217   :  { %5404 = vrot.lane.b32.xlu1 %v12183_v54, %s11026_s4 }
0x3289   :  { %v5405_v58 = vpop.permute.xlu1 %5404 }
0x328a   :  { %v5407_v59 = vsel %vm414_vm0, %v12059_v51, %v5405_v58 }
0x328b   :  { %9968 = vmatmul.mubr.msk.f32.vlgmr.msra.gmra.mxu1 %vm609_vm11, %v5407_v59 }
0x328c   :  { %9990 = vmatpush3.msra.mxu1 %v11987_v30  ;;  %10005 = vmatprep.mubr.msk.f32.mxu1 %vm11022_vm10, %v11019_v15 }
0x328d   :  { %9991 = vmatprep.subr.mxu1 %v11019_v15 }
0x328e   :  { %9992 = vmatpush3.msra.mxu1 %v11993_v32 }
0x328f   :  { %9993 = vmatprep.subr.mxu1 %v11019_v15 }
0x3290   :  { %9994 = vmatpush3.msra.mxu1 %v12000_v3 }
0x3291   :  { %9995 = vmatprep.subr.mxu1 %v11019_v15 }
0x3292   :  { %9996 = vmatpush3.msra.mxu1 %v12007_v56 }
0x3293   :  { %9997 = vmatprep.subr.mxu1 %v11019_v15 }
0x3294   :  { %9998 = vmatpush3.msra.mxu1 %v12014_v17 }
0x3295   :  { %9999 = vmatprep.subr.mxu1 %v11019_v15 }
0x3296   :  { %10000 = vmatpush3.msra.mxu1 %v12021_v39 }
0x3297   :  { %10001 = vmatprep.subr.mxu1 %v11019_v15 }
0x3298   :  { %10002 = vmatpush3.msra.mxu1 %v12026_v46 }
0x3299   :  { %10003 = vmatprep.subr.mxu1 %v11019_v15 }
0x329a   :  { %10004 = vmatpush3.msra.mxu1 %v12031_v9 }
0x329b   :  { %10027 = vmatprep.subr.mxu1 %v11019_v15 }
0x334b   :  { %v5477_v51 = vpop.f32.mrf.mxu1 }
0x334c   :  { %v5478_v60 = vadd.f32 %v12091_v12, %v5477_v51 }
0x334d   :  { %v9969_v61 = vpop.f32.mrf.mxu1 }
0x334e   :  { %10774 = vtanh.f32 %v5478_v60  ;;  %v8828_v49 = vmul.f32 -1.442695, %v5478_v60 }
0x3350   :  { %10776 = vpow2.f32 %v8828_v49 }
0x335b   :  { %v10775_v62 = vpop.eup %10774 }
0x335c   :  { %5490 = vrot.lane.b32.xlu0 %v10775_v62, %s11026_s4 }
0x335d   :  { %v10777_v63 = vpop.eup %10776 }
0x335e   :  { %v5484_v1 = vadd.f32 1.0, %v10777_v63 }
0x3360   :  { %10778 = vrcp.f32 %v5484_v1 }
0x336d   :  { %v10779_v2 = vpop.eup %10778 }
0x336e   :  { %v5488_v52 = vmul.f32 %v10779_v2, %v5396_v10 }
0x33ce   :  { %v5491_v5 = vpop.permute.xlu0 %5490 }
0x33cf   :  { %v5493_v6 = vmul.f32 %v10779_v2, %v5491_v5 }
0x33d1   :  { %5495 = vrot.lane.b32.xlu1 %v5493_v6, %s13149_s1 }
0x3443   :  { %v5496_v11 = vpop.permute.xlu1 %5495 }
0x3444   :  { %v5498_v13 = vadd.f32 %v5496_v11, %v5488_v52 }
0x3446   :  { %10780 = vtanh.f32 %v5498_v13 }
0x3453   :  { %v10781_v14 = vpop.eup %10780 }
0x3454   :  { %5501 = vrot.lane.b32.xlu0 %v10781_v14, %s11026_s4 }
0x34c6   :  { %v5502_v18 = vpop.permute.xlu0 %5501 }
0x34c7   :  { %v12212_v19 = vmul.f32 %v10779_v2, %v5502_v18 }
0x34c9   :  { %5506 = vrot.lane.b32.xlu1 %v12212_v19, %s11026_s4 }
0x353b   :  { %v5507_v4 = vpop.permute.xlu1 %5506 }
0x353c   :  { %v5509_v16 = vsel %vm414_vm0, %v12062_v34, %v5507_v4 }
0x353d   :  { %9987 = vmatmul.mubr.msk.f32.vlgmr.msra.gmra.mxu0 %vm609_vm11, %v5509_v16 }
0x353e   :  { %10009 = vmatpush3.msra.mxu0 %v11987_v30  ;;  %10024 = vmatprep.mubr.msk.f32.mxu0 %vm11022_vm10, %v11019_v15 }
0x353f   :  { %10010 = vmatprep.subr.mxu0 %v11019_v15 }
0x3540   :  { %10011 = vmatpush3.msra.mxu0 %v11993_v32 }
0x3541   :  { %10012 = vmatprep.subr.mxu0 %v11019_v15 }
0x3542   :  { %10013 = vmatpush3.msra.mxu0 %v12000_v3 }
0x3543   :  { %10014 = vmatprep.subr.mxu0 %v11019_v15 }
0x3544   :  { %10015 = vmatpush3.msra.mxu0 %v12007_v56 }
0x3545   :  { %10016 = vmatprep.subr.mxu0 %v11019_v15 }
0x3546   :  { %10017 = vmatpush3.msra.mxu0 %v12014_v17 }
0x3547   :  { %10018 = vmatprep.subr.mxu0 %v11019_v15 }
0x3548   :  { %10019 = vmatpush3.msra.mxu0 %v12021_v39 }
0x3549   :  { %10020 = vmatprep.subr.mxu0 %v11019_v15 }
0x354a   :  { %10021 = vmatpush3.msra.mxu0 %v12026_v46 }
0x354b   :  { %10022 = vmatprep.subr.mxu0 %v11019_v15 }
0x354c   :  { %10023 = vmatpush3.msra.mxu0 %v12031_v9 }
0x354d   :  { %10046 = vmatprep.subr.mxu0 %v11019_v15 }
0x35fd   :  { %v5579_v30 = vpop.f32.mrf.mxu0 }
0x35fe   :  { %v5580_v32 = vadd.f32 %v12091_v12, %v5579_v30 }
0x35ff   :  { %v9988_v3 = vpop.f32.mrf.mxu0 }
0x3600   :  { %10782 = vtanh.f32 %v5580_v32  ;;  %v8830_v17 = vmul.f32 -1.442695, %v5580_v32 }
0x3602   :  { %10784 = vpow2.f32 %v8830_v17 }
0x360d   :  { %v10783_v56 = vpop.eup %10782 }
0x360e   :  { %5592 = vrot.lane.b32.xlu0 %v10783_v56, %s11026_s4 }
0x360f   :  { %v10785_v39 = vpop.eup %10784 }
0x3610   :  { %v5586_v34 = vadd.f32 1.0, %v10785_v39 }
0x3612   :  { %10786 = vrcp.f32 %v5586_v34 }
0x361f   :  { %v10787_v46 = vpop.eup %10786 }
0x3620   :  { %v5590_v9 = vmul.f32 %v10787_v46, %v5498_v13 }
0x3680   :  { %v5593_v20 = vpop.permute.xlu0 %5592 }
0x3681   :  { %v5595_v21 = vmul.f32 %v10787_v46, %v5593_v20 }
0x3683   :  { %5597 = vrot.lane.b32.xlu1 %v5595_v21, %s13149_s1 }
0x36f5   :  { %v5598_v7 = vpop.permute.xlu1 %5597 }
0x36f6   :  { %v12240_v22 = vadd.f32 %v5598_v7, %v5590_v9 }
0x36f8   :  { %10788 = vtanh.f32 %v12240_v22 }
0x3705   :  { %v10789_v27 = vpop.eup %10788 }
0x3706   :  { %5603 = vrot.lane.b32.xlu0 %v10789_v27, %s11026_s4 }
0x370a   :  { %5822 = vrot.lane.b32.xlu0 %v12097_v40, %s13149_s1  ;;  %v12264_v40 = vld [vmem:[%s11984_s24 + $0x68] sm:$0xff] }
0x3778   :  { %v5604_v28 = vpop.permute.xlu0 %5603 }
0x3779   :  { %v12246_v31 = vmul.f32 %v10787_v46, %v5604_v28 }
0x377b   :  { %5608 = vrot.lane.b32.xlu1 %v12246_v31, %s11026_s4 }
0x377c   :  { %v5823_v55 = vpop.permute.xlu0 %5822 }
0x377d   :  { %v5825_v45 = vsel %vm414_vm0, %v5823_v55, 0.0 }
0x37ed   :  { %v5609_v33 = vpop.permute.xlu1 %5608 }
0x37ee   :  { %v5611_v38 = vsel %vm414_vm0, %v12065_v35, %v5609_v33  ;;  %v12269_v35 = vld [vmem:[%s11984_s24 + $0x60] sm:$0xff] }
0x37ef   :  { %10006 = vmatmul.mubr.msk.f32.vlgmr.msra.gmra.mxu1 %vm609_vm11, %v5611_v38 }
0x37f0   :  { %10028 = vmatpush3.msra.mxu1 %v12251_v36  ;;  %10043 = vmatprep.mubr.msk.f32.mxu1 %vm11022_vm10, %v11019_v15 }
0x37f1   :  { %10029 = vmatprep.subr.mxu1 %v11019_v15 }
0x37f2   :  { %10030 = vmatpush3.msra.mxu1 %v12257_v37 }
0x37f3   :  { %10031 = vmatprep.subr.mxu1 %v11019_v15 }
0x37f4   :  { %10032 = vmatpush3.msra.mxu1 %v12264_v40 }
0x37f5   :  { %10033 = vmatprep.subr.mxu1 %v11019_v15 }
0x37f6   :  { %10034 = vmatpush3.msra.mxu1 %v12269_v35 }
0x37f7   :  { %10035 = vmatprep.subr.mxu1 %v11019_v15 }
0x37f8   :  { %10036 = vmatpush3.msra.mxu1 %v12274_v23 }
0x37f9   :  { %10037 = vmatprep.subr.mxu1 %v11019_v15 }
0x37fa   :  { %10038 = vmatpush3.msra.mxu1 %v12279_v47 }
0x37fb   :  { %10039 = vmatprep.subr.mxu1 %v11019_v15 }
0x37fc   :  { %10040 = vmatpush3.msra.mxu1 %v12284_v41 }
0x37fd   :  { %10041 = vmatprep.subr.mxu1 %v11019_v15 }
0x37fe   :  { %10042 = vmatpush3.msra.mxu1 %v12289_v43 }
0x37ff   :  { %10044 = vmatmul.mubr.msk.f32.vlgmr.msra.gmra.mxu1 %vm609_vm11, %v5825_v45  ;;  %10065 = vmatprep.subr.mxu1 %v11019_v15 }
0x3800   :  { %10066 = vmatpush3.msra.mxu1 %v12251_v36  ;;  %10081 = vmatprep.mubr.msk.f32.mxu1 %vm11022_vm10, %v11019_v15 }
0x3801   :  { %10067 = vmatprep.subr.mxu1 %v11019_v15 }
0x3802   :  { %10068 = vmatpush3.msra.mxu1 %v12257_v37 }
0x3803   :  { %10069 = vmatprep.subr.mxu1 %v11019_v15 }
0x3804   :  { %10070 = vmatpush3.msra.mxu1 %v12264_v40 }
0x3805   :  { %10071 = vmatprep.subr.mxu1 %v11019_v15 }
0x3806   :  { %10072 = vmatpush3.msra.mxu1 %v12269_v35 }
0x3807   :  { %10073 = vmatprep.subr.mxu1 %v11019_v15 }
0x3808   :  { %10074 = vmatpush3.msra.mxu1 %v12274_v23 }
0x3809   :  { %10075 = vmatprep.subr.mxu1 %v11019_v15 }
0x380a   :  { %10076 = vmatpush3.msra.mxu1 %v12279_v47 }
0x380b   :  { %10077 = vmatprep.subr.mxu1 %v11019_v15 }
0x380c   :  { %10078 = vmatpush3.msra.mxu1 %v12284_v41 }
0x380d   :  { %10079 = vmatprep.subr.mxu1 %v11019_v15 }
0x380e   :  { %10080 = vmatpush3.msra.mxu1 %v12289_v43 }
0x380f   :  { %10103 = vmatprep.subr.mxu1 %v11019_v15 }
0x38af   :  { %v5681_v29 = vpop.f32.mrf.mxu1 }
0x38b0   :  { %v5682_v24 = vadd.f32 %v12091_v12, %v5681_v29 }
0x38b1   :  { %v10007_v25 = vpop.f32.mrf.mxu1 }
0x38b2   :  { %10790 = vtanh.f32 %v5682_v24  ;;  %v8832_v53 = vmul.f32 -1.442695, %v5682_v24 }
0x38bf   :  { %v10791_v42 = vpop.eup %10790  ;;  %v5901_v26 = vpop.f32.mrf.mxu1 }
0x38c0   :  { %v5902_v48 = vadd.f32 %v12317_v44, %v5901_v26  ;;  %5694 = vrot.lane.b32.xlu1 %v10791_v42, %s11026_s4 }
0x38c1   :  { %v10045_v10 = vpop.f32.mrf.mxu1 }
0x38c2   :  { %10792 = vtanh.f32 %v5902_v48  ;;  %v8846_v58 = vmul.f32 -1.442695, %v5902_v48 }
0x38c3   :  { %10794 = vpow2.f32 %v8832_v53 }
0x38c4   :  { %10796 = vpow2.f32 %v8846_v58 }
0x38cf   :  { %v10793_v50 = vpop.eup %10792 }
0x38d0   :  { %5914 = vrot.lane.b32.xlu0 %v10793_v50, %s11026_s4  ;;  %v10795_v59 = vpop.eup %10794 }
0x38d1   :  { %v5688_v12 = vadd.f32 1.0, %v10795_v59  ;;  %v10797_v51 = vpop.eup %10796 }
0x38d2   :  { %v5908_v60 = vadd.f32 1.0, %v10797_v51 }
0x38d3   :  { %10798 = vrcp.f32 %v5688_v12 }
0x38d4   :  { %10800 = vrcp.f32 %v5908_v60 }
0x38e0   :  { %v10799_v61 = vpop.eup %10798 }
0x38e1   :  { %v10801_v63 = vpop.eup %10800  ;;  %v5692_v5 = vmul.f32 %v10799_v61, %v12240_v22 }
0x38e2   :  { %v5912_v11 = vmul.f32 0.0, %v10801_v63 }
0x3932   :  { %v5695_v62 = vpop.permute.xlu1 %5694 }
0x3933   :  { %v5697_v49 = vmul.f32 %v10799_v61, %v5695_v62 }
0x3935   :  { %5699 = vrot.lane.b32.xlu1 %v5697_v49, %s13149_s1 }
0x3942   :  { %v5915_v1 = vpop.permute.xlu0 %5914 }
0x3943   :  { %v5917_v2 = vmul.f32 %v10801_v63, %v5915_v1 }
0x3945   :  { %5919 = vrot.lane.b32.xlu0 %v5917_v2, %s13149_s1 }
0x39a7   :  { %v5700_v6 = vpop.permute.xlu1 %5699 }
0x39a8   :  { %v12325_v52 = vadd.f32 %v5700_v6, %v5692_v5 }
0x39aa   :  { %10802 = vtanh.f32 %v12325_v52 }
0x39b7   :  { %v10803_v13 = vpop.eup %10802  ;;  %v5920_v14 = vpop.permute.xlu0 %5919 }
0x39b8   :  { %v12328_v18 = vadd.f32 %v5920_v14, %v5912_v11  ;;  %5705 = vrot.lane.b32.xlu1 %v10803_v13, %s11026_s4 }
0x39ba   :  { %10804 = vtanh.f32 %v12328_v18 }
0x39c7   :  { %v10805_v4 = vpop.eup %10804 }
0x39c8   :  { %5925 = vrot.lane.b32.xlu0 %v10805_v4, %s11026_s4 }
0x39cc   :  { %5929 = vrot.lane.b32.xlu0 %v12125_v8, %s13149_s1 }
0x3a2a   :  { %v5706_v16 = vpop.permute.xlu1 %5705 }
0x3a2b   :  { %v12335_v30 = vmul.f32 %v10799_v61, %v5706_v16 }
0x3a2d   :  { %5710 = vrot.lane.b32.xlu1 %v12335_v30, %s11026_s4 }
0x3a3a   :  { %v5926_v32 = vpop.permute.xlu0 %5925 }
0x3a3b   :  { %v12339_v3 = vmul.f32 %v10801_v63, %v5926_v32 }
0x3a3d   :  { %5933 = vrot.lane.b32.xlu1 %v12339_v3, %s11026_s4 }
0x3a9f   :  { %v5711_v56 = vpop.permute.xlu1 %5710 }
0x3aa0   :  { %v5713_v17 = vsel %vm414_vm0, %v12069_v57, %v5711_v56  ;;  %v5930_v57 = vpop.permute.xlu0 %5929 }
0x3aa1   :  { %10025 = vmatmul.mubr.msk.f32.vlgmr.msra.gmra.mxu0 %vm609_vm11, %v5713_v17 }
0x3aa2   :  { %10047 = vmatpush3.msra.mxu0 %v12251_v36  ;;  %10062 = vmatprep.mubr.msk.f32.mxu0 %vm11022_vm10, %v11019_v15 }
0x3aa3   :  { %10048 = vmatprep.subr.mxu0 %v11019_v15 }
0x3aa4   :  { %10049 = vmatpush3.msra.mxu0 %v12257_v37 }
0x3aa5   :  { %10050 = vmatprep.subr.mxu0 %v11019_v15 }
0x3aa6   :  { %10051 = vmatpush3.msra.mxu0 %v12264_v40 }
0x3aa7   :  { %10052 = vmatprep.subr.mxu0 %v11019_v15 }
0x3aa8   :  { %10053 = vmatpush3.msra.mxu0 %v12269_v35 }
0x3aa9   :  { %10054 = vmatprep.subr.mxu0 %v11019_v15 }
0x3aaa   :  { %10055 = vmatpush3.msra.mxu0 %v12274_v23 }
0x3aab   :  { %10056 = vmatprep.subr.mxu0 %v11019_v15 }
0x3aac   :  { %10057 = vmatpush3.msra.mxu0 %v12279_v47 }
0x3aad   :  { %10058 = vmatprep.subr.mxu0 %v11019_v15 }
0x3aae   :  { %10059 = vmatpush3.msra.mxu0 %v12284_v41 }
0x3aaf   :  { %10060 = vmatprep.subr.mxu0 %v11019_v15  ;;  %v5934_v8 = vpop.permute.xlu1 %5933 }
0x3ab0   :  { %v5936_v39 = vsel %vm414_vm0, %v5930_v57, %v5934_v8  ;;  %10061 = vmatpush3.msra.mxu0 %v12289_v43 }
0x3ab1   :  { %10063 = vmatmul.mubr.msk.f32.vlgmr.msra.gmra.mxu0 %vm609_vm11, %v5936_v39  ;;  %10084 = vmatprep.subr.mxu0 %v11019_v15 }
0x3ab2   :  { %10085 = vmatpush3.msra.mxu0 %v12251_v36  ;;  %10100 = vmatprep.mubr.msk.f32.mxu0 %vm11022_vm10, %v11019_v15 }
0x3ab3   :  { %10086 = vmatprep.subr.mxu0 %v11019_v15 }
0x3ab4   :  { %10087 = vmatpush3.msra.mxu0 %v12257_v37 }
0x3ab5   :  { %10088 = vmatprep.subr.mxu0 %v11019_v15 }
0x3ab6   :  { %10089 = vmatpush3.msra.mxu0 %v12264_v40 }
0x3ab7   :  { %10090 = vmatprep.subr.mxu0 %v11019_v15 }
0x3ab8   :  { %10091 = vmatpush3.msra.mxu0 %v12269_v35 }
0x3ab9   :  { %10092 = vmatprep.subr.mxu0 %v11019_v15 }
0x3aba   :  { %10093 = vmatpush3.msra.mxu0 %v12274_v23 }
0x3abb   :  { %10094 = vmatprep.subr.mxu0 %v11019_v15 }
0x3abc   :  { %10095 = vmatpush3.msra.mxu0 %v12279_v47 }
0x3abd   :  { %10096 = vmatprep.subr.mxu0 %v11019_v15 }
0x3abe   :  { %10097 = vmatpush3.msra.mxu0 %v12284_v41 }
0x3abf   :  { %10098 = vmatprep.subr.mxu0 %v11019_v15 }
0x3ac0   :  { %10099 = vmatpush3.msra.mxu0 %v12289_v43 }
0x3ac1   :  { %10122 = vmatprep.subr.mxu0 %v11019_v15 }
0x3b61   :  { %v12384_v34 = vpop.f32.mrf.mxu0 }
0x3b63   :  { %v10026_v46 = vpop.f32.mrf.mxu0 }
0x3b71   :  { %v6006_v20 = vpop.f32.mrf.mxu0 }
0x3b72   :  { %v6007_v21 = vadd.f32 %v12317_v44, %v6006_v20 }
0x3b73   :  { %v10064_v9 = vpop.f32.mrf.mxu0 }
0x3b74   :  { %10806 = vtanh.f32 %v6007_v21  ;;  %v8848_v22 = vmul.f32 -1.442695, %v6007_v21 }
0x3b76   :  { %10808 = vpow2.f32 %v8848_v22 }
0x3b81   :  { %v10807_v7 = vpop.eup %10806 }
0x3b82   :  { %6019 = vrot.lane.b32.xlu0 %v10807_v7, %s11026_s4 }
0x3b83   :  { %v10809_v27 = vpop.eup %10808 }
0x3b84   :  { %v6013_v28 = vadd.f32 1.0, %v10809_v27 }
0x3b86   :  { %10810 = vrcp.f32 %v6013_v28 }
0x3b93   :  { %v10811_v33 = vpop.eup %10810 }
0x3b94   :  { %v6017_v45 = vmul.f32 %v10811_v33, %v12328_v18 }
0x3bf4   :  { %v6020_v38 = vpop.permute.xlu0 %6019 }
0x3bf5   :  { %v6022_v55 = vmul.f32 %v10811_v33, %v6020_v38 }
0x3bf7   :  { %6024 = vrot.lane.b32.xlu1 %v6022_v55, %s13149_s1 }
0x3bfb   :  { %6034 = vrot.lane.b32.xlu1 %v12154_v0, %s13149_s1 }
0x3c69   :  { %v6025_v29 = vpop.permute.xlu1 %6024 }
0x3c6a   :  { %v6027_v24 = vadd.f32 %v6025_v29, %v6017_v45 }
0x3c6c   :  { %10812 = vtanh.f32 %v6027_v24 }
0x3c6d   :  { %v6035_v48 = vpop.permute.xlu1 %6034 }
0x3c79   :  { %v10813_v25 = vpop.eup %10812 }
0x3c7a   :  { %6030 = vrot.lane.b32.xlu0 %v10813_v25, %s11026_s4 }
0x3cec   :  { %v6031_v42 = vpop.permute.xlu0 %6030 }
0x3ced   :  { %v12393_v26 = vmul.f32 %v10811_v33, %v6031_v42 }
0x3cef   :  { %6038 = vrot.lane.b32.xlu0 %v12393_v26, %s11026_s4 }
0x3d61   :  { %v6039_v10 = vpop.permute.xlu0 %6038 }
0x3d62   :  { %v6041_v50 = vsel %vm414_vm0, %v6035_v48, %v6039_v10 }
0x3d63   :  { %10082 = vmatmul.mubr.msk.f32.vlgmr.msra.gmra.mxu1 %vm609_vm11, %v6041_v50 }
0x3d64   :  { %10104 = vmatpush3.msra.mxu1 %v12251_v36  ;;  %10119 = vmatprep.mubr.msk.f32.mxu1 %vm11022_vm10, %v11019_v15 }
0x3d65   :  { %10105 = vmatprep.subr.mxu1 %v11019_v15 }
0x3d66   :  { %10106 = vmatpush3.msra.mxu1 %v12257_v37 }
0x3d67   :  { %10107 = vmatprep.subr.mxu1 %v11019_v15 }
0x3d68   :  { %10108 = vmatpush3.msra.mxu1 %v12264_v40 }
0x3d69   :  { %10109 = vmatprep.subr.mxu1 %v11019_v15 }
0x3d6a   :  { %10110 = vmatpush3.msra.mxu1 %v12269_v35 }
0x3d6b   :  { %10111 = vmatprep.subr.mxu1 %v11019_v15 }
0x3d6c   :  { %10112 = vmatpush3.msra.mxu1 %v12274_v23 }
0x3d6d   :  { %10113 = vmatprep.subr.mxu1 %v11019_v15 }
0x3d6e   :  { %10114 = vmatpush3.msra.mxu1 %v12279_v47 }
0x3d6f   :  { %10115 = vmatprep.subr.mxu1 %v11019_v15 }
0x3d70   :  { %10116 = vmatpush3.msra.mxu1 %v12284_v41 }
0x3d71   :  { %10117 = vmatprep.subr.mxu1 %v11019_v15 }
0x3d72   :  { %10118 = vmatpush3.msra.mxu1 %v12289_v43 }
0x3d73   :  { %10141 = vmatprep.subr.mxu1 %v11019_v15 }
0x3e23   :  { %v6111_v0 = vpop.f32.mrf.mxu1 }
0x3e24   :  { %v6112_v53 = vadd.f32 %v12317_v44, %v6111_v0 }
0x3e25   :  { %v10083_v58 = vpop.f32.mrf.mxu1 }
0x3e26   :  { %10814 = vtanh.f32 %v6112_v53  ;;  %v8850_v12 = vmul.f32 -1.442695, %v6112_v53 }
0x3e28   :  { %10816 = vpow2.f32 %v8850_v12 }
0x3e33   :  { %v10815_v59 = vpop.eup %10814 }
0x3e34   :  { %6124 = vrot.lane.b32.xlu1 %v10815_v59, %s11026_s4 }
0x3e35   :  { %v10817_v51 = vpop.eup %10816 }
0x3e36   :  { %v6118_v60 = vadd.f32 1.0, %v10817_v51 }
0x3e38   :  { %10818 = vrcp.f32 %v6118_v60 }
0x3e45   :  { %v10819_v61 = vpop.eup %10818 }
0x3e46   :  { %v6122_v63 = vmul.f32 %v10819_v61, %v6027_v24 }
0x3ea6   :  { %v6125_v62 = vpop.permute.xlu1 %6124 }
0x3ea7   :  { %v6127_v49 = vmul.f32 %v10819_v61, %v6125_v62 }
0x3ea9   :  { %6129 = vrot.lane.b32.xlu0 %v6127_v49, %s13149_s1 }
0x3ead   :  { %6139 = vrot.lane.b32.xlu0 %v12183_v54, %s13149_s1 }
0x3f1b   :  { %v6130_v1 = vpop.permute.xlu0 %6129 }
0x3f1c   :  { %v6132_v2 = vadd.f32 %v6130_v1, %v6122_v63 }
0x3f1e   :  { %10820 = vtanh.f32 %v6132_v2 }
0x3f1f   :  { %v6140_v13 = vpop.permute.xlu0 %6139 }
0x3f2b   :  { %v10821_v5 = vpop.eup %10820 }
0x3f2c   :  { %6135 = vrot.lane.b32.xlu1 %v10821_v5, %s11026_s4 }
0x3f9e   :  { %v6136_v6 = vpop.permute.xlu1 %6135 }
0x3f9f   :  { %v12423_v11 = vmul.f32 %v10819_v61, %v6136_v6  ;;  %v11012_v6 = vld [vmem:[%s12088_s30] ss:$0 sm:$0xff] }
0x3fa1   :  { %6143 = vrot.lane.b32.xlu1 %v12423_v11, %s11026_s4 }
0x4013   :  { %v6144_v14 = vpop.permute.xlu1 %6143 }
0x4014   :  { %v6146_v18 = vsel %vm414_vm0, %v6140_v13, %v6144_v14  ;;  %v5784_v13 = vadd.f32 %v11012_v6, %v12384_v34 }
0x4015   :  { %10101 = vmatmul.mubr.msk.f32.vlgmr.msra.gmra.mxu0 %vm609_vm11, %v6146_v18 }
0x4016   :  { %10123 = vmatpush3.msra.mxu0 %v12251_v36  ;;  %10138 = vmatprep.mubr.msk.f32.mxu0 %vm11022_vm10, %v11019_v15 }
0x4017   :  { %10124 = vmatprep.subr.mxu0 %v11019_v15 }
0x4018   :  { %10125 = vmatpush3.msra.mxu0 %v12257_v37 }
0x4019   :  { %10126 = vmatprep.subr.mxu0 %v11019_v15 }
0x401a   :  { %10127 = vmatpush3.msra.mxu0 %v12264_v40 }
0x401b   :  { %10128 = vmatprep.subr.mxu0 %v11019_v15 }
0x401c   :  { %10129 = vmatpush3.msra.mxu0 %v12269_v35 }
0x401d   :  { %10130 = vmatprep.subr.mxu0 %v11019_v15 }
0x401e   :  { %10131 = vmatpush3.msra.mxu0 %v12274_v23 }
0x401f   :  { %10132 = vmatprep.subr.mxu0 %v11019_v15 }
0x4020   :  { %10133 = vmatpush3.msra.mxu0 %v12279_v47 }
0x4021   :  { %10134 = vmatprep.subr.mxu0 %v11019_v15 }
0x4022   :  { %10135 = vmatpush3.msra.mxu0 %v12284_v41 }
0x4023   :  { %10136 = vmatprep.subr.mxu0 %v11019_v15 }
0x4024   :  { %10137 = vmatpush3.msra.mxu0 %v12289_v43 }
0x4025   :  { %10160 = vmatprep.subr.mxu0 %v11019_v15 }
0x40d5   :  { %v6216_v54 = vpop.f32.mrf.mxu0 }
0x40d6   :  { %v6217_v4 = vadd.f32 %v12317_v44, %v6216_v54 }
0x40d7   :  { %v10102_v16 = vpop.f32.mrf.mxu0 }
0x40d8   :  { %10822 = vtanh.f32 %v6217_v4  ;;  %v8852_v56 = vmul.f32 -1.442695, %v6217_v4  ;;  %v12526_v4 = vld [vmem:[%s11984_s24 + $0xb8] sm:$0xff]  ;;  %v12531_v16 = vld [vmem:[%s11984_s24 + $0xb0] sm:$0xff] }
0x40da   :  { %10824 = vpow2.f32 %v8852_v56  ;;  %v12543_v56 = vld [vmem:[%s11984_s24 + $0xa0] sm:$0xff] }
0x40e5   :  { %v10823_v32 = vpop.eup %10822 }
0x40e6   :  { %6229 = vrot.lane.b32.xlu0 %v10823_v32, %s11026_s4  ;;  %v12538_v32 = vld [vmem:[%s11984_s24 + $0xa8] sm:$0xff] }
0x40e7   :  { %v10825_v17 = vpop.eup %10824 }
0x40e8   :  { %v6223_v57 = vadd.f32 1.0, %v10825_v17  ;;  %v12548_v17 = vld [vmem:[%s11984_s24 + $0x98] sm:$0xff] }
0x40ea   :  { %10826 = vrcp.f32 %v6223_v57  ;;  %v12553_v57 = vld [vmem:[%s11984_s24 + $0x90] sm:$0xff] }
0x40f7   :  { %v10827_v8 = vpop.eup %10826 }
0x40f8   :  { %v6227_v20 = vmul.f32 %v10827_v8, %v6132_v2 }
0x4158   :  { %v6230_v39 = vpop.permute.xlu0 %6229 }
0x4159   :  { %v6232_v46 = vmul.f32 %v10827_v8, %v6230_v39 }
0x415b   :  { %6234 = vrot.lane.b32.xlu1 %v6232_v46, %s13149_s1  ;;  %v12563_v46 = vld [vmem:[%s11984_s24 + $0x80] sm:$0xff] }
0x415f   :  { %6244 = vrot.lane.b32.xlu1 %v12212_v19, %s13149_s1 }
0x41cd   :  { %v6235_v21 = vpop.permute.xlu1 %6234 }
0x41ce   :  { %v6237_v9 = vadd.f32 %v6235_v21, %v6227_v20  ;;  %v8834_v21 = vmul.f32 -1.442695, %v5784_v13 }
0x41d0   :  { %10828 = vtanh.f32 %v6237_v9 }
0x41d1   :  { %v6245_v28 = vpop.permute.xlu1 %6244 }
0x41dd   :  { %v10829_v7 = vpop.eup %10828 }
0x41de   :  { %6240 = vrot.lane.b32.xlu0 %v10829_v7, %s11026_s4 }
0x4250   :  { %v6241_v22 = vpop.permute.xlu0 %6240 }
0x4251   :  { %v12453_v27 = vmul.f32 %v10827_v8, %v6241_v22  ;;  %v12558_v8 = vld [vmem:[%s11984_s24 + $0x88] sm:$0xff] }
0x4253   :  { %6248 = vrot.lane.b32.xlu0 %v12453_v27, %s11026_s4 }
0x42c5   :  { %v6249_v33 = vpop.permute.xlu0 %6248 }
0x42c6   :  { %v6251_v38 = vsel %vm414_vm0, %v6245_v28, %v6249_v33 }
0x42c7   :  { %10120 = vmatmul.mubr.msk.f32.vlgmr.msra.gmra.mxu1 %vm609_vm11, %v6251_v38  ;;  %v12591_v38 = vld [vmem:[%s12088_s30 + $0x2] ss:$0 sm:$0xff] }
0x42c8   :  { %10142 = vmatpush3.msra.mxu1 %v12251_v36  ;;  %10157 = vmatprep.mubr.msk.f32.mxu1 %vm11022_vm10, %v11019_v15 }
0x42c9   :  { %10143 = vmatprep.subr.mxu1 %v11019_v15 }
0x42ca   :  { %10144 = vmatpush3.msra.mxu1 %v12257_v37 }
0x42cb   :  { %10145 = vmatprep.subr.mxu1 %v11019_v15 }
0x42cc   :  { %10146 = vmatpush3.msra.mxu1 %v12264_v40 }
0x42cd   :  { %10147 = vmatprep.subr.mxu1 %v11019_v15 }
0x42ce   :  { %10148 = vmatpush3.msra.mxu1 %v12269_v35 }
0x42cf   :  { %10149 = vmatprep.subr.mxu1 %v11019_v15 }
0x42d0   :  { %10150 = vmatpush3.msra.mxu1 %v12274_v23 }
0x42d1   :  { %10151 = vmatprep.subr.mxu1 %v11019_v15 }
0x42d2   :  { %10152 = vmatpush3.msra.mxu1 %v12279_v47 }
0x42d3   :  { %10153 = vmatprep.subr.mxu1 %v11019_v15 }
0x42d4   :  { %10154 = vmatpush3.msra.mxu1 %v12284_v41 }
0x42d5   :  { %10155 = vmatprep.subr.mxu1 %v11019_v15 }
0x42d6   :  { %10156 = vmatpush3.msra.mxu1 %v12289_v43 }
0x42d7   :  { %10179 = vmatprep.subr.mxu1 %v11019_v15 }
0x4387   :  { %v6321_v19 = vpop.f32.mrf.mxu1 }
0x4388   :  { %v6322_v55 = vadd.f32 %v12317_v44, %v6321_v19 }
0x4389   :  { %v10121_v45 = vpop.f32.mrf.mxu1 }
0x438a   :  { %10830 = vtanh.f32 %v6322_v55  ;;  %v8854_v24 = vmul.f32 -1.442695, %v6322_v55 }
0x438c   :  { %10832 = vpow2.f32 %v8854_v24 }
0x4397   :  { %v10831_v29 = vpop.eup %10830 }
0x4398   :  { %6334 = vrot.lane.b32.xlu1 %v10831_v29, %s11026_s4 }
0x4399   :  { %v10833_v25 = vpop.eup %10832 }
0x439a   :  { %v6328_v42 = vadd.f32 1.0, %v10833_v25 }
0x439c   :  { %10834 = vrcp.f32 %v6328_v42 }
0x43a9   :  { %v10835_v48 = vpop.eup %10834 }
0x43aa   :  { %v6332_v0 = vmul.f32 %v10835_v48, %v6237_v9 }
0x440a   :  { %v6335_v10 = vpop.permute.xlu1 %6334 }
0x440b   :  { %v6337_v50 = vmul.f32 %v10835_v48, %v6335_v10 }
0x440d   :  { %6339 = vrot.lane.b32.xlu0 %v6337_v50, %s13149_s1 }
0x4411   :  { %6349 = vrot.lane.b32.xlu0 %v12246_v31, %s13149_s1 }
0x447f   :  { %v6340_v53 = vpop.permute.xlu0 %6339 }
0x4480   :  { %v6342_v58 = vadd.f32 %v6340_v53, %v6332_v0 }
0x4482   :  { %10836 = vtanh.f32 %v6342_v58 }
0x4483   :  { %v6350_v60 = vpop.permute.xlu0 %6349 }
0x448f   :  { %v10837_v59 = vpop.eup %10836 }
0x4490   :  { %6345 = vrot.lane.b32.xlu1 %v10837_v59, %s11026_s4 }
0x4502   :  { %v6346_v12 = vpop.permute.xlu1 %6345 }
0x4503   :  { %v12483_v51 = vmul.f32 %v10835_v48, %v6346_v12 }
0x4505   :  { %6353 = vrot.lane.b32.xlu1 %v12483_v51, %s11026_s4 }
0x4577   :  { %v6354_v61 = vpop.permute.xlu1 %6353 }
0x4578   :  { %v6356_v62 = vsel %vm414_vm0, %v6350_v60, %v6354_v61 }
0x4579   :  { %10139 = vmatmul.mubr.msk.f32.vlgmr.msra.gmra.mxu0 %vm609_vm11, %v6356_v62 }
0x457a   :  { %10161 = vmatpush3.msra.mxu0 %v12251_v36  ;;  %10176 = vmatprep.mubr.msk.f32.mxu0 %vm11022_vm10, %v11019_v15 }
0x457b   :  { %10162 = vmatprep.subr.mxu0 %v11019_v15 }
0x457c   :  { %10163 = vmatpush3.msra.mxu0 %v12257_v37 }
0x457d   :  { %10164 = vmatprep.subr.mxu0 %v11019_v15 }
0x457e   :  { %10165 = vmatpush3.msra.mxu0 %v12264_v40 }
0x457f   :  { %10166 = vmatprep.subr.mxu0 %v11019_v15 }
0x4580   :  { %10167 = vmatpush3.msra.mxu0 %v12269_v35 }
0x4581   :  { %10168 = vmatprep.subr.mxu0 %v11019_v15 }
0x4582   :  { %10169 = vmatpush3.msra.mxu0 %v12274_v23 }
0x4583   :  { %10170 = vmatprep.subr.mxu0 %v11019_v15 }
0x4584   :  { %10171 = vmatpush3.msra.mxu0 %v12279_v47 }
0x4585   :  { %10172 = vmatprep.subr.mxu0 %v11019_v15 }
0x4586   :  { %10173 = vmatpush3.msra.mxu0 %v12284_v41 }
0x4587   :  { %10174 = vmatprep.subr.mxu0 %v11019_v15 }
0x4588   :  { %10175 = vmatpush3.msra.mxu0 %v12289_v43 }
0x4589   :  { %10198 = vmatprep.subr.mxu0 %v11019_v15 }
0x4639   :  { %v6426_v31 = vpop.f32.mrf.mxu0 }
0x463a   :  { %v6427_v36 = vadd.f32 %v12317_v44, %v6426_v31 }
0x463b   :  { %v10140_v37 = vpop.f32.mrf.mxu0 }
0x463c   :  { %10838 = vtanh.f32 %v6427_v36  ;;  %v8856_v35 = vmul.f32 -1.442695, %v6427_v36 }
0x463e   :  { %10840 = vpow2.f32 %v8856_v35 }
0x4649   :  { %v10839_v40 = vpop.eup %10838 }
0x464a   :  { %6439 = vrot.lane.b32.xlu0 %v10839_v40, %s11026_s4 }
0x464b   :  { %v10841_v23 = vpop.eup %10840 }
0x464c   :  { %v6433_v47 = vadd.f32 1.0, %v10841_v23 }
0x464e   :  { %10842 = vrcp.f32 %v6433_v47 }
0x465b   :  { %v10843_v41 = vpop.eup %10842 }
0x465c   :  { %v6437_v43 = vmul.f32 %v10843_v41, %v6342_v58 }
0x46bc   :  { %v6440_v49 = vpop.permute.xlu0 %6439 }
0x46bd   :  { %v6442_v63 = vmul.f32 %v10843_v41, %v6440_v49 }
0x46bf   :  { %6444 = vrot.lane.b32.xlu1 %v6442_v63, %s13149_s1 }
0x46c3   :  { %6454 = vrot.lane.b32.xlu1 %v12335_v30, %s13149_s1 }
0x46c7   :  { %6676 = vrot.lane.b32.xlu1 %v12339_v3, %s13149_s1 }
0x4731   :  { %v6445_v1 = vpop.permute.xlu1 %6444 }
0x4732   :  { %v12514_v2 = vadd.f32 %v6445_v1, %v6437_v43 }
0x4734   :  { %10844 = vtanh.f32 %v12514_v2 }
0x4735   :  { %10846 = vtanh.f32 %v5784_v13  ;;  %v6455_v18 = vpop.permute.xlu1 %6454 }
0x4736   :  { %10848 = vpow2.f32 %v8834_v21 }
0x4739   :  { %v6677_v39 = vpop.permute.xlu1 %6676 }
0x473a   :  { %v6679_v20 = vsel %vm414_vm0, %v6677_v39, 0.0 }
0x4741   :  { %v10845_v5 = vpop.eup %10844 }
0x4742   :  { %6450 = vrot.lane.b32.xlu0 %v10845_v5, %s11026_s4  ;;  %v10847_v3 = vpop.eup %10846 }
0x4743   :  { %v10849_v9 = vpop.eup %10848 }
0x4744   :  { %v5790_v22 = vadd.f32 1.0, %v10849_v9 }
0x47b4   :  { %v6451_v30 = vpop.permute.xlu0 %6450 }
0x47b5   :  { %v12520_v14 = vmul.f32 %v10843_v41, %v6451_v30 }
0x47b7   :  { %6458 = vrot.lane.b32.xlu0 %v12520_v14, %s11026_s4 }
0x47bb   :  { %5796 = vrot.lane.b32.xlu0 %v10847_v3, %s11026_s4 }
0x4829   :  { %v6459_v54 = vpop.permute.xlu0 %6458 }
0x482a   :  { %v6461_v34 = vsel %vm414_vm0, %v6455_v18, %v6459_v54 }
0x482b   :  { %10158 = vmatmul.mubr.msk.f32.vlgmr.msra.gmra.mxu1 %vm609_vm11, %v6461_v34 }
0x482c   :  { %10180 = vmatpush3.msra.mxu1 %v12526_v4  ;;  %10195 = vmatprep.mubr.msk.f32.mxu1 %vm11022_vm10, %v11019_v15 }
0x482d   :  { %10181 = vmatprep.subr.mxu1 %v11019_v15  ;;  %v5797_v55 = vpop.permute.xlu0 %5796 }
0x482e   :  { %10182 = vmatpush3.msra.mxu1 %v12531_v16 }
0x482f   :  { %10183 = vmatprep.subr.mxu1 %v11019_v15 }
0x4830   :  { %10184 = vmatpush3.msra.mxu1 %v12538_v32 }
0x4831   :  { %10185 = vmatprep.subr.mxu1 %v11019_v15 }
0x4832   :  { %10186 = vmatpush3.msra.mxu1 %v12543_v56 }
0x4833   :  { %10187 = vmatprep.subr.mxu1 %v11019_v15 }
0x4834   :  { %10188 = vmatpush3.msra.mxu1 %v12548_v17 }
0x4835   :  { %10189 = vmatprep.subr.mxu1 %v11019_v15 }
0x4836   :  { %10190 = vmatpush3.msra.mxu1 %v12553_v57 }
0x4837   :  { %10191 = vmatprep.subr.mxu1 %v11019_v15 }
0x4838   :  { %10192 = vmatpush3.msra.mxu1 %v12558_v8 }
0x4839   :  { %10193 = vmatprep.subr.mxu1 %v11019_v15 }
0x483a   :  { %10194 = vmatpush3.msra.mxu1 %v12563_v46 }
0x483b   :  { %10196 = vmatmul.mubr.msk.f32.vlgmr.msra.gmra.mxu1 %vm609_vm11, %v6679_v20  ;;  %10217 = vmatprep.subr.mxu1 %v11019_v15 }
0x483c   :  { %10218 = vmatpush3.msra.mxu1 %v12526_v4  ;;  %10233 = vmatprep.mubr.msk.f32.mxu1 %vm11022_vm10, %v11019_v15 }
0x483d   :  { %10219 = vmatprep.subr.mxu1 %v11019_v15 }
0x483e   :  { %10220 = vmatpush3.msra.mxu1 %v12531_v16 }
0x483f   :  { %10221 = vmatprep.subr.mxu1 %v11019_v15 }
0x4840   :  { %10222 = vmatpush3.msra.mxu1 %v12538_v32 }
0x4841   :  { %10223 = vmatprep.subr.mxu1 %v11019_v15 }
0x4842   :  { %10224 = vmatpush3.msra.mxu1 %v12543_v56 }
0x4843   :  { %10225 = vmatprep.subr.mxu1 %v11019_v15 }
0x4844   :  { %10226 = vmatpush3.msra.mxu1 %v12548_v17 }
0x4845   :  { %10227 = vmatprep.subr.mxu1 %v11019_v15 }
0x4846   :  { %10228 = vmatpush3.msra.mxu1 %v12553_v57 }
0x4847   :  { %10229 = vmatprep.subr.mxu1 %v11019_v15 }
0x4848   :  { %10230 = vmatpush3.msra.mxu1 %v12558_v8 }
0x4849   :  { %10231 = vmatprep.subr.mxu1 %v11019_v15 }
0x484a   :  { %10232 = vmatpush3.msra.mxu1 %v12563_v46 }
0x484b   :  { %10255 = vmatprep.subr.mxu1 %v11019_v15 }
0x48eb   :  { %v6531_v7 = vpop.f32.mrf.mxu1 }
0x48ec   :  { %v6532_v28 = vadd.f32 %v12317_v44, %v6531_v7 }
0x48ed   :  { %v10159_v33 = vpop.f32.mrf.mxu1 }
0x48ee   :  { %10850 = vtanh.f32 %v6532_v28  ;;  %v8858_v44 = vmul.f32 -1.442695, %v6532_v28 }
0x48ef   :  { %10852 = vrcp.f32 %v5790_v22 }
0x48fb   :  { %v10851_v19 = vpop.eup %10850  ;;  %v6755_v45 = vpop.f32.mrf.mxu1 }
0x48fc   :  { %v6756_v29 = vadd.f32 %v12591_v38, %v6755_v45  ;;  %6544 = vrot.lane.b32.xlu1 %v10851_v19, %s11026_s4  ;;  %v10853_v24 = vpop.eup %10852 }
0x48fd   :  { %v10197_v25 = vpop.f32.mrf.mxu1  ;;  %v5799_v42 = vmul.f32 %v10853_v24, %v5797_v55  ;;  %v5794_v61 = vmul.f32 %v10853_v24, %v12325_v52 }
0x48fe   :  { %10854 = vtanh.f32 %v6756_v29  ;;  %v8872_v10 = vmul.f32 -1.442695, %v6756_v29 }
0x48ff   :  { %10856 = vpow2.f32 %v8858_v44 }
0x4900   :  { %5801 = vrot.lane.b32.xlu1 %v5799_v42, %s13149_s1  ;;  %10858 = vpow2.f32 %v8872_v10 }
0x490b   :  { %v10855_v48 = vpop.eup %10854 }
0x490c   :  { %6768 = vrot.lane.b32.xlu0 %v10855_v48, %s11026_s4  ;;  %v10857_v50 = vpop.eup %10856 }
0x490d   :  { %v6538_v0 = vadd.f32 1.0, %v10857_v50  ;;  %v10859_v53 = vpop.eup %10858 }
0x490e   :  { %v6762_v58 = vadd.f32 1.0, %v10859_v53 }
0x490f   :  { %10860 = vrcp.f32 %v6538_v0 }
0x4910   :  { %10862 = vrcp.f32 %v6762_v58 }
0x491c   :  { %v10861_v59 = vpop.eup %10860 }
0x491d   :  { %v10863_v36 = vpop.eup %10862  ;;  %v6542_v23 = vmul.f32 %v10861_v59, %v12514_v2 }
0x491e   :  { %v6766_v49 = vmul.f32 0.0, %v10863_v36 }
0x496e   :  { %v6545_v12 = vpop.permute.xlu1 %6544 }
0x496f   :  { %v6547_v60 = vmul.f32 %v10861_v59, %v6545_v12 }
0x4971   :  { %6549 = vrot.lane.b32.xlu0 %v6547_v60, %s13149_s1 }
0x4972   :  { %v5802_v62 = vpop.permute.xlu1 %5801 }
0x4973   :  { %v5804_v31 = vadd.f32 %v5802_v62, %v5794_v61 }
0x4975   :  { %10864 = vtanh.f32 %v5804_v31 }
0x497e   :  { %v6769_v37 = vpop.permute.xlu0 %6768 }
0x497f   :  { %v6771_v40 = vmul.f32 %v10863_v36, %v6769_v37 }
0x4981   :  { %6773 = vrot.lane.b32.xlu1 %v6771_v40, %s13149_s1 }
0x4982   :  { %v10865_v35 = vpop.eup %10864 }
0x4983   :  { %5807 = vrot.lane.b32.xlu0 %v10865_v35, %s11026_s4 }
0x49e3   :  { %v6550_v47 = vpop.permute.xlu0 %6549 }
0x49e4   :  { %v12602_v41 = vadd.f32 %v6550_v47, %v6542_v23 }
0x49e6   :  { %10866 = vtanh.f32 %v12602_v41 }
0x49f3   :  { %v10867_v52 = vpop.eup %10866  ;;  %v6774_v63 = vpop.permute.xlu1 %6773 }
0x49f4   :  { %v12605_v43 = vadd.f32 %v6774_v63, %v6766_v49  ;;  %6555 = vrot.lane.b32.xlu1 %v10867_v52, %s11026_s4 }
0x49f5   :  { %v5808_v1 = vpop.permute.xlu0 %5807 }
0x49f6   :  { %10868 = vtanh.f32 %v12605_v43  ;;  %v5810_v5 = vmul.f32 %v10853_v24, %v5808_v1 }
0x49f8   :  { %6560 = vrot.lane.b32.xlu1 %v5810_v5, %s13149_s1 }
0x49fc   :  { %6783 = vrot.lane.b32.xlu1 %v12393_v26, %s13149_s1 }
0x4a03   :  { %v10869_v2 = vpop.eup %10868 }
0x4a04   :  { %6779 = vrot.lane.b32.xlu0 %v10869_v2, %s11026_s4 }
0x4a66   :  { %v6556_v6 = vpop.permute.xlu1 %6555 }
0x4a67   :  { %v12613_v13 = vmul.f32 %v10861_v59, %v6556_v6 }
0x4a69   :  { %6564 = vrot.lane.b32.xlu0 %v12613_v13, %s11026_s4 }
0x4a6a   :  { %v6561_v18 = vpop.permute.xlu1 %6560 }
0x4a6e   :  { %v6784_v26 = vpop.permute.xlu1 %6783 }
0x4a76   :  { %v6780_v30 = vpop.permute.xlu0 %6779 }
0x4a77   :  { %v12617_v3 = vmul.f32 %v10863_v36, %v6780_v30 }
0x4a79   :  { %6787 = vrot.lane.b32.xlu0 %v12617_v3, %s11026_s4 }
0x4adb   :  { %v6565_v54 = vpop.permute.xlu0 %6564 }
0x4adc   :  { %v6567_v34 = vsel %vm414_vm0, %v6561_v18, %v6565_v54 }
0x4add   :  { %10177 = vmatmul.mubr.msk.f32.vlgmr.msra.gmra.mxu0 %vm609_vm11, %v6567_v34 }
0x4ade   :  { %10199 = vmatpush3.msra.mxu0 %v12526_v4  ;;  %10214 = vmatprep.mubr.msk.f32.mxu0 %vm11022_vm10, %v11019_v15 }
0x4adf   :  { %10200 = vmatprep.subr.mxu0 %v11019_v15 }
0x4ae0   :  { %10201 = vmatpush3.msra.mxu0 %v12531_v16 }
0x4ae1   :  { %10202 = vmatprep.subr.mxu0 %v11019_v15 }
0x4ae2   :  { %10203 = vmatpush3.msra.mxu0 %v12538_v32 }
0x4ae3   :  { %10204 = vmatprep.subr.mxu0 %v11019_v15 }
0x4ae4   :  { %10205 = vmatpush3.msra.mxu0 %v12543_v56 }
0x4ae5   :  { %10206 = vmatprep.subr.mxu0 %v11019_v15 }
0x4ae6   :  { %10207 = vmatpush3.msra.mxu0 %v12548_v17 }
0x4ae7   :  { %10208 = vmatprep.subr.mxu0 %v11019_v15 }
0x4ae8   :  { %10209 = vmatpush3.msra.mxu0 %v12553_v57 }
0x4ae9   :  { %10210 = vmatprep.subr.mxu0 %v11019_v15 }
0x4aea   :  { %10211 = vmatpush3.msra.mxu0 %v12558_v8 }
0x4aeb   :  { %10212 = vmatprep.subr.mxu0 %v11019_v15  ;;  %v6788_v39 = vpop.permute.xlu0 %6787 }
0x4aec   :  { %v6790_v20 = vsel %vm414_vm0, %v6784_v26, %v6788_v39  ;;  %10213 = vmatpush3.msra.mxu0 %v12563_v46 }
0x4aed   :  { %10215 = vmatmul.mubr.msk.f32.vlgmr.msra.gmra.mxu0 %vm609_vm11, %v6790_v20  ;;  %10236 = vmatprep.subr.mxu0 %v11019_v15 }
0x4aee   :  { %10237 = vmatpush3.msra.mxu0 %v12526_v4  ;;  %10252 = vmatprep.mubr.msk.f32.mxu0 %vm11022_vm10, %v11019_v15 }
0x4aef   :  { %10238 = vmatprep.subr.mxu0 %v11019_v15 }
0x4af0   :  { %10239 = vmatpush3.msra.mxu0 %v12531_v16 }
0x4af1   :  { %10240 = vmatprep.subr.mxu0 %v11019_v15 }
0x4af2   :  { %10241 = vmatpush3.msra.mxu0 %v12538_v32 }
0x4af3   :  { %10242 = vmatprep.subr.mxu0 %v11019_v15 }
0x4af4   :  { %10243 = vmatpush3.msra.mxu0 %v12543_v56 }
0x4af5   :  { %10244 = vmatprep.subr.mxu0 %v11019_v15 }
0x4af6   :  { %10245 = vmatpush3.msra.mxu0 %v12548_v17 }
0x4af7   :  { %10246 = vmatprep.subr.mxu0 %v11019_v15 }
0x4af8   :  { %10247 = vmatpush3.msra.mxu0 %v12553_v57 }
0x4af9   :  { %10248 = vmatprep.subr.mxu0 %v11019_v15 }
0x4afa   :  { %10249 = vmatpush3.msra.mxu0 %v12558_v8 }
0x4afb   :  { %10250 = vmatprep.subr.mxu0 %v11019_v15 }
0x4afc   :  { %10251 = vmatpush3.msra.mxu0 %v12563_v46 }
0x4afd   :  { %10274 = vmatprep.subr.mxu0 %v11019_v15 }
0x4b9d   :  { %v12661_v21 = vpop.f32.mrf.mxu0 }
0x4b9f   :  { %v10178_v9 = vpop.f32.mrf.mxu0 }
0x4bad   :  { %v6860_v7 = vpop.f32.mrf.mxu0 }
0x4bae   :  { %v6861_v22 = vadd.f32 %v12591_v38, %v6860_v7 }
0x4baf   :  { %v10216_v28 = vpop.f32.mrf.mxu0 }
0x4bb0   :  { %10870 = vtanh.f32 %v6861_v22  ;;  %v8874_v19 = vmul.f32 -1.442695, %v6861_v22 }
0x4bb2   :  { %10872 = vpow2.f32 %v8874_v19 }
0x4bbd   :  { %v10871_v33 = vpop.eup %10870 }
0x4bbe   :  { %6873 = vrot.lane.b32.xlu1 %v10871_v33, %s11026_s4 }
0x4bbf   :  { %v10873_v55 = vpop.eup %10872 }
0x4bc0   :  { %v6867_v45 = vadd.f32 1.0, %v10873_v55 }
0x4bc2   :  { %10874 = vrcp.f32 %v6867_v45 }
0x4bcf   :  { %v10875_v29 = vpop.eup %10874 }
0x4bd0   :  { %v6871_v42 = vmul.f32 %v10875_v29, %v12605_v43 }
0x4c30   :  { %v6874_v24 = vpop.permute.xlu1 %6873 }
0x4c31   :  { %v6876_v25 = vmul.f32 %v10875_v29, %v6874_v24 }
0x4c33   :  { %6878 = vrot.lane.b32.xlu0 %v6876_v25, %s13149_s1 }
0x4c37   :  { %6888 = vrot.lane.b32.xlu0 %v12423_v11, %s13149_s1 }
0x4ca5   :  { %v6879_v48 = vpop.permute.xlu0 %6878 }
0x4ca6   :  { %v6881_v44 = vadd.f32 %v6879_v48, %v6871_v42 }
0x4ca8   :  { %10876 = vtanh.f32 %v6881_v44 }
0x4ca9   :  { %v6889_v53 = vpop.permute.xlu0 %6888 }
0x4cb5   :  { %v10877_v10 = vpop.eup %10876 }
0x4cb6   :  { %6884 = vrot.lane.b32.xlu1 %v10877_v10, %s11026_s4 }
0x4d28   :  { %v6885_v50 = vpop.permute.xlu1 %6884 }
0x4d29   :  { %v12670_v0 = vmul.f32 %v10875_v29, %v6885_v50 }
0x4d2b   :  { %6892 = vrot.lane.b32.xlu1 %v12670_v0, %s11026_s4 }
0x4d9d   :  { %v6893_v58 = vpop.permute.xlu1 %6892 }
0x4d9e   :  { %v6895_v59 = vsel %vm414_vm0, %v6889_v53, %v6893_v58 }
0x4d9f   :  { %10234 = vmatmul.mubr.msk.f32.vlgmr.msra.gmra.mxu1 %vm609_vm11, %v6895_v59 }
0x4da0   :  { %10256 = vmatpush3.msra.mxu1 %v12526_v4  ;;  %10271 = vmatprep.mubr.msk.f32.mxu1 %vm11022_vm10, %v11019_v15 }
0x4da1   :  { %10257 = vmatprep.subr.mxu1 %v11019_v15 }
0x4da2   :  { %10258 = vmatpush3.msra.mxu1 %v12531_v16 }
0x4da3   :  { %10259 = vmatprep.subr.mxu1 %v11019_v15 }
0x4da4   :  { %10260 = vmatpush3.msra.mxu1 %v12538_v32 }
0x4da5   :  { %10261 = vmatprep.subr.mxu1 %v11019_v15 }
0x4da6   :  { %10262 = vmatpush3.msra.mxu1 %v12543_v56 }
0x4da7   :  { %10263 = vmatprep.subr.mxu1 %v11019_v15 }
0x4da8   :  { %10264 = vmatpush3.msra.mxu1 %v12548_v17 }
0x4da9   :  { %10265 = vmatprep.subr.mxu1 %v11019_v15 }
0x4daa   :  { %10266 = vmatpush3.msra.mxu1 %v12553_v57 }
0x4dab   :  { %10267 = vmatprep.subr.mxu1 %v11019_v15 }
0x4dac   :  { %10268 = vmatpush3.msra.mxu1 %v12558_v8 }
0x4dad   :  { %10269 = vmatprep.subr.mxu1 %v11019_v15 }
0x4dae   :  { %10270 = vmatpush3.msra.mxu1 %v12563_v46 }
0x4daf   :  { %10293 = vmatprep.subr.mxu1 %v11019_v15 }
0x4e5f   :  { %v6965_v11 = vpop.f32.mrf.mxu1 }
0x4e60   :  { %v6966_v12 = vadd.f32 %v12591_v38, %v6965_v11 }
0x4e61   :  { %v10235_v60 = vpop.f32.mrf.mxu1 }
0x4e62   :  { %10878 = vtanh.f32 %v6966_v12  ;;  %v8876_v62 = vmul.f32 -1.442695, %v6966_v12 }
0x4e64   :  { %10880 = vpow2.f32 %v8876_v62 }
0x4e6f   :  { %v10879_v61 = vpop.eup %10878 }
0x4e70   :  { %6978 = vrot.lane.b32.xlu0 %v10879_v61, %s11026_s4 }
0x4e71   :  { %v10881_v31 = vpop.eup %10880 }
0x4e72   :  { %v6972_v36 = vadd.f32 1.0, %v10881_v31 }
0x4e74   :  { %10882 = vrcp.f32 %v6972_v36 }
0x4e81   :  { %v10883_v37 = vpop.eup %10882 }
0x4e82   :  { %v6976_v23 = vmul.f32 %v10883_v37, %v6881_v44 }
0x4ee2   :  { %v6979_v40 = vpop.permute.xlu0 %6978 }
0x4ee3   :  { %v6981_v35 = vmul.f32 %v10883_v37, %v6979_v40 }
0x4ee5   :  { %6983 = vrot.lane.b32.xlu1 %v6981_v35, %s13149_s1 }
0x4ee9   :  { %6993 = vrot.lane.b32.xlu1 %v12453_v27, %s13149_s1 }
0x4f57   :  { %v6984_v47 = vpop.permute.xlu1 %6983 }
0x4f58   :  { %v6986_v49 = vadd.f32 %v6984_v47, %v6976_v23 }
0x4f5a   :  { %10884 = vtanh.f32 %v6986_v49 }
0x4f5b   :  { %v6994_v1 = vpop.permute.xlu1 %6993 }
0x4f67   :  { %v10885_v52 = vpop.eup %10884 }
0x4f68   :  { %6989 = vrot.lane.b32.xlu0 %v10885_v52, %s11026_s4 }
0x4fda   :  { %v6990_v63 = vpop.permute.xlu0 %6989 }
0x4fdb   :  { %v12700_v43 = vmul.f32 %v10883_v37, %v6990_v63  ;;  %v11013_v63 = vld [vmem:[%s12088_s30 + $0x1] ss:$0 sm:$0xff] }
0x4fdd   :  { %6997 = vrot.lane.b32.xlu0 %v12700_v43, %s11026_s4 }
0x504f   :  { %v6998_v5 = vpop.permute.xlu0 %6997 }
0x5050   :  { %v7000_v2 = vsel %vm414_vm0, %v6994_v1, %v6998_v5  ;;  %v6638_v1 = vadd.f32 %v11013_v63, %v12661_v21 }
0x5051   :  { %10253 = vmatmul.mubr.msk.f32.vlgmr.msra.gmra.mxu0 %vm609_vm11, %v7000_v2 }
0x5052   :  { %10275 = vmatpush3.msra.mxu0 %v12526_v4  ;;  %10290 = vmatprep.mubr.msk.f32.mxu0 %vm11022_vm10, %v11019_v15 }
0x5053   :  { %10276 = vmatprep.subr.mxu0 %v11019_v15 }
0x5054   :  { %10277 = vmatpush3.msra.mxu0 %v12531_v16 }
0x5055   :  { %10278 = vmatprep.subr.mxu0 %v11019_v15 }
0x5056   :  { %10279 = vmatpush3.msra.mxu0 %v12538_v32 }
0x5057   :  { %10280 = vmatprep.subr.mxu0 %v11019_v15 }
0x5058   :  { %10281 = vmatpush3.msra.mxu0 %v12543_v56 }
0x5059   :  { %10282 = vmatprep.subr.mxu0 %v11019_v15 }
0x505a   :  { %10283 = vmatpush3.msra.mxu0 %v12548_v17 }
0x505b   :  { %10284 = vmatprep.subr.mxu0 %v11019_v15 }
0x505c   :  { %10285 = vmatpush3.msra.mxu0 %v12553_v57 }
0x505d   :  { %10286 = vmatprep.subr.mxu0 %v11019_v15 }
0x505e   :  { %10287 = vmatpush3.msra.mxu0 %v12558_v8 }
0x505f   :  { %10288 = vmatprep.subr.mxu0 %v11019_v15 }
0x5060   :  { %10289 = vmatpush3.msra.mxu0 %v12563_v46 }
0x5061   :  { %10312 = vmatprep.subr.mxu0 %v11019_v15 }
0x5111   :  { %v7070_v27 = vpop.f32.mrf.mxu0 }
0x5112   :  { %v7071_v6 = vadd.f32 %v12591_v38, %v7070_v27 }
0x5113   :  { %v10254_v30 = vpop.f32.mrf.mxu0 }
0x5114   :  { %10886 = vtanh.f32 %v7071_v6  ;;  %v8878_v54 = vmul.f32 -1.442695, %v7071_v6  ;;  %v12803_v6 = vld [vmem:[%s11984_s24 + $0xf8] sm:$0xff]  ;;  %v12808_v30 = vld [vmem:[%s11984_s24 + $0xf0] sm:$0xff] }
0x5116   :  { %10888 = vpow2.f32 %v8878_v54  ;;  %v12820_v54 = vld [vmem:[%s11984_s24 + $0xe0] sm:$0xff] }
0x5121   :  { %v10887_v18 = vpop.eup %10886 }
0x5122   :  { %7083 = vrot.lane.b32.xlu1 %v10887_v18, %s11026_s4  ;;  %v12815_v18 = vld [vmem:[%s11984_s24 + $0xe8] sm:$0xff] }
0x5123   :  { %v10889_v34 = vpop.eup %10888 }
0x5124   :  { %v7077_v26 = vadd.f32 1.0, %v10889_v34  ;;  %v12825_v34 = vld [vmem:[%s11984_s24 + $0xd8] sm:$0xff] }
0x5126   :  { %10890 = vrcp.f32 %v7077_v26  ;;  %v12830_v26 = vld [vmem:[%s11984_s24 + $0xd0] sm:$0xff] }
0x5133   :  { %v10891_v39 = vpop.eup %10890 }
0x5134   :  { %v7081_v7 = vmul.f32 %v10891_v39, %v6986_v49 }
0x5194   :  { %v7084_v20 = vpop.permute.xlu1 %7083 }
0x5195   :  { %v7086_v9 = vmul.f32 %v10891_v39, %v7084_v20 }
0x5197   :  { %7088 = vrot.lane.b32.xlu0 %v7086_v9, %s13149_s1  ;;  %v12840_v9 = vld [vmem:[%s11984_s24 + $0xc0] sm:$0xff] }
0x519b   :  { %7098 = vrot.lane.b32.xlu0 %v12483_v51, %s13149_s1 }
0x5209   :  { %v7089_v22 = vpop.permute.xlu0 %7088 }
0x520a   :  { %v7091_v28 = vadd.f32 %v7089_v22, %v7081_v7  ;;  %v8860_v22 = vmul.f32 -1.442695, %v6638_v1 }
0x520c   :  { %10892 = vtanh.f32 %v7091_v28 }
0x520d   :  { %v7099_v45 = vpop.permute.xlu0 %7098 }
0x5219   :  { %v10893_v33 = vpop.eup %10892 }
0x521a   :  { %7094 = vrot.lane.b32.xlu1 %v10893_v33, %s11026_s4 }
0x528c   :  { %v7095_v19 = vpop.permute.xlu1 %7094 }
0x528d   :  { %v12730_v55 = vmul.f32 %v10891_v39, %v7095_v19  ;;  %v12835_v39 = vld [vmem:[%s11984_s24 + $0xc8] sm:$0xff]  ;;  %s8662_s24 = sld [smem:[%s13146_s0 + %s11058_s17]]  }
0x528f   :  { %7102 = vrot.lane.b32.xlu1 %v12730_v55, %s11026_s4 }
0x5301   :  { %v7103_v29 = vpop.permute.xlu1 %7102 }
0x5302   :  { %v7105_v24 = vsel %vm414_vm0, %v7099_v45, %v7103_v29 }
0x5303   :  { %10272 = vmatmul.mubr.msk.f32.vlgmr.msra.gmra.mxu1 %vm609_vm11, %v7105_v24  ;;  %v12868_v24 = vld [vmem:[%s12088_s30 + $0x3] ss:$0 sm:$0xff] }
0x5304   :  { %10294 = vmatpush3.msra.mxu1 %v12526_v4  ;;  %10309 = vmatprep.mubr.msk.f32.mxu1 %vm11022_vm10, %v11019_v15 }
0x5305   :  { %10295 = vmatprep.subr.mxu1 %v11019_v15 }
0x5306   :  { %10296 = vmatpush3.msra.mxu1 %v12531_v16 }
0x5307   :  { %10297 = vmatprep.subr.mxu1 %v11019_v15 }
0x5308   :  { %10298 = vmatpush3.msra.mxu1 %v12538_v32 }
0x5309   :  { %10299 = vmatprep.subr.mxu1 %v11019_v15 }
0x530a   :  { %10300 = vmatpush3.msra.mxu1 %v12543_v56 }
0x530b   :  { %10301 = vmatprep.subr.mxu1 %v11019_v15 }
0x530c   :  { %10302 = vmatpush3.msra.mxu1 %v12548_v17 }
0x530d   :  { %10303 = vmatprep.subr.mxu1 %v11019_v15 }
0x530e   :  { %10304 = vmatpush3.msra.mxu1 %v12553_v57 }
0x530f   :  { %10305 = vmatprep.subr.mxu1 %v11019_v15 }
0x5310   :  { %10306 = vmatpush3.msra.mxu1 %v12558_v8 }
0x5311   :  { %10307 = vmatprep.subr.mxu1 %v11019_v15 }
0x5312   :  { %10308 = vmatpush3.msra.mxu1 %v12563_v46 }
0x5313   :  { %10331 = vmatprep.subr.mxu1 %v11019_v15 }
0x53c3   :  { %v7175_v51 = vpop.f32.mrf.mxu1 }
0x53c4   :  { %v7176_v25 = vadd.f32 %v12591_v38, %v7175_v51 }
0x53c5   :  { %v10273_v42 = vpop.f32.mrf.mxu1 }
0x53c6   :  { %10894 = vtanh.f32 %v7176_v25  ;;  %v8880_v44 = vmul.f32 -1.442695, %v7176_v25 }
0x53c8   :  { %10896 = vpow2.f32 %v8880_v44 }
0x53d3   :  { %v10895_v48 = vpop.eup %10894 }
0x53d4   :  { %7188 = vrot.lane.b32.xlu0 %v10895_v48, %s11026_s4 }
0x53d5   :  { %v10897_v10 = vpop.eup %10896 }
0x53d6   :  { %v7182_v50 = vadd.f32 1.0, %v10897_v10 }
0x53d8   :  { %10898 = vrcp.f32 %v7182_v50 }
0x53e5   :  { %v10899_v53 = vpop.eup %10898 }
0x53e6   :  { %v7186_v11 = vmul.f32 %v10899_v53, %v7091_v28 }
0x5446   :  { %v7189_v58 = vpop.permute.xlu0 %7188 }
0x5447   :  { %v7191_v59 = vmul.f32 %v10899_v53, %v7189_v58 }
0x5449   :  { %7193 = vrot.lane.b32.xlu1 %v7191_v59, %s13149_s1 }
0x544d   :  { %7203 = vrot.lane.b32.xlu1 %v12520_v14, %s13149_s1 }
0x54bb   :  { %v7194_v12 = vpop.permute.xlu1 %7193 }
0x54bc   :  { %v7196_v60 = vadd.f32 %v7194_v12, %v7186_v11 }
0x54be   :  { %10900 = vtanh.f32 %v7196_v60 }
0x54bf   :  { %v7204_v36 = vpop.permute.xlu1 %7203 }
0x54cb   :  { %v10901_v61 = vpop.eup %10900 }
0x54cc   :  { %7199 = vrot.lane.b32.xlu0 %v10901_v61, %s11026_s4 }
0x553e   :  { %v7200_v62 = vpop.permute.xlu0 %7199 }
0x553f   :  { %v12760_v31 = vmul.f32 %v10899_v53, %v7200_v62 }
0x5541   :  { %7207 = vrot.lane.b32.xlu0 %v12760_v31, %s11026_s4 }
0x55b3   :  { %v7208_v37 = vpop.permute.xlu0 %7207 }
0x55b4   :  { %v7210_v40 = vsel %vm414_vm0, %v7204_v36, %v7208_v37 }
0x55b5   :  { %10291 = vmatmul.mubr.msk.f32.vlgmr.msra.gmra.mxu0 %vm609_vm11, %v7210_v40 }
0x55b6   :  { %10313 = vmatpush3.msra.mxu0 %v12526_v4  ;;  %10328 = vmatprep.mubr.msk.f32.mxu0 %vm11022_vm10, %v11019_v15 }
0x55b7   :  { %10314 = vmatprep.subr.mxu0 %v11019_v15 }
0x55b8   :  { %10315 = vmatpush3.msra.mxu0 %v12531_v16 }
0x55b9   :  { %10316 = vmatprep.subr.mxu0 %v11019_v15 }
0x55ba   :  { %10317 = vmatpush3.msra.mxu0 %v12538_v32 }
0x55bb   :  { %10318 = vmatprep.subr.mxu0 %v11019_v15 }
0x55bc   :  { %10319 = vmatpush3.msra.mxu0 %v12543_v56 }
0x55bd   :  { %10320 = vmatprep.subr.mxu0 %v11019_v15 }
0x55be   :  { %10321 = vmatpush3.msra.mxu0 %v12548_v17 }
0x55bf   :  { %10322 = vmatprep.subr.mxu0 %v11019_v15 }
0x55c0   :  { %10323 = vmatpush3.msra.mxu0 %v12553_v57 }
0x55c1   :  { %10324 = vmatprep.subr.mxu0 %v11019_v15 }
0x55c2   :  { %10325 = vmatpush3.msra.mxu0 %v12558_v8 }
0x55c3   :  { %10326 = vmatprep.subr.mxu0 %v11019_v15 }
0x55c4   :  { %10327 = vmatpush3.msra.mxu0 %v12563_v46 }
0x55c5   :  { %10350 = vmatprep.subr.mxu0 %v11019_v15 }
0x5675   :  { %v7280_v14 = vpop.f32.mrf.mxu0 }
0x5676   :  { %v7281_v4 = vadd.f32 %v12591_v38, %v7280_v14 }
0x5677   :  { %v10292_v16 = vpop.f32.mrf.mxu0 }
0x5678   :  { %10902 = vtanh.f32 %v7281_v4  ;;  %v8882_v56 = vmul.f32 -1.442695, %v7281_v4 }
0x567a   :  { %10904 = vpow2.f32 %v8882_v56 }
0x5685   :  { %v10903_v32 = vpop.eup %10902 }
0x5686   :  { %7293 = vrot.lane.b32.xlu1 %v10903_v32, %s11026_s4 }
0x5687   :  { %v10905_v17 = vpop.eup %10904 }
0x5688   :  { %v7287_v57 = vadd.f32 1.0, %v10905_v17 }
0x568a   :  { %10906 = vrcp.f32 %v7287_v57 }
0x5697   :  { %v10907_v8 = vpop.eup %10906 }
0x5698   :  { %v7291_v46 = vmul.f32 %v10907_v8, %v7196_v60 }
0x56f8   :  { %v7294_v35 = vpop.permute.xlu1 %7293 }
0x56f9   :  { %v7296_v23 = vmul.f32 %v10907_v8, %v7294_v35 }
0x56fb   :  { %7298 = vrot.lane.b32.xlu0 %v7296_v23, %s13149_s1 }
0x56ff   :  { %7308 = vrot.lane.b32.xlu0 %v12613_v13, %s13149_s1 }
0x5703   :  { %7530 = vrot.lane.b32.xlu0 %v12617_v3, %s13149_s1 }
0x576d   :  { %v7299_v47 = vpop.permute.xlu0 %7298 }
0x576e   :  { %v12791_v49 = vadd.f32 %v7299_v47, %v7291_v46 }
0x5770   :  { %10908 = vtanh.f32 %v12791_v49 }
0x5771   :  { %10910 = vtanh.f32 %v6638_v1  ;;  %v7309_v2 = vpop.permute.xlu0 %7308 }
0x5772   :  { %10912 = vpow2.f32 %v8860_v22 }
0x5775   :  { %v7531_v20 = vpop.permute.xlu0 %7530 }
0x5776   :  { %v7533_v7 = vsel %vm414_vm0, %v7531_v20, 0.0 }
0x577d   :  { %v10909_v52 = vpop.eup %10908 }
0x577e   :  { %7304 = vrot.lane.b32.xlu1 %v10909_v52, %s11026_s4  ;;  %v10911_v3 = vpop.eup %10910 }
0x577f   :  { %v10913_v28 = vpop.eup %10912 }
0x5780   :  { %v6644_v19 = vadd.f32 1.0, %v10913_v28 }
0x57f0   :  { %v7305_v13 = vpop.permute.xlu1 %7304 }
0x57f1   :  { %v12797_v5 = vmul.f32 %v10907_v8, %v7305_v13 }
0x57f3   :  { %7312 = vrot.lane.b32.xlu1 %v12797_v5, %s11026_s4 }
0x57f7   :  { %6650 = vrot.lane.b32.xlu1 %v10911_v3, %s11026_s4 }
0x5865   :  { %v7313_v27 = vpop.permute.xlu1 %7312 }
0x5866   :  { %v7315_v21 = vsel %vm414_vm0, %v7309_v2, %v7313_v27 }
0x5867   :  { %10310 = vmatmul.mubr.msk.f32.vlgmr.msra.gmra.mxu1 %vm609_vm11, %v7315_v21 }
0x5868   :  { %10332 = vmatpush3.msra.mxu1 %v12803_v6  ;;  %10347 = vmatprep.mubr.msk.f32.mxu1 %vm11022_vm10, %v11019_v15 }
0x5869   :  { %10333 = vmatprep.subr.mxu1 %v11019_v15  ;;  %v6651_v25 = vpop.permute.xlu1 %6650 }
0x586a   :  { %10334 = vmatpush3.msra.mxu1 %v12808_v30 }
0x586b   :  { %10335 = vmatprep.subr.mxu1 %v11019_v15 }
0x586c   :  { %10336 = vmatpush3.msra.mxu1 %v12815_v18 }
0x586d   :  { %10337 = vmatprep.subr.mxu1 %v11019_v15 }
0x586e   :  { %10338 = vmatpush3.msra.mxu1 %v12820_v54 }
0x586f   :  { %10339 = vmatprep.subr.mxu1 %v11019_v15 }
0x5870   :  { %10340 = vmatpush3.msra.mxu1 %v12825_v34 }
0x5871   :  { %10341 = vmatprep.subr.mxu1 %v11019_v15 }
0x5872   :  { %10342 = vmatpush3.msra.mxu1 %v12830_v26 }
0x5873   :  { %10343 = vmatprep.subr.mxu1 %v11019_v15 }
0x5874   :  { %10344 = vmatpush3.msra.mxu1 %v12835_v39 }
0x5875   :  { %10345 = vmatprep.subr.mxu1 %v11019_v15 }
0x5876   :  { %10346 = vmatpush3.msra.mxu1 %v12840_v9 }
0x5877   :  { %10348 = vmatmul.mubr.msk.f32.vlgmr.msra.gmra.mxu1 %vm609_vm11, %v7533_v7  ;;  %10369 = vmatprep.subr.mxu1 %v11019_v15 }
0x5878   :  { %10370 = vmatpush3.msra.mxu1 %v12803_v6  ;;  %10385 = vmatprep.mubr.msk.f32.mxu1 %vm11022_vm10, %v11019_v15 }
0x5879   :  { %10371 = vmatprep.subr.mxu1 %v11019_v15 }
0x587a   :  { %10372 = vmatpush3.msra.mxu1 %v12808_v30 }
0x587b   :  { %10373 = vmatprep.subr.mxu1 %v11019_v15 }
0x587c   :  { %10374 = vmatpush3.msra.mxu1 %v12815_v18 }
0x587d   :  { %10375 = vmatprep.subr.mxu1 %v11019_v15 }
0x587e   :  { %10376 = vmatpush3.msra.mxu1 %v12820_v54 }
0x587f   :  { %10377 = vmatprep.subr.mxu1 %v11019_v15 }
0x5880   :  { %10378 = vmatpush3.msra.mxu1 %v12825_v34 }
0x5881   :  { %10379 = vmatprep.subr.mxu1 %v11019_v15 }
0x5882   :  { %10380 = vmatpush3.msra.mxu1 %v12830_v26 }
0x5883   :  { %10381 = vmatprep.subr.mxu1 %v11019_v15 }
0x5884   :  { %10382 = vmatpush3.msra.mxu1 %v12835_v39 }
0x5885   :  { %10383 = vmatprep.subr.mxu1 %v11019_v15 }
0x5886   :  { %10384 = vmatpush3.msra.mxu1 %v12840_v9 }
0x5887   :  { %10407 = vmatprep.subr.mxu1 %v11019_v15 }
0x5927   :  { %v7385_v33 = vpop.f32.mrf.mxu1 }
0x5928   :  { %v7386_v45 = vadd.f32 %v12591_v38, %v7385_v33 }
0x5929   :  { %v10311_v29 = vpop.f32.mrf.mxu1 }
0x592a   :  { %10914 = vtanh.f32 %v7386_v45  ;;  %v8884_v38 = vmul.f32 -1.442695, %v7386_v45 }
0x592b   :  { %10916 = vrcp.f32 %v6644_v19 }
0x5937   :  { %v10915_v51 = vpop.eup %10914  ;;  %v7609_v42 = vpop.f32.mrf.mxu1 }
0x5938   :  { %v7610_v48 = vadd.f32 %v12868_v24, %v7609_v42  ;;  %7398 = vrot.lane.b32.xlu0 %v10915_v51, %s11026_s4  ;;  %v10917_v44 = vpop.eup %10916 }
0x5939   :  { %v10349_v10 = vpop.f32.mrf.mxu1  ;;  %v6653_v50 = vmul.f32 %v10917_v44, %v6651_v25  ;;  %v6648_v37 = vmul.f32 %v10917_v44, %v12602_v41 }
0x593a   :  { %10918 = vtanh.f32 %v7610_v48  ;;  %v8898_v58 = vmul.f32 -1.442695, %v7610_v48 }
0x593b   :  { %10920 = vpow2.f32 %v8884_v38 }
0x593c   :  { %6655 = vrot.lane.b32.xlu0 %v6653_v50, %s13149_s1  ;;  %10922 = vpow2.f32 %v8898_v58 }
0x5947   :  { %v10919_v53 = vpop.eup %10918 }
0x5948   :  { %7622 = vrot.lane.b32.xlu1 %v10919_v53, %s11026_s4  ;;  %v10921_v59 = vpop.eup %10920 }
0x5949   :  { %v7392_v11 = vadd.f32 1.0, %v10921_v59  ;;  %v10923_v12 = vpop.eup %10922 }
0x594a   :  { %v7616_v60 = vadd.f32 1.0, %v10923_v12 }
0x594b   :  { %10924 = vrcp.f32 %v7392_v11 }
0x594c   :  { %10926 = vrcp.f32 %v7616_v60 }
0x5958   :  { %v10925_v61 = vpop.eup %10924 }
0x5959   :  { %v10927_v4 = vpop.eup %10926  ;;  %v7396_v17 = vmul.f32 %v10925_v61, %v12791_v49 }
0x595a   :  { %v7620_v35 = vmul.f32 0.0, %v10927_v4 }
0x59aa   :  { %v7399_v62 = vpop.permute.xlu0 %7398 }
0x59ab   :  { %v7401_v36 = vmul.f32 %v10925_v61, %v7399_v62 }
0x59ad   :  { %7403 = vrot.lane.b32.xlu1 %v7401_v36, %s13149_s1 }
0x59ae   :  { %v6656_v40 = vpop.permute.xlu0 %6655 }
0x59af   :  { %v6658_v14 = vadd.f32 %v6656_v40, %v6648_v37 }
0x59b1   :  { %10928 = vtanh.f32 %v6658_v14 }
0x59ba   :  { %v7623_v16 = vpop.permute.xlu1 %7622 }
0x59bb   :  { %v7625_v32 = vmul.f32 %v10927_v4, %v7623_v16 }
0x59bd   :  { %7627 = vrot.lane.b32.xlu0 %v7625_v32, %s13149_s1 }
0x59be   :  { %v10929_v56 = vpop.eup %10928 }
0x59bf   :  { %6661 = vrot.lane.b32.xlu1 %v10929_v56, %s11026_s4 }
0x5a1f   :  { %v7404_v57 = vpop.permute.xlu1 %7403 }
0x5a20   :  { %v12879_v8 = vadd.f32 %v7404_v57, %v7396_v17 }
0x5a22   :  { %10930 = vtanh.f32 %v12879_v8 }
0x5a2f   :  { %v10931_v41 = vpop.eup %10930  ;;  %v7628_v23 = vpop.permute.xlu0 %7627 }
0x5a30   :  { %v12882_v46 = vadd.f32 %v7628_v23, %v7620_v35  ;;  %7409 = vrot.lane.b32.xlu0 %v10931_v41, %s11026_s4 }
0x5a31   :  { %v6662_v47 = vpop.permute.xlu1 %6661 }
0x5a32   :  { %10932 = vtanh.f32 %v12882_v46  ;;  %v6664_v52 = vmul.f32 %v10917_v44, %v6662_v47 }
0x5a34   :  { %7414 = vrot.lane.b32.xlu0 %v6664_v52, %s13149_s1 }
0x5a38   :  { %7637 = vrot.lane.b32.xlu0 %v12670_v0, %s13149_s1 }
0x5a3f   :  { %v10933_v49 = vpop.eup %10932 }
0x5a40   :  { %7633 = vrot.lane.b32.xlu1 %v10933_v49, %s11026_s4 }
0x5aa2   :  { %v7410_v63 = vpop.permute.xlu0 %7409 }
0x5aa3   :  { %v12890_v1 = vmul.f32 %v10925_v61, %v7410_v63 }
0x5aa5   :  { %7418 = vrot.lane.b32.xlu1 %v12890_v1, %s11026_s4 }
0x5aa6   :  { %v7415_v2 = vpop.permute.xlu0 %7414 }
0x5aaa   :  { %v7638_v0 = vpop.permute.xlu0 %7637 }
0x5ab2   :  { %v7634_v13 = vpop.permute.xlu1 %7633 }
0x5ab3   :  { %v7636_v3 = vmul.f32 %v10927_v4, %v7634_v13 }
0x5ab5   :  { %7641 = vrot.lane.b32.xlu1 %v7636_v3, %s11026_s4 }
0x5b17   :  { %v7419_v27 = vpop.permute.xlu1 %7418 }
0x5b18   :  { %v7421_v21 = vsel %vm414_vm0, %v7415_v2, %v7419_v27 }
0x5b19   :  { %10329 = vmatmul.mubr.msk.f32.vlgmr.msra.gmra.mxu0 %vm609_vm11, %v7421_v21 }
0x5b1a   :  { %10351 = vmatpush3.msra.mxu0 %v12803_v6  ;;  %10366 = vmatprep.mubr.msk.f32.mxu0 %vm11022_vm10, %v11019_v15 }
0x5b1b   :  { %10352 = vmatprep.subr.mxu0 %v11019_v15 }
0x5b1c   :  { %10353 = vmatpush3.msra.mxu0 %v12808_v30 }
0x5b1d   :  { %10354 = vmatprep.subr.mxu0 %v11019_v15 }
0x5b1e   :  { %10355 = vmatpush3.msra.mxu0 %v12815_v18 }
0x5b1f   :  { %10356 = vmatprep.subr.mxu0 %v11019_v15 }
0x5b20   :  { %10357 = vmatpush3.msra.mxu0 %v12820_v54 }
0x5b21   :  { %10358 = vmatprep.subr.mxu0 %v11019_v15 }
0x5b22   :  { %10359 = vmatpush3.msra.mxu0 %v12825_v34 }
0x5b23   :  { %10360 = vmatprep.subr.mxu0 %v11019_v15 }
0x5b24   :  { %10361 = vmatpush3.msra.mxu0 %v12830_v26 }
0x5b25   :  { %10362 = vmatprep.subr.mxu0 %v11019_v15 }
0x5b26   :  { %10363 = vmatpush3.msra.mxu0 %v12835_v39 }
0x5b27   :  { %10364 = vmatprep.subr.mxu0 %v11019_v15  ;;  %v7642_v20 = vpop.permute.xlu1 %7641 }
0x5b28   :  { %v7644_v7 = vsel %vm414_vm0, %v7638_v0, %v7642_v20  ;;  %10365 = vmatpush3.msra.mxu0 %v12840_v9 }
0x5b29   :  { %10367 = vmatmul.mubr.msk.f32.vlgmr.msra.gmra.mxu0 %vm609_vm11, %v7644_v7  ;;  %10388 = vmatprep.subr.mxu0 %v11019_v15 }
0x5b2a   :  { %10389 = vmatpush3.msra.mxu0 %v12803_v6  ;;  %10404 = vmatprep.mubr.msk.f32.mxu0 %vm11022_vm10, %v11019_v15 }
0x5b2b   :  { %10390 = vmatprep.subr.mxu0 %v11019_v15 }
0x5b2c   :  { %10391 = vmatpush3.msra.mxu0 %v12808_v30 }
0x5b2d   :  { %10392 = vmatprep.subr.mxu0 %v11019_v15 }
0x5b2e   :  { %10393 = vmatpush3.msra.mxu0 %v12815_v18 }
0x5b2f   :  { %10394 = vmatprep.subr.mxu0 %v11019_v15 }
0x5b30   :  { %10395 = vmatpush3.msra.mxu0 %v12820_v54 }
0x5b31   :  { %10396 = vmatprep.subr.mxu0 %v11019_v15 }
0x5b32   :  { %10397 = vmatpush3.msra.mxu0 %v12825_v34 }
0x5b33   :  { %10398 = vmatprep.subr.mxu0 %v11019_v15 }
0x5b34   :  { %10399 = vmatpush3.msra.mxu0 %v12830_v26 }
0x5b35   :  { %10400 = vmatprep.subr.mxu0 %v11019_v15 }
0x5b36   :  { %10401 = vmatpush3.msra.mxu0 %v12835_v39 }
0x5b37   :  { %10402 = vmatprep.subr.mxu0 %v11019_v15 }
0x5b38   :  { %10403 = vmatpush3.msra.mxu0 %v12840_v9 }
0x5b39   :  { %10426 = vmatprep.subr.mxu0 %v11019_v15 }
0x5bd9   :  { %v12935_v22 = vpop.f32.mrf.mxu0 }
0x5bdb   :  { %v10330_v28 = vpop.f32.mrf.mxu0 }
0x5be9   :  { %v7714_v33 = vpop.f32.mrf.mxu0 }
0x5bea   :  { %v7715_v19 = vadd.f32 %v12868_v24, %v7714_v33 }
0x5beb   :  { %v10368_v45 = vpop.f32.mrf.mxu0 }
0x5bec   :  { %10934 = vtanh.f32 %v7715_v19  ;;  %v8900_v51 = vmul.f32 -1.442695, %v7715_v19 }
0x5bee   :  { %10936 = vpow2.f32 %v8900_v51 }
0x5bf9   :  { %v10935_v29 = vpop.eup %10934 }
0x5bfa   :  { %7727 = vrot.lane.b32.xlu0 %v10935_v29, %s11026_s4 }
0x5bfb   :  { %v10937_v25 = vpop.eup %10936 }
0x5bfc   :  { %v7721_v42 = vadd.f32 1.0, %v10937_v25 }
0x5bfe   :  { %10938 = vrcp.f32 %v7721_v42 }
0x5c0b   :  { %v10939_v48 = vpop.eup %10938 }
0x5c0c   :  { %v7725_v50 = vmul.f32 %v10939_v48, %v12882_v46 }
0x5c6c   :  { %v7728_v44 = vpop.permute.xlu0 %7727 }
0x5c6d   :  { %v7730_v10 = vmul.f32 %v10939_v48, %v7728_v44 }
0x5c6f   :  { %7732 = vrot.lane.b32.xlu1 %v7730_v10, %s13149_s1 }
0x5c73   :  { %7742 = vrot.lane.b32.xlu1 %v12700_v43, %s13149_s1 }
0x5ce1   :  { %v7733_v53 = vpop.permute.xlu1 %7732 }
0x5ce2   :  { %v7735_v38 = vadd.f32 %v7733_v53, %v7725_v50 }
0x5ce4   :  { %10940 = vtanh.f32 %v7735_v38 }
0x5ce5   :  { %v7743_v12 = vpop.permute.xlu1 %7742 }
0x5cf1   :  { %v10941_v58 = vpop.eup %10940 }
0x5cf2   :  { %7738 = vrot.lane.b32.xlu0 %v10941_v58, %s11026_s4 }
0x5d64   :  { %v7739_v59 = vpop.permute.xlu0 %7738 }
0x5d65   :  { %v7741_v11 = vmul.f32 %v10939_v48, %v7739_v59 }
0x5d67   :  { %7746 = vrot.lane.b32.xlu0 %v7741_v11, %s11026_s4 }
0x5dd9   :  { %v7747_v60 = vpop.permute.xlu0 %7746 }
0x5dda   :  { %v7749_v61 = vsel %vm414_vm0, %v7743_v12, %v7747_v60 }
0x5ddb   :  { %10386 = vmatmul.mubr.msk.f32.vlgmr.msra.gmra.mxu1 %vm609_vm11, %v7749_v61 }
0x5ddc   :  { %10408 = vmatpush3.msra.mxu1 %v12803_v6  ;;  %10423 = vmatprep.mubr.msk.f32.mxu1 %vm11022_vm10, %v11019_v15 }
0x5ddd   :  { %10409 = vmatprep.subr.mxu1 %v11019_v15 }
0x5dde   :  { %10410 = vmatpush3.msra.mxu1 %v12808_v30 }
0x5ddf   :  { %10411 = vmatprep.subr.mxu1 %v11019_v15 }
0x5de0   :  { %10412 = vmatpush3.msra.mxu1 %v12815_v18 }
0x5de1   :  { %10413 = vmatprep.subr.mxu1 %v11019_v15 }
0x5de2   :  { %10414 = vmatpush3.msra.mxu1 %v12820_v54 }
0x5de3   :  { %10415 = vmatprep.subr.mxu1 %v11019_v15 }
0x5de4   :  { %10416 = vmatpush3.msra.mxu1 %v12825_v34 }
0x5de5   :  { %10417 = vmatprep.subr.mxu1 %v11019_v15 }
0x5de6   :  { %10418 = vmatpush3.msra.mxu1 %v12830_v26 }
0x5de7   :  { %10419 = vmatprep.subr.mxu1 %v11019_v15 }
0x5de8   :  { %10420 = vmatpush3.msra.mxu1 %v12835_v39 }
0x5de9   :  { %10421 = vmatprep.subr.mxu1 %v11019_v15 }
0x5dea   :  { %10422 = vmatpush3.msra.mxu1 %v12840_v9 }
0x5deb   :  { %10445 = vmatprep.subr.mxu1 %v11019_v15 }
0x5e9b   :  { %v7819_v43 = vpop.f32.mrf.mxu1 }
0x5e9c   :  { %v7820_v62 = vadd.f32 %v12868_v24, %v7819_v43 }
0x5e9d   :  { %v10387_v36 = vpop.f32.mrf.mxu1 }
0x5e9e   :  { %10942 = vtanh.f32 %v7820_v62  ;;  %v8902_v40 = vmul.f32 -1.442695, %v7820_v62 }
0x5ea0   :  { %10944 = vpow2.f32 %v8902_v40 }
0x5eab   :  { %v10943_v37 = vpop.eup %10942 }
0x5eac   :  { %7832 = vrot.lane.b32.xlu1 %v10943_v37, %s11026_s4 }
0x5ead   :  { %v10945_v14 = vpop.eup %10944 }
0x5eae   :  { %v7826_v4 = vadd.f32 1.0, %v10945_v14 }
0x5eb0   :  { %10946 = vrcp.f32 %v7826_v4 }
0x5ebd   :  { %v10947_v16 = vpop.eup %10946 }
0x5ebe   :  { %v7830_v17 = vmul.f32 %v10947_v16, %v7735_v38 }
0x5f1e   :  { %v7833_v32 = vpop.permute.xlu1 %7832 }
0x5f1f   :  { %v7835_v56 = vmul.f32 %v10947_v16, %v7833_v32 }
0x5f21   :  { %7837 = vrot.lane.b32.xlu0 %v7835_v56, %s13149_s1 }
0x5f25   :  { %7847 = vrot.lane.b32.xlu0 %v12730_v55, %s13149_s1 }
0x5f93   :  { %v7838_v57 = vpop.permute.xlu0 %7837 }
0x5f94   :  { %v7840_v35 = vadd.f32 %v7838_v57, %v7830_v17 }
0x5f96   :  { %10948 = vtanh.f32 %v7840_v35 }
0x5f97   :  { %v7848_v47 = vpop.permute.xlu0 %7847 }
0x5fa3   :  { %v10949_v41 = vpop.eup %10948 }
0x5fa4   :  { %7843 = vrot.lane.b32.xlu1 %v10949_v41, %s11026_s4 }
0x6016   :  { %v7844_v23 = vpop.permute.xlu1 %7843 }
0x6017   :  { %v7846_v46 = vmul.f32 %v10947_v16, %v7844_v23 }
0x6019   :  { %7851 = vrot.lane.b32.xlu1 %v7846_v46, %s11026_s4 }
0x608b   :  { %v7852_v52 = vpop.permute.xlu1 %7851 }
0x608c   :  { %v7854_v49 = vsel %vm414_vm0, %v7848_v47, %v7852_v52 }
0x608d   :  { %10405 = vmatmul.mubr.msk.f32.vlgmr.msra.gmra.mxu0 %vm609_vm11, %v7854_v49 }
0x608e   :  { %10427 = vmatpush3.msra.mxu0 %v12803_v6  ;;  %10442 = vmatprep.mubr.msk.f32.mxu0 %vm11022_vm10, %v11019_v15 }
0x608f   :  { %10428 = vmatprep.subr.mxu0 %v11019_v15 }
0x6090   :  { %10429 = vmatpush3.msra.mxu0 %v12808_v30 }
0x6091   :  { %10430 = vmatprep.subr.mxu0 %v11019_v15 }
0x6092   :  { %10431 = vmatpush3.msra.mxu0 %v12815_v18 }
0x6093   :  { %10432 = vmatprep.subr.mxu0 %v11019_v15 }
0x6094   :  { %10433 = vmatpush3.msra.mxu0 %v12820_v54 }
0x6095   :  { %10434 = vmatprep.subr.mxu0 %v11019_v15 }
0x6096   :  { %10435 = vmatpush3.msra.mxu0 %v12825_v34 }
0x6097   :  { %10436 = vmatprep.subr.mxu0 %v11019_v15 }
0x6098   :  { %10437 = vmatpush3.msra.mxu0 %v12830_v26 }
0x6099   :  { %10438 = vmatprep.subr.mxu0 %v11019_v15 }
0x609a   :  { %10439 = vmatpush3.msra.mxu0 %v12835_v39 }
0x609b   :  { %10440 = vmatprep.subr.mxu0 %v11019_v15 }
0x609c   :  { %10441 = vmatpush3.msra.mxu0 %v12840_v9 }
0x609d   :  { %10464 = vmatprep.subr.mxu0 %v11019_v15 }
0x614d   :  { %v7924_v55 = vpop.f32.mrf.mxu0 }
0x614e   :  { %v7925_v63 = vadd.f32 %v12868_v24, %v7924_v55 }
0x614f   :  { %v10406_v13 = vpop.f32.mrf.mxu0 }
0x6150   :  { %10950 = vtanh.f32 %v7925_v63  ;;  %v8904_v2 = vmul.f32 -1.442695, %v7925_v63 }
0x6152   :  { %10952 = vpow2.f32 %v8904_v2 }
0x615d   :  { %v10951_v3 = vpop.eup %10950 }
0x615e   :  { %7937 = vrot.lane.b32.xlu0 %v10951_v3, %s11026_s4 }
0x615f   :  { %v10953_v27 = vpop.eup %10952 }
0x6160   :  { %v7931_v21 = vadd.f32 1.0, %v10953_v27 }
0x6162   :  { %10954 = vrcp.f32 %v7931_v21 }
0x616f   :  { %v10955_v0 = vpop.eup %10954 }
0x6170   :  { %v7935_v28 = vmul.f32 %v10955_v0, %v7840_v35 }
0x61d0   :  { %v7938_v20 = vpop.permute.xlu0 %7937 }
0x61d1   :  { %v7940_v7 = vmul.f32 %v10955_v0, %v7938_v20 }
0x61d3   :  { %7942 = vrot.lane.b32.xlu1 %v7940_v7, %s13149_s1 }
0x61d7   :  { %7952 = vrot.lane.b32.xlu1 %v12760_v31, %s13149_s1 }
0x6245   :  { %v7943_v33 = vpop.permute.xlu1 %7942 }
0x6246   :  { %v7945_v19 = vadd.f32 %v7943_v33, %v7935_v28 }
0x6248   :  { %10956 = vtanh.f32 %v7945_v19 }
0x6249   :  { %v7953_v25 = vpop.permute.xlu1 %7952 }
0x6255   :  { %v10957_v45 = vpop.eup %10956 }
0x6256   :  { %7948 = vrot.lane.b32.xlu0 %v10957_v45, %s11026_s4 }
0x62c8   :  { %v7949_v29 = vpop.permute.xlu0 %7948 }
0x62c9   :  { %v7951_v51 = vmul.f32 %v10955_v0, %v7949_v29 }
0x62cb   :  { %7956 = vrot.lane.b32.xlu0 %v7951_v51, %s11026_s4 }
0x633d   :  { %v7957_v42 = vpop.permute.xlu0 %7956 }
0x633e   :  { %v7959_v48 = vsel %vm414_vm0, %v7953_v25, %v7957_v42 }
0x633f   :  { %10424 = vmatmul.mubr.msk.f32.vlgmr.msra.gmra.mxu1 %vm609_vm11, %v7959_v48 }
0x6340   :  { %10446 = vmatpush3.msra.mxu1 %v12803_v6  ;;  %10461 = vmatprep.mubr.msk.f32.mxu1 %vm11022_vm10, %v11019_v15 }
0x6341   :  { %10447 = vmatprep.subr.mxu1 %v11019_v15 }
0x6342   :  { %10448 = vmatpush3.msra.mxu1 %v12808_v30 }
0x6343   :  { %10449 = vmatprep.subr.mxu1 %v11019_v15 }
0x6344   :  { %10450 = vmatpush3.msra.mxu1 %v12815_v18 }
0x6345   :  { %10451 = vmatprep.subr.mxu1 %v11019_v15 }
0x6346   :  { %10452 = vmatpush3.msra.mxu1 %v12820_v54 }
0x6347   :  { %10453 = vmatprep.subr.mxu1 %v11019_v15 }
0x6348   :  { %10454 = vmatpush3.msra.mxu1 %v12825_v34 }
0x6349   :  { %10455 = vmatprep.subr.mxu1 %v11019_v15 }
0x634a   :  { %10456 = vmatpush3.msra.mxu1 %v12830_v26 }
0x634b   :  { %10457 = vmatprep.subr.mxu1 %v11019_v15 }
0x634c   :  { %10458 = vmatpush3.msra.mxu1 %v12835_v39 }
0x634d   :  { %10459 = vmatprep.subr.mxu1 %v11019_v15 }
0x634e   :  { %10460 = vmatpush3.msra.mxu1 %v12840_v9 }
0x634f   :  { %10483 = vmatprep.subr.mxu1 %v11019_v15 }
0x63ff   :  { %v8029_v31 = vpop.f32.mrf.mxu1 }
0x6400   :  { %v8030_v44 = vadd.f32 %v12868_v24, %v8029_v31 }
0x6401   :  { %v10425_v10 = vpop.f32.mrf.mxu1 }
0x6402   :  { %10958 = vtanh.f32 %v8030_v44  ;;  %v8906_v53 = vmul.f32 -1.442695, %v8030_v44 }
0x6404   :  { %10960 = vpow2.f32 %v8906_v53 }
0x640f   :  { %v10959_v50 = vpop.eup %10958 }
0x6410   :  { %8042 = vrot.lane.b32.xlu1 %v10959_v50, %s11026_s4 }
0x6411   :  { %v10961_v38 = vpop.eup %10960 }
0x6412   :  { %v8036_v58 = vadd.f32 1.0, %v10961_v38 }
0x6414   :  { %10962 = vrcp.f32 %v8036_v58 }
0x6421   :  { %v10963_v59 = vpop.eup %10962 }
0x6422   :  { %v8040_v60 = vmul.f32 %v10963_v59, %v7945_v19 }
0x6482   :  { %v8043_v11 = vpop.permute.xlu1 %8042 }
0x6483   :  { %v8045_v12 = vmul.f32 %v10963_v59, %v8043_v11 }
0x6485   :  { %8047 = vrot.lane.b32.xlu0 %v8045_v12, %s13149_s1 }
0x6489   :  { %8057 = vrot.lane.b32.xlu0 %v12797_v5, %s13149_s1 }
0x64f7   :  { %v8048_v61 = vpop.permute.xlu0 %8047 }
0x64f8   :  { %v8050_v43 = vadd.f32 %v8048_v61, %v8040_v60 }
0x64fa   :  { %10964 = vtanh.f32 %v8050_v43 }
0x64fb   :  { %v8058_v40 = vpop.permute.xlu0 %8057 }
0x6507   :  { %v10965_v62 = vpop.eup %10964 }
0x6508   :  { %8053 = vrot.lane.b32.xlu1 %v10965_v62, %s11026_s4 }
0x657a   :  { %v8054_v36 = vpop.permute.xlu1 %8053 }
0x657b   :  { %v8056_v37 = vmul.f32 %v10963_v59, %v8054_v36 }
0x657d   :  { %8061 = vrot.lane.b32.xlu1 %v8056_v37, %s11026_s4 }
0x65ef   :  { %v8062_v14 = vpop.permute.xlu1 %8061 }
0x65f0   :  { %v8064_v4 = vsel %vm414_vm0, %v8058_v40, %v8062_v14 }
0x65f1   :  { %10443 = vmatmul.mubr.msk.f32.vlgmr.msra.gmra.mxu0 %vm609_vm11, %v8064_v4 }
0x65f2   :  { %10465 = vmatpush3.msra.mxu0 %v12803_v6  ;;  %10480 = vmatprep.mubr.msk.f32.mxu0 %vm11022_vm10, %v11019_v15 }
0x65f3   :  { %10466 = vmatprep.subr.mxu0 %v11019_v15 }
0x65f4   :  { %10467 = vmatpush3.msra.mxu0 %v12808_v30 }
0x65f5   :  { %10468 = vmatprep.subr.mxu0 %v11019_v15 }
0x65f6   :  { %10469 = vmatpush3.msra.mxu0 %v12815_v18 }
0x65f7   :  { %10470 = vmatprep.subr.mxu0 %v11019_v15 }
0x65f8   :  { %10471 = vmatpush3.msra.mxu0 %v12820_v54 }
0x65f9   :  { %10472 = vmatprep.subr.mxu0 %v11019_v15 }
0x65fa   :  { %10473 = vmatpush3.msra.mxu0 %v12825_v34 }
0x65fb   :  { %10474 = vmatprep.subr.mxu0 %v11019_v15 }
0x65fc   :  { %10475 = vmatpush3.msra.mxu0 %v12830_v26 }
0x65fd   :  { %10476 = vmatprep.subr.mxu0 %v11019_v15 }
0x65fe   :  { %10477 = vmatpush3.msra.mxu0 %v12835_v39  ;;  %v11014_v39 = vld [vmem:[%s12088_s30 + $0x2] ss:$0 sm:$0xff] }
0x65ff   :  { %10478 = vmatprep.subr.mxu0 %v11019_v15  ;;  %v7492_v16 = vadd.f32 %v11014_v39, %v12935_v22  ;;  %v8373_v39 = vld [vmem:[%s8659_s19] sm:$0xff] }
0x6600   :  { %10479 = vmatpush3.msra.mxu0 %v12840_v9 }
0x6601   :  { %10494 = vmatprep.subr.mxu0 %v11019_v15  ;;  %v8886_v57 = vmul.f32 -1.442695, %v7492_v16 }
0x66b1   :  { %v8134_v5 = vpop.f32.mrf.mxu0 }
0x66b2   :  { %v8135_v6 = vadd.f32 %v12868_v24, %v8134_v5 }
0x66b3   :  { %v10444_v30 = vpop.f32.mrf.mxu0 }
0x66b4   :  { %10966 = vtanh.f32 %v8135_v6  ;;  %v8908_v54 = vmul.f32 -1.442695, %v8135_v6 }
0x66b6   :  { %10968 = vpow2.f32 %v8908_v54  ;;  %v8375_v54 = vld [vmem:[%s8659_s19 + $0x10] sm:$0xff] }
0x66c1   :  { %v10967_v18 = vpop.eup %10966 }
0x66c2   :  { %8147 = vrot.lane.b32.xlu0 %v10967_v18, %s11026_s4 }
0x66c3   :  { %v10969_v34 = vpop.eup %10968 }
0x66c4   :  { %v8141_v26 = vadd.f32 1.0, %v10969_v34  ;;  %v8374_v34 = vld [vmem:[%s8659_s19 + $0x8] sm:$0xff] }
0x66c6   :  { %10970 = vrcp.f32 %v8141_v26 }
0x66c7   :  { %10972 = vtanh.f32 %v7492_v16  ;;  %v8475_v16 = vld [vmem:[%s13086_s12 + $0x78] sm:$0xff] }
0x66c8   :  { %10974 = vpow2.f32 %v8886_v57  ;;  %v8472_v57 = vld [vmem:[%s13086_s12 + $0x60] sm:$0xff] }
0x66d3   :  { %v10971_v9 = vpop.eup %10970 }
0x66d4   :  { %v10973_v17 = vpop.eup %10972  ;;  %v8145_v23 = vmul.f32 %v10971_v9, %v8050_v43 }
0x66d5   :  { %v10975_v35 = vpop.eup %10974 }
0x66d6   :  { %v7498_v41 = vadd.f32 1.0, %v10975_v35  ;;  %v8471_v35 = vld [vmem:[%s13086_s12 + $0x58] sm:$0xff] }
0x66d8   :  { %10976 = vrcp.f32 %v7498_v41  ;;  %v8470_v41 = vld [vmem:[%s13086_s12 + $0x50] sm:$0xff] }
0x66e5   :  { %v10977_v52 = vpop.eup %10976 }
0x6734   :  { %v8148_v32 = vpop.permute.xlu0 %8147 }
0x6735   :  { %v8150_v56 = vmul.f32 %v10971_v9, %v8148_v32  ;;  %v8473_v32 = vld [vmem:[%s13086_s12 + $0x68] sm:$0xff] }
0x6737   :  { %8152 = vrot.lane.b32.xlu1 %v8150_v56, %s13149_s1 }
0x673b   :  { %8162 = vrot.lane.b32.xlu1 %v12890_v1, %s13149_s1  ;;  %v7502_v1 = vmul.f32 %v10977_v52, %v12879_v8 }
0x673f   :  { %7504 = vrot.lane.b32.xlu1 %v10973_v17, %s11026_s4 }
0x67a9   :  { %v8153_v46 = vpop.permute.xlu1 %8152 }
0x67aa   :  { %v8155_v22 = vadd.f32 %v8153_v46, %v8145_v23  ;;  %v8469_v23 = vld [vmem:[%s13086_s12 + $0x48] sm:$0xff]  ;;  %v8468_v46 = vld [vmem:[%s13086_s12 + $0x40] sm:$0xff] }
0x67ac   :  { %10978 = vtanh.f32 %v8155_v22 }
0x67ad   :  { %v8163_v47 = vpop.permute.xlu1 %8162 }
0x67b1   :  { %v7505_v49 = vpop.permute.xlu1 %7504 }
0x67b2   :  { %v7507_v55 = vmul.f32 %v10977_v52, %v7505_v49  ;;  %v8464_v49 = vld [vmem:[%s13086_s12 + $0x20] sm:$0xff] }
0x67b4   :  { %7509 = vrot.lane.b32.xlu1 %v7507_v55, %s13149_s1  ;;  %v8463_v55 = vld [vmem:[%s13086_s12 + $0x18] sm:$0xff] }
0x67b9   :  { %v10979_v63 = vpop.eup %10978 }
0x67ba   :  { %8158 = vrot.lane.b32.xlu0 %v10979_v63, %s11026_s4 }
0x6826   :  { %v7510_v13 = vpop.permute.xlu1 %7509 }
0x6827   :  { %v7512_v3 = vadd.f32 %v7510_v13, %v7502_v1  ;;  %v8462_v1 = vld [vmem:[%s13086_s12 + $0x10] sm:$0xff]  ;;  %v8461_v13 = vld [vmem:[%s13086_s12 + $0x8] sm:$0xff] }
0x6829   :  { %10980 = vtanh.f32 %v7512_v3  ;;  %v8460_v3 = vld [vmem:[%s13086_s12] sm:$0xff] }
0x682c   :  { %v8159_v2 = vpop.permute.xlu0 %8158 }
0x682d   :  { %v8161_v27 = vmul.f32 %v10971_v9, %v8159_v2  ;;  %v8474_v9 = vld [vmem:[%s13086_s12 + $0x70] sm:$0xff] }
0x682f   :  { %8166 = vrot.lane.b32.xlu0 %v8161_v27, %s11026_s4  ;;  %v8913_v27 = vld [vmem:[%s8660_s20] ss:$0 sm:$0xff] }
0x6836   :  { %v10981_v21 = vpop.eup %10980 }
0x6837   :  { %7515 = vrot.lane.b32.xlu1 %v10981_v21, %s11026_s4 }
0x68a1   :  { %v8167_v0 = vpop.permute.xlu0 %8166 }
0x68a2   :  { %v8169_v20 = vsel %vm414_vm0, %v8163_v47, %v8167_v0  ;;  %v8466_v47 = vld [vmem:[%s13086_s12 + $0x30] sm:$0xff] }
0x68a3   :  { %10462 = vmatmul.mubr.msk.f32.vlgmr.msra.gmra.mxu1 %vm609_vm11, %v8169_v20 }
0x68a4   :  { %10491 = vmatprep.mubr.msk.f32.mxu1 %vm11022_vm10, %v11019_v15 }
0x68a9   :  { %v7516_v7 = vpop.permute.xlu1 %7515 }
0x68aa   :  { %v7518_v8 = vmul.f32 %v10977_v52, %v7516_v7  ;;  %v8465_v52 = vld [vmem:[%s13086_s12 + $0x28] sm:$0xff]  ;;  %v8915_v7 = vld [vmem:[%s8662_s24] ss:$0 sm:$0xff] }
0x68ac   :  { %8268 = vrot.lane.b32.xlu1 %v7518_v8, %s13149_s1 }
0x691e   :  { %v8269_v59 = vpop.permute.xlu1 %8268 }
0x6963   :  { %v8239_v28 = vpop.f32.mrf.mxu1 }
0x6964   :  { %v8240_v33 = vadd.f32 %v12868_v24, %v8239_v28 }
0x6965   :  { %v10463_v19 = vpop.f32.mrf.mxu1 }
0x6966   :  { %10982 = vtanh.f32 %v8240_v33  ;;  %v8910_v29 = vmul.f32 -1.442695, %v8240_v33 }
0x6968   :  { %10984 = vpow2.f32 %v8910_v29 }
0x6973   :  { %v10983_v45 = vpop.eup %10982 }
0x6974   :  { %8252 = vrot.lane.b32.xlu0 %v10983_v45, %s11026_s4 }
0x6975   :  { %v10985_v51 = vpop.eup %10984 }
0x6976   :  { %v8246_v25 = vadd.f32 1.0, %v10985_v51 }
0x6978   :  { %10986 = vrcp.f32 %v8246_v25 }
0x6985   :  { %v10987_v42 = vpop.eup %10986 }
0x6986   :  { %v8250_v44 = vmul.f32 %v10987_v42, %v8155_v22  ;;  %v8467_v22 = vld [vmem:[%s13086_s12 + $0x38] sm:$0xff] }
0x69e6   :  { %v8253_v48 = vpop.permute.xlu0 %8252 }
0x69e7   :  { %v8255_v31 = vmul.f32 %v10987_v42, %v8253_v48 }
0x69e9   :  { %8257 = vrot.lane.b32.xlu0 %v8255_v31, %s13149_s1 }
0x6a5b   :  { %v8258_v10 = vpop.permute.xlu0 %8257 }
0x6a5c   :  { %v8260_v50 = vadd.f32 %v8258_v10, %v8250_v44 }
0x6a5e   :  { %10988 = vtanh.f32 %v8260_v50 }
0x6a6b   :  { %v10989_v53 = vpop.eup %10988 }
0x6a6c   :  { %8263 = vrot.lane.b32.xlu0 %v10989_v53, %s11026_s4 }
0x6ade   :  { %v8264_v38 = vpop.permute.xlu0 %8263 }
0x6adf   :  { %v8266_v58 = vmul.f32 %v10987_v42, %v8264_v38 }
0x6ae1   :  { %8272 = vrot.lane.b32.xlu0 %v8266_v58, %s11026_s4 }
0x6b53   :  { %v8273_v11 = vpop.permute.xlu0 %8272 }
0x6b54   :  { %v8275_v12 = vsel %vm414_vm0, %v8269_v59, %v8273_v11 }
0x6b55   :  { %10481 = vmatmul.mubr.msk.f32.vlgmr.msra.gmra.mxu0 %vm609_vm11, %v8275_v12  ;;  %vm8591_vm11 = vcmask 189568  }
0x6b56   :  { %10526 = vmatprep.mubr.msk.f32.mxu0 %vm11022_vm10, %v11019_v15  ;;  %10495 = vmatpush3.msra.mxu0 %v8475_v16  ;;  %vm8571_vm10 = vcmask 123968  }
0x6b57   :  { %10496 = vmatprep.subr.mxu0 %v11019_v15 }
0x6b58   :  { %10497 = vmatpush3.msra.mxu0 %v8474_v9 }
0x6b59   :  { %10498 = vmatprep.subr.mxu0 %v11019_v15 }
0x6b5a   :  { %10499 = vmatpush3.msra.mxu0 %v8473_v32 }
0x6b5b   :  { %10500 = vmatprep.subr.mxu0 %v11019_v15 }
0x6b5c   :  { %10501 = vmatpush3.msra.mxu0 %v8472_v57 }
0x6b5d   :  { %10502 = vmatprep.subr.mxu0 %v11019_v15 }
0x6b5e   :  { %10503 = vmatpush3.msra.mxu0 %v8471_v35 }
0x6b5f   :  { %10504 = vmatprep.subr.mxu0 %v11019_v15 }
0x6b60   :  { %10505 = vmatpush3.msra.mxu0 %v8470_v41 }
0x6b61   :  { %10506 = vmatprep.subr.mxu0 %v11019_v15 }
0x6b62   :  { %10507 = vmatpush3.msra.mxu0 %v8469_v23 }
0x6b63   :  { %10508 = vmatprep.subr.mxu0 %v11019_v15 }
0x6b64   :  { %10509 = vmatpush3.msra.mxu0 %v8468_v46 }
0x6b65   :  { %10510 = vmatprep.subr.mxu0 %v11019_v15 }
0x6b66   :  { %10511 = vmatpush3.msra.mxu0 %v8467_v22 }
0x6b67   :  { %10512 = vmatprep.subr.mxu0 %v11019_v15 }
0x6b68   :  { %10513 = vmatpush3.msra.mxu0 %v8466_v47 }
0x6b69   :  { %10514 = vmatprep.subr.mxu0 %v11019_v15 }
0x6b6a   :  { %10515 = vmatpush3.msra.mxu0 %v8465_v52 }
0x6b6b   :  { %10516 = vmatprep.subr.mxu0 %v11019_v15 }
0x6b6c   :  { %10517 = vmatpush3.msra.mxu0 %v8464_v49 }
0x6b6d   :  { %10518 = vmatprep.subr.mxu0 %v11019_v15 }
0x6b6e   :  { %10519 = vmatpush3.msra.mxu0 %v8463_v55 }
0x6b6f   :  { %10520 = vmatprep.subr.mxu0 %v11019_v15 }
0x6b70   :  { %10521 = vmatpush3.msra.mxu0 %v8462_v1 }
0x6b71   :  { %10522 = vmatprep.subr.mxu0 %v11019_v15 }
0x6b72   :  { %10523 = vmatpush3.msra.mxu0 %v8461_v13 }
0x6b73   :  { %10524 = vmatprep.subr.mxu0 %v11019_v15 }
0x6b74   :  { %10525 = vmatpush3.msra.mxu0 %v8460_v3 }
0x6c15   :  { %v8345_v60 = vpop.f32.mrf.mxu0 }
0x6c16   :  { %v8346_v61 = vadd.f32 %v12868_v24, %v8345_v60  ;;  %v8376_v24 = vld [vmem:[%s8659_s19 + $0x18] sm:$0xff] }
0x6c17   :  { %v10482_v43 = vpop.f32.mrf.mxu0  ;;  %10484 = vmatpush3.msra.mxu1 %v8376_v24 }
0x6c18   :  { %10990 = vtanh.f32 %v8346_v61  ;;  %v8912_v36 = vmul.f32 -1.442695, %v8346_v61  ;;  %10485 = vmatprep.subr.mxu1 %v11019_v15 }
0x6c19   :  { %10486 = vmatpush3.msra.mxu1 %v8375_v54 }
0x6c1a   :  { %10992 = vpow2.f32 %v8912_v36  ;;  %10487 = vmatprep.subr.mxu1 %v11019_v15 }
0x6c1b   :  { %10488 = vmatpush3.msra.mxu1 %v8374_v34 }
0x6c1c   :  { %10489 = vmatprep.subr.mxu1 %v11019_v15 }
0x6c1d   :  { %10490 = vmatpush3.msra.mxu1 %v8373_v39 }
0x6c25   :  { %v10991_v62 = vpop.eup %10990 }
0x6c26   :  { %8358 = vrot.lane.b32.xlu1 %v10991_v62, %s11026_s4 }
0x6c27   :  { %v10993_v37 = vpop.eup %10992 }
0x6c28   :  { %v8352_v40 = vadd.f32 1.0, %v10993_v37 }
0x6c2a   :  { %10994 = vrcp.f32 %v8352_v40 }
0x6c37   :  { %v10995_v14 = vpop.eup %10994 }
0x6c38   :  { %v8356_v6 = vmul.f32 %v10995_v14, %v8260_v50 }
0x6c98   :  { %v8359_v4 = vpop.permute.xlu1 %8358 }
0x6c99   :  { %v8361_v5 = vmul.f32 %v10995_v14, %v8359_v4 }
0x6c9b   :  { %8363 = vrot.lane.b32.xlu0 %v8361_v5, %s13149_s1 }
0x6d0d   :  { %v8364_v30 = vpop.permute.xlu0 %8363 }
0x6d0e   :  { %v8366_v18 = vadd.f32 %v8364_v30, %v8356_v6 }
0x6d10   :  { %10996 = vtanh.f32 %v8366_v18 }
0x6d1d   :  { %v10997_v26 = vpop.eup %10996 }
0x6d1e   :  { %8369 = vrot.lane.b32.xlu1 %v10997_v26, %s11026_s4  ;;  %s11056_s4 = smov 5  }
0x6d1f   :  { %s8639_s11 = sld [smem:[%s13146_s0 + %s11056_s4]]  }
0x6d25   :  { %v8553_v2 = vld [vmem:[%s8639_s11] sm:$0x3] }
0x6d26   :  { %8567 = vrot.lane.b32.xlu1 %v8553_v2, %s11028_s6  ;;  %s11059_s6 = smov 29  }
0x6d90   :  { %v8370_v56 = vpop.permute.xlu1 %8369 }
0x6d91   :  { %v8372_v17 = vmul.f32 %v10995_v14, %v8370_v56 }
0x6d93   :  { %8385 = vrot.lane.b32.xlu0 %v8372_v17, %s13149_s1 }
0x6d97   :  { %8587 = vrot.lane.b32.xlu0 %v8553_v2, %s11042_s2  ;;  %s8663_s2 = sld [smem:[%s13146_s0 + %s11059_s6]]  }
0x6d98   :  { %v8568_v28 = vpop.permute.xlu1 %8567 }
0x6e05   :  { %v8386_v63 = vpop.permute.xlu0 %8385 }
0x6e06   :  { %10492 = vmatmul.mubr.msk.f32.vlgmr.msra.gmra.mxu1 %vm414_vm0, %v8386_v63  ;;  %vm8554_vm0 = vcmask 58368  }
0x6e09   :  { %v8588_v25 = vpop.permute.xlu0 %8587 }
0x6ec6   :  { %v8455_v21 = vpop.f32.mrf.mxu1 }
0x6ec7   :  { %v8456_v15 = vadd.f32 %v8913_v27, %v8455_v21 }
0x6ec8   :  { %v10493_v0 = vpop.f32.mrf.mxu1 }
0x6ec9   :  { %v8459_v20 = vmax.f32 %v8456_v15, 0.0 }
0x6ecb   :  { %10527 = vmatmul.mubr.f32.vlgmr.msra.gmra.mxu0 %v8459_v20  ;;  %v8607_v36 = vadd.f32 1.0, %v8459_v20  ;;  %v8614_v9 = vmax.f32 %v8459_v20, 0.01 }
0x6f8b   :  { %v8549_v8 = vpop.f32.mrf.mxu0 }
0x6f8c   :  { %v8550_v33 = vadd.f32 %v8915_v7, %v8549_v8 }
0x6f8d   :  { %v10528_v19 = vpop.f32.mrf.mxu0 }
0x6f8e   :  { %v8570_v45 = vadd.f32 %v8568_v28, %v8550_v33  ;;  %v8555_v29 = vsel %vm8554_vm0, %v8550_v33, -inf  ;;  %v8590_v38 = vadd.f32 %v8588_v25, %v8550_v33 }
0x6f8f   :  { %8556 = vmax.xlane.f32.xlu1 %v8555_v29 }
0x6f90   :  { %v8572_v51 = vsel %vm8571_vm10, %v8570_v45, -inf  ;;  %v8592_v11 = vsel %vm8591_vm11, %v8590_v38, -inf }
0x6f91   :  { %8573 = vmax.xlane.f32.xlu0 %v8572_v51 }
0x7018   :  { %v8557_v42 = vpop.xlane.xlu1 %8556 }
0x7019   :  { %v8558_v48 = vsub.f32 %v8550_v33, %v8557_v42 }
0x701a   :  { %v8574_v31 = vpop.xlane.xlu0 %8573 }
0x701b   :  { %v8559_v44 = vmul.f32 1.442695, %v8558_v48  ;;  %v8575_v10 = vsub.f32 %v8570_v45, %v8574_v31 }
0x701d   :  { %10998 = vpow2.f32 %v8559_v44  ;;  %v8576_v50 = vmul.f32 1.442695, %v8575_v10 }
0x701f   :  { %11000 = vpow2.f32 %v8576_v50 }
0x702a   :  { %v10999_v53 = vpop.eup %10998 }
0x702b   :  { %v8561_v58 = vsel %vm8554_vm0, %v10999_v53, 0.0 }
0x702c   :  { %v11001_v59 = vpop.eup %11000  ;;  %8562 = vadd.xlane.f32.xlu0 %v8561_v58 }
0x702d   :  { %8579 = vrot.lane.b32.xlu1 %v11001_v59, %s11035_s25 }
0x7030   :  { %8593 = vmax.xlane.f32.xlu0 %v8592_v11 }
0x709f   :  { %v8580_v4 = vpop.permute.xlu1 %8579 }
0x70a0   :  { %v8582_v6 = vsel %vm8554_vm0, %v8580_v4, 0.0 }
0x70b5   :  { %v8563_v12 = vpop.xlane.xlu0 %8562 }
0x70b9   :  { %v8594_v60 = vpop.xlane.xlu0 %8593 }
0x70ba   :  { %v8595_v61 = vsub.f32 %v8590_v38, %v8594_v60 }
0x70bc   :  { %v8596_v43 = vmul.f32 1.442695, %v8595_v61 }
0x70be   :  { %11002 = vpow2.f32 %v8596_v43 }
0x70bf   :  { %11004 = vlog2.f32 %v8607_v36 }
0x70cb   :  { %v11003_v62 = vpop.eup %11002 }
0x70cc   :  { %8599 = vrot.lane.b32.xlu0 %v11003_v62, %s11037_s27  ;;  %v11005_v37 = vpop.eup %11004 }
0x70cd   :  { %v8609_v40 = vmul.f32 0.6931472, %v11005_v37 }
0x70cf   :  { %v8610_v14 = vmul.f32 10.0, %v8609_v40 }
0x70d1   :  { %v8916_v5 = vadd.f32 -0.5, %v8610_v14 }
0x70d3   :  { %v8612_v30 = vadd.f32 1e-06, %v8916_v5 }
0x70d5   :  { %v10531_v18 = vcvt.f32.s32 %v8612_v30  ;;  %v10534_v34 = vand.u32 2147483648, %v8612_v30  ;;  %v10529_v26 = vand.u32 2147483647, %v8612_v30 }
0x70d7   :  { %v10532_v24 = vcvt.s32.f32 %v10531_v18  ;;  %vm10530_vm3 = vcmp.lt.f32.partialorder %v10529_v26, 8388608.0 }
0x70d9   :  { %v10533_v54 = vand.u32 2147483647, %v10532_v24 }
0x70db   :  { %v10535_v39 = vor.u32 %v10534_v34, %v10533_v54 }
0x70dd   :  { %v10536_v16 = vsel %vm10530_vm3, %v10535_v39, %v8612_v30 }
0x70eb   :  { %8583 = vadd.xlane.f32.xlu0 %v8582_v6 }
0x7101   :  { %8616 = vrot.lane.b32.xlu0 %v10536_v16, %s11039_s29 }
0x7105   :  { %8620 = vrot.lane.b32.xlu0 %v8614_v9, %s11039_s29 }
0x713e   :  { %v8600_v32 = vpop.permute.xlu0 %8599 }
0x713f   :  { %v8602_v56 = vsel %vm8554_vm0, %v8600_v32, 0.0 }
0x7140   :  { %8603 = vadd.xlane.f32.xlu1 %v8602_v56 }
0x7174   :  { %v8584_v17 = vpop.xlane.xlu0 %8583 }
0x7175   :  { %11006 = vrcp.f32 %v8584_v17 }
0x7176   :  { %11008 = vrcp.f32 %v8563_v12 }
0x7178   :  { %v8617_v46 = vpop.permute.xlu0 %8616 }
0x717c   :  { %v8621_v63 = vpop.permute.xlu0 %8620 }
0x7182   :  { %v11007_v35 = vpop.eup %11006 }
0x7183   :  { %v11009_v41 = vpop.eup %11008  ;;  %v8586_v23 = vmul.f32 %v11007_v35, %v11001_v59 }
0x7184   :  { %v8565_v47 = vmul.f32 %v11009_v41, %v10999_v53 }
0x7186   :  { %v8623_v49 = vsel %vm1377_vm15, %v8565_v47, %v8586_v23 }
0x71c9   :  { %v8604_v57 = vpop.xlane.xlu1 %8603 }
0x71ca   :  { %11010 = vrcp.f32 %v8604_v57 }
0x71d7   :  { %v11011_v22 = vpop.eup %11010 }
0x71d8   :  { %v8606_v52 = vmul.f32 %v11011_v22, %v11003_v62 }
0x71da   :  { %v8624_v55 = vsel %vm296_vm7, %v8623_v49, %v8606_v52 }
0x71db   :  { %v8625_v1 = vsel %vm2052_vm1, %v8624_v55, %v8617_v46 }
0x71dc   :  { %v8627_v13 = vsel %vm8626_vm4, %v8625_v1, %v8621_v63 }
0x71dd   :  { %v8629_v3 = vsel %vm8628_vm5, %v8627_v13, 0.0 }
0x71de   :  { %8630 = vst [vmem:[%s8663_s2] sm:$0x3] %v8629_v3 }

</bundles_post_ra>
